<compile_context>
chip_gen: v5e
topology: v5e:2x2
jax: 0.10.0
libtpu: 0.0.40
codegen_flags: <defaults>
</compile_context>

<pallas_src>
import jax
import jax.numpy as jnp
from jax.experimental import pallas as pl
from jax.experimental.pallas import tpu as pltpu

H = 32   # hidden width (CFNet.__init__)
F = 56   # pose feature width

# Kernel-side parameter list.  All "concat then Linear" first layers are split
# on the host; linear->linear chains are pre-fused; the pose-consuming rollout
# weights are concatenated into Wroll_p = [Wd1a_p | Wd1b_p | Wg1_p].
PARAM_ORDER = (
    # mlp_inter: Linear(112,H) split at 56 (x[j]/x[i] halves), Linear(H,H), Linear(H,H)
    "Wi1a", "Wi1b", "bi1", "Wi2", "bi2", "Wi3", "bi3",
    # mlp_out L1 split into pose / E halves (L2 is fused into the GRU input proj)
    "Wo1x", "Wo1e", "bo1",
    # rnn: GRU(H,H); input projection pre-fused with mlp_out L2; gate order [r,z,n]
    "rnn_Wih_f", "rnn_bih_f", "rnn_Whh", "rnn_bhh",
    # mlp_inter_stab: Linear(2*(H+56),H) split into crep/pose halves per pair side
    "Ws1a_c", "Ws1a_p", "Ws1b_c", "Ws1b_p", "bs1", "Ws2", "bs2", "Ws3", "bs3",
    # mlp_stab: Linear(2H+56,H) split into [crep, pose, E], Linear(H,1)
    "Wst1_c", "Wst1_p", "Wst1_e", "bst1", "Wst2", "bst2",
    # mlp_inter_delta: pose halves fused (with mlp_gcn_delta pose half) into Wroll_p
    "Wroll_p", "Wd1a_c", "Wd1b_c", "bd1", "Wd2", "bd2", "Wd3", "bd3",
    # mlp_gcn_delta L1 crep / E parts (L2 fused into the rnn_delta input proj)
    "Wg1_c", "Wg1_e", "bg1",
    # rnn_delta: GRU(H,H); input projection pre-fused with mlp_gcn_delta L2
    "rnd_Wih_f", "rnd_bih_f", "rnd_Whh", "rnd_bhh",
    # fc_delta: Linear(H,56)
    "Wf", "bf",
)


def _relu(v):
    return jnp.maximum(v, 0.0)


def _sigmoid(v):
    # sigmoid(x) = 0.5 * (1 + tanh(x/2)) : runs on the EUP, never overflows
    # (important for the stability gate which scales its argument by 100).
    return 0.5 * (jnp.tanh(0.5 * v) + 1.0)


def _gru_update(gi, gh, h):
    """PyTorch GRU cell update from precomputed input/hidden projections."""
    r = _sigmoid(gi[:, 0:H] + gh[:, 0:H])
    z = _sigmoid(gi[:, H:2 * H] + gh[:, H:2 * H])
    n = jnp.tanh(gi[:, 2 * H:3 * H] + r * gh[:, 2 * H:3 * H])
    return (1.0 - z) * n + z * h


def cfnet_kernel(*refs):
    x_ref, pc_ref, repj_ref, repi_ref, meant_ref, mean1_ref = refs[:6]
    wr = {name: refs[6 + i] for i, name in enumerate(PARAM_ORDER)}
    out_ref, stab_ref, crep_ref = refs[6 + len(PARAM_ORDER):]

    Tm1, Kp, _ = out_ref.shape          # Kp = padded object count (8-aligned)
    T = Tm1 + 1

    def dot(a, b):
        return jnp.dot(a, b, preferred_element_type=jnp.float32)

    # Pairwise expansion on the XLU/VPU (no MXU hop on the dependent chain).
    def rep_rows(v):
        # (Kp, C) -> (Kp*Kp, C); result row r = v[r // Kp]   ("j" side of the pair)
        return jnp.concatenate(
            [jnp.broadcast_to(v[m:m + 1, :], (Kp, v.shape[1])) for m in range(Kp)],
            axis=0)

    def tile_rows(v):
        # (Kp, C) -> (Kp*Kp, C); result row r = v[r % Kp]    ("i" side of the pair)
        return jnp.concatenate([v] * Kp, axis=0)

    # -------- observed path: feature extraction batched over all T*Kp rows --------
    x_all = x_ref[...]                                                # (T*Kp, 56)
    a_all = dot(x_all, wr["Wi1a"][...])                               # x[j]-half of mlp_inter L1
    b_all = dot(x_all, wr["Wi1b"][...])                               # x[i]-half
    pair = _relu(dot(repj_ref[...], a_all) + dot(repi_ref[...], b_all)
                 + wr["bi1"][...])                                    # (T*K*K, H) real pairs only
    pair = _relu(dot(pair, wr["Wi2"][...]) + wr["bi2"][...])
    pair = _relu(dot(pair, wr["Wi3"][...]) + wr["bi3"][...])
    e_all = dot(meant_ref[...], pair)                                 # masked mean over i -> (T*Kp, H)
    s_all = _relu(dot(x_all, wr["Wo1x"][...]) + dot(e_all, wr["Wo1e"][...])
                  + wr["bo1"][...])
    gi_all = dot(s_all, wr["rnn_Wih_f"][...]) + wr["rnn_bih_f"][...]  # fused mlp_out L2 + GRU Wih

    # Sequential GRU over time; the Kp objects are the batch.  Per-step rows
    # are static, sublane-aligned slices (no selector matmul).
    h = jnp.zeros((Kp, H), jnp.float32)
    for t in range(T):
        gi = gi_all[t * Kp:(t + 1) * Kp, :]
        gh = dot(h, wr["rnn_Whh"][...]) + wr["rnn_bhh"][...]
        h = _gru_update(gi, gh, h)
    crep = h                                                          # causal_rep (Kp, H)
    crep_ref[...] = crep

    # -------- stability: evaluated once (True == 'true' is False in the reference) --------
    pose0 = pc_ref[...]                                               # (Kp, 56)
    pj = dot(crep, wr["Ws1a_c"][...]) + dot(pose0, wr["Ws1a_p"][...])
    pi = dot(crep, wr["Ws1b_c"][...]) + dot(pose0, wr["Ws1b_p"][...])
    sp = _relu(rep_rows(pj) + tile_rows(pi) + wr["bs1"][...])         # (Kp*Kp, H)
    sp = _relu(dot(sp, wr["Ws2"][...]) + wr["bs2"][...])
    sp = _relu(dot(sp, wr["Ws3"][...]) + wr["bs3"][...])
    e_s = dot(mean1_ref[...], sp)                                     # masked mean over i -> (Kp, H)
    st = _relu(dot(crep, wr["Wst1_c"][...]) + dot(pose0, wr["Wst1_p"][...])
               + dot(e_s, wr["Wst1_e"][...]) + wr["bst1"][...])
    stab = dot(st, wr["Wst2"][...]) + wr["bst2"][...]                 # (Kp, 1)
    stab_ref[...] = stab
    gate = 1.0 - _sigmoid(stab * (1.0 / 0.01))                        # training-mode gate

    # -------- counterfactual rollout: Tm1 sequential steps ------------------------
    # crep-dependent halves of the first layers are loop-invariant -> hoisted.
    pre_c = (rep_rows(dot(crep, wr["Wd1a_c"][...]))
             + tile_rows(dot(crep, wr["Wd1b_c"][...]))
             + wr["bd1"][...])                                        # (Kp*Kp, H)
    g_c = dot(crep, wr["Wg1_c"][...]) + wr["bg1"][...]                # (Kp, H)

    mean1 = mean1_ref[...]
    pose = pose0
    hd = jnp.zeros((Kp, H), jnp.float32)                              # rnn_delta state
    for i in range(Tm1):
        pp = dot(pose, wr["Wroll_p"][...])                            # [Wd1a_p | Wd1b_p | Wg1_p]
        dp = _relu(rep_rows(pp[:, 0:H]) + tile_rows(pp[:, H:2 * H]) + pre_c)
        dp = _relu(dot(dp, wr["Wd2"][...]) + wr["bd2"][...])
        dp = _relu(dot(dp, wr["Wd3"][...]) + wr["bd3"][...])
        e_d = dot(mean1, dp)                                          # (Kp, H)
        g = _relu(pp[:, 2 * H:3 * H] + dot(e_d, wr["Wg1_e"][...]) + g_c)
        gi = dot(g, wr["rnd_Wih_f"][...]) + wr["rnd_bih_f"][...]      # fused mlp_gcn_delta L2 + Wih
        gh = dot(hd, wr["rnd_Whh"][...]) + wr["rnd_bhh"][...]
        hd = _gru_update(gi, gh, hd)
        delta = dot(hd, wr["Wf"][...]) + wr["bf"][...]                # (Kp, 56)
        pose = pose + delta * gate
        out_ref[i] = pose


def _selectors(T, K, Kp):
    """Host-built 0/1 (and 1/K) matrices.

    Observed path: only the real T*K*K (t, j, i) pairs are materialized; the
    selectors index into the Kp-padded row stack so every per-object tensor is
    8-sublane aligned.  The mean reducers weight only real objects by 1/K and
    padded objects by 0, so all means stay exact."""
    t_idx = jnp.repeat(jnp.arange(T), K * K)
    j_idx = jnp.tile(jnp.repeat(jnp.arange(K), K), T)
    i_idx = jnp.tile(jnp.arange(K), T * K)
    rep_j = jax.nn.one_hot(t_idx * Kp + j_idx, T * Kp, dtype=jnp.float32)  # (T*K*K, T*Kp)
    rep_i = jax.nn.one_hot(t_idx * Kp + i_idx, T * Kp, dtype=jnp.float32)  # (T*K*K, T*Kp)
    mean_t = rep_j.T / float(K)                                            # (T*Kp, T*K*K)

    # Rollout / stability: pairs live on the full Kp*Kp grid (row r = j*Kp + i);
    # the mean over i only weights the K real objects.
    i_mask = (jnp.arange(Kp) < K).astype(jnp.float32) / float(K)           # (Kp,)
    rep_j1 = jnp.repeat(jnp.eye(Kp, dtype=jnp.float32), Kp, axis=0)        # (Kp*Kp, Kp)
    mean_1 = rep_j1.T * jnp.tile(i_mask, Kp)[None, :]                      # (Kp, Kp*Kp)
    return rep_j, rep_i, mean_t, mean_1


def _split_params(p):
    """Split / pre-fuse the PyTorch-layout weights so the kernel never
    concatenates along lanes and never runs back-to-back linear layers."""
    s = {}
    s["Wi1a"], s["Wi1b"], s["bi1"] = p["Wi1"][:F], p["Wi1"][F:], p["bi1"]
    s["Wi2"], s["bi2"] = p["Wi2"], p["bi2"]
    s["Wi3"], s["bi3"] = p["Wi3"], p["bi3"]
    s["Wo1x"], s["Wo1e"], s["bo1"] = p["Wo1"][:F], p["Wo1"][F:], p["bo1"]
    # mlp_out L2 folded into the GRU input projection (no nonlinearity between).
    s["rnn_Wih_f"] = p["Wo2"] @ p["rnn_Wih"]
    s["rnn_bih_f"] = p["bo2"] @ p["rnn_Wih"] + p["rnn_bih"]
    s["rnn_Whh"], s["rnn_bhh"] = p["rnn_Whh"], p["rnn_bhh"]

    Ws1 = p["Ws1"]                                  # input order [crep_j, pose_j, crep_i, pose_i]
    s["Ws1a_c"], s["Ws1a_p"] = Ws1[:H], Ws1[H:H + F]
    s["Ws1b_c"], s["Ws1b_p"] = Ws1[H + F:2 * H + F], Ws1[2 * H + F:]
    s["bs1"] = p["bs1"]
    s["Ws2"], s["bs2"] = p["Ws2"], p["bs2"]
    s["Ws3"], s["bs3"] = p["Ws3"], p["bs3"]

    Wst1 = p["Wst1"]                                # input order [crep, pose, E]
    s["Wst1_c"], s["Wst1_p"], s["Wst1_e"] = Wst1[:H], Wst1[H:H + F], Wst1[H + F:]
    s["bst1"] = p["bst1"]
    s["Wst2"], s["bst2"] = p["Wst2"], p["bst2"]

    Wd1 = p["Wd1"]                                  # input order [pose_j, crep_j, pose_i, crep_i]
    Wd1a_p, Wd1a_c = Wd1[:F], Wd1[F:F + H]
    Wd1b_p, Wd1b_c = Wd1[F + H:2 * F + H], Wd1[2 * F + H:]
    Wg1 = p["Wg1"]                                  # input order [pose, crep, E]
    Wg1_p, Wg1_c, Wg1_e = Wg1[:F], Wg1[F:F + H], Wg1[F + H:]
    # One (56, 3H) matmul per rollout step for everything that consumes `pose`.
    s["Wroll_p"] = jnp.concatenate([Wd1a_p, Wd1b_p, Wg1_p], axis=1)
    s["Wd1a_c"], s["Wd1b_c"], s["bd1"] = Wd1a_c, Wd1b_c, p["bd1"]
    s["Wd2"], s["bd2"] = p["Wd2"], p["bd2"]
    s["Wd3"], s["bd3"] = p["Wd3"], p["bd3"]
    s["Wg1_c"], s["Wg1_e"], s["bg1"] = Wg1_c, Wg1_e, p["bg1"]
    # mlp_gcn_delta L2 folded into the rnn_delta input projection.
    s["rnd_Wih_f"] = p["Wg2"] @ p["rnd_Wih"]
    s["rnd_bih_f"] = p["bg2"] @ p["rnd_Wih"] + p["rnd_bih"]
    s["rnd_Whh"], s["rnd_bhh"] = p["rnd_Whh"], p["rnd_bhh"]
    s["Wf"], s["bf"] = p["Wf"], p["bf"]
    return [s[name] for name in PARAM_ORDER]


@jax.jit
def cfnet_forward(pose_3d_ab, pose_3d_c, params):
    T, K, feat = pose_3d_ab.shape
    assert feat == F
    Tm1 = T - 1
    Kp = max(8, ((K + 7) // 8) * 8)                 # pad objects to sublane multiple

    x_pad = jnp.zeros((T, Kp, F), jnp.float32).at[:, :K, :].set(
        pose_3d_ab.astype(jnp.float32))
    x_all = x_pad.reshape(T * Kp, F)                # row-stacked, 8-aligned per timestep
    pose_c = jnp.zeros((Kp, F), jnp.float32).at[:K, :].set(
        pose_3d_c.astype(jnp.float32).reshape(K, F))

    selectors = _selectors(T, K, Kp)
    weights = _split_params(params)

    vmem = pl.BlockSpec(memory_space=pltpu.MemorySpace.VMEM)
    n_in = 2 + len(selectors) + len(weights)
    out, stab, crep = pl.pallas_call(
        cfnet_kernel,
        out_shape=(
            jax.ShapeDtypeStruct((Tm1, Kp, F), jnp.float32),
            jax.ShapeDtypeStruct((Kp, 1), jnp.float32),
            jax.ShapeDtypeStruct((Kp, H), jnp.float32),
        ),
        in_specs=[vmem] * n_in,
        out_specs=(vmem, vmem, vmem),
    )(x_all, pose_c, *selectors, *weights)

    # Strip the object padding and restore PyTorch output conventions.  The
    # reference reuses the step-0 stability value for every rollout step, so
    # the broadcast happens on host.
    out = out[:, :K, :]
    stability = jnp.broadcast_to(stab[:K].reshape(1, 1, K), (1, Tm1, K))
    return out[None], stability, crep[None, :K]


def init_params(key):
    """Deterministic synthetic parameters with the same shapes as CFNet.__init__
    (weights transposed to (in, out); GRU weights to (in, 3H), gate order [r,z,n])."""
    keys = iter(jax.random.split(key, 48))

    def lin(fan_in, fan_out):
        bound = 1.0 / (fan_in ** 0.5)
        W = jax.random.uniform(next(keys), (fan_in, fan_out), jnp.float32, -bound, bound)
        b = jax.random.uniform(next(keys), (1, fan_out), jnp.float32, -bound, bound)
        return W, b

    def gru(in_dim, hid):
        bound = 1.0 / (hid ** 0.5)
        shapes = [(in_dim, 3 * hid), (1, 3 * hid), (hid, 3 * hid), (1, 3 * hid)]
        return tuple(jax.random.uniform(next(keys), s, jnp.float32, -bound, bound)
                     for s in shapes)

    p = {}
    p["Wi1"], p["bi1"] = lin(2 * F, H)
    p["Wi2"], p["bi2"] = lin(H, H)
    p["Wi3"], p["bi3"] = lin(H, H)
    p["Wo1"], p["bo1"] = lin(F + H, H)
    p["Wo2"], p["bo2"] = lin(H, H)
    p["rnn_Wih"], p["rnn_bih"], p["rnn_Whh"], p["rnn_bhh"] = gru(H, H)
    p["Ws1"], p["bs1"] = lin(2 * (H + F), H)
    p["Ws2"], p["bs2"] = lin(H, H)
    p["Ws3"], p["bs3"] = lin(H, H)
    p["Wst1"], p["bst1"] = lin(2 * H + F, H)
    p["Wst2"], p["bst2"] = lin(H, 1)
    p["Wd1"], p["bd1"] = lin(2 * (H + F), H)
    p["Wd2"], p["bd2"] = lin(H, H)
    p["Wd3"], p["bd3"] = lin(H, H)
    p["Wg1"], p["bg1"] = lin(2 * H + F, H)
    p["Wg2"], p["bg2"] = lin(H, H)
    p["rnd_Wih"], p["rnd_bih"], p["rnd_Whh"], p["rnd_bhh"] = gru(H, H)
    p["Wf"], p["bf"] = lin(H, F)
    return p


if __name__ == "__main__":
    key = jax.random.PRNGKey(0)
    k_params, k_ab, k_c = jax.random.split(key, 3)

    K = 5    # num_objects (module default)
    T = 8    # observed sequence length -> rollout length T-1 = 7

    params = init_params(k_params)
    pose_3d_ab = jax.random.normal(k_ab, (T, K, F), jnp.float32)
    pose_3d_c = jax.random.normal(k_c, (1, K, F), jnp.float32)

    out, stability, causal_rep = cfnet_forward(pose_3d_ab, pose_3d_c, params)
    jax.block_until_ready((out, stability, causal_rep))

    assert out.shape == (1, T - 1, K, F)
    assert stability.shape == (1, T - 1, K)
    assert causal_rep.shape == (1, K, H)
    assert bool(jnp.all(jnp.isfinite(out)))
    assert bool(jnp.all(jnp.isfinite(stability)))
    assert bool(jnp.all(jnp.isfinite(causal_rep)))
    print("KERNEL_OK")
</pallas_src>

<mosaic_0001>
module attributes {stable_mosaic.version = 11 : i64} {
  func.func @cfnet_kernel(%arg0: memref<64x56xf32, #tpu.memory_space<vmem>>, %arg1: memref<8x56xf32, #tpu.memory_space<vmem>>, %arg2: memref<200x64xf32, #tpu.memory_space<vmem>>, %arg3: memref<200x64xf32, #tpu.memory_space<vmem>>, %arg4: memref<64x200xf32, #tpu.memory_space<vmem>>, %arg5: memref<8x64xf32, #tpu.memory_space<vmem>>, %arg6: memref<56x32xf32, #tpu.memory_space<vmem>>, %arg7: memref<56x32xf32, #tpu.memory_space<vmem>>, %arg8: memref<1x32xf32, #tpu.memory_space<vmem>>, %arg9: memref<32x32xf32, #tpu.memory_space<vmem>>, %arg10: memref<1x32xf32, #tpu.memory_space<vmem>>, %arg11: memref<32x32xf32, #tpu.memory_space<vmem>>, %arg12: memref<1x32xf32, #tpu.memory_space<vmem>>, %arg13: memref<56x32xf32, #tpu.memory_space<vmem>>, %arg14: memref<32x32xf32, #tpu.memory_space<vmem>>, %arg15: memref<1x32xf32, #tpu.memory_space<vmem>>, %arg16: memref<32x96xf32, #tpu.memory_space<vmem>>, %arg17: memref<1x96xf32, #tpu.memory_space<vmem>>, %arg18: memref<32x96xf32, #tpu.memory_space<vmem>>, %arg19: memref<1x96xf32, #tpu.memory_space<vmem>>, %arg20: memref<32x32xf32, #tpu.memory_space<vmem>>, %arg21: memref<56x32xf32, #tpu.memory_space<vmem>>, %arg22: memref<32x32xf32, #tpu.memory_space<vmem>>, %arg23: memref<56x32xf32, #tpu.memory_space<vmem>>, %arg24: memref<1x32xf32, #tpu.memory_space<vmem>>, %arg25: memref<32x32xf32, #tpu.memory_space<vmem>>, %arg26: memref<1x32xf32, #tpu.memory_space<vmem>>, %arg27: memref<32x32xf32, #tpu.memory_space<vmem>>, %arg28: memref<1x32xf32, #tpu.memory_space<vmem>>, %arg29: memref<32x32xf32, #tpu.memory_space<vmem>>, %arg30: memref<56x32xf32, #tpu.memory_space<vmem>>, %arg31: memref<32x32xf32, #tpu.memory_space<vmem>>, %arg32: memref<1x32xf32, #tpu.memory_space<vmem>>, %arg33: memref<32x1xf32, #tpu.memory_space<vmem>>, %arg34: memref<1x1xf32, #tpu.memory_space<vmem>>, %arg35: memref<56x96xf32, #tpu.memory_space<vmem>>, %arg36: memref<32x32xf32, #tpu.memory_space<vmem>>, %arg37: memref<32x32xf32, #tpu.memory_space<vmem>>, %arg38: memref<1x32xf32, #tpu.memory_space<vmem>>, %arg39: memref<32x32xf32, #tpu.memory_space<vmem>>, %arg40: memref<1x32xf32, #tpu.memory_space<vmem>>, %arg41: memref<32x32xf32, #tpu.memory_space<vmem>>, %arg42: memref<1x32xf32, #tpu.memory_space<vmem>>, %arg43: memref<32x32xf32, #tpu.memory_space<vmem>>, %arg44: memref<32x32xf32, #tpu.memory_space<vmem>>, %arg45: memref<1x32xf32, #tpu.memory_space<vmem>>, %arg46: memref<32x96xf32, #tpu.memory_space<vmem>>, %arg47: memref<1x96xf32, #tpu.memory_space<vmem>>, %arg48: memref<32x96xf32, #tpu.memory_space<vmem>>, %arg49: memref<1x96xf32, #tpu.memory_space<vmem>>, %arg50: memref<32x56xf32, #tpu.memory_space<vmem>>, %arg51: memref<1x56xf32, #tpu.memory_space<vmem>>, %arg52: memref<7x8x56xf32, #tpu.memory_space<vmem>>, %arg53: memref<8x1xf32, #tpu.memory_space<vmem>>, %arg54: memref<8x32xf32, #tpu.memory_space<vmem>>) attributes {dimension_semantics = [], scalar_prefetch = 0 : i64, scratch_operands = 0 : i64, tpu.core_type = #tpu.core_type<tc>} {
    %c0 = arith.constant 0 : index
    %c0_0 = arith.constant 0 : index
    %0 = vector.load %arg0[%c0, %c0_0] : memref<64x56xf32, #tpu.memory_space<vmem>>, vector<64x56xf32>
    %c0_1 = arith.constant 0 : index
    %c0_2 = arith.constant 0 : index
    %1 = vector.load %arg6[%c0_1, %c0_2] : memref<56x32xf32, #tpu.memory_space<vmem>>, vector<56x32xf32>
    %cst = arith.constant dense<0.000000e+00> : vector<64x32xf32>
    %2 = tpu.matmul %0, %1, %cst {dimension_numbers = #tpu.dot_dimension_numbers<[1], [0], [0], [1], [0, 0, 1, 1], [], []>} : vector<64x56xf32>, vector<56x32xf32>, vector<64x32xf32> -> vector<64x32xf32>
    %c0_3 = arith.constant 0 : index
    %c0_4 = arith.constant 0 : index
    %3 = vector.load %arg7[%c0_3, %c0_4] : memref<56x32xf32, #tpu.memory_space<vmem>>, vector<56x32xf32>
    %cst_5 = arith.constant dense<0.000000e+00> : vector<64x32xf32>
    %4 = tpu.matmul %0, %3, %cst_5 {dimension_numbers = #tpu.dot_dimension_numbers<[1], [0], [0], [1], [0, 0, 1, 1], [], []>} : vector<64x56xf32>, vector<56x32xf32>, vector<64x32xf32> -> vector<64x32xf32>
    %c0_6 = arith.constant 0 : index
    %c0_7 = arith.constant 0 : index
    %5 = vector.load %arg2[%c0_6, %c0_7] : memref<200x64xf32, #tpu.memory_space<vmem>>, vector<200x64xf32>
    %cst_8 = arith.constant dense<0.000000e+00> : vector<200x32xf32>
    %6 = tpu.matmul %5, %2, %cst_8 {dimension_numbers = #tpu.dot_dimension_numbers<[1], [0], [0], [1], [0, 0, 1, 1], [], []>} : vector<200x64xf32>, vector<64x32xf32>, vector<200x32xf32> -> vector<200x32xf32>
    %c0_9 = arith.constant 0 : index
    %c0_10 = arith.constant 0 : index
    %7 = vector.load %arg3[%c0_9, %c0_10] : memref<200x64xf32, #tpu.memory_space<vmem>>, vector<200x64xf32>
    %cst_11 = arith.constant dense<0.000000e+00> : vector<200x32xf32>
    %8 = tpu.matmul %7, %4, %cst_11 {dimension_numbers = #tpu.dot_dimension_numbers<[1], [0], [0], [1], [0, 0, 1, 1], [], []>} : vector<200x64xf32>, vector<64x32xf32>, vector<200x32xf32> -> vector<200x32xf32>
    %9 = arith.addf %6, %8 : vector<200x32xf32>
    %c0_12 = arith.constant 0 : index
    %c0_13 = arith.constant 0 : index
    %10 = vector.load %arg8[%c0_12, %c0_13] : memref<1x32xf32, #tpu.memory_space<vmem>>, vector<1x32xf32>
    %11 = vector.broadcast %10 : vector<1x32xf32> to vector<200x32xf32>
    %12 = arith.addf %9, %11 : vector<200x32xf32>
    %cst_14 = arith.constant 0.000000e+00 : f32
    %13 = vector.broadcast %cst_14 : f32 to vector<200x32xf32>
    %14 = arith.maximumf %12, %13 : vector<200x32xf32>
    %c0_15 = arith.constant 0 : index
    %c0_16 = arith.constant 0 : index
    %15 = vector.load %arg9[%c0_15, %c0_16] : memref<32x32xf32, #tpu.memory_space<vmem>>, vector<32x32xf32>
    %cst_17 = arith.constant dense<0.000000e+00> : vector<200x32xf32>
    %16 = tpu.matmul %14, %15, %cst_17 {dimension_numbers = #tpu.dot_dimension_numbers<[1], [0], [0], [1], [0, 0, 1, 1], [], []>} : vector<200x32xf32>, vector<32x32xf32>, vector<200x32xf32> -> vector<200x32xf32>
    %c0_18 = arith.constant 0 : index
    %c0_19 = arith.constant 0 : index
    %17 = vector.load %arg10[%c0_18, %c0_19] : memref<1x32xf32, #tpu.memory_space<vmem>>, vector<1x32xf32>
    %18 = vector.broadcast %17 : vector<1x32xf32> to vector<200x32xf32>
    %19 = arith.addf %16, %18 : vector<200x32xf32>
    %cst_20 = arith.constant 0.000000e+00 : f32
    %20 = vector.broadcast %cst_20 : f32 to vector<200x32xf32>
    %21 = arith.maximumf %19, %20 : vector<200x32xf32>
    %c0_21 = arith.constant 0 : index
    %c0_22 = arith.constant 0 : index
    %22 = vector.load %arg11[%c0_21, %c0_22] : memref<32x32xf32, #tpu.memory_space<vmem>>, vector<32x32xf32>
    %cst_23 = arith.constant dense<0.000000e+00> : vector<200x32xf32>
    %23 = tpu.matmul %21, %22, %cst_23 {dimension_numbers = #tpu.dot_dimension_numbers<[1], [0], [0], [1], [0, 0, 1, 1], [], []>} : vector<200x32xf32>, vector<32x32xf32>, vector<200x32xf32> -> vector<200x32xf32>
    %c0_24 = arith.constant 0 : index
    %c0_25 = arith.constant 0 : index
    %24 = vector.load %arg12[%c0_24, %c0_25] : memref<1x32xf32, #tpu.memory_space<vmem>>, vector<1x32xf32>
    %25 = vector.broadcast %24 : vector<1x32xf32> to vector<200x32xf32>
    %26 = arith.addf %23, %25 : vector<200x32xf32>
    %cst_26 = arith.constant 0.000000e+00 : f32
    %27 = vector.broadcast %cst_26 : f32 to vector<200x32xf32>
    %28 = arith.maximumf %26, %27 : vector<200x32xf32>
    %c0_27 = arith.constant 0 : index
    %c0_28 = arith.constant 0 : index
    %29 = vector.load %arg4[%c0_27, %c0_28] : memref<64x200xf32, #tpu.memory_space<vmem>>, vector<64x200xf32>
    %cst_29 = arith.constant dense<0.000000e+00> : vector<64x32xf32>
    %30 = tpu.matmul %29, %28, %cst_29 {dimension_numbers = #tpu.dot_dimension_numbers<[1], [0], [0], [1], [0, 0, 1, 1], [], []>} : vector<64x200xf32>, vector<200x32xf32>, vector<64x32xf32> -> vector<64x32xf32>
    %c0_30 = arith.constant 0 : index
    %c0_31 = arith.constant 0 : index
    %31 = vector.load %arg13[%c0_30, %c0_31] : memref<56x32xf32, #tpu.memory_space<vmem>>, vector<56x32xf32>
    %cst_32 = arith.constant dense<0.000000e+00> : vector<64x32xf32>
    %32 = tpu.matmul %0, %31, %cst_32 {dimension_numbers = #tpu.dot_dimension_numbers<[1], [0], [0], [1], [0, 0, 1, 1], [], []>} : vector<64x56xf32>, vector<56x32xf32>, vector<64x32xf32> -> vector<64x32xf32>
    %c0_33 = arith.constant 0 : index
    %c0_34 = arith.constant 0 : index
    %33 = vector.load %arg14[%c0_33, %c0_34] : memref<32x32xf32, #tpu.memory_space<vmem>>, vector<32x32xf32>
    %cst_35 = arith.constant dense<0.000000e+00> : vector<64x32xf32>
    %34 = tpu.matmul %30, %33, %cst_35 {dimension_numbers = #tpu.dot_dimension_numbers<[1], [0], [0], [1], [0, 0, 1, 1], [], []>} : vector<64x32xf32>, vector<32x32xf32>, vector<64x32xf32> -> vector<64x32xf32>
    %35 = arith.addf %32, %34 : vector<64x32xf32>
    %c0_36 = arith.constant 0 : index
    %c0_37 = arith.constant 0 : index
    %36 = vector.load %arg15[%c0_36, %c0_37] : memref<1x32xf32, #tpu.memory_space<vmem>>, vector<1x32xf32>
    %37 = vector.broadcast %36 : vector<1x32xf32> to vector<64x32xf32>
    %38 = arith.addf %35, %37 : vector<64x32xf32>
    %cst_38 = arith.constant 0.000000e+00 : f32
    %39 = vector.broadcast %cst_38 : f32 to vector<64x32xf32>
    %40 = arith.maximumf %38, %39 : vector<64x32xf32>
    %c0_39 = arith.constant 0 : index
    %c0_40 = arith.constant 0 : index
    %41 = vector.load %arg16[%c0_39, %c0_40] : memref<32x96xf32, #tpu.memory_space<vmem>>, vector<32x96xf32>
    %cst_41 = arith.constant dense<0.000000e+00> : vector<64x96xf32>
    %42 = tpu.matmul %40, %41, %cst_41 {dimension_numbers = #tpu.dot_dimension_numbers<[1], [0], [0], [1], [0, 0, 1, 1], [], []>} : vector<64x32xf32>, vector<32x96xf32>, vector<64x96xf32> -> vector<64x96xf32>
    %c0_42 = arith.constant 0 : index
    %c0_43 = arith.constant 0 : index
    %43 = vector.load %arg17[%c0_42, %c0_43] : memref<1x96xf32, #tpu.memory_space<vmem>>, vector<1x96xf32>
    %44 = vector.broadcast %43 : vector<1x96xf32> to vector<64x96xf32>
    %45 = arith.addf %42, %44 : vector<64x96xf32>
    %cst_44 = arith.constant 0.000000e+00 : f32
    %46 = vector.broadcast %cst_44 : f32 to vector<8x32xf32>
    %47 = vector.extract_strided_slice %45 {offsets = [0, 0], sizes = [8, 96], strides = [1, 1]} : vector<64x96xf32> to vector<8x96xf32>
    %c0_45 = arith.constant 0 : index
    %c0_46 = arith.constant 0 : index
    %48 = vector.load %arg18[%c0_45, %c0_46] : memref<32x96xf32, #tpu.memory_space<vmem>>, vector<32x96xf32>
    %cst_47 = arith.constant dense<0.000000e+00> : vector<8x96xf32>
    %49 = tpu.matmul %46, %48, %cst_47 {dimension_numbers = #tpu.dot_dimension_numbers<[1], [0], [0], [1], [0, 0, 1, 1], [], []>} : vector<8x32xf32>, vector<32x96xf32>, vector<8x96xf32> -> vector<8x96xf32>
    %c0_48 = arith.constant 0 : index
    %c0_49 = arith.constant 0 : index
    %50 = vector.load %arg19[%c0_48, %c0_49] : memref<1x96xf32, #tpu.memory_space<vmem>>, vector<1x96xf32>
    %51 = vector.broadcast %50 : vector<1x96xf32> to vector<8x96xf32>
    %52 = arith.addf %49, %51 : vector<8x96xf32>
    %53 = vector.extract_strided_slice %47 {offsets = [0, 0], sizes = [8, 32], strides = [1, 1]} : vector<8x96xf32> to vector<8x32xf32>
    %54 = vector.extract_strided_slice %52 {offsets = [0, 0], sizes = [8, 32], strides = [1, 1]} : vector<8x96xf32> to vector<8x32xf32>
    %55 = arith.addf %53, %54 : vector<8x32xf32>
    %cst_50 = arith.constant 5.000000e-01 : f32
    %56 = vector.broadcast %cst_50 : f32 to vector<8x32xf32>
    %57 = arith.mulf %56, %55 : vector<8x32xf32>
    %58 = math.tanh %57 : vector<8x32xf32>
    %cst_51 = arith.constant 1.000000e+00 : f32
    %59 = vector.broadcast %cst_51 : f32 to vector<8x32xf32>
    %60 = arith.addf %58, %59 : vector<8x32xf32>
    %cst_52 = arith.constant 5.000000e-01 : f32
    %61 = vector.broadcast %cst_52 : f32 to vector<8x32xf32>
    %62 = arith.mulf %61, %60 : vector<8x32xf32>
    %63 = vector.extract_strided_slice %47 {offsets = [0, 32], sizes = [8, 32], strides = [1, 1]} : vector<8x96xf32> to vector<8x32xf32>
    %64 = vector.extract_strided_slice %52 {offsets = [0, 32], sizes = [8, 32], strides = [1, 1]} : vector<8x96xf32> to vector<8x32xf32>
    %65 = arith.addf %63, %64 : vector<8x32xf32>
    %cst_53 = arith.constant 5.000000e-01 : f32
    %66 = vector.broadcast %cst_53 : f32 to vector<8x32xf32>
    %67 = arith.mulf %66, %65 : vector<8x32xf32>
    %68 = math.tanh %67 : vector<8x32xf32>
    %cst_54 = arith.constant 1.000000e+00 : f32
    %69 = vector.broadcast %cst_54 : f32 to vector<8x32xf32>
    %70 = arith.addf %68, %69 : vector<8x32xf32>
    %cst_55 = arith.constant 5.000000e-01 : f32
    %71 = vector.broadcast %cst_55 : f32 to vector<8x32xf32>
    %72 = arith.mulf %71, %70 : vector<8x32xf32>
    %73 = vector.extract_strided_slice %47 {offsets = [0, 64], sizes = [8, 32], strides = [1, 1]} : vector<8x96xf32> to vector<8x32xf32>
    %74 = vector.extract_strided_slice %52 {offsets = [0, 64], sizes = [8, 32], strides = [1, 1]} : vector<8x96xf32> to vector<8x32xf32>
    %75 = arith.mulf %62, %74 : vector<8x32xf32>
    %76 = arith.addf %73, %75 : vector<8x32xf32>
    %77 = math.tanh %76 : vector<8x32xf32>
    %cst_56 = arith.constant 1.000000e+00 : f32
    %78 = vector.broadcast %cst_56 : f32 to vector<8x32xf32>
    %79 = arith.subf %78, %72 : vector<8x32xf32>
    %80 = arith.mulf %79, %77 : vector<8x32xf32>
    %81 = arith.mulf %72, %46 : vector<8x32xf32>
    %82 = arith.addf %80, %81 : vector<8x32xf32>
    %83 = vector.extract_strided_slice %45 {offsets = [8, 0], sizes = [8, 96], strides = [1, 1]} : vector<64x96xf32> to vector<8x96xf32>
    %c0_57 = arith.constant 0 : index
    %c0_58 = arith.constant 0 : index
    %84 = vector.load %arg18[%c0_57, %c0_58] : memref<32x96xf32, #tpu.memory_space<vmem>>, vector<32x96xf32>
    %cst_59 = arith.constant dense<0.000000e+00> : vector<8x96xf32>
    %85 = tpu.matmul %82, %84, %cst_59 {dimension_numbers = #tpu.dot_dimension_numbers<[1], [0], [0], [1], [0, 0, 1, 1], [], []>} : vector<8x32xf32>, vector<32x96xf32>, vector<8x96xf32> -> vector<8x96xf32>
    %c0_60 = arith.constant 0 : index
    %c0_61 = arith.constant 0 : index
    %86 = vector.load %arg19[%c0_60, %c0_61] : memref<1x96xf32, #tpu.memory_space<vmem>>, vector<1x96xf32>
    %87 = vector.broadcast %86 : vector<1x96xf32> to vector<8x96xf32>
    %88 = arith.addf %85, %87 : vector<8x96xf32>
    %89 = vector.extract_strided_slice %83 {offsets = [0, 0], sizes = [8, 32], strides = [1, 1]} : vector<8x96xf32> to vector<8x32xf32>
    %90 = vector.extract_strided_slice %88 {offsets = [0, 0], sizes = [8, 32], strides = [1, 1]} : vector<8x96xf32> to vector<8x32xf32>
    %91 = arith.addf %89, %90 : vector<8x32xf32>
    %cst_62 = arith.constant 5.000000e-01 : f32
    %92 = vector.broadcast %cst_62 : f32 to vector<8x32xf32>
    %93 = arith.mulf %92, %91 : vector<8x32xf32>
    %94 = math.tanh %93 : vector<8x32xf32>
    %cst_63 = arith.constant 1.000000e+00 : f32
    %95 = vector.broadcast %cst_63 : f32 to vector<8x32xf32>
    %96 = arith.addf %94, %95 : vector<8x32xf32>
    %cst_64 = arith.constant 5.000000e-01 : f32
    %97 = vector.broadcast %cst_64 : f32 to vector<8x32xf32>
    %98 = arith.mulf %97, %96 : vector<8x32xf32>
    %99 = vector.extract_strided_slice %83 {offsets = [0, 32], sizes = [8, 32], strides = [1, 1]} : vector<8x96xf32> to vector<8x32xf32>
    %100 = vector.extract_strided_slice %88 {offsets = [0, 32], sizes = [8, 32], strides = [1, 1]} : vector<8x96xf32> to vector<8x32xf32>
    %101 = arith.addf %99, %100 : vector<8x32xf32>
    %cst_65 = arith.constant 5.000000e-01 : f32
    %102 = vector.broadcast %cst_65 : f32 to vector<8x32xf32>
    %103 = arith.mulf %102, %101 : vector<8x32xf32>
    %104 = math.tanh %103 : vector<8x32xf32>
    %cst_66 = arith.constant 1.000000e+00 : f32
    %105 = vector.broadcast %cst_66 : f32 to vector<8x32xf32>
    %106 = arith.addf %104, %105 : vector<8x32xf32>
    %cst_67 = arith.constant 5.000000e-01 : f32
    %107 = vector.broadcast %cst_67 : f32 to vector<8x32xf32>
    %108 = arith.mulf %107, %106 : vector<8x32xf32>
    %109 = vector.extract_strided_slice %83 {offsets = [0, 64], sizes = [8, 32], strides = [1, 1]} : vector<8x96xf32> to vector<8x32xf32>
    %110 = vector.extract_strided_slice %88 {offsets = [0, 64], sizes = [8, 32], strides = [1, 1]} : vector<8x96xf32> to vector<8x32xf32>
    %111 = arith.mulf %98, %110 : vector<8x32xf32>
    %112 = arith.addf %109, %111 : vector<8x32xf32>
    %113 = math.tanh %112 : vector<8x32xf32>
    %cst_68 = arith.constant 1.000000e+00 : f32
    %114 = vector.broadcast %cst_68 : f32 to vector<8x32xf32>
    %115 = arith.subf %114, %108 : vector<8x32xf32>
    %116 = arith.mulf %115, %113 : vector<8x32xf32>
    %117 = arith.mulf %108, %82 : vector<8x32xf32>
    %118 = arith.addf %116, %117 : vector<8x32xf32>
    %119 = vector.extract_strided_slice %45 {offsets = [16, 0], sizes = [8, 96], strides = [1, 1]} : vector<64x96xf32> to vector<8x96xf32>
    %c0_69 = arith.constant 0 : index
    %c0_70 = arith.constant 0 : index
    %120 = vector.load %arg18[%c0_69, %c0_70] : memref<32x96xf32, #tpu.memory_space<vmem>>, vector<32x96xf32>
    %cst_71 = arith.constant dense<0.000000e+00> : vector<8x96xf32>
    %121 = tpu.matmul %118, %120, %cst_71 {dimension_numbers = #tpu.dot_dimension_numbers<[1], [0], [0], [1], [0, 0, 1, 1], [], []>} : vector<8x32xf32>, vector<32x96xf32>, vector<8x96xf32> -> vector<8x96xf32>
    %c0_72 = arith.constant 0 : index
    %c0_73 = arith.constant 0 : index
    %122 = vector.load %arg19[%c0_72, %c0_73] : memref<1x96xf32, #tpu.memory_space<vmem>>, vector<1x96xf32>
    %123 = vector.broadcast %122 : vector<1x96xf32> to vector<8x96xf32>
    %124 = arith.addf %121, %123 : vector<8x96xf32>
    %125 = vector.extract_strided_slice %119 {offsets = [0, 0], sizes = [8, 32], strides = [1, 1]} : vector<8x96xf32> to vector<8x32xf32>
    %126 = vector.extract_strided_slice %124 {offsets = [0, 0], sizes = [8, 32], strides = [1, 1]} : vector<8x96xf32> to vector<8x32xf32>
    %127 = arith.addf %125, %126 : vector<8x32xf32>
    %cst_74 = arith.constant 5.000000e-01 : f32
    %128 = vector.broadcast %cst_74 : f32 to vector<8x32xf32>
    %129 = arith.mulf %128, %127 : vector<8x32xf32>
    %130 = math.tanh %129 : vector<8x32xf32>
    %cst_75 = arith.constant 1.000000e+00 : f32
    %131 = vector.broadcast %cst_75 : f32 to vector<8x32xf32>
    %132 = arith.addf %130, %131 : vector<8x32xf32>
    %cst_76 = arith.constant 5.000000e-01 : f32
    %133 = vector.broadcast %cst_76 : f32 to vector<8x32xf32>
    %134 = arith.mulf %133, %132 : vector<8x32xf32>
    %135 = vector.extract_strided_slice %119 {offsets = [0, 32], sizes = [8, 32], strides = [1, 1]} : vector<8x96xf32> to vector<8x32xf32>
    %136 = vector.extract_strided_slice %124 {offsets = [0, 32], sizes = [8, 32], strides = [1, 1]} : vector<8x96xf32> to vector<8x32xf32>
    %137 = arith.addf %135, %136 : vector<8x32xf32>
    %cst_77 = arith.constant 5.000000e-01 : f32
    %138 = vector.broadcast %cst_77 : f32 to vector<8x32xf32>
    %139 = arith.mulf %138, %137 : vector<8x32xf32>
    %140 = math.tanh %139 : vector<8x32xf32>
    %cst_78 = arith.constant 1.000000e+00 : f32
    %141 = vector.broadcast %cst_78 : f32 to vector<8x32xf32>
    %142 = arith.addf %140, %141 : vector<8x32xf32>
    %cst_79 = arith.constant 5.000000e-01 : f32
    %143 = vector.broadcast %cst_79 : f32 to vector<8x32xf32>
    %144 = arith.mulf %143, %142 : vector<8x32xf32>
    %145 = vector.extract_strided_slice %119 {offsets = [0, 64], sizes = [8, 32], strides = [1, 1]} : vector<8x96xf32> to vector<8x32xf32>
    %146 = vector.extract_strided_slice %124 {offsets = [0, 64], sizes = [8, 32], strides = [1, 1]} : vector<8x96xf32> to vector<8x32xf32>
    %147 = arith.mulf %134, %146 : vector<8x32xf32>
    %148 = arith.addf %145, %147 : vector<8x32xf32>
    %149 = math.tanh %148 : vector<8x32xf32>
    %cst_80 = arith.constant 1.000000e+00 : f32
    %150 = vector.broadcast %cst_80 : f32 to vector<8x32xf32>
    %151 = arith.subf %150, %144 : vector<8x32xf32>
    %152 = arith.mulf %151, %149 : vector<8x32xf32>
    %153 = arith.mulf %144, %118 : vector<8x32xf32>
    %154 = arith.addf %152, %153 : vector<8x32xf32>
    %155 = vector.extract_strided_slice %45 {offsets = [24, 0], sizes = [8, 96], strides = [1, 1]} : vector<64x96xf32> to vector<8x96xf32>
    %c0_81 = arith.constant 0 : index
    %c0_82 = arith.constant 0 : index
    %156 = vector.load %arg18[%c0_81, %c0_82] : memref<32x96xf32, #tpu.memory_space<vmem>>, vector<32x96xf32>
    %cst_83 = arith.constant dense<0.000000e+00> : vector<8x96xf32>
    %157 = tpu.matmul %154, %156, %cst_83 {dimension_numbers = #tpu.dot_dimension_numbers<[1], [0], [0], [1], [0, 0, 1, 1], [], []>} : vector<8x32xf32>, vector<32x96xf32>, vector<8x96xf32> -> vector<8x96xf32>
    %c0_84 = arith.constant 0 : index
    %c0_85 = arith.constant 0 : index
    %158 = vector.load %arg19[%c0_84, %c0_85] : memref<1x96xf32, #tpu.memory_space<vmem>>, vector<1x96xf32>
    %159 = vector.broadcast %158 : vector<1x96xf32> to vector<8x96xf32>
    %160 = arith.addf %157, %159 : vector<8x96xf32>
    %161 = vector.extract_strided_slice %155 {offsets = [0, 0], sizes = [8, 32], strides = [1, 1]} : vector<8x96xf32> to vector<8x32xf32>
    %162 = vector.extract_strided_slice %160 {offsets = [0, 0], sizes = [8, 32], strides = [1, 1]} : vector<8x96xf32> to vector<8x32xf32>
    %163 = arith.addf %161, %162 : vector<8x32xf32>
    %cst_86 = arith.constant 5.000000e-01 : f32
    %164 = vector.broadcast %cst_86 : f32 to vector<8x32xf32>
    %165 = arith.mulf %164, %163 : vector<8x32xf32>
    %166 = math.tanh %165 : vector<8x32xf32>
    %cst_87 = arith.constant 1.000000e+00 : f32
    %167 = vector.broadcast %cst_87 : f32 to vector<8x32xf32>
    %168 = arith.addf %166, %167 : vector<8x32xf32>
    %cst_88 = arith.constant 5.000000e-01 : f32
    %169 = vector.broadcast %cst_88 : f32 to vector<8x32xf32>
    %170 = arith.mulf %169, %168 : vector<8x32xf32>
    %171 = vector.extract_strided_slice %155 {offsets = [0, 32], sizes = [8, 32], strides = [1, 1]} : vector<8x96xf32> to vector<8x32xf32>
    %172 = vector.extract_strided_slice %160 {offsets = [0, 32], sizes = [8, 32], strides = [1, 1]} : vector<8x96xf32> to vector<8x32xf32>
    %173 = arith.addf %171, %172 : vector<8x32xf32>
    %cst_89 = arith.constant 5.000000e-01 : f32
    %174 = vector.broadcast %cst_89 : f32 to vector<8x32xf32>
    %175 = arith.mulf %174, %173 : vector<8x32xf32>
    %176 = math.tanh %175 : vector<8x32xf32>
    %cst_90 = arith.constant 1.000000e+00 : f32
    %177 = vector.broadcast %cst_90 : f32 to vector<8x32xf32>
    %178 = arith.addf %176, %177 : vector<8x32xf32>
    %cst_91 = arith.constant 5.000000e-01 : f32
    %179 = vector.broadcast %cst_91 : f32 to vector<8x32xf32>
    %180 = arith.mulf %179, %178 : vector<8x32xf32>
    %181 = vector.extract_strided_slice %155 {offsets = [0, 64], sizes = [8, 32], strides = [1, 1]} : vector<8x96xf32> to vector<8x32xf32>
    %182 = vector.extract_strided_slice %160 {offsets = [0, 64], sizes = [8, 32], strides = [1, 1]} : vector<8x96xf32> to vector<8x32xf32>
    %183 = arith.mulf %170, %182 : vector<8x32xf32>
    %184 = arith.addf %181, %183 : vector<8x32xf32>
    %185 = math.tanh %184 : vector<8x32xf32>
    %cst_92 = arith.constant 1.000000e+00 : f32
    %186 = vector.broadcast %cst_92 : f32 to vector<8x32xf32>
    %187 = arith.subf %186, %180 : vector<8x32xf32>
    %188 = arith.mulf %187, %185 : vector<8x32xf32>
    %189 = arith.mulf %180, %154 : vector<8x32xf32>
    %190 = arith.addf %188, %189 : vector<8x32xf32>
    %191 = vector.extract_strided_slice %45 {offsets = [32, 0], sizes = [8, 96], strides = [1, 1]} : vector<64x96xf32> to vector<8x96xf32>
    %c0_93 = arith.constant 0 : index
    %c0_94 = arith.constant 0 : index
    %192 = vector.load %arg18[%c0_93, %c0_94] : memref<32x96xf32, #tpu.memory_space<vmem>>, vector<32x96xf32>
    %cst_95 = arith.constant dense<0.000000e+00> : vector<8x96xf32>
    %193 = tpu.matmul %190, %192, %cst_95 {dimension_numbers = #tpu.dot_dimension_numbers<[1], [0], [0], [1], [0, 0, 1, 1], [], []>} : vector<8x32xf32>, vector<32x96xf32>, vector<8x96xf32> -> vector<8x96xf32>
    %c0_96 = arith.constant 0 : index
    %c0_97 = arith.constant 0 : index
    %194 = vector.load %arg19[%c0_96, %c0_97] : memref<1x96xf32, #tpu.memory_space<vmem>>, vector<1x96xf32>
    %195 = vector.broadcast %194 : vector<1x96xf32> to vector<8x96xf32>
    %196 = arith.addf %193, %195 : vector<8x96xf32>
    %197 = vector.extract_strided_slice %191 {offsets = [0, 0], sizes = [8, 32], strides = [1, 1]} : vector<8x96xf32> to vector<8x32xf32>
    %198 = vector.extract_strided_slice %196 {offsets = [0, 0], sizes = [8, 32], strides = [1, 1]} : vector<8x96xf32> to vector<8x32xf32>
    %199 = arith.addf %197, %198 : vector<8x32xf32>
    %cst_98 = arith.constant 5.000000e-01 : f32
    %200 = vector.broadcast %cst_98 : f32 to vector<8x32xf32>
    %201 = arith.mulf %200, %199 : vector<8x32xf32>
    %202 = math.tanh %201 : vector<8x32xf32>
    %cst_99 = arith.constant 1.000000e+00 : f32
    %203 = vector.broadcast %cst_99 : f32 to vector<8x32xf32>
    %204 = arith.addf %202, %203 : vector<8x32xf32>
    %cst_100 = arith.constant 5.000000e-01 : f32
    %205 = vector.broadcast %cst_100 : f32 to vector<8x32xf32>
    %206 = arith.mulf %205, %204 : vector<8x32xf32>
    %207 = vector.extract_strided_slice %191 {offsets = [0, 32], sizes = [8, 32], strides = [1, 1]} : vector<8x96xf32> to vector<8x32xf32>
    %208 = vector.extract_strided_slice %196 {offsets = [0, 32], sizes = [8, 32], strides = [1, 1]} : vector<8x96xf32> to vector<8x32xf32>
    %209 = arith.addf %207, %208 : vector<8x32xf32>
    %cst_101 = arith.constant 5.000000e-01 : f32
    %210 = vector.broadcast %cst_101 : f32 to vector<8x32xf32>
    %211 = arith.mulf %210, %209 : vector<8x32xf32>
    %212 = math.tanh %211 : vector<8x32xf32>
    %cst_102 = arith.constant 1.000000e+00 : f32
    %213 = vector.broadcast %cst_102 : f32 to vector<8x32xf32>
    %214 = arith.addf %212, %213 : vector<8x32xf32>
    %cst_103 = arith.constant 5.000000e-01 : f32
    %215 = vector.broadcast %cst_103 : f32 to vector<8x32xf32>
    %216 = arith.mulf %215, %214 : vector<8x32xf32>
    %217 = vector.extract_strided_slice %191 {offsets = [0, 64], sizes = [8, 32], strides = [1, 1]} : vector<8x96xf32> to vector<8x32xf32>
    %218 = vector.extract_strided_slice %196 {offsets = [0, 64], sizes = [8, 32], strides = [1, 1]} : vector<8x96xf32> to vector<8x32xf32>
    %219 = arith.mulf %206, %218 : vector<8x32xf32>
    %220 = arith.addf %217, %219 : vector<8x32xf32>
    %221 = math.tanh %220 : vector<8x32xf32>
    %cst_104 = arith.constant 1.000000e+00 : f32
    %222 = vector.broadcast %cst_104 : f32 to vector<8x32xf32>
    %223 = arith.subf %222, %216 : vector<8x32xf32>
    %224 = arith.mulf %223, %221 : vector<8x32xf32>
    %225 = arith.mulf %216, %190 : vector<8x32xf32>
    %226 = arith.addf %224, %225 : vector<8x32xf32>
    %227 = vector.extract_strided_slice %45 {offsets = [40, 0], sizes = [8, 96], strides = [1, 1]} : vector<64x96xf32> to vector<8x96xf32>
    %c0_105 = arith.constant 0 : index
    %c0_106 = arith.constant 0 : index
    %228 = vector.load %arg18[%c0_105, %c0_106] : memref<32x96xf32, #tpu.memory_space<vmem>>, vector<32x96xf32>
    %cst_107 = arith.constant dense<0.000000e+00> : vector<8x96xf32>
    %229 = tpu.matmul %226, %228, %cst_107 {dimension_numbers = #tpu.dot_dimension_numbers<[1], [0], [0], [1], [0, 0, 1, 1], [], []>} : vector<8x32xf32>, vector<32x96xf32>, vector<8x96xf32> -> vector<8x96xf32>
    %c0_108 = arith.constant 0 : index
    %c0_109 = arith.constant 0 : index
    %230 = vector.load %arg19[%c0_108, %c0_109] : memref<1x96xf32, #tpu.memory_space<vmem>>, vector<1x96xf32>
    %231 = vector.broadcast %230 : vector<1x96xf32> to vector<8x96xf32>
    %232 = arith.addf %229, %231 : vector<8x96xf32>
    %233 = vector.extract_strided_slice %227 {offsets = [0, 0], sizes = [8, 32], strides = [1, 1]} : vector<8x96xf32> to vector<8x32xf32>
    %234 = vector.extract_strided_slice %232 {offsets = [0, 0], sizes = [8, 32], strides = [1, 1]} : vector<8x96xf32> to vector<8x32xf32>
    %235 = arith.addf %233, %234 : vector<8x32xf32>
    %cst_110 = arith.constant 5.000000e-01 : f32
    %236 = vector.broadcast %cst_110 : f32 to vector<8x32xf32>
    %237 = arith.mulf %236, %235 : vector<8x32xf32>
    %238 = math.tanh %237 : vector<8x32xf32>
    %cst_111 = arith.constant 1.000000e+00 : f32
    %239 = vector.broadcast %cst_111 : f32 to vector<8x32xf32>
    %240 = arith.addf %238, %239 : vector<8x32xf32>
    %cst_112 = arith.constant 5.000000e-01 : f32
    %241 = vector.broadcast %cst_112 : f32 to vector<8x32xf32>
    %242 = arith.mulf %241, %240 : vector<8x32xf32>
    %243 = vector.extract_strided_slice %227 {offsets = [0, 32], sizes = [8, 32], strides = [1, 1]} : vector<8x96xf32> to vector<8x32xf32>
    %244 = vector.extract_strided_slice %232 {offsets = [0, 32], sizes = [8, 32], strides = [1, 1]} : vector<8x96xf32> to vector<8x32xf32>
    %245 = arith.addf %243, %244 : vector<8x32xf32>
    %cst_113 = arith.constant 5.000000e-01 : f32
    %246 = vector.broadcast %cst_113 : f32 to vector<8x32xf32>
    %247 = arith.mulf %246, %245 : vector<8x32xf32>
    %248 = math.tanh %247 : vector<8x32xf32>
    %cst_114 = arith.constant 1.000000e+00 : f32
    %249 = vector.broadcast %cst_114 : f32 to vector<8x32xf32>
    %250 = arith.addf %248, %249 : vector<8x32xf32>
    %cst_115 = arith.constant 5.000000e-01 : f32
    %251 = vector.broadcast %cst_115 : f32 to vector<8x32xf32>
    %252 = arith.mulf %251, %250 : vector<8x32xf32>
    %253 = vector.extract_strided_slice %227 {offsets = [0, 64], sizes = [8, 32], strides = [1, 1]} : vector<8x96xf32> to vector<8x32xf32>
    %254 = vector.extract_strided_slice %232 {offsets = [0, 64], sizes = [8, 32], strides = [1, 1]} : vector<8x96xf32> to vector<8x32xf32>
    %255 = arith.mulf %242, %254 : vector<8x32xf32>
    %256 = arith.addf %253, %255 : vector<8x32xf32>
    %257 = math.tanh %256 : vector<8x32xf32>
    %cst_116 = arith.constant 1.000000e+00 : f32
    %258 = vector.broadcast %cst_116 : f32 to vector<8x32xf32>
    %259 = arith.subf %258, %252 : vector<8x32xf32>
    %260 = arith.mulf %259, %257 : vector<8x32xf32>
    %261 = arith.mulf %252, %226 : vector<8x32xf32>
    %262 = arith.addf %260, %261 : vector<8x32xf32>
    %263 = vector.extract_strided_slice %45 {offsets = [48, 0], sizes = [8, 96], strides = [1, 1]} : vector<64x96xf32> to vector<8x96xf32>
    %c0_117 = arith.constant 0 : index
    %c0_118 = arith.constant 0 : index
    %264 = vector.load %arg18[%c0_117, %c0_118] : memref<32x96xf32, #tpu.memory_space<vmem>>, vector<32x96xf32>
    %cst_119 = arith.constant dense<0.000000e+00> : vector<8x96xf32>
    %265 = tpu.matmul %262, %264, %cst_119 {dimension_numbers = #tpu.dot_dimension_numbers<[1], [0], [0], [1], [0, 0, 1, 1], [], []>} : vector<8x32xf32>, vector<32x96xf32>, vector<8x96xf32> -> vector<8x96xf32>
    %c0_120 = arith.constant 0 : index
    %c0_121 = arith.constant 0 : index
    %266 = vector.load %arg19[%c0_120, %c0_121] : memref<1x96xf32, #tpu.memory_space<vmem>>, vector<1x96xf32>
    %267 = vector.broadcast %266 : vector<1x96xf32> to vector<8x96xf32>
    %268 = arith.addf %265, %267 : vector<8x96xf32>
    %269 = vector.extract_strided_slice %263 {offsets = [0, 0], sizes = [8, 32], strides = [1, 1]} : vector<8x96xf32> to vector<8x32xf32>
    %270 = vector.extract_strided_slice %268 {offsets = [0, 0], sizes = [8, 32], strides = [1, 1]} : vector<8x96xf32> to vector<8x32xf32>
    %271 = arith.addf %269, %270 : vector<8x32xf32>
    %cst_122 = arith.constant 5.000000e-01 : f32
    %272 = vector.broadcast %cst_122 : f32 to vector<8x32xf32>
    %273 = arith.mulf %272, %271 : vector<8x32xf32>
    %274 = math.tanh %273 : vector<8x32xf32>
    %cst_123 = arith.constant 1.000000e+00 : f32
    %275 = vector.broadcast %cst_123 : f32 to vector<8x32xf32>
    %276 = arith.addf %274, %275 : vector<8x32xf32>
    %cst_124 = arith.constant 5.000000e-01 : f32
    %277 = vector.broadcast %cst_124 : f32 to vector<8x32xf32>
    %278 = arith.mulf %277, %276 : vector<8x32xf32>
    %279 = vector.extract_strided_slice %263 {offsets = [0, 32], sizes = [8, 32], strides = [1, 1]} : vector<8x96xf32> to vector<8x32xf32>
    %280 = vector.extract_strided_slice %268 {offsets = [0, 32], sizes = [8, 32], strides = [1, 1]} : vector<8x96xf32> to vector<8x32xf32>
    %281 = arith.addf %279, %280 : vector<8x32xf32>
    %cst_125 = arith.constant 5.000000e-01 : f32
    %282 = vector.broadcast %cst_125 : f32 to vector<8x32xf32>
    %283 = arith.mulf %282, %281 : vector<8x32xf32>
    %284 = math.tanh %283 : vector<8x32xf32>
    %cst_126 = arith.constant 1.000000e+00 : f32
    %285 = vector.broadcast %cst_126 : f32 to vector<8x32xf32>
    %286 = arith.addf %284, %285 : vector<8x32xf32>
    %cst_127 = arith.constant 5.000000e-01 : f32
    %287 = vector.broadcast %cst_127 : f32 to vector<8x32xf32>
    %288 = arith.mulf %287, %286 : vector<8x32xf32>
    %289 = vector.extract_strided_slice %263 {offsets = [0, 64], sizes = [8, 32], strides = [1, 1]} : vector<8x96xf32> to vector<8x32xf32>
    %290 = vector.extract_strided_slice %268 {offsets = [0, 64], sizes = [8, 32], strides = [1, 1]} : vector<8x96xf32> to vector<8x32xf32>
    %291 = arith.mulf %278, %290 : vector<8x32xf32>
    %292 = arith.addf %289, %291 : vector<8x32xf32>
    %293 = math.tanh %292 : vector<8x32xf32>
    %cst_128 = arith.constant 1.000000e+00 : f32
    %294 = vector.broadcast %cst_128 : f32 to vector<8x32xf32>
    %295 = arith.subf %294, %288 : vector<8x32xf32>
    %296 = arith.mulf %295, %293 : vector<8x32xf32>
    %297 = arith.mulf %288, %262 : vector<8x32xf32>
    %298 = arith.addf %296, %297 : vector<8x32xf32>
    %299 = vector.extract_strided_slice %45 {offsets = [56, 0], sizes = [8, 96], strides = [1, 1]} : vector<64x96xf32> to vector<8x96xf32>
    %c0_129 = arith.constant 0 : index
    %c0_130 = arith.constant 0 : index
    %300 = vector.load %arg18[%c0_129, %c0_130] : memref<32x96xf32, #tpu.memory_space<vmem>>, vector<32x96xf32>
    %cst_131 = arith.constant dense<0.000000e+00> : vector<8x96xf32>
    %301 = tpu.matmul %298, %300, %cst_131 {dimension_numbers = #tpu.dot_dimension_numbers<[1], [0], [0], [1], [0, 0, 1, 1], [], []>} : vector<8x32xf32>, vector<32x96xf32>, vector<8x96xf32> -> vector<8x96xf32>
    %c0_132 = arith.constant 0 : index
    %c0_133 = arith.constant 0 : index
    %302 = vector.load %arg19[%c0_132, %c0_133] : memref<1x96xf32, #tpu.memory_space<vmem>>, vector<1x96xf32>
    %303 = vector.broadcast %302 : vector<1x96xf32> to vector<8x96xf32>
    %304 = arith.addf %301, %303 : vector<8x96xf32>
    %305 = vector.extract_strided_slice %299 {offsets = [0, 0], sizes = [8, 32], strides = [1, 1]} : vector<8x96xf32> to vector<8x32xf32>
    %306 = vector.extract_strided_slice %304 {offsets = [0, 0], sizes = [8, 32], strides = [1, 1]} : vector<8x96xf32> to vector<8x32xf32>
    %307 = arith.addf %305, %306 : vector<8x32xf32>
    %cst_134 = arith.constant 5.000000e-01 : f32
    %308 = vector.broadcast %cst_134 : f32 to vector<8x32xf32>
    %309 = arith.mulf %308, %307 : vector<8x32xf32>
    %310 = math.tanh %309 : vector<8x32xf32>
    %cst_135 = arith.constant 1.000000e+00 : f32
    %311 = vector.broadcast %cst_135 : f32 to vector<8x32xf32>
    %312 = arith.addf %310, %311 : vector<8x32xf32>
    %cst_136 = arith.constant 5.000000e-01 : f32
    %313 = vector.broadcast %cst_136 : f32 to vector<8x32xf32>
    %314 = arith.mulf %313, %312 : vector<8x32xf32>
    %315 = vector.extract_strided_slice %299 {offsets = [0, 32], sizes = [8, 32], strides = [1, 1]} : vector<8x96xf32> to vector<8x32xf32>
    %316 = vector.extract_strided_slice %304 {offsets = [0, 32], sizes = [8, 32], strides = [1, 1]} : vector<8x96xf32> to vector<8x32xf32>
    %317 = arith.addf %315, %316 : vector<8x32xf32>
    %cst_137 = arith.constant 5.000000e-01 : f32
    %318 = vector.broadcast %cst_137 : f32 to vector<8x32xf32>
    %319 = arith.mulf %318, %317 : vector<8x32xf32>
    %320 = math.tanh %319 : vector<8x32xf32>
    %cst_138 = arith.constant 1.000000e+00 : f32
    %321 = vector.broadcast %cst_138 : f32 to vector<8x32xf32>
    %322 = arith.addf %320, %321 : vector<8x32xf32>
    %cst_139 = arith.constant 5.000000e-01 : f32
    %323 = vector.broadcast %cst_139 : f32 to vector<8x32xf32>
    %324 = arith.mulf %323, %322 : vector<8x32xf32>
    %325 = vector.extract_strided_slice %299 {offsets = [0, 64], sizes = [8, 32], strides = [1, 1]} : vector<8x96xf32> to vector<8x32xf32>
    %326 = vector.extract_strided_slice %304 {offsets = [0, 64], sizes = [8, 32], strides = [1, 1]} : vector<8x96xf32> to vector<8x32xf32>
    %327 = arith.mulf %314, %326 : vector<8x32xf32>
    %328 = arith.addf %325, %327 : vector<8x32xf32>
    %329 = math.tanh %328 : vector<8x32xf32>
    %cst_140 = arith.constant 1.000000e+00 : f32
    %330 = vector.broadcast %cst_140 : f32 to vector<8x32xf32>
    %331 = arith.subf %330, %324 : vector<8x32xf32>
    %332 = arith.mulf %331, %329 : vector<8x32xf32>
    %333 = arith.mulf %324, %298 : vector<8x32xf32>
    %334 = arith.addf %332, %333 : vector<8x32xf32>
    %c0_141 = arith.constant 0 : index
    %c0_142 = arith.constant 0 : index
    %335 = vector.load %arg54[%c0_141, %c0_142] : memref<8x32xf32, #tpu.memory_space<vmem>>, vector<8x32xf32>
    tpu.vector_store %arg54[%c0_141, %c0_142], %334 {strides = array<i32>} : memref<8x32xf32, #tpu.memory_space<vmem>>, vector<8x32xf32>,
    %c0_143 = arith.constant 0 : index
    %c0_144 = arith.constant 0 : index
    %336 = vector.load %arg1[%c0_143, %c0_144] : memref<8x56xf32, #tpu.memory_space<vmem>>, vector<8x56xf32>
    %c0_145 = arith.constant 0 : index
    %c0_146 = arith.constant 0 : index
    %337 = vector.load %arg20[%c0_145, %c0_146] : memref<32x32xf32, #tpu.memory_space<vmem>>, vector<32x32xf32>
    %cst_147 = arith.constant dense<0.000000e+00> : vector<8x32xf32>
    %338 = tpu.matmul %334, %337, %cst_147 {dimension_numbers = #tpu.dot_dimension_numbers<[1], [0], [0], [1], [0, 0, 1, 1], [], []>} : vector<8x32xf32>, vector<32x32xf32>, vector<8x32xf32> -> vector<8x32xf32>
    %c0_148 = arith.constant 0 : index
    %c0_149 = arith.constant 0 : index
    %339 = vector.load %arg21[%c0_148, %c0_149] : memref<56x32xf32, #tpu.memory_space<vmem>>, vector<56x32xf32>
    %cst_150 = arith.constant dense<0.000000e+00> : vector<8x32xf32>
    %340 = tpu.matmul %336, %339, %cst_150 {dimension_numbers = #tpu.dot_dimension_numbers<[1], [0], [0], [1], [0, 0, 1, 1], [], []>} : vector<8x56xf32>, vector<56x32xf32>, vector<8x32xf32> -> vector<8x32xf32>
    %341 = arith.addf %338, %340 : vector<8x32xf32>
    %c0_151 = arith.constant 0 : index
    %c0_152 = arith.constant 0 : index
    %342 = vector.load %arg22[%c0_151, %c0_152] : memref<32x32xf32, #tpu.memory_space<vmem>>, vector<32x32xf32>
    %cst_153 = arith.constant dense<0.000000e+00> : vector<8x32xf32>
    %343 = tpu.matmul %334, %342, %cst_153 {dimension_numbers = #tpu.dot_dimension_numbers<[1], [0], [0], [1], [0, 0, 1, 1], [], []>} : vector<8x32xf32>, vector<32x32xf32>, vector<8x32xf32> -> vector<8x32xf32>
    %c0_154 = arith.constant 0 : index
    %c0_155 = arith.constant 0 : index
    %344 = vector.load %arg23[%c0_154, %c0_155] : memref<56x32xf32, #tpu.memory_space<vmem>>, vector<56x32xf32>
    %cst_156 = arith.constant dense<0.000000e+00> : vector<8x32xf32>
    %345 = tpu.matmul %336, %344, %cst_156 {dimension_numbers = #tpu.dot_dimension_numbers<[1], [0], [0], [1], [0, 0, 1, 1], [], []>} : vector<8x56xf32>, vector<56x32xf32>, vector<8x32xf32> -> vector<8x32xf32>
    %346 = arith.addf %343, %345 : vector<8x32xf32>
    %347 = vector.extract_strided_slice %341 {offsets = [0, 0], sizes = [1, 32], strides = [1, 1]} : vector<8x32xf32> to vector<1x32xf32>
    %348 = vector.shape_cast %347 : vector<1x32xf32> to vector<1x32xf32>
    %349 = vector.broadcast %348 : vector<1x32xf32> to vector<8x32xf32>
    %350 = vector.extract_strided_slice %341 {offsets = [1, 0], sizes = [1, 32], strides = [1, 1]} : vector<8x32xf32> to vector<1x32xf32>
    %351 = vector.shape_cast %350 : vector<1x32xf32> to vector<1x32xf32>
    %352 = vector.broadcast %351 : vector<1x32xf32> to vector<8x32xf32>
    %353 = vector.extract_strided_slice %341 {offsets = [2, 0], sizes = [1, 32], strides = [1, 1]} : vector<8x32xf32> to vector<1x32xf32>
    %354 = vector.shape_cast %353 : vector<1x32xf32> to vector<1x32xf32>
    %355 = vector.broadcast %354 : vector<1x32xf32> to vector<8x32xf32>
    %356 = vector.extract_strided_slice %341 {offsets = [3, 0], sizes = [1, 32], strides = [1, 1]} : vector<8x32xf32> to vector<1x32xf32>
    %357 = vector.shape_cast %356 : vector<1x32xf32> to vector<1x32xf32>
    %358 = vector.broadcast %357 : vector<1x32xf32> to vector<8x32xf32>
    %359 = vector.extract_strided_slice %341 {offsets = [4, 0], sizes = [1, 32], strides = [1, 1]} : vector<8x32xf32> to vector<1x32xf32>
    %360 = vector.shape_cast %359 : vector<1x32xf32> to vector<1x32xf32>
    %361 = vector.broadcast %360 : vector<1x32xf32> to vector<8x32xf32>
    %362 = vector.extract_strided_slice %341 {offsets = [5, 0], sizes = [1, 32], strides = [1, 1]} : vector<8x32xf32> to vector<1x32xf32>
    %363 = vector.shape_cast %362 : vector<1x32xf32> to vector<1x32xf32>
    %364 = vector.broadcast %363 : vector<1x32xf32> to vector<8x32xf32>
    %365 = vector.extract_strided_slice %341 {offsets = [6, 0], sizes = [1, 32], strides = [1, 1]} : vector<8x32xf32> to vector<1x32xf32>
    %366 = vector.shape_cast %365 : vector<1x32xf32> to vector<1x32xf32>
    %367 = vector.broadcast %366 : vector<1x32xf32> to vector<8x32xf32>
    %368 = vector.extract_strided_slice %341 {offsets = [7, 0], sizes = [1, 32], strides = [1, 1]} : vector<8x32xf32> to vector<1x32xf32>
    %369 = vector.shape_cast %368 : vector<1x32xf32> to vector<1x32xf32>
    %370 = vector.broadcast %369 : vector<1x32xf32> to vector<8x32xf32>
    %371 = tpu.concatenate %349, %352, %355, %358, %361, %364, %367, %370 in 0 : vector<8x32xf32>, vector<8x32xf32>, vector<8x32xf32>, vector<8x32xf32>, vector<8x32xf32>, vector<8x32xf32>, vector<8x32xf32>, vector<8x32xf32> -> vector<64x32xf32>
    %372 = tpu.concatenate %346, %346, %346, %346, %346, %346, %346, %346 in 0 : vector<8x32xf32>, vector<8x32xf32>, vector<8x32xf32>, vector<8x32xf32>, vector<8x32xf32>, vector<8x32xf32>, vector<8x32xf32>, vector<8x32xf32> -> vector<64x32xf32>
    %373 = arith.addf %371, %372 : vector<64x32xf32>
    %c0_157 = arith.constant 0 : index
    %c0_158 = arith.constant 0 : index
    %374 = vector.load %arg24[%c0_157, %c0_158] : memref<1x32xf32, #tpu.memory_space<vmem>>, vector<1x32xf32>
    %375 = vector.broadcast %374 : vector<1x32xf32> to vector<64x32xf32>
    %376 = arith.addf %373, %375 : vector<64x32xf32>
    %cst_159 = arith.constant 0.000000e+00 : f32
    %377 = vector.broadcast %cst_159 : f32 to vector<64x32xf32>
    %378 = arith.maximumf %376, %377 : vector<64x32xf32>
    %c0_160 = arith.constant 0 : index
    %c0_161 = arith.constant 0 : index
    %379 = vector.load %arg25[%c0_160, %c0_161] : memref<32x32xf32, #tpu.memory_space<vmem>>, vector<32x32xf32>
    %cst_162 = arith.constant dense<0.000000e+00> : vector<64x32xf32>
    %380 = tpu.matmul %378, %379, %cst_162 {dimension_numbers = #tpu.dot_dimension_numbers<[1], [0], [0], [1], [0, 0, 1, 1], [], []>} : vector<64x32xf32>, vector<32x32xf32>, vector<64x32xf32> -> vector<64x32xf32>
    %c0_163 = arith.constant 0 : index
    %c0_164 = arith.constant 0 : index
    %381 = vector.load %arg26[%c0_163, %c0_164] : memref<1x32xf32, #tpu.memory_space<vmem>>, vector<1x32xf32>
    %382 = vector.broadcast %381 : vector<1x32xf32> to vector<64x32xf32>
    %383 = arith.addf %380, %382 : vector<64x32xf32>
    %cst_165 = arith.constant 0.000000e+00 : f32
    %384 = vector.broadcast %cst_165 : f32 to vector<64x32xf32>
    %385 = arith.maximumf %383, %384 : vector<64x32xf32>
    %c0_166 = arith.constant 0 : index
    %c0_167 = arith.constant 0 : index
    %386 = vector.load %arg27[%c0_166, %c0_167] : memref<32x32xf32, #tpu.memory_space<vmem>>, vector<32x32xf32>
    %cst_168 = arith.constant dense<0.000000e+00> : vector<64x32xf32>
    %387 = tpu.matmul %385, %386, %cst_168 {dimension_numbers = #tpu.dot_dimension_numbers<[1], [0], [0], [1], [0, 0, 1, 1], [], []>} : vector<64x32xf32>, vector<32x32xf32>, vector<64x32xf32> -> vector<64x32xf32>
    %c0_169 = arith.constant 0 : index
    %c0_170 = arith.constant 0 : index
    %388 = vector.load %arg28[%c0_169, %c0_170] : memref<1x32xf32, #tpu.memory_space<vmem>>, vector<1x32xf32>
    %389 = vector.broadcast %388 : vector<1x32xf32> to vector<64x32xf32>
    %390 = arith.addf %387, %389 : vector<64x32xf32>
    %cst_171 = arith.constant 0.000000e+00 : f32
    %391 = vector.broadcast %cst_171 : f32 to vector<64x32xf32>
    %392 = arith.maximumf %390, %391 : vector<64x32xf32>
    %c0_172 = arith.constant 0 : index
    %c0_173 = arith.constant 0 : index
    %393 = vector.load %arg5[%c0_172, %c0_173] : memref<8x64xf32, #tpu.memory_space<vmem>>, vector<8x64xf32>
    %cst_174 = arith.constant dense<0.000000e+00> : vector<8x32xf32>
    %394 = tpu.matmul %393, %392, %cst_174 {dimension_numbers = #tpu.dot_dimension_numbers<[1], [0], [0], [1], [0, 0, 1, 1], [], []>} : vector<8x64xf32>, vector<64x32xf32>, vector<8x32xf32> -> vector<8x32xf32>
    %c0_175 = arith.constant 0 : index
    %c0_176 = arith.constant 0 : index
    %395 = vector.load %arg29[%c0_175, %c0_176] : memref<32x32xf32, #tpu.memory_space<vmem>>, vector<32x32xf32>
    %cst_177 = arith.constant dense<0.000000e+00> : vector<8x32xf32>
    %396 = tpu.matmul %334, %395, %cst_177 {dimension_numbers = #tpu.dot_dimension_numbers<[1], [0], [0], [1], [0, 0, 1, 1], [], []>} : vector<8x32xf32>, vector<32x32xf32>, vector<8x32xf32> -> vector<8x32xf32>
    %c0_178 = arith.constant 0 : index
    %c0_179 = arith.constant 0 : index
    %397 = vector.load %arg30[%c0_178, %c0_179] : memref<56x32xf32, #tpu.memory_space<vmem>>, vector<56x32xf32>
    %cst_180 = arith.constant dense<0.000000e+00> : vector<8x32xf32>
    %398 = tpu.matmul %336, %397, %cst_180 {dimension_numbers = #tpu.dot_dimension_numbers<[1], [0], [0], [1], [0, 0, 1, 1], [], []>} : vector<8x56xf32>, vector<56x32xf32>, vector<8x32xf32> -> vector<8x32xf32>
    %399 = arith.addf %396, %398 : vector<8x32xf32>
    %c0_181 = arith.constant 0 : index
    %c0_182 = arith.constant 0 : index
    %400 = vector.load %arg31[%c0_181, %c0_182] : memref<32x32xf32, #tpu.memory_space<vmem>>, vector<32x32xf32>
    %cst_183 = arith.constant dense<0.000000e+00> : vector<8x32xf32>
    %401 = tpu.matmul %394, %400, %cst_183 {dimension_numbers = #tpu.dot_dimension_numbers<[1], [0], [0], [1], [0, 0, 1, 1], [], []>} : vector<8x32xf32>, vector<32x32xf32>, vector<8x32xf32> -> vector<8x32xf32>
    %402 = arith.addf %399, %401 : vector<8x32xf32>
    %c0_184 = arith.constant 0 : index
    %c0_185 = arith.constant 0 : index
    %403 = vector.load %arg32[%c0_184, %c0_185] : memref<1x32xf32, #tpu.memory_space<vmem>>, vector<1x32xf32>
    %404 = vector.broadcast %403 : vector<1x32xf32> to vector<8x32xf32>
    %405 = arith.addf %402, %404 : vector<8x32xf32>
    %cst_186 = arith.constant 0.000000e+00 : f32
    %406 = vector.broadcast %cst_186 : f32 to vector<8x32xf32>
    %407 = arith.maximumf %405, %406 : vector<8x32xf32>
    %c0_187 = arith.constant 0 : index
    %c0_188 = arith.constant 0 : index
    %408 = vector.load %arg33[%c0_187, %c0_188] : memref<32x1xf32, #tpu.memory_space<vmem>>, vector<32x1xf32>
    %cst_189 = arith.constant dense<0.000000e+00> : vector<8x1xf32>
    %409 = tpu.matmul %407, %408, %cst_189 {dimension_numbers = #tpu.dot_dimension_numbers<[1], [0], [0], [1], [0, 0, 1, 1], [], []>} : vector<8x32xf32>, vector<32x1xf32>, vector<8x1xf32> -> vector<8x1xf32>
    %c0_190 = arith.constant 0 : index
    %c0_191 = arith.constant 0 : index
    %410 = vector.load %arg34[%c0_190, %c0_191] : memref<1x1xf32, #tpu.memory_space<vmem>>, vector<1x1xf32>
    %411 = vector.broadcast %410 : vector<1x1xf32> to vector<8x1xf32>
    %412 = arith.addf %409, %411 : vector<8x1xf32>
    %c0_192 = arith.constant 0 : index
    %c0_193 = arith.constant 0 : index
    %413 = vector.load %arg53[%c0_192, %c0_193] : memref<8x1xf32, #tpu.memory_space<vmem>>, vector<8x1xf32>
    tpu.vector_store %arg53[%c0_192, %c0_193], %412 {strides = array<i32>} : memref<8x1xf32, #tpu.memory_space<vmem>>, vector<8x1xf32>,
    %cst_194 = arith.constant 1.000000e+02 : f32
    %414 = vector.broadcast %cst_194 : f32 to vector<8x1xf32>
    %415 = arith.mulf %412, %414 : vector<8x1xf32>
    %cst_195 = arith.constant 5.000000e-01 : f32
    %416 = vector.broadcast %cst_195 : f32 to vector<8x1xf32>
    %417 = arith.mulf %416, %415 : vector<8x1xf32>
    %418 = math.tanh %417 : vector<8x1xf32>
    %cst_196 = arith.constant 1.000000e+00 : f32
    %419 = vector.broadcast %cst_196 : f32 to vector<8x1xf32>
    %420 = arith.addf %418, %419 : vector<8x1xf32>
    %cst_197 = arith.constant 5.000000e-01 : f32
    %421 = vector.broadcast %cst_197 : f32 to vector<8x1xf32>
    %422 = arith.mulf %421, %420 : vector<8x1xf32>
    %cst_198 = arith.constant 1.000000e+00 : f32
    %423 = vector.broadcast %cst_198 : f32 to vector<8x1xf32>
    %424 = arith.subf %423, %422 : vector<8x1xf32>
    %c0_199 = arith.constant 0 : index
    %c0_200 = arith.constant 0 : index
    %425 = vector.load %arg36[%c0_199, %c0_200] : memref<32x32xf32, #tpu.memory_space<vmem>>, vector<32x32xf32>
    %cst_201 = arith.constant dense<0.000000e+00> : vector<8x32xf32>
    %426 = tpu.matmul %334, %425, %cst_201 {dimension_numbers = #tpu.dot_dimension_numbers<[1], [0], [0], [1], [0, 0, 1, 1], [], []>} : vector<8x32xf32>, vector<32x32xf32>, vector<8x32xf32> -> vector<8x32xf32>
    %427 = vector.extract_strided_slice %426 {offsets = [0, 0], sizes = [1, 32], strides = [1, 1]} : vector<8x32xf32> to vector<1x32xf32>
    %428 = vector.shape_cast %427 : vector<1x32xf32> to vector<1x32xf32>
    %429 = vector.broadcast %428 : vector<1x32xf32> to vector<8x32xf32>
    %430 = vector.extract_strided_slice %426 {offsets = [1, 0], sizes = [1, 32], strides = [1, 1]} : vector<8x32xf32> to vector<1x32xf32>
    %431 = vector.shape_cast %430 : vector<1x32xf32> to vector<1x32xf32>
    %432 = vector.broadcast %431 : vector<1x32xf32> to vector<8x32xf32>
    %433 = vector.extract_strided_slice %426 {offsets = [2, 0], sizes = [1, 32], strides = [1, 1]} : vector<8x32xf32> to vector<1x32xf32>
    %434 = vector.shape_cast %433 : vector<1x32xf32> to vector<1x32xf32>
    %435 = vector.broadcast %434 : vector<1x32xf32> to vector<8x32xf32>
    %436 = vector.extract_strided_slice %426 {offsets = [3, 0], sizes = [1, 32], strides = [1, 1]} : vector<8x32xf32> to vector<1x32xf32>
    %437 = vector.shape_cast %436 : vector<1x32xf32> to vector<1x32xf32>
    %438 = vector.broadcast %437 : vector<1x32xf32> to vector<8x32xf32>
    %439 = vector.extract_strided_slice %426 {offsets = [4, 0], sizes = [1, 32], strides = [1, 1]} : vector<8x32xf32> to vector<1x32xf32>
    %440 = vector.shape_cast %439 : vector<1x32xf32> to vector<1x32xf32>
    %441 = vector.broadcast %440 : vector<1x32xf32> to vector<8x32xf32>
    %442 = vector.extract_strided_slice %426 {offsets = [5, 0], sizes = [1, 32], strides = [1, 1]} : vector<8x32xf32> to vector<1x32xf32>
    %443 = vector.shape_cast %442 : vector<1x32xf32> to vector<1x32xf32>
    %444 = vector.broadcast %443 : vector<1x32xf32> to vector<8x32xf32>
    %445 = vector.extract_strided_slice %426 {offsets = [6, 0], sizes = [1, 32], strides = [1, 1]} : vector<8x32xf32> to vector<1x32xf32>
    %446 = vector.shape_cast %445 : vector<1x32xf32> to vector<1x32xf32>
    %447 = vector.broadcast %446 : vector<1x32xf32> to vector<8x32xf32>
    %448 = vector.extract_strided_slice %426 {offsets = [7, 0], sizes = [1, 32], strides = [1, 1]} : vector<8x32xf32> to vector<1x32xf32>
    %449 = vector.shape_cast %448 : vector<1x32xf32> to vector<1x32xf32>
    %450 = vector.broadcast %449 : vector<1x32xf32> to vector<8x32xf32>
    %451 = tpu.concatenate %429, %432, %435, %438, %441, %444, %447, %450 in 0 : vector<8x32xf32>, vector<8x32xf32>, vector<8x32xf32>, vector<8x32xf32>, vector<8x32xf32>, vector<8x32xf32>, vector<8x32xf32>, vector<8x32xf32> -> vector<64x32xf32>
    %c0_202 = arith.constant 0 : index
    %c0_203 = arith.constant 0 : index
    %452 = vector.load %arg37[%c0_202, %c0_203] : memref<32x32xf32, #tpu.memory_space<vmem>>, vector<32x32xf32>
    %cst_204 = arith.constant dense<0.000000e+00> : vector<8x32xf32>
    %453 = tpu.matmul %334, %452, %cst_204 {dimension_numbers = #tpu.dot_dimension_numbers<[1], [0], [0], [1], [0, 0, 1, 1], [], []>} : vector<8x32xf32>, vector<32x32xf32>, vector<8x32xf32> -> vector<8x32xf32>
    %454 = tpu.concatenate %453, %453, %453, %453, %453, %453, %453, %453 in 0 : vector<8x32xf32>, vector<8x32xf32>, vector<8x32xf32>, vector<8x32xf32>, vector<8x32xf32>, vector<8x32xf32>, vector<8x32xf32>, vector<8x32xf32> -> vector<64x32xf32>
    %455 = arith.addf %451, %454 : vector<64x32xf32>
    %c0_205 = arith.constant 0 : index
    %c0_206 = arith.constant 0 : index
    %456 = vector.load %arg38[%c0_205, %c0_206] : memref<1x32xf32, #tpu.memory_space<vmem>>, vector<1x32xf32>
    %457 = vector.broadcast %456 : vector<1x32xf32> to vector<64x32xf32>
    %458 = arith.addf %455, %457 : vector<64x32xf32>
    %c0_207 = arith.constant 0 : index
    %c0_208 = arith.constant 0 : index
    %459 = vector.load %arg43[%c0_207, %c0_208] : memref<32x32xf32, #tpu.memory_space<vmem>>, vector<32x32xf32>
    %cst_209 = arith.constant dense<0.000000e+00> : vector<8x32xf32>
    %460 = tpu.matmul %334, %459, %cst_209 {dimension_numbers = #tpu.dot_dimension_numbers<[1], [0], [0], [1], [0, 0, 1, 1], [], []>} : vector<8x32xf32>, vector<32x32xf32>, vector<8x32xf32> -> vector<8x32xf32>
    %c0_210 = arith.constant 0 : index
    %c0_211 = arith.constant 0 : index
    %461 = vector.load %arg45[%c0_210, %c0_211] : memref<1x32xf32, #tpu.memory_space<vmem>>, vector<1x32xf32>
    %462 = vector.broadcast %461 : vector<1x32xf32> to vector<8x32xf32>
    %463 = arith.addf %460, %462 : vector<8x32xf32>
    %c0_212 = arith.constant 0 : index
    %c0_213 = arith.constant 0 : index
    %464 = vector.load %arg5[%c0_212, %c0_213] : memref<8x64xf32, #tpu.memory_space<vmem>>, vector<8x64xf32>
    %cst_214 = arith.constant 0.000000e+00 : f32
    %465 = vector.broadcast %cst_214 : f32 to vector<8x32xf32>
    %c0_215 = arith.constant 0 : index
    %c0_216 = arith.constant 0 : index
    %466 = vector.load %arg35[%c0_215, %c0_216] : memref<56x96xf32, #tpu.memory_space<vmem>>, vector<56x96xf32>
    %cst_217 = arith.constant dense<0.000000e+00> : vector<8x96xf32>
    %467 = tpu.matmul %336, %466, %cst_217 {dimension_numbers = #tpu.dot_dimension_numbers<[1], [0], [0], [1], [0, 0, 1, 1], [], []>} : vector<8x56xf32>, vector<56x96xf32>, vector<8x96xf32> -> vector<8x96xf32>
    %468 = vector.extract_strided_slice %467 {offsets = [0, 0], sizes = [8, 32], strides = [1, 1]} : vector<8x96xf32> to vector<8x32xf32>
    %469 = vector.extract_strided_slice %468 {offsets = [0, 0], sizes = [1, 32], strides = [1, 1]} : vector<8x32xf32> to vector<1x32xf32>
    %470 = vector.shape_cast %469 : vector<1x32xf32> to vector<1x32xf32>
    %471 = vector.broadcast %470 : vector<1x32xf32> to vector<8x32xf32>
    %472 = vector.extract_strided_slice %468 {offsets = [1, 0], sizes = [1, 32], strides = [1, 1]} : vector<8x32xf32> to vector<1x32xf32>
    %473 = vector.shape_cast %472 : vector<1x32xf32> to vector<1x32xf32>
    %474 = vector.broadcast %473 : vector<1x32xf32> to vector<8x32xf32>
    %475 = vector.extract_strided_slice %468 {offsets = [2, 0], sizes = [1, 32], strides = [1, 1]} : vector<8x32xf32> to vector<1x32xf32>
    %476 = vector.shape_cast %475 : vector<1x32xf32> to vector<1x32xf32>
    %477 = vector.broadcast %476 : vector<1x32xf32> to vector<8x32xf32>
    %478 = vector.extract_strided_slice %468 {offsets = [3, 0], sizes = [1, 32], strides = [1, 1]} : vector<8x32xf32> to vector<1x32xf32>
    %479 = vector.shape_cast %478 : vector<1x32xf32> to vector<1x32xf32>
    %480 = vector.broadcast %479 : vector<1x32xf32> to vector<8x32xf32>
    %481 = vector.extract_strided_slice %468 {offsets = [4, 0], sizes = [1, 32], strides = [1, 1]} : vector<8x32xf32> to vector<1x32xf32>
    %482 = vector.shape_cast %481 : vector<1x32xf32> to vector<1x32xf32>
    %483 = vector.broadcast %482 : vector<1x32xf32> to vector<8x32xf32>
    %484 = vector.extract_strided_slice %468 {offsets = [5, 0], sizes = [1, 32], strides = [1, 1]} : vector<8x32xf32> to vector<1x32xf32>
    %485 = vector.shape_cast %484 : vector<1x32xf32> to vector<1x32xf32>
    %486 = vector.broadcast %485 : vector<1x32xf32> to vector<8x32xf32>
    %487 = vector.extract_strided_slice %468 {offsets = [6, 0], sizes = [1, 32], strides = [1, 1]} : vector<8x32xf32> to vector<1x32xf32>
    %488 = vector.shape_cast %487 : vector<1x32xf32> to vector<1x32xf32>
    %489 = vector.broadcast %488 : vector<1x32xf32> to vector<8x32xf32>
    %490 = vector.extract_strided_slice %468 {offsets = [7, 0], sizes = [1, 32], strides = [1, 1]} : vector<8x32xf32> to vector<1x32xf32>
    %491 = vector.shape_cast %490 : vector<1x32xf32> to vector<1x32xf32>
    %492 = vector.broadcast %491 : vector<1x32xf32> to vector<8x32xf32>
    %493 = tpu.concatenate %471, %474, %477, %480, %483, %486, %489, %492 in 0 : vector<8x32xf32>, vector<8x32xf32>, vector<8x32xf32>, vector<8x32xf32>, vector<8x32xf32>, vector<8x32xf32>, vector<8x32xf32>, vector<8x32xf32> -> vector<64x32xf32>
    %494 = vector.extract_strided_slice %467 {offsets = [0, 32], sizes = [8, 32], strides = [1, 1]} : vector<8x96xf32> to vector<8x32xf32>
    %495 = tpu.concatenate %494, %494, %494, %494, %494, %494, %494, %494 in 0 : vector<8x32xf32>, vector<8x32xf32>, vector<8x32xf32>, vector<8x32xf32>, vector<8x32xf32>, vector<8x32xf32>, vector<8x32xf32>, vector<8x32xf32> -> vector<64x32xf32>
    %496 = arith.addf %493, %495 : vector<64x32xf32>
    %497 = arith.addf %496, %458 : vector<64x32xf32>
    %cst_218 = arith.constant 0.000000e+00 : f32
    %498 = vector.broadcast %cst_218 : f32 to vector<64x32xf32>
    %499 = arith.maximumf %497, %498 : vector<64x32xf32>
    %c0_219 = arith.constant 0 : index
    %c0_220 = arith.constant 0 : index
    %500 = vector.load %arg39[%c0_219, %c0_220] : memref<32x32xf32, #tpu.memory_space<vmem>>, vector<32x32xf32>
    %cst_221 = arith.constant dense<0.000000e+00> : vector<64x32xf32>
    %501 = tpu.matmul %499, %500, %cst_221 {dimension_numbers = #tpu.dot_dimension_numbers<[1], [0], [0], [1], [0, 0, 1, 1], [], []>} : vector<64x32xf32>, vector<32x32xf32>, vector<64x32xf32> -> vector<64x32xf32>
    %c0_222 = arith.constant 0 : index
    %c0_223 = arith.constant 0 : index
    %502 = vector.load %arg40[%c0_222, %c0_223] : memref<1x32xf32, #tpu.memory_space<vmem>>, vector<1x32xf32>
    %503 = vector.broadcast %502 : vector<1x32xf32> to vector<64x32xf32>
    %504 = arith.addf %501, %503 : vector<64x32xf32>
    %cst_224 = arith.constant 0.000000e+00 : f32
    %505 = vector.broadcast %cst_224 : f32 to vector<64x32xf32>
    %506 = arith.maximumf %504, %505 : vector<64x32xf32>
    %c0_225 = arith.constant 0 : index
    %c0_226 = arith.constant 0 : index
    %507 = vector.load %arg41[%c0_225, %c0_226] : memref<32x32xf32, #tpu.memory_space<vmem>>, vector<32x32xf32>
    %cst_227 = arith.constant dense<0.000000e+00> : vector<64x32xf32>
    %508 = tpu.matmul %506, %507, %cst_227 {dimension_numbers = #tpu.dot_dimension_numbers<[1], [0], [0], [1], [0, 0, 1, 1], [], []>} : vector<64x32xf32>, vector<32x32xf32>, vector<64x32xf32> -> vector<64x32xf32>
    %c0_228 = arith.constant 0 : index
    %c0_229 = arith.constant 0 : index
    %509 = vector.load %arg42[%c0_228, %c0_229] : memref<1x32xf32, #tpu.memory_space<vmem>>, vector<1x32xf32>
    %510 = vector.broadcast %509 : vector<1x32xf32> to vector<64x32xf32>
    %511 = arith.addf %508, %510 : vector<64x32xf32>
    %cst_230 = arith.constant 0.000000e+00 : f32
    %512 = vector.broadcast %cst_230 : f32 to vector<64x32xf32>
    %513 = arith.maximumf %511, %512 : vector<64x32xf32>
    %cst_231 = arith.constant dense<0.000000e+00> : vector<8x32xf32>
    %514 = tpu.matmul %464, %513, %cst_231 {dimension_numbers = #tpu.dot_dimension_numbers<[1], [0], [0], [1], [0, 0, 1, 1], [], []>} : vector<8x64xf32>, vector<64x32xf32>, vector<8x32xf32> -> vector<8x32xf32>
    %515 = vector.extract_strided_slice %467 {offsets = [0, 64], sizes = [8, 32], strides = [1, 1]} : vector<8x96xf32> to vector<8x32xf32>
    %c0_232 = arith.constant 0 : index
    %c0_233 = arith.constant 0 : index
    %516 = vector.load %arg44[%c0_232, %c0_233] : memref<32x32xf32, #tpu.memory_space<vmem>>, vector<32x32xf32>
    %cst_234 = arith.constant dense<0.000000e+00> : vector<8x32xf32>
    %517 = tpu.matmul %514, %516, %cst_234 {dimension_numbers = #tpu.dot_dimension_numbers<[1], [0], [0], [1], [0, 0, 1, 1], [], []>} : vector<8x32xf32>, vector<32x32xf32>, vector<8x32xf32> -> vector<8x32xf32>
    %518 = arith.addf %515, %517 : vector<8x32xf32>
    %519 = arith.addf %518, %463 : vector<8x32xf32>
    %cst_235 = arith.constant 0.000000e+00 : f32
    %520 = vector.broadcast %cst_235 : f32 to vector<8x32xf32>
    %521 = arith.maximumf %519, %520 : vector<8x32xf32>
    %c0_236 = arith.constant 0 : index
    %c0_237 = arith.constant 0 : index
    %522 = vector.load %arg46[%c0_236, %c0_237] : memref<32x96xf32, #tpu.memory_space<vmem>>, vector<32x96xf32>
    %cst_238 = arith.constant dense<0.000000e+00> : vector<8x96xf32>
    %523 = tpu.matmul %521, %522, %cst_238 {dimension_numbers = #tpu.dot_dimension_numbers<[1], [0], [0], [1], [0, 0, 1, 1], [], []>} : vector<8x32xf32>, vector<32x96xf32>, vector<8x96xf32> -> vector<8x96xf32>
    %c0_239 = arith.constant 0 : index
    %c0_240 = arith.constant 0 : index
    %524 = vector.load %arg47[%c0_239, %c0_240] : memref<1x96xf32, #tpu.memory_space<vmem>>, vector<1x96xf32>
    %525 = vector.broadcast %524 : vector<1x96xf32> to vector<8x96xf32>
    %526 = arith.addf %523, %525 : vector<8x96xf32>
    %c0_241 = arith.constant 0 : index
    %c0_242 = arith.constant 0 : index
    %527 = vector.load %arg48[%c0_241, %c0_242] : memref<32x96xf32, #tpu.memory_space<vmem>>, vector<32x96xf32>
    %cst_243 = arith.constant dense<0.000000e+00> : vector<8x96xf32>
    %528 = tpu.matmul %465, %527, %cst_243 {dimension_numbers = #tpu.dot_dimension_numbers<[1], [0], [0], [1], [0, 0, 1, 1], [], []>} : vector<8x32xf32>, vector<32x96xf32>, vector<8x96xf32> -> vector<8x96xf32>
    %c0_244 = arith.constant 0 : index
    %c0_245 = arith.constant 0 : index
    %529 = vector.load %arg49[%c0_244, %c0_245] : memref<1x96xf32, #tpu.memory_space<vmem>>, vector<1x96xf32>
    %530 = vector.broadcast %529 : vector<1x96xf32> to vector<8x96xf32>
    %531 = arith.addf %528, %530 : vector<8x96xf32>
    %532 = vector.extract_strided_slice %526 {offsets = [0, 0], sizes = [8, 32], strides = [1, 1]} : vector<8x96xf32> to vector<8x32xf32>
    %533 = vector.extract_strided_slice %531 {offsets = [0, 0], sizes = [8, 32], strides = [1, 1]} : vector<8x96xf32> to vector<8x32xf32>
    %534 = arith.addf %532, %533 : vector<8x32xf32>
    %cst_246 = arith.constant 5.000000e-01 : f32
    %535 = vector.broadcast %cst_246 : f32 to vector<8x32xf32>
    %536 = arith.mulf %535, %534 : vector<8x32xf32>
    %537 = math.tanh %536 : vector<8x32xf32>
    %cst_247 = arith.constant 1.000000e+00 : f32
    %538 = vector.broadcast %cst_247 : f32 to vector<8x32xf32>
    %539 = arith.addf %537, %538 : vector<8x32xf32>
    %cst_248 = arith.constant 5.000000e-01 : f32
    %540 = vector.broadcast %cst_248 : f32 to vector<8x32xf32>
    %541 = arith.mulf %540, %539 : vector<8x32xf32>
    %542 = vector.extract_strided_slice %526 {offsets = [0, 32], sizes = [8, 32], strides = [1, 1]} : vector<8x96xf32> to vector<8x32xf32>
    %543 = vector.extract_strided_slice %531 {offsets = [0, 32], sizes = [8, 32], strides = [1, 1]} : vector<8x96xf32> to vector<8x32xf32>
    %544 = arith.addf %542, %543 : vector<8x32xf32>
    %cst_249 = arith.constant 5.000000e-01 : f32
    %545 = vector.broadcast %cst_249 : f32 to vector<8x32xf32>
    %546 = arith.mulf %545, %544 : vector<8x32xf32>
    %547 = math.tanh %546 : vector<8x32xf32>
    %cst_250 = arith.constant 1.000000e+00 : f32
    %548 = vector.broadcast %cst_250 : f32 to vector<8x32xf32>
    %549 = arith.addf %547, %548 : vector<8x32xf32>
    %cst_251 = arith.constant 5.000000e-01 : f32
    %550 = vector.broadcast %cst_251 : f32 to vector<8x32xf32>
    %551 = arith.mulf %550, %549 : vector<8x32xf32>
    %552 = vector.extract_strided_slice %526 {offsets = [0, 64], sizes = [8, 32], strides = [1, 1]} : vector<8x96xf32> to vector<8x32xf32>
    %553 = vector.extract_strided_slice %531 {offsets = [0, 64], sizes = [8, 32], strides = [1, 1]} : vector<8x96xf32> to vector<8x32xf32>
    %554 = arith.mulf %541, %553 : vector<8x32xf32>
    %555 = arith.addf %552, %554 : vector<8x32xf32>
    %556 = math.tanh %555 : vector<8x32xf32>
    %cst_252 = arith.constant 1.000000e+00 : f32
    %557 = vector.broadcast %cst_252 : f32 to vector<8x32xf32>
    %558 = arith.subf %557, %551 : vector<8x32xf32>
    %559 = arith.mulf %558, %556 : vector<8x32xf32>
    %560 = arith.mulf %551, %465 : vector<8x32xf32>
    %561 = arith.addf %559, %560 : vector<8x32xf32>
    %c0_253 = arith.constant 0 : index
    %c0_254 = arith.constant 0 : index
    %562 = vector.load %arg50[%c0_253, %c0_254] : memref<32x56xf32, #tpu.memory_space<vmem>>, vector<32x56xf32>
    %cst_255 = arith.constant dense<0.000000e+00> : vector<8x56xf32>
    %563 = tpu.matmul %561, %562, %cst_255 {dimension_numbers = #tpu.dot_dimension_numbers<[1], [0], [0], [1], [0, 0, 1, 1], [], []>} : vector<8x32xf32>, vector<32x56xf32>, vector<8x56xf32> -> vector<8x56xf32>
    %c0_256 = arith.constant 0 : index
    %c0_257 = arith.constant 0 : index
    %564 = vector.load %arg51[%c0_256, %c0_257] : memref<1x56xf32, #tpu.memory_space<vmem>>, vector<1x56xf32>
    %565 = vector.broadcast %564 : vector<1x56xf32> to vector<8x56xf32>
    %566 = arith.addf %563, %565 : vector<8x56xf32>
    %567 = vector.broadcast %424 : vector<8x1xf32> to vector<8x56xf32>
    %568 = arith.mulf %566, %567 : vector<8x56xf32>
    %569 = arith.addf %336, %568 : vector<8x56xf32>
    %c0_258 = arith.constant 0 : index
    %c0_259 = arith.constant 0 : index
    %c0_260 = arith.constant 0 : index
    %570 = vector.load %arg52[%c0_258, %c0_259, %c0_260] : memref<7x8x56xf32, #tpu.memory_space<vmem>>, vector<1x8x56xf32>
    %571 = vector.shape_cast %570 : vector<1x8x56xf32> to vector<8x56xf32>
    %572 = vector.shape_cast %569 : vector<8x56xf32> to vector<1x8x56xf32>
    tpu.vector_store %arg52[%c0_258, %c0_259, %c0_260], %572 {strides = array<i32>} : memref<7x8x56xf32, #tpu.memory_space<vmem>>, vector<1x8x56xf32>,
    %c0_261 = arith.constant 0 : index
    %c0_262 = arith.constant 0 : index
    %573 = vector.load %arg35[%c0_261, %c0_262] : memref<56x96xf32, #tpu.memory_space<vmem>>, vector<56x96xf32>
    %cst_263 = arith.constant dense<0.000000e+00> : vector<8x96xf32>
    %574 = tpu.matmul %569, %573, %cst_263 {dimension_numbers = #tpu.dot_dimension_numbers<[1], [0], [0], [1], [0, 0, 1, 1], [], []>} : vector<8x56xf32>, vector<56x96xf32>, vector<8x96xf32> -> vector<8x96xf32>
    %575 = vector.extract_strided_slice %574 {offsets = [0, 0], sizes = [8, 32], strides = [1, 1]} : vector<8x96xf32> to vector<8x32xf32>
    %576 = vector.extract_strided_slice %575 {offsets = [0, 0], sizes = [1, 32], strides = [1, 1]} : vector<8x32xf32> to vector<1x32xf32>
    %577 = vector.shape_cast %576 : vector<1x32xf32> to vector<1x32xf32>
    %578 = vector.broadcast %577 : vector<1x32xf32> to vector<8x32xf32>
    %579 = vector.extract_strided_slice %575 {offsets = [1, 0], sizes = [1, 32], strides = [1, 1]} : vector<8x32xf32> to vector<1x32xf32>
    %580 = vector.shape_cast %579 : vector<1x32xf32> to vector<1x32xf32>
    %581 = vector.broadcast %580 : vector<1x32xf32> to vector<8x32xf32>
    %582 = vector.extract_strided_slice %575 {offsets = [2, 0], sizes = [1, 32], strides = [1, 1]} : vector<8x32xf32> to vector<1x32xf32>
    %583 = vector.shape_cast %582 : vector<1x32xf32> to vector<1x32xf32>
    %584 = vector.broadcast %583 : vector<1x32xf32> to vector<8x32xf32>
    %585 = vector.extract_strided_slice %575 {offsets = [3, 0], sizes = [1, 32], strides = [1, 1]} : vector<8x32xf32> to vector<1x32xf32>
    %586 = vector.shape_cast %585 : vector<1x32xf32> to vector<1x32xf32>
    %587 = vector.broadcast %586 : vector<1x32xf32> to vector<8x32xf32>
    %588 = vector.extract_strided_slice %575 {offsets = [4, 0], sizes = [1, 32], strides = [1, 1]} : vector<8x32xf32> to vector<1x32xf32>
    %589 = vector.shape_cast %588 : vector<1x32xf32> to vector<1x32xf32>
    %590 = vector.broadcast %589 : vector<1x32xf32> to vector<8x32xf32>
    %591 = vector.extract_strided_slice %575 {offsets = [5, 0], sizes = [1, 32], strides = [1, 1]} : vector<8x32xf32> to vector<1x32xf32>
    %592 = vector.shape_cast %591 : vector<1x32xf32> to vector<1x32xf32>
    %593 = vector.broadcast %592 : vector<1x32xf32> to vector<8x32xf32>
    %594 = vector.extract_strided_slice %575 {offsets = [6, 0], sizes = [1, 32], strides = [1, 1]} : vector<8x32xf32> to vector<1x32xf32>
    %595 = vector.shape_cast %594 : vector<1x32xf32> to vector<1x32xf32>
    %596 = vector.broadcast %595 : vector<1x32xf32> to vector<8x32xf32>
    %597 = vector.extract_strided_slice %575 {offsets = [7, 0], sizes = [1, 32], strides = [1, 1]} : vector<8x32xf32> to vector<1x32xf32>
    %598 = vector.shape_cast %597 : vector<1x32xf32> to vector<1x32xf32>
    %599 = vector.broadcast %598 : vector<1x32xf32> to vector<8x32xf32>
    %600 = tpu.concatenate %578, %581, %584, %587, %590, %593, %596, %599 in 0 : vector<8x32xf32>, vector<8x32xf32>, vector<8x32xf32>, vector<8x32xf32>, vector<8x32xf32>, vector<8x32xf32>, vector<8x32xf32>, vector<8x32xf32> -> vector<64x32xf32>
    %601 = vector.extract_strided_slice %574 {offsets = [0, 32], sizes = [8, 32], strides = [1, 1]} : vector<8x96xf32> to vector<8x32xf32>
    %602 = tpu.concatenate %601, %601, %601, %601, %601, %601, %601, %601 in 0 : vector<8x32xf32>, vector<8x32xf32>, vector<8x32xf32>, vector<8x32xf32>, vector<8x32xf32>, vector<8x32xf32>, vector<8x32xf32>, vector<8x32xf32> -> vector<64x32xf32>
    %603 = arith.addf %600, %602 : vector<64x32xf32>
    %604 = arith.addf %603, %458 : vector<64x32xf32>
    %cst_264 = arith.constant 0.000000e+00 : f32
    %605 = vector.broadcast %cst_264 : f32 to vector<64x32xf32>
    %606 = arith.maximumf %604, %605 : vector<64x32xf32>
    %c0_265 = arith.constant 0 : index
    %c0_266 = arith.constant 0 : index
    %607 = vector.load %arg39[%c0_265, %c0_266] : memref<32x32xf32, #tpu.memory_space<vmem>>, vector<32x32xf32>
    %cst_267 = arith.constant dense<0.000000e+00> : vector<64x32xf32>
    %608 = tpu.matmul %606, %607, %cst_267 {dimension_numbers = #tpu.dot_dimension_numbers<[1], [0], [0], [1], [0, 0, 1, 1], [], []>} : vector<64x32xf32>, vector<32x32xf32>, vector<64x32xf32> -> vector<64x32xf32>
    %c0_268 = arith.constant 0 : index
    %c0_269 = arith.constant 0 : index
    %609 = vector.load %arg40[%c0_268, %c0_269] : memref<1x32xf32, #tpu.memory_space<vmem>>, vector<1x32xf32>
    %610 = vector.broadcast %609 : vector<1x32xf32> to vector<64x32xf32>
    %611 = arith.addf %608, %610 : vector<64x32xf32>
    %cst_270 = arith.constant 0.000000e+00 : f32
    %612 = vector.broadcast %cst_270 : f32 to vector<64x32xf32>
    %613 = arith.maximumf %611, %612 : vector<64x32xf32>
    %c0_271 = arith.constant 0 : index
    %c0_272 = arith.constant 0 : index
    %614 = vector.load %arg41[%c0_271, %c0_272] : memref<32x32xf32, #tpu.memory_space<vmem>>, vector<32x32xf32>
    %cst_273 = arith.constant dense<0.000000e+00> : vector<64x32xf32>
    %615 = tpu.matmul %613, %614, %cst_273 {dimension_numbers = #tpu.dot_dimension_numbers<[1], [0], [0], [1], [0, 0, 1, 1], [], []>} : vector<64x32xf32>, vector<32x32xf32>, vector<64x32xf32> -> vector<64x32xf32>
    %c0_274 = arith.constant 0 : index
    %c0_275 = arith.constant 0 : index
    %616 = vector.load %arg42[%c0_274, %c0_275] : memref<1x32xf32, #tpu.memory_space<vmem>>, vector<1x32xf32>
    %617 = vector.broadcast %616 : vector<1x32xf32> to vector<64x32xf32>
    %618 = arith.addf %615, %617 : vector<64x32xf32>
    %cst_276 = arith.constant 0.000000e+00 : f32
    %619 = vector.broadcast %cst_276 : f32 to vector<64x32xf32>
    %620 = arith.maximumf %618, %619 : vector<64x32xf32>
    %cst_277 = arith.constant dense<0.000000e+00> : vector<8x32xf32>
    %621 = tpu.matmul %464, %620, %cst_277 {dimension_numbers = #tpu.dot_dimension_numbers<[1], [0], [0], [1], [0, 0, 1, 1], [], []>} : vector<8x64xf32>, vector<64x32xf32>, vector<8x32xf32> -> vector<8x32xf32>
    %622 = vector.extract_strided_slice %574 {offsets = [0, 64], sizes = [8, 32], strides = [1, 1]} : vector<8x96xf32> to vector<8x32xf32>
    %c0_278 = arith.constant 0 : index
    %c0_279 = arith.constant 0 : index
    %623 = vector.load %arg44[%c0_278, %c0_279] : memref<32x32xf32, #tpu.memory_space<vmem>>, vector<32x32xf32>
    %cst_280 = arith.constant dense<0.000000e+00> : vector<8x32xf32>
    %624 = tpu.matmul %621, %623, %cst_280 {dimension_numbers = #tpu.dot_dimension_numbers<[1], [0], [0], [1], [0, 0, 1, 1], [], []>} : vector<8x32xf32>, vector<32x32xf32>, vector<8x32xf32> -> vector<8x32xf32>
    %625 = arith.addf %622, %624 : vector<8x32xf32>
    %626 = arith.addf %625, %463 : vector<8x32xf32>
    %cst_281 = arith.constant 0.000000e+00 : f32
    %627 = vector.broadcast %cst_281 : f32 to vector<8x32xf32>
    %628 = arith.maximumf %626, %627 : vector<8x32xf32>
    %c0_282 = arith.constant 0 : index
    %c0_283 = arith.constant 0 : index
    %629 = vector.load %arg46[%c0_282, %c0_283] : memref<32x96xf32, #tpu.memory_space<vmem>>, vector<32x96xf32>
    %cst_284 = arith.constant dense<0.000000e+00> : vector<8x96xf32>
    %630 = tpu.matmul %628, %629, %cst_284 {dimension_numbers = #tpu.dot_dimension_numbers<[1], [0], [0], [1], [0, 0, 1, 1], [], []>} : vector<8x32xf32>, vector<32x96xf32>, vector<8x96xf32> -> vector<8x96xf32>
    %c0_285 = arith.constant 0 : index
    %c0_286 = arith.constant 0 : index
    %631 = vector.load %arg47[%c0_285, %c0_286] : memref<1x96xf32, #tpu.memory_space<vmem>>, vector<1x96xf32>
    %632 = vector.broadcast %631 : vector<1x96xf32> to vector<8x96xf32>
    %633 = arith.addf %630, %632 : vector<8x96xf32>
    %c0_287 = arith.constant 0 : index
    %c0_288 = arith.constant 0 : index
    %634 = vector.load %arg48[%c0_287, %c0_288] : memref<32x96xf32, #tpu.memory_space<vmem>>, vector<32x96xf32>
    %cst_289 = arith.constant dense<0.000000e+00> : vector<8x96xf32>
    %635 = tpu.matmul %561, %634, %cst_289 {dimension_numbers = #tpu.dot_dimension_numbers<[1], [0], [0], [1], [0, 0, 1, 1], [], []>} : vector<8x32xf32>, vector<32x96xf32>, vector<8x96xf32> -> vector<8x96xf32>
    %c0_290 = arith.constant 0 : index
    %c0_291 = arith.constant 0 : index
    %636 = vector.load %arg49[%c0_290, %c0_291] : memref<1x96xf32, #tpu.memory_space<vmem>>, vector<1x96xf32>
    %637 = vector.broadcast %636 : vector<1x96xf32> to vector<8x96xf32>
    %638 = arith.addf %635, %637 : vector<8x96xf32>
    %639 = vector.extract_strided_slice %633 {offsets = [0, 0], sizes = [8, 32], strides = [1, 1]} : vector<8x96xf32> to vector<8x32xf32>
    %640 = vector.extract_strided_slice %638 {offsets = [0, 0], sizes = [8, 32], strides = [1, 1]} : vector<8x96xf32> to vector<8x32xf32>
    %641 = arith.addf %639, %640 : vector<8x32xf32>
    %cst_292 = arith.constant 5.000000e-01 : f32
    %642 = vector.broadcast %cst_292 : f32 to vector<8x32xf32>
    %643 = arith.mulf %642, %641 : vector<8x32xf32>
    %644 = math.tanh %643 : vector<8x32xf32>
    %cst_293 = arith.constant 1.000000e+00 : f32
    %645 = vector.broadcast %cst_293 : f32 to vector<8x32xf32>
    %646 = arith.addf %644, %645 : vector<8x32xf32>
    %cst_294 = arith.constant 5.000000e-01 : f32
    %647 = vector.broadcast %cst_294 : f32 to vector<8x32xf32>
    %648 = arith.mulf %647, %646 : vector<8x32xf32>
    %649 = vector.extract_strided_slice %633 {offsets = [0, 32], sizes = [8, 32], strides = [1, 1]} : vector<8x96xf32> to vector<8x32xf32>
    %650 = vector.extract_strided_slice %638 {offsets = [0, 32], sizes = [8, 32], strides = [1, 1]} : vector<8x96xf32> to vector<8x32xf32>
    %651 = arith.addf %649, %650 : vector<8x32xf32>
    %cst_295 = arith.constant 5.000000e-01 : f32
    %652 = vector.broadcast %cst_295 : f32 to vector<8x32xf32>
    %653 = arith.mulf %652, %651 : vector<8x32xf32>
    %654 = math.tanh %653 : vector<8x32xf32>
    %cst_296 = arith.constant 1.000000e+00 : f32
    %655 = vector.broadcast %cst_296 : f32 to vector<8x32xf32>
    %656 = arith.addf %654, %655 : vector<8x32xf32>
    %cst_297 = arith.constant 5.000000e-01 : f32
    %657 = vector.broadcast %cst_297 : f32 to vector<8x32xf32>
    %658 = arith.mulf %657, %656 : vector<8x32xf32>
    %659 = vector.extract_strided_slice %633 {offsets = [0, 64], sizes = [8, 32], strides = [1, 1]} : vector<8x96xf32> to vector<8x32xf32>
    %660 = vector.extract_strided_slice %638 {offsets = [0, 64], sizes = [8, 32], strides = [1, 1]} : vector<8x96xf32> to vector<8x32xf32>
    %661 = arith.mulf %648, %660 : vector<8x32xf32>
    %662 = arith.addf %659, %661 : vector<8x32xf32>
    %663 = math.tanh %662 : vector<8x32xf32>
    %cst_298 = arith.constant 1.000000e+00 : f32
    %664 = vector.broadcast %cst_298 : f32 to vector<8x32xf32>
    %665 = arith.subf %664, %658 : vector<8x32xf32>
    %666 = arith.mulf %665, %663 : vector<8x32xf32>
    %667 = arith.mulf %658, %561 : vector<8x32xf32>
    %668 = arith.addf %666, %667 : vector<8x32xf32>
    %c0_299 = arith.constant 0 : index
    %c0_300 = arith.constant 0 : index
    %669 = vector.load %arg50[%c0_299, %c0_300] : memref<32x56xf32, #tpu.memory_space<vmem>>, vector<32x56xf32>
    %cst_301 = arith.constant dense<0.000000e+00> : vector<8x56xf32>
    %670 = tpu.matmul %668, %669, %cst_301 {dimension_numbers = #tpu.dot_dimension_numbers<[1], [0], [0], [1], [0, 0, 1, 1], [], []>} : vector<8x32xf32>, vector<32x56xf32>, vector<8x56xf32> -> vector<8x56xf32>
    %c0_302 = arith.constant 0 : index
    %c0_303 = arith.constant 0 : index
    %671 = vector.load %arg51[%c0_302, %c0_303] : memref<1x56xf32, #tpu.memory_space<vmem>>, vector<1x56xf32>
    %672 = vector.broadcast %671 : vector<1x56xf32> to vector<8x56xf32>
    %673 = arith.addf %670, %672 : vector<8x56xf32>
    %674 = vector.broadcast %424 : vector<8x1xf32> to vector<8x56xf32>
    %675 = arith.mulf %673, %674 : vector<8x56xf32>
    %676 = arith.addf %569, %675 : vector<8x56xf32>
    %c1 = arith.constant 1 : index
    %c0_304 = arith.constant 0 : index
    %c0_305 = arith.constant 0 : index
    %677 = vector.load %arg52[%c1, %c0_304, %c0_305] : memref<7x8x56xf32, #tpu.memory_space<vmem>>, vector<1x8x56xf32>
    %678 = vector.shape_cast %677 : vector<1x8x56xf32> to vector<8x56xf32>
    %679 = vector.shape_cast %676 : vector<8x56xf32> to vector<1x8x56xf32>
    tpu.vector_store %arg52[%c1, %c0_304, %c0_305], %679 {strides = array<i32>} : memref<7x8x56xf32, #tpu.memory_space<vmem>>, vector<1x8x56xf32>,
    %c0_306 = arith.constant 0 : index
    %c0_307 = arith.constant 0 : index
    %680 = vector.load %arg35[%c0_306, %c0_307] : memref<56x96xf32, #tpu.memory_space<vmem>>, vector<56x96xf32>
    %cst_308 = arith.constant dense<0.000000e+00> : vector<8x96xf32>
    %681 = tpu.matmul %676, %680, %cst_308 {dimension_numbers = #tpu.dot_dimension_numbers<[1], [0], [0], [1], [0, 0, 1, 1], [], []>} : vector<8x56xf32>, vector<56x96xf32>, vector<8x96xf32> -> vector<8x96xf32>
    %682 = vector.extract_strided_slice %681 {offsets = [0, 0], sizes = [8, 32], strides = [1, 1]} : vector<8x96xf32> to vector<8x32xf32>
    %683 = vector.extract_strided_slice %682 {offsets = [0, 0], sizes = [1, 32], strides = [1, 1]} : vector<8x32xf32> to vector<1x32xf32>
    %684 = vector.shape_cast %683 : vector<1x32xf32> to vector<1x32xf32>
    %685 = vector.broadcast %684 : vector<1x32xf32> to vector<8x32xf32>
    %686 = vector.extract_strided_slice %682 {offsets = [1, 0], sizes = [1, 32], strides = [1, 1]} : vector<8x32xf32> to vector<1x32xf32>
    %687 = vector.shape_cast %686 : vector<1x32xf32> to vector<1x32xf32>
    %688 = vector.broadcast %687 : vector<1x32xf32> to vector<8x32xf32>
    %689 = vector.extract_strided_slice %682 {offsets = [2, 0], sizes = [1, 32], strides = [1, 1]} : vector<8x32xf32> to vector<1x32xf32>
    %690 = vector.shape_cast %689 : vector<1x32xf32> to vector<1x32xf32>
    %691 = vector.broadcast %690 : vector<1x32xf32> to vector<8x32xf32>
    %692 = vector.extract_strided_slice %682 {offsets = [3, 0], sizes = [1, 32], strides = [1, 1]} : vector<8x32xf32> to vector<1x32xf32>
    %693 = vector.shape_cast %692 : vector<1x32xf32> to vector<1x32xf32>
    %694 = vector.broadcast %693 : vector<1x32xf32> to vector<8x32xf32>
    %695 = vector.extract_strided_slice %682 {offsets = [4, 0], sizes = [1, 32], strides = [1, 1]} : vector<8x32xf32> to vector<1x32xf32>
    %696 = vector.shape_cast %695 : vector<1x32xf32> to vector<1x32xf32>
    %697 = vector.broadcast %696 : vector<1x32xf32> to vector<8x32xf32>
    %698 = vector.extract_strided_slice %682 {offsets = [5, 0], sizes = [1, 32], strides = [1, 1]} : vector<8x32xf32> to vector<1x32xf32>
    %699 = vector.shape_cast %698 : vector<1x32xf32> to vector<1x32xf32>
    %700 = vector.broadcast %699 : vector<1x32xf32> to vector<8x32xf32>
    %701 = vector.extract_strided_slice %682 {offsets = [6, 0], sizes = [1, 32], strides = [1, 1]} : vector<8x32xf32> to vector<1x32xf32>
    %702 = vector.shape_cast %701 : vector<1x32xf32> to vector<1x32xf32>
    %703 = vector.broadcast %702 : vector<1x32xf32> to vector<8x32xf32>
    %704 = vector.extract_strided_slice %682 {offsets = [7, 0], sizes = [1, 32], strides = [1, 1]} : vector<8x32xf32> to vector<1x32xf32>
    %705 = vector.shape_cast %704 : vector<1x32xf32> to vector<1x32xf32>
    %706 = vector.broadcast %705 : vector<1x32xf32> to vector<8x32xf32>
    %707 = tpu.concatenate %685, %688, %691, %694, %697, %700, %703, %706 in 0 : vector<8x32xf32>, vector<8x32xf32>, vector<8x32xf32>, vector<8x32xf32>, vector<8x32xf32>, vector<8x32xf32>, vector<8x32xf32>, vector<8x32xf32> -> vector<64x32xf32>
    %708 = vector.extract_strided_slice %681 {offsets = [0, 32], sizes = [8, 32], strides = [1, 1]} : vector<8x96xf32> to vector<8x32xf32>
    %709 = tpu.concatenate %708, %708, %708, %708, %708, %708, %708, %708 in 0 : vector<8x32xf32>, vector<8x32xf32>, vector<8x32xf32>, vector<8x32xf32>, vector<8x32xf32>, vector<8x32xf32>, vector<8x32xf32>, vector<8x32xf32> -> vector<64x32xf32>
    %710 = arith.addf %707, %709 : vector<64x32xf32>
    %711 = arith.addf %710, %458 : vector<64x32xf32>
    %cst_309 = arith.constant 0.000000e+00 : f32
    %712 = vector.broadcast %cst_309 : f32 to vector<64x32xf32>
    %713 = arith.maximumf %711, %712 : vector<64x32xf32>
    %c0_310 = arith.constant 0 : index
    %c0_311 = arith.constant 0 : index
    %714 = vector.load %arg39[%c0_310, %c0_311] : memref<32x32xf32, #tpu.memory_space<vmem>>, vector<32x32xf32>
    %cst_312 = arith.constant dense<0.000000e+00> : vector<64x32xf32>
    %715 = tpu.matmul %713, %714, %cst_312 {dimension_numbers = #tpu.dot_dimension_numbers<[1], [0], [0], [1], [0, 0, 1, 1], [], []>} : vector<64x32xf32>, vector<32x32xf32>, vector<64x32xf32> -> vector<64x32xf32>
    %c0_313 = arith.constant 0 : index
    %c0_314 = arith.constant 0 : index
    %716 = vector.load %arg40[%c0_313, %c0_314] : memref<1x32xf32, #tpu.memory_space<vmem>>, vector<1x32xf32>
    %717 = vector.broadcast %716 : vector<1x32xf32> to vector<64x32xf32>
    %718 = arith.addf %715, %717 : vector<64x32xf32>
    %cst_315 = arith.constant 0.000000e+00 : f32
    %719 = vector.broadcast %cst_315 : f32 to vector<64x32xf32>
    %720 = arith.maximumf %718, %719 : vector<64x32xf32>
    %c0_316 = arith.constant 0 : index
    %c0_317 = arith.constant 0 : index
    %721 = vector.load %arg41[%c0_316, %c0_317] : memref<32x32xf32, #tpu.memory_space<vmem>>, vector<32x32xf32>
    %cst_318 = arith.constant dense<0.000000e+00> : vector<64x32xf32>
    %722 = tpu.matmul %720, %721, %cst_318 {dimension_numbers = #tpu.dot_dimension_numbers<[1], [0], [0], [1], [0, 0, 1, 1], [], []>} : vector<64x32xf32>, vector<32x32xf32>, vector<64x32xf32> -> vector<64x32xf32>
    %c0_319 = arith.constant 0 : index
    %c0_320 = arith.constant 0 : index
    %723 = vector.load %arg42[%c0_319, %c0_320] : memref<1x32xf32, #tpu.memory_space<vmem>>, vector<1x32xf32>
    %724 = vector.broadcast %723 : vector<1x32xf32> to vector<64x32xf32>
    %725 = arith.addf %722, %724 : vector<64x32xf32>
    %cst_321 = arith.constant 0.000000e+00 : f32
    %726 = vector.broadcast %cst_321 : f32 to vector<64x32xf32>
    %727 = arith.maximumf %725, %726 : vector<64x32xf32>
    %cst_322 = arith.constant dense<0.000000e+00> : vector<8x32xf32>
    %728 = tpu.matmul %464, %727, %cst_322 {dimension_numbers = #tpu.dot_dimension_numbers<[1], [0], [0], [1], [0, 0, 1, 1], [], []>} : vector<8x64xf32>, vector<64x32xf32>, vector<8x32xf32> -> vector<8x32xf32>
    %729 = vector.extract_strided_slice %681 {offsets = [0, 64], sizes = [8, 32], strides = [1, 1]} : vector<8x96xf32> to vector<8x32xf32>
    %c0_323 = arith.constant 0 : index
    %c0_324 = arith.constant 0 : index
    %730 = vector.load %arg44[%c0_323, %c0_324] : memref<32x32xf32, #tpu.memory_space<vmem>>, vector<32x32xf32>
    %cst_325 = arith.constant dense<0.000000e+00> : vector<8x32xf32>
    %731 = tpu.matmul %728, %730, %cst_325 {dimension_numbers = #tpu.dot_dimension_numbers<[1], [0], [0], [1], [0, 0, 1, 1], [], []>} : vector<8x32xf32>, vector<32x32xf32>, vector<8x32xf32> -> vector<8x32xf32>
    %732 = arith.addf %729, %731 : vector<8x32xf32>
    %733 = arith.addf %732, %463 : vector<8x32xf32>
    %cst_326 = arith.constant 0.000000e+00 : f32
    %734 = vector.broadcast %cst_326 : f32 to vector<8x32xf32>
    %735 = arith.maximumf %733, %734 : vector<8x32xf32>
    %c0_327 = arith.constant 0 : index
    %c0_328 = arith.constant 0 : index
    %736 = vector.load %arg46[%c0_327, %c0_328] : memref<32x96xf32, #tpu.memory_space<vmem>>, vector<32x96xf32>
    %cst_329 = arith.constant dense<0.000000e+00> : vector<8x96xf32>
    %737 = tpu.matmul %735, %736, %cst_329 {dimension_numbers = #tpu.dot_dimension_numbers<[1], [0], [0], [1], [0, 0, 1, 1], [], []>} : vector<8x32xf32>, vector<32x96xf32>, vector<8x96xf32> -> vector<8x96xf32>
    %c0_330 = arith.constant 0 : index
    %c0_331 = arith.constant 0 : index
    %738 = vector.load %arg47[%c0_330, %c0_331] : memref<1x96xf32, #tpu.memory_space<vmem>>, vector<1x96xf32>
    %739 = vector.broadcast %738 : vector<1x96xf32> to vector<8x96xf32>
    %740 = arith.addf %737, %739 : vector<8x96xf32>
    %c0_332 = arith.constant 0 : index
    %c0_333 = arith.constant 0 : index
    %741 = vector.load %arg48[%c0_332, %c0_333] : memref<32x96xf32, #tpu.memory_space<vmem>>, vector<32x96xf32>
    %cst_334 = arith.constant dense<0.000000e+00> : vector<8x96xf32>
    %742 = tpu.matmul %668, %741, %cst_334 {dimension_numbers = #tpu.dot_dimension_numbers<[1], [0], [0], [1], [0, 0, 1, 1], [], []>} : vector<8x32xf32>, vector<32x96xf32>, vector<8x96xf32> -> vector<8x96xf32>
    %c0_335 = arith.constant 0 : index
    %c0_336 = arith.constant 0 : index
    %743 = vector.load %arg49[%c0_335, %c0_336] : memref<1x96xf32, #tpu.memory_space<vmem>>, vector<1x96xf32>
    %744 = vector.broadcast %743 : vector<1x96xf32> to vector<8x96xf32>
    %745 = arith.addf %742, %744 : vector<8x96xf32>
    %746 = vector.extract_strided_slice %740 {offsets = [0, 0], sizes = [8, 32], strides = [1, 1]} : vector<8x96xf32> to vector<8x32xf32>
    %747 = vector.extract_strided_slice %745 {offsets = [0, 0], sizes = [8, 32], strides = [1, 1]} : vector<8x96xf32> to vector<8x32xf32>
    %748 = arith.addf %746, %747 : vector<8x32xf32>
    %cst_337 = arith.constant 5.000000e-01 : f32
    %749 = vector.broadcast %cst_337 : f32 to vector<8x32xf32>
    %750 = arith.mulf %749, %748 : vector<8x32xf32>
    %751 = math.tanh %750 : vector<8x32xf32>
    %cst_338 = arith.constant 1.000000e+00 : f32
    %752 = vector.broadcast %cst_338 : f32 to vector<8x32xf32>
    %753 = arith.addf %751, %752 : vector<8x32xf32>
    %cst_339 = arith.constant 5.000000e-01 : f32
    %754 = vector.broadcast %cst_339 : f32 to vector<8x32xf32>
    %755 = arith.mulf %754, %753 : vector<8x32xf32>
    %756 = vector.extract_strided_slice %740 {offsets = [0, 32], sizes = [8, 32], strides = [1, 1]} : vector<8x96xf32> to vector<8x32xf32>
    %757 = vector.extract_strided_slice %745 {offsets = [0, 32], sizes = [8, 32], strides = [1, 1]} : vector<8x96xf32> to vector<8x32xf32>
    %758 = arith.addf %756, %757 : vector<8x32xf32>
    %cst_340 = arith.constant 5.000000e-01 : f32
    %759 = vector.broadcast %cst_340 : f32 to vector<8x32xf32>
    %760 = arith.mulf %759, %758 : vector<8x32xf32>
    %761 = math.tanh %760 : vector<8x32xf32>
    %cst_341 = arith.constant 1.000000e+00 : f32
    %762 = vector.broadcast %cst_341 : f32 to vector<8x32xf32>
    %763 = arith.addf %761, %762 : vector<8x32xf32>
    %cst_342 = arith.constant 5.000000e-01 : f32
    %764 = vector.broadcast %cst_342 : f32 to vector<8x32xf32>
    %765 = arith.mulf %764, %763 : vector<8x32xf32>
    %766 = vector.extract_strided_slice %740 {offsets = [0, 64], sizes = [8, 32], strides = [1, 1]} : vector<8x96xf32> to vector<8x32xf32>
    %767 = vector.extract_strided_slice %745 {offsets = [0, 64], sizes = [8, 32], strides = [1, 1]} : vector<8x96xf32> to vector<8x32xf32>
    %768 = arith.mulf %755, %767 : vector<8x32xf32>
    %769 = arith.addf %766, %768 : vector<8x32xf32>
    %770 = math.tanh %769 : vector<8x32xf32>
    %cst_343 = arith.constant 1.000000e+00 : f32
    %771 = vector.broadcast %cst_343 : f32 to vector<8x32xf32>
    %772 = arith.subf %771, %765 : vector<8x32xf32>
    %773 = arith.mulf %772, %770 : vector<8x32xf32>
    %774 = arith.mulf %765, %668 : vector<8x32xf32>
    %775 = arith.addf %773, %774 : vector<8x32xf32>
    %c0_344 = arith.constant 0 : index
    %c0_345 = arith.constant 0 : index
    %776 = vector.load %arg50[%c0_344, %c0_345] : memref<32x56xf32, #tpu.memory_space<vmem>>, vector<32x56xf32>
    %cst_346 = arith.constant dense<0.000000e+00> : vector<8x56xf32>
    %777 = tpu.matmul %775, %776, %cst_346 {dimension_numbers = #tpu.dot_dimension_numbers<[1], [0], [0], [1], [0, 0, 1, 1], [], []>} : vector<8x32xf32>, vector<32x56xf32>, vector<8x56xf32> -> vector<8x56xf32>
    %c0_347 = arith.constant 0 : index
    %c0_348 = arith.constant 0 : index
    %778 = vector.load %arg51[%c0_347, %c0_348] : memref<1x56xf32, #tpu.memory_space<vmem>>, vector<1x56xf32>
    %779 = vector.broadcast %778 : vector<1x56xf32> to vector<8x56xf32>
    %780 = arith.addf %777, %779 : vector<8x56xf32>
    %781 = vector.broadcast %424 : vector<8x1xf32> to vector<8x56xf32>
    %782 = arith.mulf %780, %781 : vector<8x56xf32>
    %783 = arith.addf %676, %782 : vector<8x56xf32>
    %c2 = arith.constant 2 : index
    %c0_349 = arith.constant 0 : index
    %c0_350 = arith.constant 0 : index
    %784 = vector.load %arg52[%c2, %c0_349, %c0_350] : memref<7x8x56xf32, #tpu.memory_space<vmem>>, vector<1x8x56xf32>
    %785 = vector.shape_cast %784 : vector<1x8x56xf32> to vector<8x56xf32>
    %786 = vector.shape_cast %783 : vector<8x56xf32> to vector<1x8x56xf32>
    tpu.vector_store %arg52[%c2, %c0_349, %c0_350], %786 {strides = array<i32>} : memref<7x8x56xf32, #tpu.memory_space<vmem>>, vector<1x8x56xf32>,
    %c0_351 = arith.constant 0 : index
    %c0_352 = arith.constant 0 : index
    %787 = vector.load %arg35[%c0_351, %c0_352] : memref<56x96xf32, #tpu.memory_space<vmem>>, vector<56x96xf32>
    %cst_353 = arith.constant dense<0.000000e+00> : vector<8x96xf32>
    %788 = tpu.matmul %783, %787, %cst_353 {dimension_numbers = #tpu.dot_dimension_numbers<[1], [0], [0], [1], [0, 0, 1, 1], [], []>} : vector<8x56xf32>, vector<56x96xf32>, vector<8x96xf32> -> vector<8x96xf32>
    %789 = vector.extract_strided_slice %788 {offsets = [0, 0], sizes = [8, 32], strides = [1, 1]} : vector<8x96xf32> to vector<8x32xf32>
    %790 = vector.extract_strided_slice %789 {offsets = [0, 0], sizes = [1, 32], strides = [1, 1]} : vector<8x32xf32> to vector<1x32xf32>
    %791 = vector.shape_cast %790 : vector<1x32xf32> to vector<1x32xf32>
    %792 = vector.broadcast %791 : vector<1x32xf32> to vector<8x32xf32>
    %793 = vector.extract_strided_slice %789 {offsets = [1, 0], sizes = [1, 32], strides = [1, 1]} : vector<8x32xf32> to vector<1x32xf32>
    %794 = vector.shape_cast %793 : vector<1x32xf32> to vector<1x32xf32>
    %795 = vector.broadcast %794 : vector<1x32xf32> to vector<8x32xf32>
    %796 = vector.extract_strided_slice %789 {offsets = [2, 0], sizes = [1, 32], strides = [1, 1]} : vector<8x32xf32> to vector<1x32xf32>
    %797 = vector.shape_cast %796 : vector<1x32xf32> to vector<1x32xf32>
    %798 = vector.broadcast %797 : vector<1x32xf32> to vector<8x32xf32>
    %799 = vector.extract_strided_slice %789 {offsets = [3, 0], sizes = [1, 32], strides = [1, 1]} : vector<8x32xf32> to vector<1x32xf32>
    %800 = vector.shape_cast %799 : vector<1x32xf32> to vector<1x32xf32>
    %801 = vector.broadcast %800 : vector<1x32xf32> to vector<8x32xf32>
    %802 = vector.extract_strided_slice %789 {offsets = [4, 0], sizes = [1, 32], strides = [1, 1]} : vector<8x32xf32> to vector<1x32xf32>
    %803 = vector.shape_cast %802 : vector<1x32xf32> to vector<1x32xf32>
    %804 = vector.broadcast %803 : vector<1x32xf32> to vector<8x32xf32>
    %805 = vector.extract_strided_slice %789 {offsets = [5, 0], sizes = [1, 32], strides = [1, 1]} : vector<8x32xf32> to vector<1x32xf32>
    %806 = vector.shape_cast %805 : vector<1x32xf32> to vector<1x32xf32>
    %807 = vector.broadcast %806 : vector<1x32xf32> to vector<8x32xf32>
    %808 = vector.extract_strided_slice %789 {offsets = [6, 0], sizes = [1, 32], strides = [1, 1]} : vector<8x32xf32> to vector<1x32xf32>
    %809 = vector.shape_cast %808 : vector<1x32xf32> to vector<1x32xf32>
    %810 = vector.broadcast %809 : vector<1x32xf32> to vector<8x32xf32>
    %811 = vector.extract_strided_slice %789 {offsets = [7, 0], sizes = [1, 32], strides = [1, 1]} : vector<8x32xf32> to vector<1x32xf32>
    %812 = vector.shape_cast %811 : vector<1x32xf32> to vector<1x32xf32>
    %813 = vector.broadcast %812 : vector<1x32xf32> to vector<8x32xf32>
    %814 = tpu.concatenate %792, %795, %798, %801, %804, %807, %810, %813 in 0 : vector<8x32xf32>, vector<8x32xf32>, vector<8x32xf32>, vector<8x32xf32>, vector<8x32xf32>, vector<8x32xf32>, vector<8x32xf32>, vector<8x32xf32> -> vector<64x32xf32>
    %815 = vector.extract_strided_slice %788 {offsets = [0, 32], sizes = [8, 32], strides = [1, 1]} : vector<8x96xf32> to vector<8x32xf32>
    %816 = tpu.concatenate %815, %815, %815, %815, %815, %815, %815, %815 in 0 : vector<8x32xf32>, vector<8x32xf32>, vector<8x32xf32>, vector<8x32xf32>, vector<8x32xf32>, vector<8x32xf32>, vector<8x32xf32>, vector<8x32xf32> -> vector<64x32xf32>
    %817 = arith.addf %814, %816 : vector<64x32xf32>
    %818 = arith.addf %817, %458 : vector<64x32xf32>
    %cst_354 = arith.constant 0.000000e+00 : f32
    %819 = vector.broadcast %cst_354 : f32 to vector<64x32xf32>
    %820 = arith.maximumf %818, %819 : vector<64x32xf32>
    %c0_355 = arith.constant 0 : index
    %c0_356 = arith.constant 0 : index
    %821 = vector.load %arg39[%c0_355, %c0_356] : memref<32x32xf32, #tpu.memory_space<vmem>>, vector<32x32xf32>
    %cst_357 = arith.constant dense<0.000000e+00> : vector<64x32xf32>
    %822 = tpu.matmul %820, %821, %cst_357 {dimension_numbers = #tpu.dot_dimension_numbers<[1], [0], [0], [1], [0, 0, 1, 1], [], []>} : vector<64x32xf32>, vector<32x32xf32>, vector<64x32xf32> -> vector<64x32xf32>
    %c0_358 = arith.constant 0 : index
    %c0_359 = arith.constant 0 : index
    %823 = vector.load %arg40[%c0_358, %c0_359] : memref<1x32xf32, #tpu.memory_space<vmem>>, vector<1x32xf32>
    %824 = vector.broadcast %823 : vector<1x32xf32> to vector<64x32xf32>
    %825 = arith.addf %822, %824 : vector<64x32xf32>
    %cst_360 = arith.constant 0.000000e+00 : f32
    %826 = vector.broadcast %cst_360 : f32 to vector<64x32xf32>
    %827 = arith.maximumf %825, %826 : vector<64x32xf32>
    %c0_361 = arith.constant 0 : index
    %c0_362 = arith.constant 0 : index
    %828 = vector.load %arg41[%c0_361, %c0_362] : memref<32x32xf32, #tpu.memory_space<vmem>>, vector<32x32xf32>
    %cst_363 = arith.constant dense<0.000000e+00> : vector<64x32xf32>
    %829 = tpu.matmul %827, %828, %cst_363 {dimension_numbers = #tpu.dot_dimension_numbers<[1], [0], [0], [1], [0, 0, 1, 1], [], []>} : vector<64x32xf32>, vector<32x32xf32>, vector<64x32xf32> -> vector<64x32xf32>
    %c0_364 = arith.constant 0 : index
    %c0_365 = arith.constant 0 : index
    %830 = vector.load %arg42[%c0_364, %c0_365] : memref<1x32xf32, #tpu.memory_space<vmem>>, vector<1x32xf32>
    %831 = vector.broadcast %830 : vector<1x32xf32> to vector<64x32xf32>
    %832 = arith.addf %829, %831 : vector<64x32xf32>
    %cst_366 = arith.constant 0.000000e+00 : f32
    %833 = vector.broadcast %cst_366 : f32 to vector<64x32xf32>
    %834 = arith.maximumf %832, %833 : vector<64x32xf32>
    %cst_367 = arith.constant dense<0.000000e+00> : vector<8x32xf32>
    %835 = tpu.matmul %464, %834, %cst_367 {dimension_numbers = #tpu.dot_dimension_numbers<[1], [0], [0], [1], [0, 0, 1, 1], [], []>} : vector<8x64xf32>, vector<64x32xf32>, vector<8x32xf32> -> vector<8x32xf32>
    %836 = vector.extract_strided_slice %788 {offsets = [0, 64], sizes = [8, 32], strides = [1, 1]} : vector<8x96xf32> to vector<8x32xf32>
    %c0_368 = arith.constant 0 : index
    %c0_369 = arith.constant 0 : index
    %837 = vector.load %arg44[%c0_368, %c0_369] : memref<32x32xf32, #tpu.memory_space<vmem>>, vector<32x32xf32>
    %cst_370 = arith.constant dense<0.000000e+00> : vector<8x32xf32>
    %838 = tpu.matmul %835, %837, %cst_370 {dimension_numbers = #tpu.dot_dimension_numbers<[1], [0], [0], [1], [0, 0, 1, 1], [], []>} : vector<8x32xf32>, vector<32x32xf32>, vector<8x32xf32> -> vector<8x32xf32>
    %839 = arith.addf %836, %838 : vector<8x32xf32>
    %840 = arith.addf %839, %463 : vector<8x32xf32>
    %cst_371 = arith.constant 0.000000e+00 : f32
    %841 = vector.broadcast %cst_371 : f32 to vector<8x32xf32>
    %842 = arith.maximumf %840, %841 : vector<8x32xf32>
    %c0_372 = arith.constant 0 : index
    %c0_373 = arith.constant 0 : index
    %843 = vector.load %arg46[%c0_372, %c0_373] : memref<32x96xf32, #tpu.memory_space<vmem>>, vector<32x96xf32>
    %cst_374 = arith.constant dense<0.000000e+00> : vector<8x96xf32>
    %844 = tpu.matmul %842, %843, %cst_374 {dimension_numbers = #tpu.dot_dimension_numbers<[1], [0], [0], [1], [0, 0, 1, 1], [], []>} : vector<8x32xf32>, vector<32x96xf32>, vector<8x96xf32> -> vector<8x96xf32>
    %c0_375 = arith.constant 0 : index
    %c0_376 = arith.constant 0 : index
    %845 = vector.load %arg47[%c0_375, %c0_376] : memref<1x96xf32, #tpu.memory_space<vmem>>, vector<1x96xf32>
    %846 = vector.broadcast %845 : vector<1x96xf32> to vector<8x96xf32>
    %847 = arith.addf %844, %846 : vector<8x96xf32>
    %c0_377 = arith.constant 0 : index
    %c0_378 = arith.constant 0 : index
    %848 = vector.load %arg48[%c0_377, %c0_378] : memref<32x96xf32, #tpu.memory_space<vmem>>, vector<32x96xf32>
    %cst_379 = arith.constant dense<0.000000e+00> : vector<8x96xf32>
    %849 = tpu.matmul %775, %848, %cst_379 {dimension_numbers = #tpu.dot_dimension_numbers<[1], [0], [0], [1], [0, 0, 1, 1], [], []>} : vector<8x32xf32>, vector<32x96xf32>, vector<8x96xf32> -> vector<8x96xf32>
    %c0_380 = arith.constant 0 : index
    %c0_381 = arith.constant 0 : index
    %850 = vector.load %arg49[%c0_380, %c0_381] : memref<1x96xf32, #tpu.memory_space<vmem>>, vector<1x96xf32>
    %851 = vector.broadcast %850 : vector<1x96xf32> to vector<8x96xf32>
    %852 = arith.addf %849, %851 : vector<8x96xf32>
    %853 = vector.extract_strided_slice %847 {offsets = [0, 0], sizes = [8, 32], strides = [1, 1]} : vector<8x96xf32> to vector<8x32xf32>
    %854 = vector.extract_strided_slice %852 {offsets = [0, 0], sizes = [8, 32], strides = [1, 1]} : vector<8x96xf32> to vector<8x32xf32>
    %855 = arith.addf %853, %854 : vector<8x32xf32>
    %cst_382 = arith.constant 5.000000e-01 : f32
    %856 = vector.broadcast %cst_382 : f32 to vector<8x32xf32>
    %857 = arith.mulf %856, %855 : vector<8x32xf32>
    %858 = math.tanh %857 : vector<8x32xf32>
    %cst_383 = arith.constant 1.000000e+00 : f32
    %859 = vector.broadcast %cst_383 : f32 to vector<8x32xf32>
    %860 = arith.addf %858, %859 : vector<8x32xf32>
    %cst_384 = arith.constant 5.000000e-01 : f32
    %861 = vector.broadcast %cst_384 : f32 to vector<8x32xf32>
    %862 = arith.mulf %861, %860 : vector<8x32xf32>
    %863 = vector.extract_strided_slice %847 {offsets = [0, 32], sizes = [8, 32], strides = [1, 1]} : vector<8x96xf32> to vector<8x32xf32>
    %864 = vector.extract_strided_slice %852 {offsets = [0, 32], sizes = [8, 32], strides = [1, 1]} : vector<8x96xf32> to vector<8x32xf32>
    %865 = arith.addf %863, %864 : vector<8x32xf32>
    %cst_385 = arith.constant 5.000000e-01 : f32
    %866 = vector.broadcast %cst_385 : f32 to vector<8x32xf32>
    %867 = arith.mulf %866, %865 : vector<8x32xf32>
    %868 = math.tanh %867 : vector<8x32xf32>
    %cst_386 = arith.constant 1.000000e+00 : f32
    %869 = vector.broadcast %cst_386 : f32 to vector<8x32xf32>
    %870 = arith.addf %868, %869 : vector<8x32xf32>
    %cst_387 = arith.constant 5.000000e-01 : f32
    %871 = vector.broadcast %cst_387 : f32 to vector<8x32xf32>
    %872 = arith.mulf %871, %870 : vector<8x32xf32>
    %873 = vector.extract_strided_slice %847 {offsets = [0, 64], sizes = [8, 32], strides = [1, 1]} : vector<8x96xf32> to vector<8x32xf32>
    %874 = vector.extract_strided_slice %852 {offsets = [0, 64], sizes = [8, 32], strides = [1, 1]} : vector<8x96xf32> to vector<8x32xf32>
    %875 = arith.mulf %862, %874 : vector<8x32xf32>
    %876 = arith.addf %873, %875 : vector<8x32xf32>
    %877 = math.tanh %876 : vector<8x32xf32>
    %cst_388 = arith.constant 1.000000e+00 : f32
    %878 = vector.broadcast %cst_388 : f32 to vector<8x32xf32>
    %879 = arith.subf %878, %872 : vector<8x32xf32>
    %880 = arith.mulf %879, %877 : vector<8x32xf32>
    %881 = arith.mulf %872, %775 : vector<8x32xf32>
    %882 = arith.addf %880, %881 : vector<8x32xf32>
    %c0_389 = arith.constant 0 : index
    %c0_390 = arith.constant 0 : index
    %883 = vector.load %arg50[%c0_389, %c0_390] : memref<32x56xf32, #tpu.memory_space<vmem>>, vector<32x56xf32>
    %cst_391 = arith.constant dense<0.000000e+00> : vector<8x56xf32>
    %884 = tpu.matmul %882, %883, %cst_391 {dimension_numbers = #tpu.dot_dimension_numbers<[1], [0], [0], [1], [0, 0, 1, 1], [], []>} : vector<8x32xf32>, vector<32x56xf32>, vector<8x56xf32> -> vector<8x56xf32>
    %c0_392 = arith.constant 0 : index
    %c0_393 = arith.constant 0 : index
    %885 = vector.load %arg51[%c0_392, %c0_393] : memref<1x56xf32, #tpu.memory_space<vmem>>, vector<1x56xf32>
    %886 = vector.broadcast %885 : vector<1x56xf32> to vector<8x56xf32>
    %887 = arith.addf %884, %886 : vector<8x56xf32>
    %888 = vector.broadcast %424 : vector<8x1xf32> to vector<8x56xf32>
    %889 = arith.mulf %887, %888 : vector<8x56xf32>
    %890 = arith.addf %783, %889 : vector<8x56xf32>
    %c3 = arith.constant 3 : index
    %c0_394 = arith.constant 0 : index
    %c0_395 = arith.constant 0 : index
    %891 = vector.load %arg52[%c3, %c0_394, %c0_395] : memref<7x8x56xf32, #tpu.memory_space<vmem>>, vector<1x8x56xf32>
    %892 = vector.shape_cast %891 : vector<1x8x56xf32> to vector<8x56xf32>
    %893 = vector.shape_cast %890 : vector<8x56xf32> to vector<1x8x56xf32>
    tpu.vector_store %arg52[%c3, %c0_394, %c0_395], %893 {strides = array<i32>} : memref<7x8x56xf32, #tpu.memory_space<vmem>>, vector<1x8x56xf32>,
    %c0_396 = arith.constant 0 : index
    %c0_397 = arith.constant 0 : index
    %894 = vector.load %arg35[%c0_396, %c0_397] : memref<56x96xf32, #tpu.memory_space<vmem>>, vector<56x96xf32>
    %cst_398 = arith.constant dense<0.000000e+00> : vector<8x96xf32>
    %895 = tpu.matmul %890, %894, %cst_398 {dimension_numbers = #tpu.dot_dimension_numbers<[1], [0], [0], [1], [0, 0, 1, 1], [], []>} : vector<8x56xf32>, vector<56x96xf32>, vector<8x96xf32> -> vector<8x96xf32>
    %896 = vector.extract_strided_slice %895 {offsets = [0, 0], sizes = [8, 32], strides = [1, 1]} : vector<8x96xf32> to vector<8x32xf32>
    %897 = vector.extract_strided_slice %896 {offsets = [0, 0], sizes = [1, 32], strides = [1, 1]} : vector<8x32xf32> to vector<1x32xf32>
    %898 = vector.shape_cast %897 : vector<1x32xf32> to vector<1x32xf32>
    %899 = vector.broadcast %898 : vector<1x32xf32> to vector<8x32xf32>
    %900 = vector.extract_strided_slice %896 {offsets = [1, 0], sizes = [1, 32], strides = [1, 1]} : vector<8x32xf32> to vector<1x32xf32>
    %901 = vector.shape_cast %900 : vector<1x32xf32> to vector<1x32xf32>
    %902 = vector.broadcast %901 : vector<1x32xf32> to vector<8x32xf32>
    %903 = vector.extract_strided_slice %896 {offsets = [2, 0], sizes = [1, 32], strides = [1, 1]} : vector<8x32xf32> to vector<1x32xf32>
    %904 = vector.shape_cast %903 : vector<1x32xf32> to vector<1x32xf32>
    %905 = vector.broadcast %904 : vector<1x32xf32> to vector<8x32xf32>
    %906 = vector.extract_strided_slice %896 {offsets = [3, 0], sizes = [1, 32], strides = [1, 1]} : vector<8x32xf32> to vector<1x32xf32>
    %907 = vector.shape_cast %906 : vector<1x32xf32> to vector<1x32xf32>
    %908 = vector.broadcast %907 : vector<1x32xf32> to vector<8x32xf32>
    %909 = vector.extract_strided_slice %896 {offsets = [4, 0], sizes = [1, 32], strides = [1, 1]} : vector<8x32xf32> to vector<1x32xf32>
    %910 = vector.shape_cast %909 : vector<1x32xf32> to vector<1x32xf32>
    %911 = vector.broadcast %910 : vector<1x32xf32> to vector<8x32xf32>
    %912 = vector.extract_strided_slice %896 {offsets = [5, 0], sizes = [1, 32], strides = [1, 1]} : vector<8x32xf32> to vector<1x32xf32>
    %913 = vector.shape_cast %912 : vector<1x32xf32> to vector<1x32xf32>
    %914 = vector.broadcast %913 : vector<1x32xf32> to vector<8x32xf32>
    %915 = vector.extract_strided_slice %896 {offsets = [6, 0], sizes = [1, 32], strides = [1, 1]} : vector<8x32xf32> to vector<1x32xf32>
    %916 = vector.shape_cast %915 : vector<1x32xf32> to vector<1x32xf32>
    %917 = vector.broadcast %916 : vector<1x32xf32> to vector<8x32xf32>
    %918 = vector.extract_strided_slice %896 {offsets = [7, 0], sizes = [1, 32], strides = [1, 1]} : vector<8x32xf32> to vector<1x32xf32>
    %919 = vector.shape_cast %918 : vector<1x32xf32> to vector<1x32xf32>
    %920 = vector.broadcast %919 : vector<1x32xf32> to vector<8x32xf32>
    %921 = tpu.concatenate %899, %902, %905, %908, %911, %914, %917, %920 in 0 : vector<8x32xf32>, vector<8x32xf32>, vector<8x32xf32>, vector<8x32xf32>, vector<8x32xf32>, vector<8x32xf32>, vector<8x32xf32>, vector<8x32xf32> -> vector<64x32xf32>
    %922 = vector.extract_strided_slice %895 {offsets = [0, 32], sizes = [8, 32], strides = [1, 1]} : vector<8x96xf32> to vector<8x32xf32>
    %923 = tpu.concatenate %922, %922, %922, %922, %922, %922, %922, %922 in 0 : vector<8x32xf32>, vector<8x32xf32>, vector<8x32xf32>, vector<8x32xf32>, vector<8x32xf32>, vector<8x32xf32>, vector<8x32xf32>, vector<8x32xf32> -> vector<64x32xf32>
    %924 = arith.addf %921, %923 : vector<64x32xf32>
    %925 = arith.addf %924, %458 : vector<64x32xf32>
    %cst_399 = arith.constant 0.000000e+00 : f32
    %926 = vector.broadcast %cst_399 : f32 to vector<64x32xf32>
    %927 = arith.maximumf %925, %926 : vector<64x32xf32>
    %c0_400 = arith.constant 0 : index
    %c0_401 = arith.constant 0 : index
    %928 = vector.load %arg39[%c0_400, %c0_401] : memref<32x32xf32, #tpu.memory_space<vmem>>, vector<32x32xf32>
    %cst_402 = arith.constant dense<0.000000e+00> : vector<64x32xf32>
    %929 = tpu.matmul %927, %928, %cst_402 {dimension_numbers = #tpu.dot_dimension_numbers<[1], [0], [0], [1], [0, 0, 1, 1], [], []>} : vector<64x32xf32>, vector<32x32xf32>, vector<64x32xf32> -> vector<64x32xf32>
    %c0_403 = arith.constant 0 : index
    %c0_404 = arith.constant 0 : index
    %930 = vector.load %arg40[%c0_403, %c0_404] : memref<1x32xf32, #tpu.memory_space<vmem>>, vector<1x32xf32>
    %931 = vector.broadcast %930 : vector<1x32xf32> to vector<64x32xf32>
    %932 = arith.addf %929, %931 : vector<64x32xf32>
    %cst_405 = arith.constant 0.000000e+00 : f32
    %933 = vector.broadcast %cst_405 : f32 to vector<64x32xf32>
    %934 = arith.maximumf %932, %933 : vector<64x32xf32>
    %c0_406 = arith.constant 0 : index
    %c0_407 = arith.constant 0 : index
    %935 = vector.load %arg41[%c0_406, %c0_407] : memref<32x32xf32, #tpu.memory_space<vmem>>, vector<32x32xf32>
    %cst_408 = arith.constant dense<0.000000e+00> : vector<64x32xf32>
    %936 = tpu.matmul %934, %935, %cst_408 {dimension_numbers = #tpu.dot_dimension_numbers<[1], [0], [0], [1], [0, 0, 1, 1], [], []>} : vector<64x32xf32>, vector<32x32xf32>, vector<64x32xf32> -> vector<64x32xf32>
    %c0_409 = arith.constant 0 : index
    %c0_410 = arith.constant 0 : index
    %937 = vector.load %arg42[%c0_409, %c0_410] : memref<1x32xf32, #tpu.memory_space<vmem>>, vector<1x32xf32>
    %938 = vector.broadcast %937 : vector<1x32xf32> to vector<64x32xf32>
    %939 = arith.addf %936, %938 : vector<64x32xf32>
    %cst_411 = arith.constant 0.000000e+00 : f32
    %940 = vector.broadcast %cst_411 : f32 to vector<64x32xf32>
    %941 = arith.maximumf %939, %940 : vector<64x32xf32>
    %cst_412 = arith.constant dense<0.000000e+00> : vector<8x32xf32>
    %942 = tpu.matmul %464, %941, %cst_412 {dimension_numbers = #tpu.dot_dimension_numbers<[1], [0], [0], [1], [0, 0, 1, 1], [], []>} : vector<8x64xf32>, vector<64x32xf32>, vector<8x32xf32> -> vector<8x32xf32>
    %943 = vector.extract_strided_slice %895 {offsets = [0, 64], sizes = [8, 32], strides = [1, 1]} : vector<8x96xf32> to vector<8x32xf32>
    %c0_413 = arith.constant 0 : index
    %c0_414 = arith.constant 0 : index
    %944 = vector.load %arg44[%c0_413, %c0_414] : memref<32x32xf32, #tpu.memory_space<vmem>>, vector<32x32xf32>
    %cst_415 = arith.constant dense<0.000000e+00> : vector<8x32xf32>
    %945 = tpu.matmul %942, %944, %cst_415 {dimension_numbers = #tpu.dot_dimension_numbers<[1], [0], [0], [1], [0, 0, 1, 1], [], []>} : vector<8x32xf32>, vector<32x32xf32>, vector<8x32xf32> -> vector<8x32xf32>
    %946 = arith.addf %943, %945 : vector<8x32xf32>
    %947 = arith.addf %946, %463 : vector<8x32xf32>
    %cst_416 = arith.constant 0.000000e+00 : f32
    %948 = vector.broadcast %cst_416 : f32 to vector<8x32xf32>
    %949 = arith.maximumf %947, %948 : vector<8x32xf32>
    %c0_417 = arith.constant 0 : index
    %c0_418 = arith.constant 0 : index
    %950 = vector.load %arg46[%c0_417, %c0_418] : memref<32x96xf32, #tpu.memory_space<vmem>>, vector<32x96xf32>
    %cst_419 = arith.constant dense<0.000000e+00> : vector<8x96xf32>
    %951 = tpu.matmul %949, %950, %cst_419 {dimension_numbers = #tpu.dot_dimension_numbers<[1], [0], [0], [1], [0, 0, 1, 1], [], []>} : vector<8x32xf32>, vector<32x96xf32>, vector<8x96xf32> -> vector<8x96xf32>
    %c0_420 = arith.constant 0 : index
    %c0_421 = arith.constant 0 : index
    %952 = vector.load %arg47[%c0_420, %c0_421] : memref<1x96xf32, #tpu.memory_space<vmem>>, vector<1x96xf32>
    %953 = vector.broadcast %952 : vector<1x96xf32> to vector<8x96xf32>
    %954 = arith.addf %951, %953 : vector<8x96xf32>
    %c0_422 = arith.constant 0 : index
    %c0_423 = arith.constant 0 : index
    %955 = vector.load %arg48[%c0_422, %c0_423] : memref<32x96xf32, #tpu.memory_space<vmem>>, vector<32x96xf32>
    %cst_424 = arith.constant dense<0.000000e+00> : vector<8x96xf32>
    %956 = tpu.matmul %882, %955, %cst_424 {dimension_numbers = #tpu.dot_dimension_numbers<[1], [0], [0], [1], [0, 0, 1, 1], [], []>} : vector<8x32xf32>, vector<32x96xf32>, vector<8x96xf32> -> vector<8x96xf32>
    %c0_425 = arith.constant 0 : index
    %c0_426 = arith.constant 0 : index
    %957 = vector.load %arg49[%c0_425, %c0_426] : memref<1x96xf32, #tpu.memory_space<vmem>>, vector<1x96xf32>
    %958 = vector.broadcast %957 : vector<1x96xf32> to vector<8x96xf32>
    %959 = arith.addf %956, %958 : vector<8x96xf32>
    %960 = vector.extract_strided_slice %954 {offsets = [0, 0], sizes = [8, 32], strides = [1, 1]} : vector<8x96xf32> to vector<8x32xf32>
    %961 = vector.extract_strided_slice %959 {offsets = [0, 0], sizes = [8, 32], strides = [1, 1]} : vector<8x96xf32> to vector<8x32xf32>
    %962 = arith.addf %960, %961 : vector<8x32xf32>
    %cst_427 = arith.constant 5.000000e-01 : f32
    %963 = vector.broadcast %cst_427 : f32 to vector<8x32xf32>
    %964 = arith.mulf %963, %962 : vector<8x32xf32>
    %965 = math.tanh %964 : vector<8x32xf32>
    %cst_428 = arith.constant 1.000000e+00 : f32
    %966 = vector.broadcast %cst_428 : f32 to vector<8x32xf32>
    %967 = arith.addf %965, %966 : vector<8x32xf32>
    %cst_429 = arith.constant 5.000000e-01 : f32
    %968 = vector.broadcast %cst_429 : f32 to vector<8x32xf32>
    %969 = arith.mulf %968, %967 : vector<8x32xf32>
    %970 = vector.extract_strided_slice %954 {offsets = [0, 32], sizes = [8, 32], strides = [1, 1]} : vector<8x96xf32> to vector<8x32xf32>
    %971 = vector.extract_strided_slice %959 {offsets = [0, 32], sizes = [8, 32], strides = [1, 1]} : vector<8x96xf32> to vector<8x32xf32>
    %972 = arith.addf %970, %971 : vector<8x32xf32>
    %cst_430 = arith.constant 5.000000e-01 : f32
    %973 = vector.broadcast %cst_430 : f32 to vector<8x32xf32>
    %974 = arith.mulf %973, %972 : vector<8x32xf32>
    %975 = math.tanh %974 : vector<8x32xf32>
    %cst_431 = arith.constant 1.000000e+00 : f32
    %976 = vector.broadcast %cst_431 : f32 to vector<8x32xf32>
    %977 = arith.addf %975, %976 : vector<8x32xf32>
    %cst_432 = arith.constant 5.000000e-01 : f32
    %978 = vector.broadcast %cst_432 : f32 to vector<8x32xf32>
    %979 = arith.mulf %978, %977 : vector<8x32xf32>
    %980 = vector.extract_strided_slice %954 {offsets = [0, 64], sizes = [8, 32], strides = [1, 1]} : vector<8x96xf32> to vector<8x32xf32>
    %981 = vector.extract_strided_slice %959 {offsets = [0, 64], sizes = [8, 32], strides = [1, 1]} : vector<8x96xf32> to vector<8x32xf32>
    %982 = arith.mulf %969, %981 : vector<8x32xf32>
    %983 = arith.addf %980, %982 : vector<8x32xf32>
    %984 = math.tanh %983 : vector<8x32xf32>
    %cst_433 = arith.constant 1.000000e+00 : f32
    %985 = vector.broadcast %cst_433 : f32 to vector<8x32xf32>
    %986 = arith.subf %985, %979 : vector<8x32xf32>
    %987 = arith.mulf %986, %984 : vector<8x32xf32>
    %988 = arith.mulf %979, %882 : vector<8x32xf32>
    %989 = arith.addf %987, %988 : vector<8x32xf32>
    %c0_434 = arith.constant 0 : index
    %c0_435 = arith.constant 0 : index
    %990 = vector.load %arg50[%c0_434, %c0_435] : memref<32x56xf32, #tpu.memory_space<vmem>>, vector<32x56xf32>
    %cst_436 = arith.constant dense<0.000000e+00> : vector<8x56xf32>
    %991 = tpu.matmul %989, %990, %cst_436 {dimension_numbers = #tpu.dot_dimension_numbers<[1], [0], [0], [1], [0, 0, 1, 1], [], []>} : vector<8x32xf32>, vector<32x56xf32>, vector<8x56xf32> -> vector<8x56xf32>
    %c0_437 = arith.constant 0 : index
    %c0_438 = arith.constant 0 : index
    %992 = vector.load %arg51[%c0_437, %c0_438] : memref<1x56xf32, #tpu.memory_space<vmem>>, vector<1x56xf32>
    %993 = vector.broadcast %992 : vector<1x56xf32> to vector<8x56xf32>
    %994 = arith.addf %991, %993 : vector<8x56xf32>
    %995 = vector.broadcast %424 : vector<8x1xf32> to vector<8x56xf32>
    %996 = arith.mulf %994, %995 : vector<8x56xf32>
    %997 = arith.addf %890, %996 : vector<8x56xf32>
    %c4 = arith.constant 4 : index
    %c0_439 = arith.constant 0 : index
    %c0_440 = arith.constant 0 : index
    %998 = vector.load %arg52[%c4, %c0_439, %c0_440] : memref<7x8x56xf32, #tpu.memory_space<vmem>>, vector<1x8x56xf32>
    %999 = vector.shape_cast %998 : vector<1x8x56xf32> to vector<8x56xf32>
    %1000 = vector.shape_cast %997 : vector<8x56xf32> to vector<1x8x56xf32>
    tpu.vector_store %arg52[%c4, %c0_439, %c0_440], %1000 {strides = array<i32>} : memref<7x8x56xf32, #tpu.memory_space<vmem>>, vector<1x8x56xf32>,
    %c0_441 = arith.constant 0 : index
    %c0_442 = arith.constant 0 : index
    %1001 = vector.load %arg35[%c0_441, %c0_442] : memref<56x96xf32, #tpu.memory_space<vmem>>, vector<56x96xf32>
    %cst_443 = arith.constant dense<0.000000e+00> : vector<8x96xf32>
    %1002 = tpu.matmul %997, %1001, %cst_443 {dimension_numbers = #tpu.dot_dimension_numbers<[1], [0], [0], [1], [0, 0, 1, 1], [], []>} : vector<8x56xf32>, vector<56x96xf32>, vector<8x96xf32> -> vector<8x96xf32>
    %1003 = vector.extract_strided_slice %1002 {offsets = [0, 0], sizes = [8, 32], strides = [1, 1]} : vector<8x96xf32> to vector<8x32xf32>
    %1004 = vector.extract_strided_slice %1003 {offsets = [0, 0], sizes = [1, 32], strides = [1, 1]} : vector<8x32xf32> to vector<1x32xf32>
    %1005 = vector.shape_cast %1004 : vector<1x32xf32> to vector<1x32xf32>
    %1006 = vector.broadcast %1005 : vector<1x32xf32> to vector<8x32xf32>
    %1007 = vector.extract_strided_slice %1003 {offsets = [1, 0], sizes = [1, 32], strides = [1, 1]} : vector<8x32xf32> to vector<1x32xf32>
    %1008 = vector.shape_cast %1007 : vector<1x32xf32> to vector<1x32xf32>
    %1009 = vector.broadcast %1008 : vector<1x32xf32> to vector<8x32xf32>
    %1010 = vector.extract_strided_slice %1003 {offsets = [2, 0], sizes = [1, 32], strides = [1, 1]} : vector<8x32xf32> to vector<1x32xf32>
    %1011 = vector.shape_cast %1010 : vector<1x32xf32> to vector<1x32xf32>
    %1012 = vector.broadcast %1011 : vector<1x32xf32> to vector<8x32xf32>
    %1013 = vector.extract_strided_slice %1003 {offsets = [3, 0], sizes = [1, 32], strides = [1, 1]} : vector<8x32xf32> to vector<1x32xf32>
    %1014 = vector.shape_cast %1013 : vector<1x32xf32> to vector<1x32xf32>
    %1015 = vector.broadcast %1014 : vector<1x32xf32> to vector<8x32xf32>
    %1016 = vector.extract_strided_slice %1003 {offsets = [4, 0], sizes = [1, 32], strides = [1, 1]} : vector<8x32xf32> to vector<1x32xf32>
    %1017 = vector.shape_cast %1016 : vector<1x32xf32> to vector<1x32xf32>
    %1018 = vector.broadcast %1017 : vector<1x32xf32> to vector<8x32xf32>
    %1019 = vector.extract_strided_slice %1003 {offsets = [5, 0], sizes = [1, 32], strides = [1, 1]} : vector<8x32xf32> to vector<1x32xf32>
    %1020 = vector.shape_cast %1019 : vector<1x32xf32> to vector<1x32xf32>
    %1021 = vector.broadcast %1020 : vector<1x32xf32> to vector<8x32xf32>
    %1022 = vector.extract_strided_slice %1003 {offsets = [6, 0], sizes = [1, 32], strides = [1, 1]} : vector<8x32xf32> to vector<1x32xf32>
    %1023 = vector.shape_cast %1022 : vector<1x32xf32> to vector<1x32xf32>
    %1024 = vector.broadcast %1023 : vector<1x32xf32> to vector<8x32xf32>
    %1025 = vector.extract_strided_slice %1003 {offsets = [7, 0], sizes = [1, 32], strides = [1, 1]} : vector<8x32xf32> to vector<1x32xf32>
    %1026 = vector.shape_cast %1025 : vector<1x32xf32> to vector<1x32xf32>
    %1027 = vector.broadcast %1026 : vector<1x32xf32> to vector<8x32xf32>
    %1028 = tpu.concatenate %1006, %1009, %1012, %1015, %1018, %1021, %1024, %1027 in 0 : vector<8x32xf32>, vector<8x32xf32>, vector<8x32xf32>, vector<8x32xf32>, vector<8x32xf32>, vector<8x32xf32>, vector<8x32xf32>, vector<8x32xf32> -> vector<64x32xf32>
    %1029 = vector.extract_strided_slice %1002 {offsets = [0, 32], sizes = [8, 32], strides = [1, 1]} : vector<8x96xf32> to vector<8x32xf32>
    %1030 = tpu.concatenate %1029, %1029, %1029, %1029, %1029, %1029, %1029, %1029 in 0 : vector<8x32xf32>, vector<8x32xf32>, vector<8x32xf32>, vector<8x32xf32>, vector<8x32xf32>, vector<8x32xf32>, vector<8x32xf32>, vector<8x32xf32> -> vector<64x32xf32>
    %1031 = arith.addf %1028, %1030 : vector<64x32xf32>
    %1032 = arith.addf %1031, %458 : vector<64x32xf32>
    %cst_444 = arith.constant 0.000000e+00 : f32
    %1033 = vector.broadcast %cst_444 : f32 to vector<64x32xf32>
    %1034 = arith.maximumf %1032, %1033 : vector<64x32xf32>
    %c0_445 = arith.constant 0 : index
    %c0_446 = arith.constant 0 : index
    %1035 = vector.load %arg39[%c0_445, %c0_446] : memref<32x32xf32, #tpu.memory_space<vmem>>, vector<32x32xf32>
    %cst_447 = arith.constant dense<0.000000e+00> : vector<64x32xf32>
    %1036 = tpu.matmul %1034, %1035, %cst_447 {dimension_numbers = #tpu.dot_dimension_numbers<[1], [0], [0], [1], [0, 0, 1, 1], [], []>} : vector<64x32xf32>, vector<32x32xf32>, vector<64x32xf32> -> vector<64x32xf32>
    %c0_448 = arith.constant 0 : index
    %c0_449 = arith.constant 0 : index
    %1037 = vector.load %arg40[%c0_448, %c0_449] : memref<1x32xf32, #tpu.memory_space<vmem>>, vector<1x32xf32>
    %1038 = vector.broadcast %1037 : vector<1x32xf32> to vector<64x32xf32>
    %1039 = arith.addf %1036, %1038 : vector<64x32xf32>
    %cst_450 = arith.constant 0.000000e+00 : f32
    %1040 = vector.broadcast %cst_450 : f32 to vector<64x32xf32>
    %1041 = arith.maximumf %1039, %1040 : vector<64x32xf32>
    %c0_451 = arith.constant 0 : index
    %c0_452 = arith.constant 0 : index
    %1042 = vector.load %arg41[%c0_451, %c0_452] : memref<32x32xf32, #tpu.memory_space<vmem>>, vector<32x32xf32>
    %cst_453 = arith.constant dense<0.000000e+00> : vector<64x32xf32>
    %1043 = tpu.matmul %1041, %1042, %cst_453 {dimension_numbers = #tpu.dot_dimension_numbers<[1], [0], [0], [1], [0, 0, 1, 1], [], []>} : vector<64x32xf32>, vector<32x32xf32>, vector<64x32xf32> -> vector<64x32xf32>
    %c0_454 = arith.constant 0 : index
    %c0_455 = arith.constant 0 : index
    %1044 = vector.load %arg42[%c0_454, %c0_455] : memref<1x32xf32, #tpu.memory_space<vmem>>, vector<1x32xf32>
    %1045 = vector.broadcast %1044 : vector<1x32xf32> to vector<64x32xf32>
    %1046 = arith.addf %1043, %1045 : vector<64x32xf32>
    %cst_456 = arith.constant 0.000000e+00 : f32
    %1047 = vector.broadcast %cst_456 : f32 to vector<64x32xf32>
    %1048 = arith.maximumf %1046, %1047 : vector<64x32xf32>
    %cst_457 = arith.constant dense<0.000000e+00> : vector<8x32xf32>
    %1049 = tpu.matmul %464, %1048, %cst_457 {dimension_numbers = #tpu.dot_dimension_numbers<[1], [0], [0], [1], [0, 0, 1, 1], [], []>} : vector<8x64xf32>, vector<64x32xf32>, vector<8x32xf32> -> vector<8x32xf32>
    %1050 = vector.extract_strided_slice %1002 {offsets = [0, 64], sizes = [8, 32], strides = [1, 1]} : vector<8x96xf32> to vector<8x32xf32>
    %c0_458 = arith.constant 0 : index
    %c0_459 = arith.constant 0 : index
    %1051 = vector.load %arg44[%c0_458, %c0_459] : memref<32x32xf32, #tpu.memory_space<vmem>>, vector<32x32xf32>
    %cst_460 = arith.constant dense<0.000000e+00> : vector<8x32xf32>
    %1052 = tpu.matmul %1049, %1051, %cst_460 {dimension_numbers = #tpu.dot_dimension_numbers<[1], [0], [0], [1], [0, 0, 1, 1], [], []>} : vector<8x32xf32>, vector<32x32xf32>, vector<8x32xf32> -> vector<8x32xf32>
    %1053 = arith.addf %1050, %1052 : vector<8x32xf32>
    %1054 = arith.addf %1053, %463 : vector<8x32xf32>
    %cst_461 = arith.constant 0.000000e+00 : f32
    %1055 = vector.broadcast %cst_461 : f32 to vector<8x32xf32>
    %1056 = arith.maximumf %1054, %1055 : vector<8x32xf32>
    %c0_462 = arith.constant 0 : index
    %c0_463 = arith.constant 0 : index
    %1057 = vector.load %arg46[%c0_462, %c0_463] : memref<32x96xf32, #tpu.memory_space<vmem>>, vector<32x96xf32>
    %cst_464 = arith.constant dense<0.000000e+00> : vector<8x96xf32>
    %1058 = tpu.matmul %1056, %1057, %cst_464 {dimension_numbers = #tpu.dot_dimension_numbers<[1], [0], [0], [1], [0, 0, 1, 1], [], []>} : vector<8x32xf32>, vector<32x96xf32>, vector<8x96xf32> -> vector<8x96xf32>
    %c0_465 = arith.constant 0 : index
    %c0_466 = arith.constant 0 : index
    %1059 = vector.load %arg47[%c0_465, %c0_466] : memref<1x96xf32, #tpu.memory_space<vmem>>, vector<1x96xf32>
    %1060 = vector.broadcast %1059 : vector<1x96xf32> to vector<8x96xf32>
    %1061 = arith.addf %1058, %1060 : vector<8x96xf32>
    %c0_467 = arith.constant 0 : index
    %c0_468 = arith.constant 0 : index
    %1062 = vector.load %arg48[%c0_467, %c0_468] : memref<32x96xf32, #tpu.memory_space<vmem>>, vector<32x96xf32>
    %cst_469 = arith.constant dense<0.000000e+00> : vector<8x96xf32>
    %1063 = tpu.matmul %989, %1062, %cst_469 {dimension_numbers = #tpu.dot_dimension_numbers<[1], [0], [0], [1], [0, 0, 1, 1], [], []>} : vector<8x32xf32>, vector<32x96xf32>, vector<8x96xf32> -> vector<8x96xf32>
    %c0_470 = arith.constant 0 : index
    %c0_471 = arith.constant 0 : index
    %1064 = vector.load %arg49[%c0_470, %c0_471] : memref<1x96xf32, #tpu.memory_space<vmem>>, vector<1x96xf32>
    %1065 = vector.broadcast %1064 : vector<1x96xf32> to vector<8x96xf32>
    %1066 = arith.addf %1063, %1065 : vector<8x96xf32>
    %1067 = vector.extract_strided_slice %1061 {offsets = [0, 0], sizes = [8, 32], strides = [1, 1]} : vector<8x96xf32> to vector<8x32xf32>
    %1068 = vector.extract_strided_slice %1066 {offsets = [0, 0], sizes = [8, 32], strides = [1, 1]} : vector<8x96xf32> to vector<8x32xf32>
    %1069 = arith.addf %1067, %1068 : vector<8x32xf32>
    %cst_472 = arith.constant 5.000000e-01 : f32
    %1070 = vector.broadcast %cst_472 : f32 to vector<8x32xf32>
    %1071 = arith.mulf %1070, %1069 : vector<8x32xf32>
    %1072 = math.tanh %1071 : vector<8x32xf32>
    %cst_473 = arith.constant 1.000000e+00 : f32
    %1073 = vector.broadcast %cst_473 : f32 to vector<8x32xf32>
    %1074 = arith.addf %1072, %1073 : vector<8x32xf32>
    %cst_474 = arith.constant 5.000000e-01 : f32
    %1075 = vector.broadcast %cst_474 : f32 to vector<8x32xf32>
    %1076 = arith.mulf %1075, %1074 : vector<8x32xf32>
    %1077 = vector.extract_strided_slice %1061 {offsets = [0, 32], sizes = [8, 32], strides = [1, 1]} : vector<8x96xf32> to vector<8x32xf32>
    %1078 = vector.extract_strided_slice %1066 {offsets = [0, 32], sizes = [8, 32], strides = [1, 1]} : vector<8x96xf32> to vector<8x32xf32>
    %1079 = arith.addf %1077, %1078 : vector<8x32xf32>
    %cst_475 = arith.constant 5.000000e-01 : f32
    %1080 = vector.broadcast %cst_475 : f32 to vector<8x32xf32>
    %1081 = arith.mulf %1080, %1079 : vector<8x32xf32>
    %1082 = math.tanh %1081 : vector<8x32xf32>
    %cst_476 = arith.constant 1.000000e+00 : f32
    %1083 = vector.broadcast %cst_476 : f32 to vector<8x32xf32>
    %1084 = arith.addf %1082, %1083 : vector<8x32xf32>
    %cst_477 = arith.constant 5.000000e-01 : f32
    %1085 = vector.broadcast %cst_477 : f32 to vector<8x32xf32>
    %1086 = arith.mulf %1085, %1084 : vector<8x32xf32>
    %1087 = vector.extract_strided_slice %1061 {offsets = [0, 64], sizes = [8, 32], strides = [1, 1]} : vector<8x96xf32> to vector<8x32xf32>
    %1088 = vector.extract_strided_slice %1066 {offsets = [0, 64], sizes = [8, 32], strides = [1, 1]} : vector<8x96xf32> to vector<8x32xf32>
    %1089 = arith.mulf %1076, %1088 : vector<8x32xf32>
    %1090 = arith.addf %1087, %1089 : vector<8x32xf32>
    %1091 = math.tanh %1090 : vector<8x32xf32>
    %cst_478 = arith.constant 1.000000e+00 : f32
    %1092 = vector.broadcast %cst_478 : f32 to vector<8x32xf32>
    %1093 = arith.subf %1092, %1086 : vector<8x32xf32>
    %1094 = arith.mulf %1093, %1091 : vector<8x32xf32>
    %1095 = arith.mulf %1086, %989 : vector<8x32xf32>
    %1096 = arith.addf %1094, %1095 : vector<8x32xf32>
    %c0_479 = arith.constant 0 : index
    %c0_480 = arith.constant 0 : index
    %1097 = vector.load %arg50[%c0_479, %c0_480] : memref<32x56xf32, #tpu.memory_space<vmem>>, vector<32x56xf32>
    %cst_481 = arith.constant dense<0.000000e+00> : vector<8x56xf32>
    %1098 = tpu.matmul %1096, %1097, %cst_481 {dimension_numbers = #tpu.dot_dimension_numbers<[1], [0], [0], [1], [0, 0, 1, 1], [], []>} : vector<8x32xf32>, vector<32x56xf32>, vector<8x56xf32> -> vector<8x56xf32>
    %c0_482 = arith.constant 0 : index
    %c0_483 = arith.constant 0 : index
    %1099 = vector.load %arg51[%c0_482, %c0_483] : memref<1x56xf32, #tpu.memory_space<vmem>>, vector<1x56xf32>
    %1100 = vector.broadcast %1099 : vector<1x56xf32> to vector<8x56xf32>
    %1101 = arith.addf %1098, %1100 : vector<8x56xf32>
    %1102 = vector.broadcast %424 : vector<8x1xf32> to vector<8x56xf32>
    %1103 = arith.mulf %1101, %1102 : vector<8x56xf32>
    %1104 = arith.addf %997, %1103 : vector<8x56xf32>
    %c5 = arith.constant 5 : index
    %c0_484 = arith.constant 0 : index
    %c0_485 = arith.constant 0 : index
    %1105 = vector.load %arg52[%c5, %c0_484, %c0_485] : memref<7x8x56xf32, #tpu.memory_space<vmem>>, vector<1x8x56xf32>
    %1106 = vector.shape_cast %1105 : vector<1x8x56xf32> to vector<8x56xf32>
    %1107 = vector.shape_cast %1104 : vector<8x56xf32> to vector<1x8x56xf32>
    tpu.vector_store %arg52[%c5, %c0_484, %c0_485], %1107 {strides = array<i32>} : memref<7x8x56xf32, #tpu.memory_space<vmem>>, vector<1x8x56xf32>,
    %c0_486 = arith.constant 0 : index
    %c0_487 = arith.constant 0 : index
    %1108 = vector.load %arg35[%c0_486, %c0_487] : memref<56x96xf32, #tpu.memory_space<vmem>>, vector<56x96xf32>
    %cst_488 = arith.constant dense<0.000000e+00> : vector<8x96xf32>
    %1109 = tpu.matmul %1104, %1108, %cst_488 {dimension_numbers = #tpu.dot_dimension_numbers<[1], [0], [0], [1], [0, 0, 1, 1], [], []>} : vector<8x56xf32>, vector<56x96xf32>, vector<8x96xf32> -> vector<8x96xf32>
    %1110 = vector.extract_strided_slice %1109 {offsets = [0, 0], sizes = [8, 32], strides = [1, 1]} : vector<8x96xf32> to vector<8x32xf32>
    %1111 = vector.extract_strided_slice %1110 {offsets = [0, 0], sizes = [1, 32], strides = [1, 1]} : vector<8x32xf32> to vector<1x32xf32>
    %1112 = vector.shape_cast %1111 : vector<1x32xf32> to vector<1x32xf32>
    %1113 = vector.broadcast %1112 : vector<1x32xf32> to vector<8x32xf32>
    %1114 = vector.extract_strided_slice %1110 {offsets = [1, 0], sizes = [1, 32], strides = [1, 1]} : vector<8x32xf32> to vector<1x32xf32>
    %1115 = vector.shape_cast %1114 : vector<1x32xf32> to vector<1x32xf32>
    %1116 = vector.broadcast %1115 : vector<1x32xf32> to vector<8x32xf32>
    %1117 = vector.extract_strided_slice %1110 {offsets = [2, 0], sizes = [1, 32], strides = [1, 1]} : vector<8x32xf32> to vector<1x32xf32>
    %1118 = vector.shape_cast %1117 : vector<1x32xf32> to vector<1x32xf32>
    %1119 = vector.broadcast %1118 : vector<1x32xf32> to vector<8x32xf32>
    %1120 = vector.extract_strided_slice %1110 {offsets = [3, 0], sizes = [1, 32], strides = [1, 1]} : vector<8x32xf32> to vector<1x32xf32>
    %1121 = vector.shape_cast %1120 : vector<1x32xf32> to vector<1x32xf32>
    %1122 = vector.broadcast %1121 : vector<1x32xf32> to vector<8x32xf32>
    %1123 = vector.extract_strided_slice %1110 {offsets = [4, 0], sizes = [1, 32], strides = [1, 1]} : vector<8x32xf32> to vector<1x32xf32>
    %1124 = vector.shape_cast %1123 : vector<1x32xf32> to vector<1x32xf32>
    %1125 = vector.broadcast %1124 : vector<1x32xf32> to vector<8x32xf32>
    %1126 = vector.extract_strided_slice %1110 {offsets = [5, 0], sizes = [1, 32], strides = [1, 1]} : vector<8x32xf32> to vector<1x32xf32>
    %1127 = vector.shape_cast %1126 : vector<1x32xf32> to vector<1x32xf32>
    %1128 = vector.broadcast %1127 : vector<1x32xf32> to vector<8x32xf32>
    %1129 = vector.extract_strided_slice %1110 {offsets = [6, 0], sizes = [1, 32], strides = [1, 1]} : vector<8x32xf32> to vector<1x32xf32>
    %1130 = vector.shape_cast %1129 : vector<1x32xf32> to vector<1x32xf32>
    %1131 = vector.broadcast %1130 : vector<1x32xf32> to vector<8x32xf32>
    %1132 = vector.extract_strided_slice %1110 {offsets = [7, 0], sizes = [1, 32], strides = [1, 1]} : vector<8x32xf32> to vector<1x32xf32>
    %1133 = vector.shape_cast %1132 : vector<1x32xf32> to vector<1x32xf32>
    %1134 = vector.broadcast %1133 : vector<1x32xf32> to vector<8x32xf32>
    %1135 = tpu.concatenate %1113, %1116, %1119, %1122, %1125, %1128, %1131, %1134 in 0 : vector<8x32xf32>, vector<8x32xf32>, vector<8x32xf32>, vector<8x32xf32>, vector<8x32xf32>, vector<8x32xf32>, vector<8x32xf32>, vector<8x32xf32> -> vector<64x32xf32>
    %1136 = vector.extract_strided_slice %1109 {offsets = [0, 32], sizes = [8, 32], strides = [1, 1]} : vector<8x96xf32> to vector<8x32xf32>
    %1137 = tpu.concatenate %1136, %1136, %1136, %1136, %1136, %1136, %1136, %1136 in 0 : vector<8x32xf32>, vector<8x32xf32>, vector<8x32xf32>, vector<8x32xf32>, vector<8x32xf32>, vector<8x32xf32>, vector<8x32xf32>, vector<8x32xf32> -> vector<64x32xf32>
    %1138 = arith.addf %1135, %1137 : vector<64x32xf32>
    %1139 = arith.addf %1138, %458 : vector<64x32xf32>
    %cst_489 = arith.constant 0.000000e+00 : f32
    %1140 = vector.broadcast %cst_489 : f32 to vector<64x32xf32>
    %1141 = arith.maximumf %1139, %1140 : vector<64x32xf32>
    %c0_490 = arith.constant 0 : index
    %c0_491 = arith.constant 0 : index
    %1142 = vector.load %arg39[%c0_490, %c0_491] : memref<32x32xf32, #tpu.memory_space<vmem>>, vector<32x32xf32>
    %cst_492 = arith.constant dense<0.000000e+00> : vector<64x32xf32>
    %1143 = tpu.matmul %1141, %1142, %cst_492 {dimension_numbers = #tpu.dot_dimension_numbers<[1], [0], [0], [1], [0, 0, 1, 1], [], []>} : vector<64x32xf32>, vector<32x32xf32>, vector<64x32xf32> -> vector<64x32xf32>
    %c0_493 = arith.constant 0 : index
    %c0_494 = arith.constant 0 : index
    %1144 = vector.load %arg40[%c0_493, %c0_494] : memref<1x32xf32, #tpu.memory_space<vmem>>, vector<1x32xf32>
    %1145 = vector.broadcast %1144 : vector<1x32xf32> to vector<64x32xf32>
    %1146 = arith.addf %1143, %1145 : vector<64x32xf32>
    %cst_495 = arith.constant 0.000000e+00 : f32
    %1147 = vector.broadcast %cst_495 : f32 to vector<64x32xf32>
    %1148 = arith.maximumf %1146, %1147 : vector<64x32xf32>
    %c0_496 = arith.constant 0 : index
    %c0_497 = arith.constant 0 : index
    %1149 = vector.load %arg41[%c0_496, %c0_497] : memref<32x32xf32, #tpu.memory_space<vmem>>, vector<32x32xf32>
    %cst_498 = arith.constant dense<0.000000e+00> : vector<64x32xf32>
    %1150 = tpu.matmul %1148, %1149, %cst_498 {dimension_numbers = #tpu.dot_dimension_numbers<[1], [0], [0], [1], [0, 0, 1, 1], [], []>} : vector<64x32xf32>, vector<32x32xf32>, vector<64x32xf32> -> vector<64x32xf32>
    %c0_499 = arith.constant 0 : index
    %c0_500 = arith.constant 0 : index
    %1151 = vector.load %arg42[%c0_499, %c0_500] : memref<1x32xf32, #tpu.memory_space<vmem>>, vector<1x32xf32>
    %1152 = vector.broadcast %1151 : vector<1x32xf32> to vector<64x32xf32>
    %1153 = arith.addf %1150, %1152 : vector<64x32xf32>
    %cst_501 = arith.constant 0.000000e+00 : f32
    %1154 = vector.broadcast %cst_501 : f32 to vector<64x32xf32>
    %1155 = arith.maximumf %1153, %1154 : vector<64x32xf32>
    %cst_502 = arith.constant dense<0.000000e+00> : vector<8x32xf32>
    %1156 = tpu.matmul %464, %1155, %cst_502 {dimension_numbers = #tpu.dot_dimension_numbers<[1], [0], [0], [1], [0, 0, 1, 1], [], []>} : vector<8x64xf32>, vector<64x32xf32>, vector<8x32xf32> -> vector<8x32xf32>
    %1157 = vector.extract_strided_slice %1109 {offsets = [0, 64], sizes = [8, 32], strides = [1, 1]} : vector<8x96xf32> to vector<8x32xf32>
    %c0_503 = arith.constant 0 : index
    %c0_504 = arith.constant 0 : index
    %1158 = vector.load %arg44[%c0_503, %c0_504] : memref<32x32xf32, #tpu.memory_space<vmem>>, vector<32x32xf32>
    %cst_505 = arith.constant dense<0.000000e+00> : vector<8x32xf32>
    %1159 = tpu.matmul %1156, %1158, %cst_505 {dimension_numbers = #tpu.dot_dimension_numbers<[1], [0], [0], [1], [0, 0, 1, 1], [], []>} : vector<8x32xf32>, vector<32x32xf32>, vector<8x32xf32> -> vector<8x32xf32>
    %1160 = arith.addf %1157, %1159 : vector<8x32xf32>
    %1161 = arith.addf %1160, %463 : vector<8x32xf32>
    %cst_506 = arith.constant 0.000000e+00 : f32
    %1162 = vector.broadcast %cst_506 : f32 to vector<8x32xf32>
    %1163 = arith.maximumf %1161, %1162 : vector<8x32xf32>
    %c0_507 = arith.constant 0 : index
    %c0_508 = arith.constant 0 : index
    %1164 = vector.load %arg46[%c0_507, %c0_508] : memref<32x96xf32, #tpu.memory_space<vmem>>, vector<32x96xf32>
    %cst_509 = arith.constant dense<0.000000e+00> : vector<8x96xf32>
    %1165 = tpu.matmul %1163, %1164, %cst_509 {dimension_numbers = #tpu.dot_dimension_numbers<[1], [0], [0], [1], [0, 0, 1, 1], [], []>} : vector<8x32xf32>, vector<32x96xf32>, vector<8x96xf32> -> vector<8x96xf32>
    %c0_510 = arith.constant 0 : index
    %c0_511 = arith.constant 0 : index
    %1166 = vector.load %arg47[%c0_510, %c0_511] : memref<1x96xf32, #tpu.memory_space<vmem>>, vector<1x96xf32>
    %1167 = vector.broadcast %1166 : vector<1x96xf32> to vector<8x96xf32>
    %1168 = arith.addf %1165, %1167 : vector<8x96xf32>
    %c0_512 = arith.constant 0 : index
    %c0_513 = arith.constant 0 : index
    %1169 = vector.load %arg48[%c0_512, %c0_513] : memref<32x96xf32, #tpu.memory_space<vmem>>, vector<32x96xf32>
    %cst_514 = arith.constant dense<0.000000e+00> : vector<8x96xf32>
    %1170 = tpu.matmul %1096, %1169, %cst_514 {dimension_numbers = #tpu.dot_dimension_numbers<[1], [0], [0], [1], [0, 0, 1, 1], [], []>} : vector<8x32xf32>, vector<32x96xf32>, vector<8x96xf32> -> vector<8x96xf32>
    %c0_515 = arith.constant 0 : index
    %c0_516 = arith.constant 0 : index
    %1171 = vector.load %arg49[%c0_515, %c0_516] : memref<1x96xf32, #tpu.memory_space<vmem>>, vector<1x96xf32>
    %1172 = vector.broadcast %1171 : vector<1x96xf32> to vector<8x96xf32>
    %1173 = arith.addf %1170, %1172 : vector<8x96xf32>
    %1174 = vector.extract_strided_slice %1168 {offsets = [0, 0], sizes = [8, 32], strides = [1, 1]} : vector<8x96xf32> to vector<8x32xf32>
    %1175 = vector.extract_strided_slice %1173 {offsets = [0, 0], sizes = [8, 32], strides = [1, 1]} : vector<8x96xf32> to vector<8x32xf32>
    %1176 = arith.addf %1174, %1175 : vector<8x32xf32>
    %cst_517 = arith.constant 5.000000e-01 : f32
    %1177 = vector.broadcast %cst_517 : f32 to vector<8x32xf32>
    %1178 = arith.mulf %1177, %1176 : vector<8x32xf32>
    %1179 = math.tanh %1178 : vector<8x32xf32>
    %cst_518 = arith.constant 1.000000e+00 : f32
    %1180 = vector.broadcast %cst_518 : f32 to vector<8x32xf32>
    %1181 = arith.addf %1179, %1180 : vector<8x32xf32>
    %cst_519 = arith.constant 5.000000e-01 : f32
    %1182 = vector.broadcast %cst_519 : f32 to vector<8x32xf32>
    %1183 = arith.mulf %1182, %1181 : vector<8x32xf32>
    %1184 = vector.extract_strided_slice %1168 {offsets = [0, 32], sizes = [8, 32], strides = [1, 1]} : vector<8x96xf32> to vector<8x32xf32>
    %1185 = vector.extract_strided_slice %1173 {offsets = [0, 32], sizes = [8, 32], strides = [1, 1]} : vector<8x96xf32> to vector<8x32xf32>
    %1186 = arith.addf %1184, %1185 : vector<8x32xf32>
    %cst_520 = arith.constant 5.000000e-01 : f32
    %1187 = vector.broadcast %cst_520 : f32 to vector<8x32xf32>
    %1188 = arith.mulf %1187, %1186 : vector<8x32xf32>
    %1189 = math.tanh %1188 : vector<8x32xf32>
    %cst_521 = arith.constant 1.000000e+00 : f32
    %1190 = vector.broadcast %cst_521 : f32 to vector<8x32xf32>
    %1191 = arith.addf %1189, %1190 : vector<8x32xf32>
    %cst_522 = arith.constant 5.000000e-01 : f32
    %1192 = vector.broadcast %cst_522 : f32 to vector<8x32xf32>
    %1193 = arith.mulf %1192, %1191 : vector<8x32xf32>
    %1194 = vector.extract_strided_slice %1168 {offsets = [0, 64], sizes = [8, 32], strides = [1, 1]} : vector<8x96xf32> to vector<8x32xf32>
    %1195 = vector.extract_strided_slice %1173 {offsets = [0, 64], sizes = [8, 32], strides = [1, 1]} : vector<8x96xf32> to vector<8x32xf32>
    %1196 = arith.mulf %1183, %1195 : vector<8x32xf32>
    %1197 = arith.addf %1194, %1196 : vector<8x32xf32>
    %1198 = math.tanh %1197 : vector<8x32xf32>
    %cst_523 = arith.constant 1.000000e+00 : f32
    %1199 = vector.broadcast %cst_523 : f32 to vector<8x32xf32>
    %1200 = arith.subf %1199, %1193 : vector<8x32xf32>
    %1201 = arith.mulf %1200, %1198 : vector<8x32xf32>
    %1202 = arith.mulf %1193, %1096 : vector<8x32xf32>
    %1203 = arith.addf %1201, %1202 : vector<8x32xf32>
    %c0_524 = arith.constant 0 : index
    %c0_525 = arith.constant 0 : index
    %1204 = vector.load %arg50[%c0_524, %c0_525] : memref<32x56xf32, #tpu.memory_space<vmem>>, vector<32x56xf32>
    %cst_526 = arith.constant dense<0.000000e+00> : vector<8x56xf32>
    %1205 = tpu.matmul %1203, %1204, %cst_526 {dimension_numbers = #tpu.dot_dimension_numbers<[1], [0], [0], [1], [0, 0, 1, 1], [], []>} : vector<8x32xf32>, vector<32x56xf32>, vector<8x56xf32> -> vector<8x56xf32>
    %c0_527 = arith.constant 0 : index
    %c0_528 = arith.constant 0 : index
    %1206 = vector.load %arg51[%c0_527, %c0_528] : memref<1x56xf32, #tpu.memory_space<vmem>>, vector<1x56xf32>
    %1207 = vector.broadcast %1206 : vector<1x56xf32> to vector<8x56xf32>
    %1208 = arith.addf %1205, %1207 : vector<8x56xf32>
    %1209 = vector.broadcast %424 : vector<8x1xf32> to vector<8x56xf32>
    %1210 = arith.mulf %1208, %1209 : vector<8x56xf32>
    %1211 = arith.addf %1104, %1210 : vector<8x56xf32>
    %c6 = arith.constant 6 : index
    %c0_529 = arith.constant 0 : index
    %c0_530 = arith.constant 0 : index
    %1212 = vector.load %arg52[%c6, %c0_529, %c0_530] : memref<7x8x56xf32, #tpu.memory_space<vmem>>, vector<1x8x56xf32>
    %1213 = vector.shape_cast %1212 : vector<1x8x56xf32> to vector<8x56xf32>
    %1214 = vector.shape_cast %1211 : vector<8x56xf32> to vector<1x8x56xf32>
    tpu.vector_store %arg52[%c6, %c0_529, %c0_530], %1214 {strides = array<i32>} : memref<7x8x56xf32, #tpu.memory_space<vmem>>, vector<1x8x56xf32>,
    return
  }
}

</mosaic_0001>

<bundles_post_ra>
// kernel: tile.26
= control target key start
LH: loop header
LB: loop body
LE: loop exit
PB: predicated region body
PF: predicated region fallthrough
CT: control target
= control target key end

     0   :  { %s22_s0 = inlined_call_operand.vmem [shape: f32[8], index: 0, kind: input, shape index: {}]   ;;  %s23_s1 = inlined_call_operand.vmem [shape: f32[8,8], index: 1, kind: output, shape index: {}]  }
   0x1   :  { %v4_v0 = vld [vmem:[%s22_s0] ss:$0 sm:$0xff] }
   0x2   :  { %5 = vst [vmem:[%s23_s1] sm:$0xff] %v4_v0 }

// kernel: mul.9
= control target key start
LH: loop header
LB: loop body
LE: loop exit
PB: predicated region body
PF: predicated region fallthrough
CT: control target
= control target key end

     0   :  { %s67_s10 = smov 56   ;;  %s68_s11 = smov 40   ;;  %vm3_vm0 = vcmask 64512   ;;  %vm9_vm1 = vcmask 523712   ;;  %vm15_vm2 = vcmask 458112   ;;  %vm21_vm3 = vcmask 392512   ;;  %s111_s0 = inlined_call_operand.vmem [shape: f32[8,8], index: 0, kind: input, shape index: {}]   ;;  %s112_s1 = inlined_call_operand.vmem [shape: f32[64], index: 1, kind: output, shape index: {}]  }
   0x1   :  { %v53_v0 = vld [vmem:[%s111_s0 + $0x7] sm:$0x1]   ;;  %v55_v1 = vld [vmem:[%s111_s0 + $0x5] sm:$0x1]   ;;  %v57_v2 = vld [vmem:[%s111_s0 + $0x3] sm:$0x1]  }
   0x2   :  { %7 = vrot.lane.b32.xlu0 %v53_v0, %s67_s10  ;;  %19 = vrot.lane.b32.xlu1 %v55_v1, %s68_s11  ;;  %s69_s14 = smov 24   ;;  %v54_v3 = vld [vmem:[%s111_s0 + $0x6] sm:$0x1]   ;;  %v56_v4 = vld [vmem:[%s111_s0 + $0x4] sm:$0x1]   ;;  %s70_s21 = smov 48  }
   0x3   :  { %31 = vrot.lane.b32.xlu2 %v57_v2, %s69_s14  ;;  %v58_v5 = vld [vmem:[%s111_s0 + $0x2] sm:$0x1]   ;;  %s71_s22 = smov 32   ;;  %s72_s23 = smov 16   ;;  %v59_v6 = vld [vmem:[%s111_s0 + $0x1] sm:$0x1]  }
   0x4   :  { %s73_s26 = smov 8   ;;  %v2_v7 = vld [vmem:[%s111_s0] sm:$0x1]   ;;  %vm27_vm4 = vcmask 326912   ;;  %vm33_vm5 = vcmask 261312   ;;  %vm39_vm6 = vcmask 195712  }
   0x5   :  { %4 = vst.msk [vmem:[#allocation0] sm:$0x1] %vm3_vm0, %v2_v7   ;;  %vm45_vm7 = vcmask 130112  }
   0xa   :  { %13 = vrot.lane.b32.xlu0 %v54_v3, %s70_s21  ;;  %25 = vrot.lane.b32.xlu1 %v56_v4, %s71_s22 }
   0xb   :  { %37 = vrot.lane.b32.xlu2 %v58_v5, %s72_s23 }
  0x12   :  { %43 = vrot.lane.b32.xlu0 %v59_v6, %s73_s26 }
  0x5d   :  { %v32_v8 = vpop.permute.xlu2 %31  }
  0x65   :  { %v38_v9 = vpop.permute.xlu2 %37  }
  0x74   :  { %v8_v10 = vpop.permute.xlu0 %7   ;;  %v20_v11 = vpop.permute.xlu1 %19  }
  0x75   :  { %10 = vst.msk [vmem:[#allocation0] sm:$0x1] %vm9_vm1, %v8_v10  }
  0x7c   :  { %v14_v12 = vpop.permute.xlu0 %13   ;;  %v26_v13 = vpop.permute.xlu1 %25  }
  0x7d   :  { %16 = vst.msk [vmem:[#allocation0] sm:$0x1] %vm15_vm2, %v14_v12  }
  0x7e   :  { %22 = vst.msk [vmem:[#allocation0] sm:$0x1] %vm21_vm3, %v20_v11  }
  0x7f   :  { %28 = vst.msk [vmem:[#allocation0] sm:$0x1] %vm27_vm4, %v26_v13  }
  0x80   :  { %34 = vst.msk [vmem:[#allocation0] sm:$0x1] %vm33_vm5, %v32_v8  }
  0x81   :  { %40 = vst.msk [vmem:[#allocation0] sm:$0x1] %vm39_vm6, %v38_v9  }
  0x84   :  { %v44_v14 = vpop.permute.xlu0 %43  }
  0x85   :  { %46 = vst.msk [vmem:[#allocation0] sm:$0x1] %vm45_vm7, %v44_v14  }
  0x8c   :  { %v49_v15 = vld [vmem:[#allocation0] sm:$0x1] }
  0x8d   :  { %52 = vst [vmem:[%s112_s1] sm:$0x1] %v49_v15 }

// kernel: tile.15
= control target key start
LH: loop header
LB: loop body
LE: loop exit
PB: predicated region body
PF: predicated region fallthrough
CT: control target
= control target key end

     0   :  { %s43_s10 = smov 20   ;;  %s44_s11 = smov 10   ;;  %vm3_vm0 = vcmask 39936   ;;  %vm9_vm1 = vcmask 203936   ;;  %vm15_vm2 = vcmask 162936   ;;  %vm21_vm3 = vcmask 121936   ;;  %s75_s0 = inlined_call_operand.vmem [shape: s32[5,5], index: 0, kind: input, shape index: {}]   ;;  %s76_s1 = inlined_call_operand.vmem [shape: s32[25], index: 1, kind: output, shape index: {}]  }
   0x1   :  { %v35_v0 = vld [vmem:[%s75_s0 + $0x4] sm:$0x1]   ;;  %v37_v1 = vld [vmem:[%s75_s0 + $0x2] sm:$0x1]   ;;  %v36_v2 = vld [vmem:[%s75_s0 + $0x3] sm:$0x1]  }
   0x2   :  { %7 = vrot.lane.b32.xlu0 %v35_v0, %s43_s10  ;;  %19 = vrot.lane.b32.xlu1 %v37_v1, %s44_s11  ;;  %v38_v3 = vld [vmem:[%s75_s0 + $0x1] sm:$0x1]   ;;  %s45_s16 = smov 15   ;;  %s46_s17 = smov 5   ;;  %v2_v4 = vld [vmem:[%s75_s0] sm:$0x1]  }
   0x3   :  { %4 = vst.msk [vmem:[#allocation0] sm:$0x1] %vm3_vm0, %v2_v4   ;;  %vm27_vm4 = vcmask 80936  }
   0xa   :  { %13 = vrot.lane.b32.xlu0 %v36_v2, %s45_s16  ;;  %25 = vrot.lane.b32.xlu1 %v38_v3, %s46_s17 }
  0x74   :  { %v8_v5 = vpop.permute.xlu0 %7   ;;  %v20_v6 = vpop.permute.xlu1 %19  }
  0x75   :  { %10 = vst.msk [vmem:[#allocation0] sm:$0x1] %vm9_vm1, %v8_v5  }
  0x7c   :  { %v14_v7 = vpop.permute.xlu0 %13   ;;  %v26_v8 = vpop.permute.xlu1 %25  }
  0x7d   :  { %16 = vst.msk [vmem:[#allocation0] sm:$0x1] %vm15_vm2, %v14_v7  }
  0x7e   :  { %22 = vst.msk [vmem:[#allocation0] sm:$0x1] %vm21_vm3, %v20_v6  }
  0x7f   :  { %28 = vst.msk [vmem:[#allocation0] sm:$0x1] %vm27_vm4, %v26_v8  }
  0x86   :  { %v31_v9 = vld [vmem:[#allocation0] sm:$0x1] }
  0x87   :  { %34 = vst [vmem:[%s76_s1] sm:$0x1] %v31_v9 }

// kernel: tile.16
= control target key start
LH: loop header
LB: loop body
LE: loop exit
PB: predicated region body
PF: predicated region fallthrough
CT: control target
= control target key end

     0   :  { %s22_s0 = inlined_call_operand.vmem [shape: s32[25], index: 0, kind: input, shape index: {}]   ;;  %s23_s1 = inlined_call_operand.vmem [shape: s32[8,25], index: 1, kind: output, shape index: {}]  }
   0x1   :  { %v4_v0 = vld [vmem:[%s22_s0] ss:$0 sm:$0xff] }
   0x2   :  { %5 = vst [vmem:[%s23_s1] sm:$0xff] %v4_v0 }

// kernel: cfnet_forward.1
= control target key start
LH: loop header
LB: loop body
LE: loop exit
PB: predicated region body
PF: predicated region fallthrough
CT: control target
= control target key end

     0   :  { %s5926_s3 = smov 6   ;;  %s5927_s7 = smov 7   ;;  %vm236_vm0 = vcmask 457728   ;;  %vm400_vm1 = vcmask 523264   ;;  %vm797_vm2 = vcmask 261120   ;;  %vm1206_vm3 = vcmask 588800   ;;  %s7733_s0 = inlined_call_operand.smem [shape: u32[55], index: -1, kind: input, shape index: {}] }
   0x1   :  { %s5338_s6 = sld [smem:[%s7733_s0 + %s5926_s3]]   ;;  %s5928_s14 = smov 3   ;;  %vm2372_vm4 = vcmask 7168  }
   0x2   :  { %s5339_s10 = sld [smem:[%s7733_s0 + %s5927_s7]]   ;;  %s5929_s18 = smov 2  }
   0x3   :  { %s5998_s13 = sld [smem:[%s7733_s0]]   ;;  %s5930_s22 = smov 8  }
   0x4   :  { %s6027_s17 = sld [smem:[%s7733_s0 + %s5928_s14]]   ;;  %s5931_s26 = smov 9  }
   0x5   :  { %s6032_s21 = sld [smem:[%s7733_s0 + %s5929_s18]]   ;;  %s5932_s30 = smov 10  }
   0x6   :  { %s6037_s25 = sld [smem:[%s7733_s0 + %s5930_s22]]   ;;  %s5933_s4 = smov 11  }
   0x7   :  { %v235_v0 = vld [vmem:[%s5338_s6 + $0x30] sm:$0xff]  ;;  %v234_v1 = vld [vmem:[%s5338_s6 + $0x28] sm:$0xff]  ;;  %v233_v4 = vld [vmem:[%s5338_s6 + $0x20] sm:$0xff]  ;;  %s5341_s29 = sld [smem:[%s7733_s0 + %s5931_s26]]   ;;  %s5934_s8 = smov 12  }
   0x8   :  { %270 = vmatpush.msra.mxu0 %v235_v0  ;;  %v308_v2 = vld [vmem:[%s5339_s10 + $0x30] sm:$0xff]  ;;  %v307_v3 = vld [vmem:[%s5339_s10 + $0x28] sm:$0xff]  ;;  %v306_v5 = vld [vmem:[%s5339_s10 + $0x20] sm:$0xff]  ;;  %s6115_s3 = sld [smem:[%s7733_s0 + %s5932_s30]]   ;;  %s5935_s12 = smov 4  }
   0x9   :  { %318 = vmatpush.msra.mxu1 %v308_v2  ;;  %v232_v6 = vld [vmem:[%s5338_s6 + $0x18] sm:$0xff]  ;;  %v231_v8 = vld [vmem:[%s5338_s6 + $0x10] sm:$0xff]  ;;  %v230_v10 = vld [vmem:[%s5338_s6 + $0x8] sm:$0xff]  ;;  %s5343_s7 = sld [smem:[%s7733_s0 + %s5933_s4]]   ;;  %s5960_s18 = smov 31  }
   0xa   :  { %271 = vmatpush.msra.mxu0 %v234_v1  ;;  %v305_v7 = vld [vmem:[%s5339_s10 + $0x18] sm:$0xff]  ;;  %v304_v9 = vld [vmem:[%s5339_s10 + $0x10] sm:$0xff]  ;;  %v303_v11 = vld [vmem:[%s5339_s10 + $0x8] sm:$0xff]  ;;  %s6188_s11 = sld [smem:[%s7733_s0 + %s5934_s8]]   ;;  %s5961_s22 = smov 32  }
   0xb   :  { %319 = vmatpush.msra.mxu1 %v307_v3  ;;  %v229_v12 = vld [vmem:[%s5338_s6] sm:$0xff]  ;;  %v222_v15 = vld [vmem:[%s5998_s13 + $0x8] sm:$0xff]  ;;  %v223_v16 = vld [vmem:[%s5998_s13 + $0x10] sm:$0xff]  ;;  %s6299_s16 = sld [smem:[%s7733_s0 + %s5935_s12]]   ;;  %s5959_s12 = smov 5  }
   0xc   :  { %272 = vmatpush.msra.mxu0 %v233_v4  ;;  %v302_v13 = vld [vmem:[%s5339_s10] sm:$0xff]  ;;  %v224_v17 = vld [vmem:[%s5998_s13 + $0x18] sm:$0xff]  ;;  %v226_v19 = vld [vmem:[%s5998_s13 + $0x28] sm:$0xff]  ;;  %s5962_s26 = smov 36   ;;  %s5963_s30 = smov 33  }
   0xd   :  { %320 = vmatpush.msra.mxu1 %v306_v5  ;;  %v221_v14 = vld [vmem:[%s5998_s13] sm:$0xff]  ;;  %v227_v20 = vld [vmem:[%s5998_s13 + $0x30] sm:$0xff]  ;;  %v228_v21 = vld [vmem:[%s5998_s13 + $0x38] sm:$0xff]  ;;  %s5964_s4 = smov 43   ;;  %s5965_s8 = smov 45  }
   0xe   :  { %273 = vmatpush.msra.mxu0 %v232_v6  ;;  %v225_v18 = vld [vmem:[%s5998_s13 + $0x20] sm:$0xff]  ;;  %v351_v40 = vld [vmem:[%s6032_s21 + $0x8] sm:$0xff]  ;;  %v377_v41 = vld [vmem:[%s6027_s17 + $0x10] sm:$0xff]  ;;  %s5966_s14 = smov 37  }
   0xf   :  { %321 = vmatpush.msra.mxu1 %v305_v7  ;;  %v375_v38 = vld [vmem:[%s6027_s17] sm:$0xff]  ;;  %v376_v42 = vld [vmem:[%s6027_s17 + $0x8] sm:$0xff]  ;;  %v352_v43 = vld [vmem:[%s6032_s21 + $0x10] sm:$0xff]  ;;  %s5369_s19 = sld [smem:[%s7733_s0 + %s5966_s14]]  }
  0x10   :  { %274 = vmatpush.msra.mxu0 %v231_v8  ;;  %v350_v39 = vld [vmem:[%s6032_s21] sm:$0xff]  ;;  %v378_v44 = vld [vmem:[%s6027_s17 + $0x18] sm:$0xff]  ;;  %v380_v48 = vld [vmem:[%s6027_s17 + $0x28] sm:$0xff] }
  0x11   :  { %322 = vmatpush.msra.mxu1 %v304_v9  ;;  %v353_v45 = vld [vmem:[%s6032_s21 + $0x18] sm:$0xff]  ;;  %v379_v46 = vld [vmem:[%s6027_s17 + $0x20] sm:$0xff]  ;;  %v355_v49 = vld [vmem:[%s6032_s21 + $0x28] sm:$0xff] }
  0x12   :  { %275 = vmatpush.msra.mxu0 %v230_v10  ;;  %v354_v47 = vld [vmem:[%s6032_s21 + $0x20] sm:$0xff]  ;;  %v381_v50 = vld [vmem:[%s6027_s17 + $0x30] sm:$0xff]  ;;  %v382_v52 = vld [vmem:[%s6027_s17 + $0x38] sm:$0xff] }
  0x13   :  { %323 = vmatpush.msra.mxu1 %v303_v11  ;;  %v356_v51 = vld [vmem:[%s6032_s21 + $0x30] sm:$0xff]  ;;  %v357_v53 = vld [vmem:[%s6032_s21 + $0x38] sm:$0xff]  ;;  %v383_v54 = vld [vmem:[%s6027_s17 + $0x40] sm:$0xff] }
  0x14   :  { %276 = vmatpush.msra.mxu0 %v229_v12  ;;  %v358_v55 = vld [vmem:[%s6032_s21 + $0x40] sm:$0xff]  ;;  %v384_v56 = vld [vmem:[%s6027_s17 + $0x48] sm:$0xff]  ;;  %v385_v58 = vld [vmem:[%s6027_s17 + $0x50] sm:$0xff] }
  0x15   :  { %324 = vmatpush.msra.mxu1 %v302_v13  ;;  %5387 = vmatmul.msk.f32.vlgmr.msra.gmra.mxu0 %vm236_vm0, %v221_v14  ;;  %v359_v57 = vld [vmem:[%s6032_s21 + $0x48] sm:$0xff]  ;;  %v360_v59 = vld [vmem:[%s6032_s21 + $0x50] sm:$0xff]  ;;  %v386_v60 = vld [vmem:[%s6027_s17 + $0x58] sm:$0xff] }
  0x16   :  { %5395 = vmatmul.msk.f32.vlgmr.msra.gmra.mxu1 %vm236_vm0, %v221_v14  ;;  %v361_v61 = vld [vmem:[%s6032_s21 + $0x58] sm:$0xff]  ;;  %v387_v62 = vld [vmem:[%s6027_s17 + $0x60] sm:$0xff]  ;;  %v388_v0 = vld [vmem:[%s6027_s17 + $0x68] sm:$0xff] }
  0x17   :  { %v362_v63 = vld [vmem:[%s6032_s21 + $0x60] sm:$0xff]  ;;  %v792_v1 = vld [vmem:[%s5341_s29 + $0x18] sm:$0xff]  ;;  %v363_v2 = vld [vmem:[%s6032_s21 + $0x68] sm:$0xff] }
  0x18   :  { %v389_v3 = vld [vmem:[%s6027_s17 + $0x70] sm:$0xff]  ;;  %v790_v5 = vld [vmem:[%s5341_s29 + $0x8] sm:$0xff]  ;;  %v789_v6 = vld [vmem:[%s5341_s29] sm:$0xff] }
  0x19   :  { %v791_v4 = vld [vmem:[%s5341_s29 + $0x10] sm:$0xff]  ;;  %v390_v8 = vld [vmem:[%s6027_s17 + $0x78] sm:$0xff]  ;;  %v391_v10 = vld [vmem:[%s6027_s17 + $0x80] sm:$0xff]  ;;  %s5939_s29 = smov 15  }
  0x1a   :  { %v364_v7 = vld [vmem:[%s6032_s21 + $0x70] sm:$0xff]  ;;  %v365_v9 = vld [vmem:[%s6032_s21 + $0x78] sm:$0xff]  ;;  %v366_v11 = vld [vmem:[%s6032_s21 + $0x80] sm:$0xff]  ;;  %s6385_s2 = sld [smem:[%s7733_s0 + %s5939_s29]]   ;;  %s5949_s29 = smov 20  }
  0x1b   :  { %v392_v12 = vld [vmem:[%s6027_s17 + $0x88] sm:$0xff]  ;;  %v6118_v13 = vld [vmem:[%s6037_s25] ss:$0 sm:$0xff]  ;;  %s5938_s25 = smov 18  }
  0x1c   :  { %s5350_s28 = sld [smem:[%s7733_s0 + %s5938_s25]]   ;;  %s5948_s25 = smov 22  }
  0x1d   :  { %5388 = vmatmul.msk.f32.gmra.mxu0 %vm236_vm0, %v222_v15 }
  0x1e   :  { %5396 = vmatmul.msk.f32.gmra.mxu1 %vm236_vm0, %v222_v15 }
  0x25   :  { %5389 = vmatmul.msk.f32.gmra.mxu0 %vm236_vm0, %v223_v16 }
  0x26   :  { %5397 = vmatmul.msk.f32.gmra.mxu1 %vm236_vm0, %v223_v16 }
  0x2d   :  { %5390 = vmatmul.msk.f32.gmra.mxu0 %vm236_vm0, %v224_v17 }
  0x2e   :  { %5398 = vmatmul.msk.f32.gmra.mxu1 %vm236_vm0, %v224_v17  ;;  %v367_v17 = vld [vmem:[%s6032_s21 + $0x88] sm:$0xff] }
  0x35   :  { %5391 = vmatmul.msk.f32.gmra.mxu0 %vm236_vm0, %v225_v18 }
  0x36   :  { %5399 = vmatmul.msk.f32.gmra.mxu1 %vm236_vm0, %v225_v18  ;;  %v393_v18 = vld [vmem:[%s6027_s17 + $0x90] sm:$0xff] }
  0x3d   :  { %5392 = vmatmul.msk.f32.gmra.mxu0 %vm236_vm0, %v226_v19 }
  0x3e   :  { %5400 = vmatmul.msk.f32.gmra.mxu1 %vm236_vm0, %v226_v19 }
  0x45   :  { %5393 = vmatmul.msk.f32.gmra.mxu0 %vm236_vm0, %v227_v20 }
  0x46   :  { %5401 = vmatmul.msk.f32.gmra.mxu1 %vm236_vm0, %v227_v20 }
  0x4d   :  { %5394 = vmatmul.msk.f32.gmra.mxu0 %vm236_vm0, %v228_v21 }
  0x4e   :  { %5402 = vmatmul.msk.f32.gmra.mxu1 %vm236_vm0, %v228_v21 }
  0x92   :  { %v278_v22 = vpop.f32.mrf.mxu0 }
  0x93   :  { %v326_v23 = vpop.f32.mrf.mxu1 }
  0x9a   :  { %v281_v24 = vpop.f32.mrf.mxu0 }
  0x9b   :  { %v329_v25 = vpop.f32.mrf.mxu1 }
  0xa2   :  { %v284_v26 = vpop.f32.mrf.mxu0 }
  0xa3   :  { %v332_v27 = vpop.f32.mrf.mxu1 }
  0xaa   :  { %v287_v28 = vpop.f32.mrf.mxu0 }
  0xab   :  { %v335_v29 = vpop.f32.mrf.mxu1 }
  0xb2   :  { %v290_v30 = vpop.f32.mrf.mxu0 }
  0xb3   :  { %v338_v31 = vpop.f32.mrf.mxu1 }
  0xba   :  { %v293_v32 = vpop.f32.mrf.mxu0 }
  0xbb   :  { %v341_v33 = vpop.f32.mrf.mxu1 }
  0xc2   :  { %v296_v34 = vpop.f32.mrf.mxu0 }
  0xc3   :  { %v344_v35 = vpop.f32.mrf.mxu1 }
  0xca   :  { %v299_v36 = vpop.f32.mrf.mxu0 }
  0xcb   :  { %v347_v37 = vpop.f32.mrf.mxu1  ;;  %651 = vmatpush.msrb.mxu0 %v299_v36  ;;  %5737 = vmatpush.msra.mxu3 %v299_v36 }
  0xcc   :  { %484 = vmatpush.msrb.mxu1 %v347_v37  ;;  %5729 = vmatpush.msra.mxu2 %v347_v37 }
  0xcd   :  { %652 = vmatpush.msrb.mxu0 %v296_v34  ;;  %5738 = vmatpush.msra.mxu3 %v296_v34 }
  0xce   :  { %485 = vmatpush.msrb.mxu1 %v344_v35  ;;  %5730 = vmatpush.msra.mxu2 %v344_v35 }
  0xcf   :  { %653 = vmatpush.msrb.mxu0 %v293_v32  ;;  %5739 = vmatpush.msra.mxu3 %v293_v32  ;;  %v369_v32 = vld [vmem:[%s6032_s21 + $0x98] sm:$0xff] }
  0xd0   :  { %486 = vmatpush.msrb.mxu1 %v341_v33  ;;  %5731 = vmatpush.msra.mxu2 %v341_v33  ;;  %v395_v33 = vld [vmem:[%s6027_s17 + $0xa0] sm:$0xff] }
  0xd1   :  { %654 = vmatpush.msrb.mxu0 %v290_v30  ;;  %5740 = vmatpush.msra.mxu3 %v290_v30 }
  0xd2   :  { %487 = vmatpush.msrb.mxu1 %v338_v31  ;;  %5732 = vmatpush.msra.mxu2 %v338_v31 }
  0xd3   :  { %655 = vmatpush.msrb.mxu0 %v287_v28  ;;  %5741 = vmatpush.msra.mxu3 %v287_v28 }
  0xd4   :  { %488 = vmatpush.msrb.mxu1 %v335_v29  ;;  %5733 = vmatpush.msra.mxu2 %v335_v29 }
  0xd5   :  { %656 = vmatpush.msrb.mxu0 %v284_v26  ;;  %5742 = vmatpush.msra.mxu3 %v284_v26  ;;  %v394_v26 = vld [vmem:[%s6027_s17 + $0x98] sm:$0xff] }
  0xd6   :  { %489 = vmatpush.msrb.mxu1 %v332_v27  ;;  %5734 = vmatpush.msra.mxu2 %v332_v27 }
  0xd7   :  { %657 = vmatpush.msrb.mxu0 %v281_v24  ;;  %5743 = vmatpush.msra.mxu3 %v281_v24 }
  0xd8   :  { %490 = vmatpush.msrb.mxu1 %v329_v25  ;;  %5735 = vmatpush.msra.mxu2 %v329_v25  ;;  %v368_v25 = vld [vmem:[%s6032_s21 + $0x90] sm:$0xff] }
  0xd9   :  { %658 = vmatpush.msrb.mxu0 %v278_v22  ;;  %5744 = vmatpush.msra.mxu3 %v278_v22 }
  0xda   :  { %491 = vmatpush.msrb.mxu1 %v326_v23  ;;  %5736 = vmatpush.msra.mxu2 %v326_v23 }
  0xdb   :  { %5403 = vmatmul.msk.f32.vlgmr.msrb.gmra.mxu1 %vm400_vm1, %v375_v38  ;;  %5428 = vmatmul.msk.f32.vlgmr.msrb.gmra.mxu0 %vm400_vm1, %v350_v39  ;;  %v370_v39 = vld [vmem:[%s6032_s21 + $0xa0] sm:$0xff] }
  0xdc   :  { %5429 = vmatmul.msk.f32.vlgmr.msra.gmra.mxu3 %vm400_vm1, %v351_v40  ;;  %5405 = vmatmul.msk.f32.vlgmr.msra.gmra.mxu2 %vm400_vm1, %v377_v41  ;;  %v396_v40 = vld [vmem:[%s6027_s17 + $0xa8] sm:$0xff] }
  0xdd   :  { %885 = vmatpush.msra.mxu0 %v792_v1 }
  0xdf   :  { %886 = vmatpush.msra.mxu0 %v791_v4 }
  0xe1   :  { %887 = vmatpush.msra.mxu0 %v790_v5 }
  0xe3   :  { %5404 = vmatmul.msk.f32.gmra.mxu1 %vm400_vm1, %v376_v42  ;;  %888 = vmatpush.msra.mxu0 %v789_v6 }
  0xe4   :  { %5430 = vmatmul.msk.f32.gmra.mxu3 %vm400_vm1, %v352_v43  ;;  %5406 = vmatmul.msk.f32.gmra.mxu2 %vm400_vm1, %v378_v44 }
  0xec   :  { %5431 = vmatmul.msk.f32.gmra.mxu3 %vm400_vm1, %v353_v45  ;;  %5407 = vmatmul.msk.f32.gmra.mxu2 %vm400_vm1, %v379_v46  ;;  %v371_v46 = vld [vmem:[%s6032_s21 + $0xa8] sm:$0xff] }
  0xf4   :  { %5432 = vmatmul.msk.f32.gmra.mxu3 %vm400_vm1, %v354_v47  ;;  %5408 = vmatmul.msk.f32.gmra.mxu2 %vm400_vm1, %v380_v48  ;;  %v397_v47 = vld [vmem:[%s6027_s17 + $0xb0] sm:$0xff] }
  0xfc   :  { %5433 = vmatmul.msk.f32.gmra.mxu3 %vm400_vm1, %v355_v49  ;;  %5409 = vmatmul.msk.f32.gmra.mxu2 %vm400_vm1, %v381_v50 }
 0x104   :  { %5434 = vmatmul.msk.f32.gmra.mxu3 %vm400_vm1, %v356_v51  ;;  %5410 = vmatmul.msk.f32.gmra.mxu2 %vm400_vm1, %v382_v52 }
 0x10c   :  { %5435 = vmatmul.msk.f32.gmra.mxu3 %vm400_vm1, %v357_v53  ;;  %5411 = vmatmul.msk.f32.gmra.mxu2 %vm400_vm1, %v383_v54  ;;  %v372_v53 = vld [vmem:[%s6032_s21 + $0xb0] sm:$0xff]  ;;  %v398_v54 = vld [vmem:[%s6027_s17 + $0xb8] sm:$0xff] }
 0x114   :  { %5436 = vmatmul.msk.f32.gmra.mxu3 %vm400_vm1, %v358_v55  ;;  %5412 = vmatmul.msk.f32.gmra.mxu2 %vm400_vm1, %v384_v56 }
 0x11c   :  { %5437 = vmatmul.msk.f32.gmra.mxu3 %vm400_vm1, %v359_v57  ;;  %5413 = vmatmul.msk.f32.gmra.mxu2 %vm400_vm1, %v385_v58 }
 0x124   :  { %5438 = vmatmul.msk.f32.gmra.mxu3 %vm400_vm1, %v360_v59  ;;  %5414 = vmatmul.msk.f32.gmra.mxu2 %vm400_vm1, %v386_v60  ;;  %v373_v60 = vld [vmem:[%s6032_s21 + $0xb8] sm:$0xff] }
 0x12c   :  { %5439 = vmatmul.msk.f32.gmra.mxu3 %vm400_vm1, %v361_v61  ;;  %5415 = vmatmul.msk.f32.gmra.mxu2 %vm400_vm1, %v387_v62  ;;  %v399_v61 = vld [vmem:[%s6027_s17 + $0xc0] sm:$0xff]  ;;  %s5936_s17 = smov 14  }
 0x12d   :  { %s6304_s20 = sld [smem:[%s7733_s0 + %s5936_s17]]   ;;  %s5946_s17 = smov 21  }
 0x134   :  { %5440 = vmatmul.msk.f32.gmra.mxu3 %vm400_vm1, %v362_v63  ;;  %5416 = vmatmul.msk.f32.gmra.mxu2 %vm400_vm1, %v388_v0 }
 0x13c   :  { %5441 = vmatmul.msk.f32.gmra.mxu3 %vm400_vm1, %v363_v2  ;;  %5417 = vmatmul.msk.f32.gmra.mxu2 %vm400_vm1, %v389_v3  ;;  %v374_v3 = vld [vmem:[%s6032_s21 + $0xc0] sm:$0xff]  ;;  %s5937_s21 = smov 13  }
 0x13d   :  { %s6309_s24 = sld [smem:[%s7733_s0 + %s5937_s21]]   ;;  %s5947_s21 = smov 23  }
 0x144   :  { %5442 = vmatmul.msk.f32.gmra.mxu3 %vm400_vm1, %v364_v7  ;;  %5418 = vmatmul.msk.f32.gmra.mxu2 %vm400_vm1, %v390_v8 }
 0x14c   :  { %5443 = vmatmul.msk.f32.gmra.mxu3 %vm400_vm1, %v365_v9  ;;  %5419 = vmatmul.msk.f32.gmra.mxu2 %vm400_vm1, %v391_v10 }
 0x154   :  { %5444 = vmatmul.msk.f32.gmra.mxu3 %vm400_vm1, %v366_v11  ;;  %5420 = vmatmul.msk.f32.gmra.mxu2 %vm400_vm1, %v392_v12 }
 0x158   :  { %v493_v14 = vpop.f32.mrf.mxu1  ;;  %v660_v15 = vpop.f32.mrf.mxu0 }
 0x159   :  { %v661_v16 = vadd.f32 %v660_v15, %v493_v14 }
 0x15b   :  { %v739_v19 = vadd.f32 %v6118_v13, %v661_v16 }
 0x15c   :  { %5445 = vmatmul.msk.f32.gmra.mxu3 %vm400_vm1, %v367_v17  ;;  %5421 = vmatmul.msk.f32.gmra.mxu2 %vm400_vm1, %v393_v18 }
 0x15d   :  { %v764_v20 = vmax.f32 %v739_v19, 0.0 }
 0x15f   :  { %5453 = vmatmul.msk.f32.vlgmr.msra.gmra.mxu0 %vm797_vm2, %v764_v20  ;;  %v663_v21 = vpop.f32.mrf.mxu3  ;;  %v499_v22 = vpop.f32.mrf.mxu2 }
 0x160   :  { %v496_v23 = vpop.f32.mrf.mxu1 }
 0x161   :  { %v664_v24 = vadd.f32 %v663_v21, %v496_v23 }
 0x163   :  { %v740_v27 = vadd.f32 %v6118_v13, %v664_v24 }
 0x164   :  { %5446 = vmatmul.msk.f32.gmra.mxu3 %vm400_vm1, %v368_v25  ;;  %5422 = vmatmul.msk.f32.gmra.mxu2 %vm400_vm1, %v394_v26 }
 0x165   :  { %v765_v28 = vmax.f32 %v740_v27, 0.0 }
 0x167   :  { %5454 = vmatmul.msk.f32.gmra.mxu0 %vm797_vm2, %v765_v28  ;;  %v666_v29 = vpop.f32.mrf.mxu3  ;;  %v502_v30 = vpop.f32.mrf.mxu2 }
 0x168   :  { %v667_v31 = vadd.f32 %v666_v29, %v499_v22 }
 0x16a   :  { %v741_v34 = vadd.f32 %v6118_v13, %v667_v31 }
 0x16c   :  { %5447 = vmatmul.msk.f32.gmra.mxu3 %vm400_vm1, %v369_v32  ;;  %v766_v35 = vmax.f32 %v741_v34, 0.0  ;;  %5423 = vmatmul.msk.f32.gmra.mxu2 %vm400_vm1, %v395_v33  ;;  %v992_v32 = vld [vmem:[%s5343_s7 + $0x10] sm:$0xff]  ;;  %v991_v34 = vld [vmem:[%s5343_s7 + $0x8] sm:$0xff] }
 0x16f   :  { %5455 = vmatmul.msk.f32.gmra.mxu0 %vm797_vm2, %v766_v35  ;;  %v669_v36 = vpop.f32.mrf.mxu3  ;;  %v505_v37 = vpop.f32.mrf.mxu2 }
 0x170   :  { %v670_v38 = vadd.f32 %v669_v36, %v502_v30  ;;  %v993_v30 = vld [vmem:[%s5343_s7 + $0x18] sm:$0xff] }
 0x171   :  { %1085 = vmatpush.msra.mxu1 %v993_v30 }
 0x172   :  { %v742_v41 = vadd.f32 %v6118_v13, %v670_v38 }
 0x173   :  { %1086 = vmatpush.msra.mxu1 %v992_v32 }
 0x174   :  { %5448 = vmatmul.msk.f32.gmra.mxu3 %vm400_vm1, %v370_v39  ;;  %v767_v42 = vmax.f32 %v742_v41, 0.0  ;;  %5424 = vmatmul.msk.f32.gmra.mxu2 %vm400_vm1, %v396_v40 }
 0x175   :  { %1087 = vmatpush.msra.mxu1 %v991_v34 }
 0x177   :  { %5456 = vmatmul.msk.f32.gmra.mxu0 %vm797_vm2, %v767_v42  ;;  %v672_v43 = vpop.f32.mrf.mxu3  ;;  %v508_v44 = vpop.f32.mrf.mxu2 }
 0x178   :  { %v673_v45 = vadd.f32 %v672_v43, %v505_v37  ;;  %v990_v37 = vld [vmem:[%s5343_s7] sm:$0xff]  ;;  %s5942_s7 = smov 17  }
 0x179   :  { %1088 = vmatpush.msra.mxu1 %v990_v37  ;;  %s6404_s10 = sld [smem:[%s7733_s0 + %s5942_s7]]   ;;  %s5951_s7 = smov 1  }
 0x17a   :  { %v743_v48 = vadd.f32 %v6118_v13, %v673_v45 }
 0x17c   :  { %5449 = vmatmul.msk.f32.gmra.mxu3 %vm400_vm1, %v371_v46  ;;  %v768_v49 = vmax.f32 %v743_v48, 0.0  ;;  %5425 = vmatmul.msk.f32.gmra.mxu2 %vm400_vm1, %v397_v47 }
 0x17f   :  { %5457 = vmatmul.msk.f32.gmra.mxu0 %vm797_vm2, %v768_v49  ;;  %v675_v50 = vpop.f32.mrf.mxu3  ;;  %v511_v51 = vpop.f32.mrf.mxu2 }
 0x180   :  { %v676_v52 = vadd.f32 %v675_v50, %v508_v44 }
 0x182   :  { %v744_v55 = vadd.f32 %v6118_v13, %v676_v52 }
 0x184   :  { %5450 = vmatmul.msk.f32.gmra.mxu3 %vm400_vm1, %v372_v53  ;;  %v769_v56 = vmax.f32 %v744_v55, 0.0  ;;  %5426 = vmatmul.msk.f32.gmra.mxu2 %vm400_vm1, %v398_v54  ;;  %v6191_v54 = vld [vmem:[%s6115_s3] ss:$0 sm:$0xff]  ;;  %s5941_s3 = smov 19  }
 0x185   :  { %s6398_s6 = sld [smem:[%s7733_s0 + %s5941_s3]]   ;;  %s5950_s3 = smov 30  }
 0x187   :  { %5458 = vmatmul.msk.f32.gmra.mxu0 %vm797_vm2, %v769_v56  ;;  %v678_v57 = vpop.f32.mrf.mxu3  ;;  %v514_v58 = vpop.f32.mrf.mxu2 }
 0x188   :  { %v679_v59 = vadd.f32 %v678_v57, %v511_v51 }
 0x18a   :  { %v745_v62 = vadd.f32 %v6118_v13, %v679_v59 }
 0x18c   :  { %5451 = vmatmul.msk.f32.gmra.mxu3 %vm400_vm1, %v373_v60  ;;  %v770_v63 = vmax.f32 %v745_v62, 0.0  ;;  %5427 = vmatmul.msk.f32.gmra.mxu2 %vm400_vm1, %v399_v61 }
 0x18f   :  { %5459 = vmatmul.msk.f32.gmra.mxu0 %vm797_vm2, %v770_v63  ;;  %v681_v0 = vpop.f32.mrf.mxu3  ;;  %v517_v1 = vpop.f32.mrf.mxu2 }
 0x190   :  { %v682_v2 = vadd.f32 %v681_v0, %v514_v58 }
 0x192   :  { %v746_v4 = vadd.f32 %v6118_v13, %v682_v2 }
 0x194   :  { %5452 = vmatmul.msk.f32.gmra.mxu3 %vm400_vm1, %v374_v3  ;;  %v771_v5 = vmax.f32 %v746_v4, 0.0 }
 0x197   :  { %5460 = vmatmul.msk.f32.gmra.mxu0 %vm797_vm2, %v771_v5  ;;  %v684_v6 = vpop.f32.mrf.mxu3  ;;  %v520_v7 = vpop.f32.mrf.mxu2 }
 0x198   :  { %v685_v8 = vadd.f32 %v684_v6, %v517_v1 }
 0x19a   :  { %v747_v9 = vadd.f32 %v6118_v13, %v685_v8 }
 0x19c   :  { %v772_v10 = vmax.f32 %v747_v9, 0.0 }
 0x19f   :  { %5461 = vmatmul.msk.f32.gmra.mxu0 %vm797_vm2, %v772_v10  ;;  %v687_v11 = vpop.f32.mrf.mxu3  ;;  %v523_v12 = vpop.f32.mrf.mxu2 }
 0x1a0   :  { %v688_v14 = vadd.f32 %v687_v11, %v520_v7 }
 0x1a2   :  { %v748_v15 = vadd.f32 %v6118_v13, %v688_v14 }
 0x1a4   :  { %v773_v16 = vmax.f32 %v748_v15, 0.0 }
 0x1a7   :  { %5462 = vmatmul.msk.f32.gmra.mxu0 %vm797_vm2, %v773_v16  ;;  %v690_v17 = vpop.f32.mrf.mxu3  ;;  %v526_v18 = vpop.f32.mrf.mxu2 }
 0x1a8   :  { %v691_v19 = vadd.f32 %v690_v17, %v523_v12 }
 0x1aa   :  { %v749_v20 = vadd.f32 %v6118_v13, %v691_v19 }
 0x1ac   :  { %v774_v21 = vmax.f32 %v749_v20, 0.0 }
 0x1af   :  { %5463 = vmatmul.msk.f32.gmra.mxu0 %vm797_vm2, %v774_v21  ;;  %v693_v22 = vpop.f32.mrf.mxu3  ;;  %v529_v23 = vpop.f32.mrf.mxu2 }
 0x1b0   :  { %v694_v24 = vadd.f32 %v693_v22, %v526_v18 }
 0x1b2   :  { %v750_v25 = vadd.f32 %v6118_v13, %v694_v24 }
 0x1b4   :  { %v775_v26 = vmax.f32 %v750_v25, 0.0 }
 0x1b7   :  { %5464 = vmatmul.msk.f32.gmra.mxu0 %vm797_vm2, %v775_v26  ;;  %v696_v27 = vpop.f32.mrf.mxu3  ;;  %v532_v28 = vpop.f32.mrf.mxu2 }
 0x1b8   :  { %v697_v29 = vadd.f32 %v696_v27, %v529_v23 }
 0x1ba   :  { %v751_v31 = vadd.f32 %v6118_v13, %v697_v29 }
 0x1bc   :  { %v776_v33 = vmax.f32 %v751_v31, 0.0 }
 0x1bf   :  { %5465 = vmatmul.msk.f32.gmra.mxu0 %vm797_vm2, %v776_v33  ;;  %v699_v35 = vpop.f32.mrf.mxu3  ;;  %v535_v36 = vpop.f32.mrf.mxu2 }
 0x1c0   :  { %v700_v38 = vadd.f32 %v699_v35, %v532_v28 }
 0x1c2   :  { %v752_v39 = vadd.f32 %v6118_v13, %v700_v38 }
 0x1c4   :  { %v777_v40 = vmax.f32 %v752_v39, 0.0 }
 0x1c7   :  { %5466 = vmatmul.msk.f32.gmra.mxu0 %vm797_vm2, %v777_v40  ;;  %v702_v41 = vpop.f32.mrf.mxu3  ;;  %v538_v42 = vpop.f32.mrf.mxu2 }
 0x1c8   :  { %v703_v43 = vadd.f32 %v702_v41, %v535_v36 }
 0x1ca   :  { %v753_v44 = vadd.f32 %v6118_v13, %v703_v43 }
 0x1cc   :  { %v778_v45 = vmax.f32 %v753_v44, 0.0 }
 0x1cf   :  { %5467 = vmatmul.msk.f32.gmra.mxu0 %vm797_vm2, %v778_v45  ;;  %v705_v46 = vpop.f32.mrf.mxu3  ;;  %v541_v47 = vpop.f32.mrf.mxu2 }
 0x1d0   :  { %v706_v48 = vadd.f32 %v705_v46, %v538_v42 }
 0x1d2   :  { %v754_v49 = vadd.f32 %v6118_v13, %v706_v48 }
 0x1d4   :  { %v779_v50 = vmax.f32 %v754_v49, 0.0 }
 0x1d7   :  { %5468 = vmatmul.msk.f32.gmra.mxu0 %vm797_vm2, %v779_v50  ;;  %v708_v51 = vpop.f32.mrf.mxu3  ;;  %v544_v52 = vpop.f32.mrf.mxu2 }
 0x1d8   :  { %v709_v53 = vadd.f32 %v708_v51, %v541_v47 }
 0x1da   :  { %v755_v55 = vadd.f32 %v6118_v13, %v709_v53 }
 0x1dc   :  { %v780_v56 = vmax.f32 %v755_v55, 0.0  ;;  %v890_v57 = vpop.f32.mrf.mxu0 }
 0x1dd   :  { %v891_v58 = vadd.f32 %v6191_v54, %v890_v57 }
 0x1df   :  { %v965_v59 = vmax.f32 %v891_v58, 0.0  ;;  %5469 = vmatmul.msk.f32.gmra.mxu0 %vm797_vm2, %v780_v56  ;;  %v711_v60 = vpop.f32.mrf.mxu3  ;;  %v547_v61 = vpop.f32.mrf.mxu2 }
 0x1e0   :  { %v712_v62 = vadd.f32 %v711_v60, %v544_v52 }
 0x1e1   :  { %5478 = vmatmul.msk.f32.vlgmr.msra.gmra.mxu1 %vm797_vm2, %v965_v59 }
 0x1e2   :  { %v756_v63 = vadd.f32 %v6118_v13, %v712_v62 }
 0x1e4   :  { %v781_v0 = vmax.f32 %v756_v63, 0.0  ;;  %v893_v1 = vpop.f32.mrf.mxu0 }
 0x1e5   :  { %v894_v2 = vadd.f32 %v6191_v54, %v893_v1 }
 0x1e7   :  { %v966_v3 = vmax.f32 %v894_v2, 0.0  ;;  %5470 = vmatmul.msk.f32.gmra.mxu0 %vm797_vm2, %v781_v0  ;;  %v714_v4 = vpop.f32.mrf.mxu3  ;;  %v550_v5 = vpop.f32.mrf.mxu2 }
 0x1e8   :  { %v715_v6 = vadd.f32 %v714_v4, %v547_v61 }
 0x1e9   :  { %5479 = vmatmul.msk.f32.gmra.mxu1 %vm797_vm2, %v966_v3 }
 0x1ea   :  { %v757_v7 = vadd.f32 %v6118_v13, %v715_v6 }
 0x1ec   :  { %v782_v8 = vmax.f32 %v757_v7, 0.0  ;;  %v896_v9 = vpop.f32.mrf.mxu0 }
 0x1ed   :  { %v897_v10 = vadd.f32 %v6191_v54, %v896_v9 }
 0x1ef   :  { %v967_v11 = vmax.f32 %v897_v10, 0.0  ;;  %5471 = vmatmul.msk.f32.gmra.mxu0 %vm797_vm2, %v782_v8  ;;  %v717_v12 = vpop.f32.mrf.mxu3  ;;  %v553_v14 = vpop.f32.mrf.mxu2 }
 0x1f0   :  { %v718_v15 = vadd.f32 %v717_v12, %v550_v5 }
 0x1f1   :  { %5480 = vmatmul.msk.f32.gmra.mxu1 %vm797_vm2, %v967_v11 }
 0x1f2   :  { %v758_v16 = vadd.f32 %v6118_v13, %v718_v15 }
 0x1f4   :  { %v783_v17 = vmax.f32 %v758_v16, 0.0  ;;  %v899_v18 = vpop.f32.mrf.mxu0 }
 0x1f5   :  { %v900_v19 = vadd.f32 %v6191_v54, %v899_v18 }
 0x1f7   :  { %v968_v20 = vmax.f32 %v900_v19, 0.0  ;;  %5472 = vmatmul.msk.f32.gmra.mxu0 %vm797_vm2, %v783_v17  ;;  %v720_v21 = vpop.f32.mrf.mxu3  ;;  %v556_v22 = vpop.f32.mrf.mxu2 }
 0x1f8   :  { %v721_v23 = vadd.f32 %v720_v21, %v553_v14 }
 0x1f9   :  { %5481 = vmatmul.msk.f32.gmra.mxu1 %vm797_vm2, %v968_v20 }
 0x1fa   :  { %v759_v24 = vadd.f32 %v6118_v13, %v721_v23 }
 0x1fc   :  { %v784_v25 = vmax.f32 %v759_v24, 0.0  ;;  %v902_v26 = vpop.f32.mrf.mxu0 }
 0x1fd   :  { %v903_v27 = vadd.f32 %v6191_v54, %v902_v26 }
 0x1ff   :  { %v969_v28 = vmax.f32 %v903_v27, 0.0  ;;  %5473 = vmatmul.msk.f32.gmra.mxu0 %vm797_vm2, %v784_v25  ;;  %v723_v29 = vpop.f32.mrf.mxu3  ;;  %v559_v31 = vpop.f32.mrf.mxu2 }
 0x200   :  { %v724_v30 = vadd.f32 %v723_v29, %v556_v22 }
 0x201   :  { %5482 = vmatmul.msk.f32.gmra.mxu1 %vm797_vm2, %v969_v28 }
 0x202   :  { %v760_v32 = vadd.f32 %v6118_v13, %v724_v30 }
 0x204   :  { %v785_v33 = vmax.f32 %v760_v32, 0.0  ;;  %v905_v34 = vpop.f32.mrf.mxu0 }
 0x205   :  { %v906_v35 = vadd.f32 %v6191_v54, %v905_v34 }
 0x207   :  { %v970_v36 = vmax.f32 %v906_v35, 0.0  ;;  %5474 = vmatmul.msk.f32.gmra.mxu0 %vm797_vm2, %v785_v33  ;;  %v726_v37 = vpop.f32.mrf.mxu3  ;;  %v562_v40 = vpop.f32.mrf.mxu2 }
 0x208   :  { %v727_v38 = vadd.f32 %v726_v37, %v559_v31 }
 0x209   :  { %5483 = vmatmul.msk.f32.gmra.mxu1 %vm797_vm2, %v970_v36 }
 0x20a   :  { %v761_v39 = vadd.f32 %v6118_v13, %v727_v38 }
 0x20c   :  { %v786_v41 = vmax.f32 %v761_v39, 0.0  ;;  %v908_v42 = vpop.f32.mrf.mxu0 }
 0x20d   :  { %v909_v43 = vadd.f32 %v6191_v54, %v908_v42 }
 0x20f   :  { %v971_v44 = vmax.f32 %v909_v43, 0.0  ;;  %5475 = vmatmul.msk.f32.gmra.mxu0 %vm797_vm2, %v786_v41  ;;  %v729_v45 = vpop.f32.mrf.mxu3  ;;  %v565_v51 = vpop.f32.mrf.mxu2 }
 0x210   :  { %v730_v46 = vadd.f32 %v729_v45, %v562_v40 }
 0x211   :  { %5484 = vmatmul.msk.f32.gmra.mxu1 %vm797_vm2, %v971_v44 }
 0x212   :  { %v762_v47 = vadd.f32 %v6118_v13, %v730_v46 }
 0x214   :  { %v787_v48 = vmax.f32 %v762_v47, 0.0  ;;  %v911_v49 = vpop.f32.mrf.mxu0 }
 0x215   :  { %v912_v50 = vadd.f32 %v6191_v54, %v911_v49 }
 0x217   :  { %v972_v52 = vmax.f32 %v912_v50, 0.0  ;;  %5476 = vmatmul.msk.f32.gmra.mxu0 %vm797_vm2, %v787_v48  ;;  %v732_v53 = vpop.f32.mrf.mxu3 }
 0x218   :  { %v733_v55 = vadd.f32 %v732_v53, %v565_v51 }
 0x219   :  { %5485 = vmatmul.msk.f32.gmra.mxu1 %vm797_vm2, %v972_v52 }
 0x21a   :  { %v763_v56 = vadd.f32 %v6118_v13, %v733_v55 }
 0x21c   :  { %v788_v57 = vmax.f32 %v763_v56, 0.0  ;;  %v914_v58 = vpop.f32.mrf.mxu0 }
 0x21d   :  { %v915_v59 = vadd.f32 %v6191_v54, %v914_v58 }
 0x21f   :  { %v973_v60 = vmax.f32 %v915_v59, 0.0  ;;  %5477 = vmatmul.msk.f32.gmra.mxu0 %vm797_vm2, %v788_v57 }
 0x221   :  { %5486 = vmatmul.msk.f32.gmra.mxu1 %vm797_vm2, %v973_v60 }
 0x224   :  { %v917_v61 = vpop.f32.mrf.mxu0 }
 0x225   :  { %v918_v62 = vadd.f32 %v6191_v54, %v917_v61  ;;  %v6270_v61 = vld [vmem:[%s6188_s11] ss:$0 sm:$0xff]  ;;  %s5943_s11 = smov 16  }
 0x226   :  { %s5348_s15 = sld [smem:[%s7733_s0 + %s5943_s11]]   ;;  %s5952_s11 = smov 29  }
 0x227   :  { %v974_v63 = vmax.f32 %v918_v62, 0.0 }
 0x229   :  { %5487 = vmatmul.msk.f32.gmra.mxu1 %vm797_vm2, %v974_v63 }
 0x22c   :  { %v920_v0 = vpop.f32.mrf.mxu0 }
 0x22d   :  { %v921_v1 = vadd.f32 %v6191_v54, %v920_v0 }
 0x22f   :  { %v975_v2 = vmax.f32 %v921_v1, 0.0 }
 0x231   :  { %5488 = vmatmul.msk.f32.gmra.mxu1 %vm797_vm2, %v975_v2 }
 0x234   :  { %v923_v13 = vpop.f32.mrf.mxu0 }
 0x235   :  { %v924_v3 = vadd.f32 %v6191_v54, %v923_v13 }
 0x237   :  { %v976_v4 = vmax.f32 %v924_v3, 0.0 }
 0x239   :  { %5489 = vmatmul.msk.f32.gmra.mxu1 %vm797_vm2, %v976_v4 }
 0x23c   :  { %v926_v5 = vpop.f32.mrf.mxu0 }
 0x23d   :  { %v927_v6 = vadd.f32 %v6191_v54, %v926_v5 }
 0x23f   :  { %v977_v7 = vmax.f32 %v927_v6, 0.0 }
 0x241   :  { %5490 = vmatmul.msk.f32.gmra.mxu1 %vm797_vm2, %v977_v7 }
 0x244   :  { %v929_v8 = vpop.f32.mrf.mxu0 }
 0x245   :  { %v930_v9 = vadd.f32 %v6191_v54, %v929_v8 }
 0x247   :  { %v978_v10 = vmax.f32 %v930_v9, 0.0 }
 0x249   :  { %5491 = vmatmul.msk.f32.gmra.mxu1 %vm797_vm2, %v978_v10 }
 0x24c   :  { %v932_v11 = vpop.f32.mrf.mxu0 }
 0x24d   :  { %v933_v12 = vadd.f32 %v6191_v54, %v932_v11 }
 0x24f   :  { %v979_v14 = vmax.f32 %v933_v12, 0.0 }
 0x251   :  { %5492 = vmatmul.msk.f32.gmra.mxu1 %vm797_vm2, %v979_v14 }
 0x254   :  { %v935_v15 = vpop.f32.mrf.mxu0 }
 0x255   :  { %v936_v16 = vadd.f32 %v6191_v54, %v935_v15 }
 0x257   :  { %v980_v17 = vmax.f32 %v936_v16, 0.0 }
 0x259   :  { %5493 = vmatmul.msk.f32.gmra.mxu1 %vm797_vm2, %v980_v17 }
 0x25c   :  { %v938_v18 = vpop.f32.mrf.mxu0 }
 0x25d   :  { %v939_v19 = vadd.f32 %v6191_v54, %v938_v18 }
 0x25e   :  { %v6244_v20 = vpop.f32.mrf.mxu1 }
 0x25f   :  { %v981_v21 = vmax.f32 %v939_v19, 0.0 }
 0x261   :  { %5494 = vmatmul.msk.f32.gmra.mxu1 %vm797_vm2, %v981_v21 }
 0x264   :  { %v941_v22 = vpop.f32.mrf.mxu0 }
 0x265   :  { %v942_v23 = vadd.f32 %v6191_v54, %v941_v22 }
 0x266   :  { %v6248_v24 = vpop.f32.mrf.mxu1 }
 0x267   :  { %v982_v25 = vmax.f32 %v942_v23, 0.0 }
 0x269   :  { %5495 = vmatmul.msk.f32.gmra.mxu1 %vm797_vm2, %v982_v25 }
 0x26c   :  { %v944_v26 = vpop.f32.mrf.mxu0 }
 0x26d   :  { %v945_v27 = vadd.f32 %v6191_v54, %v944_v26 }
 0x26e   :  { %v6252_v28 = vpop.f32.mrf.mxu1 }
 0x26f   :  { %v983_v29 = vmax.f32 %v945_v27, 0.0  ;;  %v1097_v27 = vadd.f32 %v6270_v61, %v6252_v28 }
 0x271   :  { %5496 = vmatmul.msk.f32.gmra.mxu1 %vm797_vm2, %v983_v29 }
 0x274   :  { %v947_v30 = vpop.f32.mrf.mxu0 }
 0x275   :  { %v948_v31 = vadd.f32 %v6191_v54, %v947_v30  ;;  %v1094_v30 = vadd.f32 %v6270_v61, %v6248_v24  ;;  %v1190_v24 = vld [vmem:[%s6299_s16] sm:$0xff] }
 0x276   :  { %v6256_v32 = vpop.f32.mrf.mxu1 }
 0x277   :  { %v984_v33 = vmax.f32 %v948_v31, 0.0  ;;  %v1100_v23 = vadd.f32 %v6270_v61, %v6256_v32  ;;  %v1166_v32 = vmax.f32 %v1094_v30, 0.0  ;;  %v5918_v30 = vld [vmem:[%s5998_s13 + $0x18] sm:$0xff] }
 0x279   :  { %5497 = vmatmul.msk.f32.gmra.mxu1 %vm797_vm2, %v984_v33  ;;  %v1168_v31 = vmax.f32 %v1100_v23, 0.0  ;;  %v1091_v33 = vadd.f32 %v6270_v61, %v6244_v20  ;;  %v1203_v23 = vld [vmem:[%s6299_s16 + $0x68] sm:$0xff] }
 0x27c   :  { %v950_v34 = vpop.f32.mrf.mxu0 }
 0x27d   :  { %v951_v35 = vadd.f32 %v6191_v54, %v950_v34  ;;  %v1167_v34 = vmax.f32 %v1097_v27, 0.0  ;;  %v1205_v27 = vld [vmem:[%s6299_s16 + $0x78] sm:$0xff] }
 0x27e   :  { %v1102_v36 = vpop.f32.mrf.mxu1 }
 0x27f   :  { %v985_v37 = vmax.f32 %v951_v35, 0.0  ;;  %v1103_v21 = vadd.f32 %v6270_v61, %v1102_v36  ;;  %v1165_v36 = vmax.f32 %v1091_v33, 0.0 }
 0x281   :  { %5498 = vmatmul.msk.f32.gmra.mxu1 %vm797_vm2, %v985_v37  ;;  %v1169_v29 = vmax.f32 %v1103_v21, 0.0  ;;  %v1200_v21 = vld [vmem:[%s6299_s16 + $0x50] sm:$0xff] }
 0x284   :  { %v953_v38 = vpop.f32.mrf.mxu0 }
 0x285   :  { %v954_v39 = vadd.f32 %v6191_v54, %v953_v38  ;;  %v1323_v38 = vld [vmem:[%s6304_s20 + $0x18] sm:$0xff] }
 0x286   :  { %v1105_v40 = vpop.f32.mrf.mxu1  ;;  %1360 = vmatpush.msrb.mxu0 %v1323_v38 }
 0x287   :  { %v986_v41 = vmax.f32 %v954_v39, 0.0  ;;  %v1106_v18 = vadd.f32 %v6270_v61, %v1105_v40  ;;  %v1319_v39 = vld [vmem:[%s6309_s24 + $0x30] sm:$0xff] }
 0x288   :  { %1398 = vmatpush.msrb.mxu1 %v1319_v39 }
 0x289   :  { %5499 = vmatmul.msk.f32.gmra.mxu1 %vm797_vm2, %v986_v41  ;;  %v1170_v25 = vmax.f32 %v1106_v18, 0.0  ;;  %v1201_v18 = vld [vmem:[%s6299_s16 + $0x58] sm:$0xff] }
 0x28c   :  { %v956_v42 = vpop.f32.mrf.mxu0 }
 0x28d   :  { %v957_v43 = vadd.f32 %v6191_v54, %v956_v42 }
 0x28e   :  { %v1108_v44 = vpop.f32.mrf.mxu1 }
 0x28f   :  { %v987_v45 = vmax.f32 %v957_v43, 0.0  ;;  %v1109_v16 = vadd.f32 %v6270_v61, %v1108_v44 }
 0x291   :  { %5500 = vmatmul.msk.f32.gmra.mxu1 %vm797_vm2, %v987_v45  ;;  %v1171_v22 = vmax.f32 %v1109_v16, 0.0  ;;  %v6355_v16 = vld [vmem:[%s5350_s28 + $0x10] sm:$0xff] }
 0x294   :  { %v959_v46 = vpop.f32.mrf.mxu0 }
 0x295   :  { %v960_v47 = vadd.f32 %v6191_v54, %v959_v46 }
 0x296   :  { %v1111_v48 = vpop.f32.mrf.mxu1 }
 0x297   :  { %v988_v49 = vmax.f32 %v960_v47, 0.0  ;;  %v1112_v12 = vadd.f32 %v6270_v61, %v1111_v48  ;;  %v1318_v48 = vld [vmem:[%s6309_s24 + $0x28] sm:$0xff] }
 0x298   :  { %1399 = vmatpush.msrb.mxu1 %v1318_v48  ;;  %v1450_v48 = vld [vmem:[%s5348_s15] sm:$0xff] }
 0x299   :  { %5501 = vmatmul.msk.f32.gmra.mxu1 %vm797_vm2, %v988_v49  ;;  %v1172_v19 = vmax.f32 %v1112_v12, 0.0  ;;  %v1317_v49 = vld [vmem:[%s6309_s24 + $0x20] sm:$0xff] }
 0x29a   :  { %1400 = vmatpush.msrb.mxu1 %v1317_v49  ;;  %v1198_v12 = vld [vmem:[%s6299_s16 + $0x40] sm:$0xff] }
 0x29c   :  { %v962_v50 = vpop.f32.mrf.mxu0 }
 0x29d   :  { %v963_v51 = vadd.f32 %v6191_v54, %v962_v50 }
 0x29e   :  { %v1114_v52 = vpop.f32.mrf.mxu1 }
 0x29f   :  { %v989_v53 = vmax.f32 %v963_v51, 0.0  ;;  %v1115_v10 = vadd.f32 %v6270_v61, %v1114_v52 }
 0x2a1   :  { %5502 = vmatmul.msk.f32.gmra.mxu1 %vm797_vm2, %v989_v53  ;;  %v1173_v17 = vmax.f32 %v1115_v10, 0.0  ;;  %v1313_v10 = vld [vmem:[%s6309_s24] sm:$0xff] }
 0x2a6   :  { %v1117_v55 = vpop.f32.mrf.mxu1 }
 0x2a7   :  { %v1118_v8 = vadd.f32 %v6270_v61, %v1117_v55 }
 0x2a9   :  { %v1174_v14 = vmax.f32 %v1118_v8, 0.0  ;;  %v1314_v8 = vld [vmem:[%s6309_s24 + $0x8] sm:$0xff] }
 0x2ae   :  { %v1120_v56 = vpop.f32.mrf.mxu1 }
 0x2af   :  { %v1121_v6 = vadd.f32 %v6270_v61, %v1120_v56 }
 0x2b1   :  { %v1175_v11 = vmax.f32 %v1121_v6, 0.0  ;;  %v1196_v6 = vld [vmem:[%s6299_s16 + $0x30] sm:$0xff] }
 0x2b6   :  { %v1123_v57 = vpop.f32.mrf.mxu1 }
 0x2b7   :  { %v1124_v3 = vadd.f32 %v6270_v61, %v1123_v57 }
 0x2b9   :  { %v1176_v9 = vmax.f32 %v1124_v3, 0.0  ;;  %v1197_v3 = vld [vmem:[%s6299_s16 + $0x38] sm:$0xff] }
 0x2be   :  { %v1126_v58 = vpop.f32.mrf.mxu1 }
 0x2bf   :  { %v1127_v2 = vadd.f32 %v6270_v61, %v1126_v58 }
 0x2c1   :  { %v1177_v7 = vmax.f32 %v1127_v2, 0.0  ;;  %v1191_v2 = vld [vmem:[%s6299_s16 + $0x8] sm:$0xff] }
 0x2c6   :  { %v1129_v59 = vpop.f32.mrf.mxu1 }
 0x2c7   :  { %v1130_v1 = vadd.f32 %v6270_v61, %v1129_v59  ;;  %v1316_v59 = vld [vmem:[%s6309_s24 + $0x18] sm:$0xff] }
 0x2c8   :  { %1401 = vmatpush.msrb.mxu1 %v1316_v59 }
 0x2c9   :  { %v1178_v4 = vmax.f32 %v1130_v1, 0.0 }
 0x2ce   :  { %v1132_v60 = vpop.f32.mrf.mxu1 }
 0x2cf   :  { %v1133_v63 = vadd.f32 %v6270_v61, %v1132_v60  ;;  %v1322_v60 = vld [vmem:[%s6304_s20 + $0x10] sm:$0xff] }
 0x2d0   :  { %1361 = vmatpush.msrb.mxu0 %v1322_v60 }
 0x2d1   :  { %v1179_v13 = vmax.f32 %v1133_v63, 0.0 }
 0x2d6   :  { %v1135_v62 = vpop.f32.mrf.mxu1 }
 0x2d7   :  { %v1136_v0 = vadd.f32 %v6270_v61, %v1135_v62  ;;  %v1315_v62 = vld [vmem:[%s6309_s24 + $0x10] sm:$0xff]  ;;  %s6526_s24 = sld [smem:[%s7733_s0 + %s5947_s21]]   ;;  %s5954_s21 = smov 24  }
 0x2d8   :  { %1402 = vmatpush.msrb.mxu1 %v1315_v62  ;;  %v5808_v62 = vld [vmem:[%s6385_s2] ss:$0 sm:$0xff]  ;;  %s6534_s2 = sld [smem:[%s7733_s0 + %s5949_s29]]   ;;  %s5956_s29 = smov 25  }
 0x2d9   :  { %v1180_v54 = vmax.f32 %v1136_v0, 0.0 }
 0x2da   :  { %1403 = vmatpush.msrb.mxu1 %v1314_v8 }
 0x2db   :  { %1231 = vmatpush.msrb.mxu2 %v1180_v54 }
 0x2dc   :  { %1404 = vmatpush.msrb.mxu1 %v1313_v10 }
 0x2dd   :  { %1232 = vmatpush.msrb.mxu2 %v1179_v13  ;;  %v1195_v13 = vld [vmem:[%s6299_s16 + $0x28] sm:$0xff] }
 0x2de   :  { %v6277_v5 = vpop.f32.mrf.mxu1 }
 0x2df   :  { %1233 = vmatpush.msrb.mxu2 %v1178_v4  ;;  %v1139_v63 = vadd.f32 %v6270_v61, %v6277_v5  ;;  %v1192_v4 = vld [vmem:[%s6299_s16 + $0x10] sm:$0xff]  ;;  %v1194_v5 = vld [vmem:[%s6299_s16 + $0x20] sm:$0xff] }
 0x2e1   :  { %1234 = vmatpush.msrb.mxu2 %v1177_v7  ;;  %v1181_v54 = vmax.f32 %v1139_v63, 0.0  ;;  %v1321_v7 = vld [vmem:[%s6304_s20 + $0x8] sm:$0xff] }
 0x2e2   :  { %1362 = vmatpush.msrb.mxu0 %v1321_v7 }
 0x2e3   :  { %1235 = vmatpush.msrb.mxu2 %v1176_v9  ;;  %v1320_v9 = vld [vmem:[%s6304_s20] sm:$0xff]  ;;  %s6521_s20 = sld [smem:[%s7733_s0 + %s5946_s17]]   ;;  %s5953_s17 = smov 54  }
 0x2e4   :  { %1363 = vmatpush.msrb.mxu0 %v1320_v9 }
 0x2e5   :  { %1236 = vmatpush.msrb.mxu2 %v1175_v11  ;;  %v1199_v11 = vld [vmem:[%s6299_s16 + $0x48] sm:$0xff] }
 0x2e6   :  { %v6283_v15 = vpop.f32.mrf.mxu1 }
 0x2e7   :  { %1237 = vmatpush.msrb.mxu2 %v1174_v14  ;;  %v1142_v57 = vadd.f32 %v6270_v61, %v6283_v15  ;;  %v5915_v14 = vld [vmem:[%s5998_s13] sm:$0xff]  ;;  %v6353_v15 = vld [vmem:[%s5350_s28 + $0x18] sm:$0xff] }
 0x2e8   :  { %5519 = vmatmul.msk.f32.vlgmr.msrb.gmra.mxu1 %vm236_vm0, %v5915_v14 }
 0x2e9   :  { %1238 = vmatpush.msrb.mxu2 %v1173_v17  ;;  %v1182_v1 = vmax.f32 %v1142_v57, 0.0  ;;  %v6358_v17 = vld [vmem:[%s5350_s28 + $0x8] sm:$0xff] }
 0x2eb   :  { %1239 = vmatpush.msrb.mxu2 %v1172_v19  ;;  %v6363_v19 = vld [vmem:[%s5350_s28] sm:$0xff]  ;;  %s5354_s28 = sld [smem:[%s7733_s0 + %s5948_s25]]   ;;  %s5955_s25 = smov 26  }
 0x2ed   :  { %1240 = vmatpush.msrb.mxu2 %v1171_v22  ;;  %v5916_v22 = vld [vmem:[%s5998_s13 + $0x8] sm:$0xff] }
 0x2ee   :  { %v1144_v26 = vpop.f32.mrf.mxu1 }
 0x2ef   :  { %1241 = vmatpush.msrb.mxu2 %v1170_v25  ;;  %v1145_v55 = vadd.f32 %v6270_v61, %v1144_v26  ;;  %v1202_v25 = vld [vmem:[%s6299_s16 + $0x60] sm:$0xff]  ;;  %v5917_v26 = vld [vmem:[%s5998_s13 + $0x10] sm:$0xff] }
 0x2f0   :  { %5520 = vmatmul.msk.f32.gmra.mxu1 %vm236_vm0, %v5916_v22 }
 0x2f1   :  { %1242 = vmatpush.msrb.mxu2 %v1169_v29  ;;  %v1183_v0 = vmax.f32 %v1145_v55, 0.0  ;;  %v1204_v29 = vld [vmem:[%s6299_s16 + $0x70] sm:$0xff] }
 0x2f3   :  { %1243 = vmatpush.msrb.mxu2 %v1168_v31 }
 0x2f5   :  { %1244 = vmatpush.msrb.mxu2 %v1167_v34 }
 0x2f6   :  { %v1147_v35 = vpop.f32.mrf.mxu1 }
 0x2f7   :  { %1245 = vmatpush.msrb.mxu2 %v1166_v32  ;;  %v1148_v52 = vadd.f32 %v6270_v61, %v1147_v35  ;;  %v5940_v32 = vmov 0.0   ;;  %v5919_v35 = vld [vmem:[%s5998_s13 + $0x20] sm:$0xff] }
 0x2f8   :  { %5521 = vmatmul.msk.f32.gmra.mxu1 %vm236_vm0, %v5917_v26 }
 0x2f9   :  { %1246 = vmatpush.msrb.mxu2 %v1165_v36  ;;  %v1184_v58 = vmax.f32 %v1148_v52, 0.0  ;;  %v5920_v36 = vld [vmem:[%s5998_s13 + $0x28] sm:$0xff] }
 0x2fa   :  { %1247 = vmatmul.f32.vlgmr.msrb.gmra.mxu2 %v1190_v24 }
 0x2fe   :  { %v1150_v37 = vpop.f32.mrf.mxu1 }
 0x2ff   :  { %v1151_v50 = vadd.f32 %v6270_v61, %v1150_v37  ;;  %v5921_v37 = vld [vmem:[%s5998_s13 + $0x30] sm:$0xff] }
 0x300   :  { %5522 = vmatmul.msk.f32.gmra.mxu1 %vm236_vm0, %v5918_v30 }
 0x301   :  { %v1185_v56 = vmax.f32 %v1151_v50, 0.0 }
 0x302   :  { %1250 = vmatmul.f32.gmra.mxu2 %v1192_v4 }
 0x306   :  { %v1153_v28 = vpop.f32.mrf.mxu1 }
 0x307   :  { %v1154_v46 = vadd.f32 %v6270_v61, %v1153_v28  ;;  %v5922_v28 = vld [vmem:[%s5998_s13 + $0x38] sm:$0xff]  ;;  %s5944_s13 = smov 64  }
 0x308   :  { %5523 = vmatmul.msk.f32.gmra.mxu1 %vm236_vm0, %v5919_v35 }
 0x309   :  { %v1186_v53 = vmax.f32 %v1154_v46, 0.0  ;;  %v1452_v46 = vld [vmem:[%s5348_s15 + $0x10] sm:$0xff] }
 0x30a   :  { %1253 = vmatmul.f32.gmra.mxu2 %v1194_v5 }
 0x30e   :  { %v1156_v20 = vpop.f32.mrf.mxu1 }
 0x30f   :  { %v1157_v44 = vadd.f32 %v6270_v61, %v1156_v20 }
 0x310   :  { %5524 = vmatmul.msk.f32.gmra.mxu1 %vm236_vm0, %v5920_v36 }
 0x311   :  { %v1187_v51 = vmax.f32 %v1157_v44, 0.0  ;;  %v1453_v44 = vld [vmem:[%s5348_s15 + $0x18] sm:$0xff] }
 0x312   :  { %1256 = vmatmul.f32.gmra.mxu2 %v1196_v6 }
 0x313   :  { %1494 = vmatpush.msra.mxu2 %v1453_v44 }
 0x315   :  { %1495 = vmatpush.msra.mxu2 %v1452_v46  ;;  %v6438_v46 = vld [vmem:[%s6404_s10] ss:$0 sm:$0xff]  ;;  %s6569_s10 = sld [smem:[%s7733_s0 + %s5951_s7]]   ;;  %s5958_s7 = smov 28  }
 0x316   :  { %v1159_v40 = vpop.f32.mrf.mxu1 }
 0x317   :  { %v1160_v42 = vadd.f32 %v6270_v61, %v1159_v40 }
 0x318   :  { %5525 = vmatmul.msk.f32.gmra.mxu1 %vm236_vm0, %v5921_v37 }
 0x319   :  { %v1188_v47 = vmax.f32 %v1160_v42, 0.0 }
 0x31a   :  { %1259 = vmatmul.f32.gmra.mxu2 %v1198_v12 }
 0x31e   :  { %v1162_v41 = vpop.f32.mrf.mxu1 }
 0x31f   :  { %v1163_v43 = vadd.f32 %v6270_v61, %v1162_v41  ;;  %v1193_v61 = vld [vmem:[%s6299_s16 + $0x18] sm:$0xff]  ;;  %s5945_s16 = smov 96  }
 0x320   :  { %5526 = vmatmul.msk.f32.gmra.mxu1 %vm236_vm0, %v5922_v28 }
 0x321   :  { %v1189_v45 = vmax.f32 %v1163_v43, 0.0 }
 0x322   :  { %1262 = vmatmul.f32.gmra.mxu2 %v1200_v21 }
 0x323   :  { %1279 = vmatpush.msrb.mxu3 %v1189_v45 }
 0x325   :  { %1280 = vmatpush.msrb.mxu3 %v1188_v47  ;;  %v1451_v47 = vld [vmem:[%s5348_s15 + $0x8] sm:$0xff]  ;;  %s5361_s15 = sld [smem:[%s7733_s0 + %s5952_s11]]  }
 0x326   :  { %1496 = vmatpush.msra.mxu2 %v1451_v47  ;;  %s6628_s11 = sld [smem:[%s7733_s0 + %s5958_s7]]  }
 0x327   :  { %1281 = vmatpush.msrb.mxu3 %v1187_v51  ;;  %s5375_s7 = sld [smem:[%s7733_s0 + %s5964_s4]]  }
 0x328   :  { %1497 = vmatpush.msra.mxu2 %v1450_v48 }
 0x329   :  { %1282 = vmatpush.msrb.mxu3 %v1186_v53 }
 0x32a   :  { %1265 = vmatmul.f32.gmra.mxu2 %v1202_v25 }
 0x32b   :  { %1283 = vmatpush.msrb.mxu3 %v1185_v56 }
 0x32d   :  { %1284 = vmatpush.msrb.mxu3 %v1184_v58 }
 0x32f   :  { %1285 = vmatpush.msrb.mxu3 %v1183_v0 }
 0x331   :  { %1286 = vmatpush.msrb.mxu3 %v1182_v1 }
 0x332   :  { %1268 = vmatmul.f32.gmra.mxu2 %v1204_v29 }
 0x333   :  { %1287 = vmatpush.msrb.mxu3 %v1181_v54 }
 0x334   :  { %5503 = vmatmul.msk.f32.vlgmr.msrb.gmra.mxu3 %vm1206_vm3, %v1191_v2 }
 0x335   :  { %1546 = vmatpush.msra.mxu3 %v6353_v15 }
 0x337   :  { %1547 = vmatpush.msra.mxu3 %v6355_v16 }
 0x339   :  { %1548 = vmatpush.msra.mxu3 %v6358_v17 }
 0x33b   :  { %1549 = vmatpush.msra.mxu3 %v6363_v19 }
 0x33c   :  { %5504 = vmatmul.msk.f32.gmra.mxu3 %vm1206_vm3, %v1193_v61  ;;  %v6425_v61 = vld [vmem:[%s6398_s6] ss:$0 sm:$0xff]  ;;  %s6539_s6 = sld [smem:[%s7733_s0 + %s5950_s3]]   ;;  %s5957_s3 = smov 27  }
 0x33d   :  { %1595 = vmatpush.msrb.mxu3 %v6353_v15 }
 0x33f   :  { %1596 = vmatpush.msrb.mxu3 %v6355_v16 }
 0x341   :  { %1597 = vmatpush.msrb.mxu3 %v6358_v17 }
 0x343   :  { %1598 = vmatpush.msrb.mxu3 %v6363_v19 }
 0x344   :  { %5505 = vmatmul.msk.f32.gmra.mxu3 %vm1206_vm3, %v1195_v13 }
 0x34c   :  { %5506 = vmatmul.msk.f32.gmra.mxu3 %vm1206_vm3, %v1197_v3 }
 0x354   :  { %5507 = vmatmul.msk.f32.gmra.mxu3 %vm1206_vm3, %v1199_v11 }
 0x35c   :  { %5508 = vmatmul.msk.f32.gmra.mxu3 %vm1206_vm3, %v1201_v18 }
 0x364   :  { %5509 = vmatmul.msk.f32.gmra.mxu3 %vm1206_vm3, %v1203_v23 }
 0x365   :  { %v1406_v59 = vpop.f32.mrf.mxu1 }
 0x36c   :  { %5510 = vmatmul.msk.f32.gmra.mxu3 %vm1206_vm3, %v1205_v27 }
 0x36d   :  { %v1409_v6 = vpop.f32.mrf.mxu1 }
 0x374   :  { %1550 = vmatmul.f32.vlgmr.msra.gmra.mxu3 %v5940_v32 }
 0x375   :  { %1644 = vmatpush.msra.mxu3 %v6353_v15  ;;  %v1412_v11 = vpop.f32.mrf.mxu1 }
 0x377   :  { %1645 = vmatpush.msra.mxu3 %v6355_v16 }
 0x379   :  { %1646 = vmatpush.msra.mxu3 %v6358_v17 }
 0x37b   :  { %1647 = vmatpush.msra.mxu3 %v6363_v19 }
 0x37d   :  { %v1248_v31 = vpop.f32.mrf.mxu2  ;;  %v1415_v22 = vpop.f32.mrf.mxu1 }
 0x385   :  { %v1251_v24 = vpop.f32.mrf.mxu2  ;;  %v1418_v27 = vpop.f32.mrf.mxu1 }
 0x38d   :  { %v1254_v40 = vpop.f32.mrf.mxu2 }
 0x395   :  { %v1257_v43 = vpop.f32.mrf.mxu2 }
 0x39d   :  { %v1260_v50 = vpop.f32.mrf.mxu2 }
 0x3a5   :  { %v1263_v53 = vpop.f32.mrf.mxu2 }
 0x3ad   :  { %v1266_v57 = vpop.f32.mrf.mxu2 }
 0x3b5   :  { %v1269_v63 = vpop.f32.mrf.mxu2 }
 0x3b7   :  { %v1289_v33 = vpop.f32.mrf.mxu3 }
 0x3b8   :  { %v1290_v34 = vadd.f32 %v1289_v33, %v1248_v31 }
 0x3ba   :  { %5511 = vmatmul.msk.f32.vlgmr.msrb.gmra.mxu0 %vm797_vm2, %v1290_v34  ;;  %v1421_v34 = vpop.f32.mrf.mxu1 }
 0x3bf   :  { %v1292_v20 = vpop.f32.mrf.mxu3 }
 0x3c0   :  { %v1293_v38 = vadd.f32 %v1292_v20, %v1251_v24 }
 0x3c2   :  { %5512 = vmatmul.msk.f32.gmra.mxu0 %vm797_vm2, %v1293_v38  ;;  %v1424_v20 = vpop.f32.mrf.mxu1 }
 0x3c7   :  { %v1295_v39 = vpop.f32.mrf.mxu3 }
 0x3c8   :  { %v1296_v41 = vadd.f32 %v1295_v39, %v1254_v40 }
 0x3ca   :  { %5513 = vmatmul.msk.f32.gmra.mxu0 %vm797_vm2, %v1296_v41  ;;  %v1427_v41 = vpop.f32.mrf.mxu1 }
 0x3cf   :  { %v1298_v42 = vpop.f32.mrf.mxu3 }
 0x3d0   :  { %v1299_v45 = vadd.f32 %v1298_v42, %v1257_v43 }
 0x3d2   :  { %5514 = vmatmul.msk.f32.gmra.mxu0 %vm797_vm2, %v1299_v45 }
 0x3d7   :  { %v1301_v49 = vpop.f32.mrf.mxu3 }
 0x3d8   :  { %v1302_v51 = vadd.f32 %v1301_v49, %v1260_v50 }
 0x3da   :  { %5515 = vmatmul.msk.f32.gmra.mxu0 %vm797_vm2, %v1302_v51 }
 0x3df   :  { %v1304_v52 = vpop.f32.mrf.mxu3 }
 0x3e0   :  { %v1305_v55 = vadd.f32 %v1304_v52, %v1263_v53 }
 0x3e2   :  { %5516 = vmatmul.msk.f32.gmra.mxu0 %vm797_vm2, %v1305_v55 }
 0x3e7   :  { %v1307_v56 = vpop.f32.mrf.mxu3 }
 0x3e8   :  { %v1308_v58 = vadd.f32 %v1307_v56, %v1266_v57 }
 0x3ea   :  { %5517 = vmatmul.msk.f32.gmra.mxu0 %vm797_vm2, %v1308_v58 }
 0x3ef   :  { %v1310_v60 = vpop.f32.mrf.mxu3 }
 0x3f0   :  { %v1311_v1 = vadd.f32 %v1310_v60, %v1269_v63 }
 0x3f2   :  { %5518 = vmatmul.msk.f32.gmra.mxu0 %vm797_vm2, %v1311_v1 }
 0x3f7   :  { %v1551_v3 = vpop.f32.mrf.mxu3 }
 0x3f8   :  { %v1552_v4 = vadd.f32 %v6425_v61, %v1551_v3 }
 0x3fa   :  { %1560 = vrot.lane.b32.xlu0 %v1552_v4, %s5944_s13 }
 0x437   :  { %v1365_v0 = vpop.f32.mrf.mxu0 }
 0x438   :  { %v1407_v54 = vadd.f32 %v1406_v59, %v1365_v0 }
 0x43a   :  { %v1434_v2 = vadd.f32 %v5808_v62, %v1407_v54 }
 0x43c   :  { %v1442_v13 = vmax.f32 %v1434_v2, 0.0 }
 0x43e   :  { %5527 = vmatmul.msk.f32.vlgmr.msra.gmra.mxu2 %vm797_vm2, %v1442_v13 }
 0x43f   :  { %v1368_v5 = vpop.f32.mrf.mxu0 }
 0x440   :  { %v1410_v7 = vadd.f32 %v1409_v6, %v1368_v5 }
 0x442   :  { %v1435_v8 = vadd.f32 %v5808_v62, %v1410_v7 }
 0x444   :  { %v1443_v9 = vmax.f32 %v1435_v8, 0.0 }
 0x446   :  { %5528 = vmatmul.msk.f32.gmra.mxu2 %vm797_vm2, %v1443_v9 }
 0x447   :  { %v1371_v10 = vpop.f32.mrf.mxu0 }
 0x448   :  { %v1413_v12 = vadd.f32 %v1412_v11, %v1371_v10 }
 0x44a   :  { %v1436_v14 = vadd.f32 %v5808_v62, %v1413_v12 }
 0x44c   :  { %v1444_v18 = vmax.f32 %v1436_v14, 0.0 }
 0x44e   :  { %5529 = vmatmul.msk.f32.gmra.mxu2 %vm797_vm2, %v1444_v18 }
 0x44f   :  { %v1374_v21 = vpop.f32.mrf.mxu0 }
 0x450   :  { %v1416_v23 = vadd.f32 %v1415_v22, %v1374_v21 }
 0x452   :  { %v1437_v25 = vadd.f32 %v5808_v62, %v1416_v23 }
 0x454   :  { %v1445_v26 = vmax.f32 %v1437_v25, 0.0 }
 0x456   :  { %5530 = vmatmul.msk.f32.gmra.mxu2 %vm797_vm2, %v1445_v26 }
 0x457   :  { %v1377_v29 = vpop.f32.mrf.mxu0 }
 0x458   :  { %v1419_v30 = vadd.f32 %v1418_v27, %v1377_v29 }
 0x45a   :  { %v1438_v31 = vadd.f32 %v5808_v62, %v1419_v30 }
 0x45c   :  { %v1446_v33 = vmax.f32 %v1438_v31, 0.0 }
 0x45e   :  { %5531 = vmatmul.msk.f32.gmra.mxu2 %vm797_vm2, %v1446_v33 }
 0x45f   :  { %v1380_v35 = vpop.f32.mrf.mxu0 }
 0x460   :  { %v1422_v36 = vadd.f32 %v1421_v34, %v1380_v35 }
 0x462   :  { %v1439_v37 = vadd.f32 %v5808_v62, %v1422_v36 }
 0x464   :  { %v1447_v28 = vmax.f32 %v1439_v37, 0.0 }
 0x466   :  { %5532 = vmatmul.msk.f32.gmra.mxu2 %vm797_vm2, %v1447_v28 }
 0x467   :  { %v1383_v24 = vpop.f32.mrf.mxu0 }
 0x468   :  { %v1425_v38 = vadd.f32 %v1424_v20, %v1383_v24 }
 0x46a   :  { %v1440_v39 = vadd.f32 %v5808_v62, %v1425_v38 }
 0x46c   :  { %v1448_v40 = vmax.f32 %v1440_v39, 0.0  ;;  %v1561_v53 = vpop.permute.xlu0 %1560 }
 0x46e   :  { %5533 = vmatmul.msk.f32.gmra.mxu2 %vm797_vm2, %v1448_v40 }
 0x46f   :  { %v1386_v42 = vpop.f32.mrf.mxu0 }
 0x470   :  { %v1428_v43 = vadd.f32 %v1427_v41, %v1386_v42 }
 0x472   :  { %v1441_v44 = vadd.f32 %v5808_v62, %v1428_v43 }
 0x474   :  { %v1449_v45 = vmax.f32 %v1441_v44, 0.0 }
 0x476   :  { %5534 = vmatmul.msk.f32.gmra.mxu2 %vm797_vm2, %v1449_v45 }
 0x4c1   :  { %v1499_v47 = vpop.f32.mrf.mxu2 }
 0x4c2   :  { %v1500_v48 = vadd.f32 %v6438_v46, %v1499_v47 }
 0x4c4   :  { %v1554_v49 = vadd.f32 %v1552_v4, %v1500_v48 }
 0x4c6   :  { %v1555_v50 = vmul.f32 0.5, %v1554_v49 }
 0x4c8   :  { %5853 = vtanh.f32 %v1555_v50 }
 0x4c9   :  { %v1502_v3 = vpop.f32.mrf.mxu2 }
 0x4ca   :  { %v1503_v4 = vadd.f32 %v6438_v46, %v1502_v3 }
 0x4ce   :  { %v5854_v51 = vpop.eup %5853 }
 0x4cf   :  { %v1557_v52 = vadd.f32 1.0, %v5854_v51 }
 0x4d1   :  { %v1558_v55 = vmul.f32 0.5, %v1557_v52  ;;  %v1505_v31 = vpop.f32.mrf.mxu2 }
 0x4d2   :  { %v1506_v33 = vadd.f32 %v6438_v46, %v1505_v31 }
 0x4d3   :  { %v1563_v56 = vmul.f32 %v1561_v53, %v1558_v55  ;;  %v1570_v60 = vsub.f32 1.0, %v1558_v55  ;;  %v1576_v63 = vmul.f32 0.0, %v1558_v55 }
 0x4d5   :  { %1565 = vrot.lane.b32.xlu0 %v1563_v56, %s5944_s13 }
 0x4d9   :  { %v1508_v50 = vpop.f32.mrf.mxu2 }
 0x4da   :  { %v1509_v51 = vadd.f32 %v6438_v46, %v1508_v50 }
 0x547   :  { %v1566_v57 = vpop.permute.xlu0 %1565 }
 0x548   :  { %v1568_v58 = vadd.f32 %v1566_v57, %v1500_v48 }
 0x54a   :  { %5855 = vtanh.f32 %v1568_v58 }
 0x550   :  { %v5856_v59 = vpop.eup %5855 }
 0x551   :  { %1572 = vrot.lane.b32.xlu1 %v5856_v59, %s5945_s16 }
 0x5c3   :  { %v1573_v62 = vpop.permute.xlu1 %1572 }
 0x5c4   :  { %v1575_v0 = vmul.f32 %v1573_v62, %v1570_v60 }
 0x5c6   :  { %v1577_v1 = vadd.f32 %v1576_v63, %v1575_v0 }
 0x5c8   :  { %1579 = vrot.lane.b32.xlu1 %v1577_v1, %s5945_s16 }
 0x63a   :  { %v1580_v54 = vpop.permute.xlu1 %1579 }
 0x63b   :  { %5535 = vmatmul.msk.f32.vlgmr.msrb.gmra.mxu3 %vm797_vm2, %v1580_v54 }
 0x63c   :  { %1693 = vmatpush.msrb.mxu3 %v6353_v15 }
 0x63e   :  { %1694 = vmatpush.msrb.mxu3 %v6355_v16 }
 0x640   :  { %1695 = vmatpush.msrb.mxu3 %v6358_v17 }
 0x642   :  { %1696 = vmatpush.msrb.mxu3 %v6363_v19 }
 0x6be   :  { %v1600_v2 = vpop.f32.mrf.mxu3 }
 0x6bf   :  { %v1601_v13 = vadd.f32 %v6425_v61, %v1600_v2 }
 0x6c1   :  { %1609 = vrot.lane.b32.xlu2 %v1601_v13, %s5944_s13  ;;  %v1603_v5 = vadd.f32 %v1601_v13, %v1503_v4 }
 0x6c3   :  { %v1604_v6 = vmul.f32 0.5, %v1603_v5 }
 0x6c5   :  { %5857 = vtanh.f32 %v1604_v6  ;;  %v1511_v6 = vpop.f32.mrf.mxu2 }
 0x6cb   :  { %v5858_v7 = vpop.eup %5857 }
 0x6cc   :  { %v1606_v8 = vadd.f32 1.0, %v5858_v7  ;;  %v1512_v7 = vadd.f32 %v6438_v46, %v1511_v6 }
 0x6ce   :  { %v1607_v9 = vmul.f32 0.5, %v1606_v8 }
 0x6d0   :  { %v1619_v21 = vsub.f32 1.0, %v1607_v9  ;;  %v1625_v23 = vmul.f32 %v1607_v9, %v1577_v1 }
 0x71b   :  { %v1610_v10 = vpop.permute.xlu2 %1609 }
 0x71c   :  { %v1612_v11 = vmul.f32 %v1610_v10, %v1607_v9 }
 0x71e   :  { %1614 = vrot.lane.b32.xlu2 %v1612_v11, %s5944_s13 }
 0x778   :  { %v1615_v12 = vpop.permute.xlu2 %1614 }
 0x779   :  { %v1617_v14 = vadd.f32 %v1615_v12, %v1503_v4 }
 0x77b   :  { %5859 = vtanh.f32 %v1617_v14 }
 0x781   :  { %v5860_v18 = vpop.eup %5859 }
 0x782   :  { %1621 = vrot.lane.b32.xlu0 %v5860_v18, %s5945_s16 }
 0x7f4   :  { %v1622_v22 = vpop.permute.xlu0 %1621 }
 0x7f5   :  { %v1624_v25 = vmul.f32 %v1622_v22, %v1619_v21 }
 0x7f7   :  { %v1626_v26 = vadd.f32 %v1625_v23, %v1624_v25 }
 0x7f9   :  { %1628 = vrot.lane.b32.xlu1 %v1626_v26, %s5945_s16 }
 0x86b   :  { %v1629_v27 = vpop.permute.xlu1 %1628 }
 0x86c   :  { %5536 = vmatmul.msk.f32.vlgmr.msra.gmra.mxu3 %vm797_vm2, %v1629_v27 }
 0x86d   :  { %1742 = vmatpush.msra.mxu3 %v6353_v15 }
 0x86f   :  { %1743 = vmatpush.msra.mxu3 %v6355_v16 }
 0x871   :  { %1744 = vmatpush.msra.mxu3 %v6358_v17 }
 0x873   :  { %1745 = vmatpush.msra.mxu3 %v6363_v19 }
 0x8ef   :  { %v1649_v29 = vpop.f32.mrf.mxu3 }
 0x8f0   :  { %v1650_v30 = vadd.f32 %v6425_v61, %v1649_v29 }
 0x8f2   :  { %1658 = vrot.lane.b32.xlu2 %v1650_v30, %s5944_s13  ;;  %v1652_v34 = vadd.f32 %v1650_v30, %v1506_v33 }
 0x8f4   :  { %v1653_v35 = vmul.f32 0.5, %v1652_v34 }
 0x8f6   :  { %5861 = vtanh.f32 %v1653_v35  ;;  %v1514_v35 = vpop.f32.mrf.mxu2 }
 0x8fc   :  { %v5862_v36 = vpop.eup %5861 }
 0x8fd   :  { %v1655_v37 = vadd.f32 1.0, %v5862_v36  ;;  %v1515_v36 = vadd.f32 %v6438_v46, %v1514_v35  ;;  %v1990_v35 = vld [vmem:[%s6526_s24 + $0x18] sm:$0xff] }
 0x8ff   :  { %v1656_v28 = vmul.f32 0.5, %v1655_v37 }
 0x901   :  { %v1668_v41 = vsub.f32 1.0, %v1656_v28  ;;  %v1674_v43 = vmul.f32 %v1656_v28, %v1626_v26 }
 0x94c   :  { %v1659_v20 = vpop.permute.xlu2 %1658 }
 0x94d   :  { %v1661_v24 = vmul.f32 %v1659_v20, %v1656_v28 }
 0x94f   :  { %1663 = vrot.lane.b32.xlu0 %v1661_v24, %s5944_s13 }
 0x9c1   :  { %v1664_v38 = vpop.permute.xlu0 %1663 }
 0x9c2   :  { %v1666_v39 = vadd.f32 %v1664_v38, %v1506_v33 }
 0x9c4   :  { %5863 = vtanh.f32 %v1666_v39 }
 0x9ca   :  { %v5864_v40 = vpop.eup %5863 }
 0x9cb   :  { %1670 = vrot.lane.b32.xlu1 %v5864_v40, %s5945_s16 }
 0xa3d   :  { %v1671_v42 = vpop.permute.xlu1 %1670 }
 0xa3e   :  { %v1673_v44 = vmul.f32 %v1671_v42, %v1668_v41 }
 0xa40   :  { %v1675_v45 = vadd.f32 %v1674_v43, %v1673_v44 }
 0xa42   :  { %1677 = vrot.lane.b32.xlu2 %v1675_v45, %s5945_s16 }
 0xa9c   :  { %v1678_v47 = vpop.permute.xlu2 %1677 }
 0xa9d   :  { %5537 = vmatmul.msk.f32.vlgmr.msrb.gmra.mxu3 %vm797_vm2, %v1678_v47 }
 0xa9e   :  { %1791 = vmatpush.msrb.mxu3 %v6353_v15 }
 0xaa0   :  { %1792 = vmatpush.msrb.mxu3 %v6355_v16 }
 0xaa2   :  { %1793 = vmatpush.msrb.mxu3 %v6358_v17 }
 0xaa4   :  { %1794 = vmatpush.msrb.mxu3 %v6363_v19 }
 0xb20   :  { %v1698_v48 = vpop.f32.mrf.mxu3 }
 0xb21   :  { %v1699_v49 = vadd.f32 %v6425_v61, %v1698_v48 }
 0xb23   :  { %1707 = vrot.lane.b32.xlu0 %v1699_v49, %s5944_s13  ;;  %v1701_v52 = vadd.f32 %v1699_v49, %v1509_v51  ;;  %v1517_v49 = vpop.f32.mrf.mxu2 }
 0xb24   :  { %v1518_v50 = vadd.f32 %v6438_v46, %v1517_v49  ;;  %v2263_v49 = vld [vmem:[%s6539_s6 + $0x18] sm:$0xff] }
 0xb25   :  { %v1702_v53 = vmul.f32 0.5, %v1701_v52 }
 0xb27   :  { %5865 = vtanh.f32 %v1702_v53 }
 0xb2d   :  { %v5866_v55 = vpop.eup %5865 }
 0xb2e   :  { %v1704_v56 = vadd.f32 1.0, %v5866_v55 }
 0xb30   :  { %v1705_v57 = vmul.f32 0.5, %v1704_v56 }
 0xb32   :  { %v1717_v0 = vsub.f32 1.0, %v1705_v57  ;;  %v1723_v54 = vmul.f32 %v1705_v57, %v1675_v45 }
 0xb95   :  { %v1708_v58 = vpop.permute.xlu0 %1707 }
 0xb96   :  { %v1710_v59 = vmul.f32 %v1708_v58, %v1705_v57 }
 0xb98   :  { %1712 = vrot.lane.b32.xlu1 %v1710_v59, %s5944_s13 }
 0xc0a   :  { %v1713_v60 = vpop.permute.xlu1 %1712 }
 0xc0b   :  { %v1715_v62 = vadd.f32 %v1713_v60, %v1509_v51 }
 0xc0d   :  { %5867 = vtanh.f32 %v1715_v62 }
 0xc13   :  { %v5868_v63 = vpop.eup %5867 }
 0xc14   :  { %1719 = vrot.lane.b32.xlu2 %v5868_v63, %s5945_s16 }
 0xc6e   :  { %v1720_v1 = vpop.permute.xlu2 %1719 }
 0xc6f   :  { %v1722_v2 = vmul.f32 %v1720_v1, %v1717_v0 }
 0xc71   :  { %v1724_v13 = vadd.f32 %v1723_v54, %v1722_v2 }
 0xc73   :  { %1726 = vrot.lane.b32.xlu0 %v1724_v13, %s5945_s16 }
 0xce5   :  { %v1727_v3 = vpop.permute.xlu0 %1726 }
 0xce6   :  { %5538 = vmatmul.msk.f32.vlgmr.msra.gmra.mxu3 %vm797_vm2, %v1727_v3 }
 0xce7   :  { %1840 = vmatpush.msra.mxu3 %v6353_v15 }
 0xce9   :  { %1841 = vmatpush.msra.mxu3 %v6355_v16 }
 0xceb   :  { %1842 = vmatpush.msra.mxu3 %v6358_v17 }
 0xced   :  { %1843 = vmatpush.msra.mxu3 %v6363_v19 }
 0xd69   :  { %v1747_v4 = vpop.f32.mrf.mxu3 }
 0xd6a   :  { %v1748_v5 = vadd.f32 %v6425_v61, %v1747_v4 }
 0xd6c   :  { %1756 = vrot.lane.b32.xlu1 %v1748_v5, %s5944_s13  ;;  %v1750_v8 = vadd.f32 %v1748_v5, %v1512_v7  ;;  %v1520_v5 = vpop.f32.mrf.mxu2 }
 0xd6d   :  { %v1521_v6 = vadd.f32 %v6438_v46, %v1520_v5  ;;  %v1937_v46 = vld [vmem:[%s6521_s20 + $0x30] sm:$0xff] }
 0xd6e   :  { %v1751_v9 = vmul.f32 0.5, %v1750_v8  ;;  %1950 = vmatpush.msra.mxu0 %v1937_v46 }
 0xd70   :  { %5869 = vtanh.f32 %v1751_v9 }
 0xd76   :  { %v5870_v10 = vpop.eup %5869 }
 0xd77   :  { %v1753_v11 = vadd.f32 1.0, %v5870_v10 }
 0xd79   :  { %v1754_v12 = vmul.f32 0.5, %v1753_v11 }
 0xd7b   :  { %v1766_v25 = vsub.f32 1.0, %v1754_v12  ;;  %v1772_v27 = vmul.f32 %v1754_v12, %v1724_v13 }
 0xdde   :  { %v1757_v14 = vpop.permute.xlu1 %1756 }
 0xddf   :  { %v1759_v18 = vmul.f32 %v1757_v14, %v1754_v12 }
 0xde1   :  { %1761 = vrot.lane.b32.xlu2 %v1759_v18, %s5944_s13 }
 0xe3b   :  { %v1762_v21 = vpop.permute.xlu2 %1761 }
 0xe3c   :  { %v1764_v22 = vadd.f32 %v1762_v21, %v1512_v7 }
 0xe3e   :  { %5871 = vtanh.f32 %v1764_v22  ;;  %v1993_v22 = vld [vmem:[%s6526_s24 + $0x30] sm:$0xff] }
 0xe3f   :  { %2003 = vmatpush.msrb.mxu2 %v1993_v22 }
 0xe44   :  { %v5872_v23 = vpop.eup %5871 }
 0xe45   :  { %1768 = vrot.lane.b32.xlu0 %v5872_v23, %s5945_s16  ;;  %v1986_v23 = vld [vmem:[%s5354_s28 + $0x18] sm:$0xff] }
 0xeb7   :  { %v1769_v26 = vpop.permute.xlu0 %1768 }
 0xeb8   :  { %v1771_v29 = vmul.f32 %v1769_v26, %v1766_v25  ;;  %v1936_v25 = vld [vmem:[%s6521_s20 + $0x28] sm:$0xff] }
 0xeb9   :  { %v1992_v26 = vld [vmem:[%s6526_s24 + $0x28] sm:$0xff]  ;;  %1951 = vmatpush.msra.mxu0 %v1936_v25 }
 0xeba   :  { %v1773_v30 = vadd.f32 %v1772_v27, %v1771_v29  ;;  %v1985_v27 = vld [vmem:[%s5354_s28 + $0x10] sm:$0xff]  ;;  %v1935_v29 = vld [vmem:[%s6521_s20 + $0x20] sm:$0xff]  ;;  %2004 = vmatpush.msrb.mxu2 %v1992_v26 }
 0xebb   :  { %1952 = vmatpush.msra.mxu0 %v1935_v29 }
 0xebc   :  { %1775 = vrot.lane.b32.xlu1 %v1773_v30, %s5945_s16 }
 0xf2e   :  { %v1776_v31 = vpop.permute.xlu1 %1775 }
 0xf2f   :  { %5539 = vmatmul.msk.f32.vlgmr.msrb.gmra.mxu3 %vm797_vm2, %v1776_v31  ;;  %v1984_v31 = vld [vmem:[%s5354_s28 + $0x8] sm:$0xff] }
 0xf30   :  { %1889 = vmatpush.msrb.mxu3 %v6353_v15 }
 0xf32   :  { %1890 = vmatpush.msrb.mxu3 %v6355_v16 }
 0xf34   :  { %1891 = vmatpush.msrb.mxu3 %v6358_v17 }
 0xf36   :  { %1892 = vmatpush.msrb.mxu3 %v6363_v19 }
 0xfb2   :  { %v1796_v33 = vpop.f32.mrf.mxu3 }
 0xfb3   :  { %v1797_v34 = vadd.f32 %v6425_v61, %v1796_v33  ;;  %v1930_v33 = vld [vmem:[%s6534_s2 + $0x18] sm:$0xff] }
 0xfb4   :  { %1975 = vmatpush.msra.mxu1 %v1930_v33 }
 0xfb5   :  { %1805 = vrot.lane.b32.xlu2 %v1797_v34, %s5944_s13  ;;  %v1799_v37 = vadd.f32 %v1797_v34, %v1515_v36  ;;  %v1934_v34 = vld [vmem:[%s6521_s20 + $0x18] sm:$0xff] }
 0xfb6   :  { %1953 = vmatpush.msra.mxu0 %v1934_v34 }
 0xfb7   :  { %v1800_v28 = vmul.f32 0.5, %v1799_v37  ;;  %v1983_v37 = vld [vmem:[%s5354_s28] sm:$0xff]  ;;  %s6606_s28 = sld [smem:[%s7733_s0 + %s5955_s25]]  }
 0xfb8   :  { %s6659_s25 = sld [smem:[%s7733_s0 + %s5961_s22]]   ;;  %s5974_s22 = smov 42  }
 0xfb9   :  { %5873 = vtanh.f32 %v1800_v28  ;;  %v1933_v28 = vld [vmem:[%s6521_s20 + $0x10] sm:$0xff] }
 0xfba   :  { %1954 = vmatpush.msra.mxu0 %v1933_v28 }
 0xfbf   :  { %v5874_v20 = vpop.eup %5873 }
 0xfc0   :  { %v1802_v24 = vadd.f32 1.0, %v5874_v20  ;;  %v1989_v20 = vld [vmem:[%s6526_s24 + $0x10] sm:$0xff] }
 0xfc2   :  { %v1803_v15 = vmul.f32 0.5, %v1802_v24  ;;  %v1928_v24 = vld [vmem:[%s6534_s2 + $0x8] sm:$0xff] }
 0xfc4   :  { %v1815_v40 = vsub.f32 1.0, %v1803_v15  ;;  %v1821_v42 = vmul.f32 %v1803_v15, %v1773_v30  ;;  %v1991_v30 = vld [vmem:[%s6526_s24 + $0x20] sm:$0xff] }
 0xfc5   :  { %2005 = vmatpush.msrb.mxu2 %v1991_v30 }
 0xfc7   :  { %2006 = vmatpush.msrb.mxu2 %v1990_v35 }
 0xfc9   :  { %2007 = vmatpush.msrb.mxu2 %v1989_v20 }
0x100f   :  { %v1806_v38 = vpop.permute.xlu2 %1805 }
0x1010   :  { %v1808_v16 = vmul.f32 %v1806_v38, %v1803_v15  ;;  %v2266_v15 = vld [vmem:[%s6539_s6 + $0x30] sm:$0xff]  ;;  %v1927_v38 = vld [vmem:[%s6534_s2] sm:$0xff] }
0x1012   :  { %1810 = vrot.lane.b32.xlu0 %v1808_v16, %s5944_s13  ;;  %v1932_v16 = vld [vmem:[%s6521_s20 + $0x8] sm:$0xff] }
0x1013   :  { %1955 = vmatpush.msra.mxu0 %v1932_v16 }
0x1084   :  { %v1811_v17 = vpop.permute.xlu0 %1810 }
0x1085   :  { %v1813_v19 = vadd.f32 %v1811_v17, %v1515_v36  ;;  %v1929_v36 = vld [vmem:[%s6534_s2 + $0x10] sm:$0xff]  ;;  %v1988_v17 = vld [vmem:[%s6526_s24 + $0x8] sm:$0xff]  ;;  %s5357_s2 = sld [smem:[%s7733_s0 + %s5956_s29]]  }
0x1086   :  { %1976 = vmatpush.msra.mxu1 %v1929_v36  ;;  %2008 = vmatpush.msrb.mxu2 %v1988_v17  ;;  %s5368_s29 = sld [smem:[%s7733_s0 + %s5962_s26]]  }
0x1087   :  { %5875 = vtanh.f32 %v1813_v19  ;;  %v2265_v19 = vld [vmem:[%s6539_s6 + $0x28] sm:$0xff]  ;;  %s6851_s26 = sld [smem:[%s7733_s0 + %s5974_s22]]  }
0x1088   :  { %1977 = vmatpush.msra.mxu1 %v1928_v24 }
0x108a   :  { %1978 = vmatpush.msra.mxu1 %v1927_v38 }
0x108d   :  { %v5876_v39 = vpop.eup %5875 }
0x108e   :  { %1817 = vrot.lane.b32.xlu1 %v5876_v39, %s5945_s16  ;;  %v1931_v39 = vld [vmem:[%s6521_s20] sm:$0xff]  ;;  %s5386_s20 = sld [smem:[%s7733_s0 + %s5953_s17]]  }
0x108f   :  { %1956 = vmatpush.msra.mxu0 %v1931_v39  ;;  %s6646_s17 = sld [smem:[%s7733_s0 + %s5959_s12]]  }
0x1090   :  { %s6676_s12 = sld [smem:[%s7733_s0 + %s5965_s8]]  }
0x1100   :  { %v1818_v41 = vpop.permute.xlu1 %1817 }
0x1101   :  { %v1820_v43 = vmul.f32 %v1818_v41, %v1815_v40  ;;  %v1987_v40 = vld [vmem:[%s6526_s24] sm:$0xff]  ;;  %s5356_s24 = sld [smem:[%s7733_s0 + %s5954_s21]]  }
0x1102   :  { %v2264_v41 = vld [vmem:[%s6539_s6 + $0x20] sm:$0xff]  ;;  %2009 = vmatpush.msrb.mxu2 %v1987_v40  ;;  %s5363_s21 = sld [smem:[%s7733_s0 + %s5960_s18]]   ;;  %s5973_s18 = smov 41  }
0x1103   :  { %v1822_v44 = vadd.f32 %v1821_v42, %v1820_v43 }
0x1105   :  { %1824 = vrot.lane.b32.xlu2 %v1822_v44, %s5945_s16 }
0x1107   :  { %v5811_v5 = vld [vmem:[%s5356_s24] ss:$0 sm:$0xff]  ;;  %s5968_s24 = smov 38  }
0x1108   :  { %s6715_s27 = sld [smem:[%s7733_s0 + %s5968_s24]]  }
0x115f   :  { %v1825_v45 = vpop.permute.xlu2 %1824 }
0x1160   :  { %5540 = vmatmul.msk.f32.vlgmr.msra.gmra.mxu3 %vm797_vm2, %v1825_v45 }
0x1161   :  { %2026 = vmatpush.msra.mxu3 %v1986_v23 }
0x1163   :  { %2027 = vmatpush.msra.mxu3 %v1985_v27 }
0x1165   :  { %2028 = vmatpush.msra.mxu3 %v1984_v31 }
0x1167   :  { %2029 = vmatpush.msra.mxu3 %v1983_v37 }
0x11e3   :  { %v1845_v47 = vpop.f32.mrf.mxu3 }
0x11e4   :  { %v1846_v48 = vadd.f32 %v6425_v61, %v1845_v47 }
0x11e6   :  { %1854 = vrot.lane.b32.xlu0 %v1846_v48, %s5944_s13  ;;  %v1848_v51 = vadd.f32 %v1846_v48, %v1518_v50  ;;  %v6572_v48 = vld [vmem:[%s6569_s10] sm:$0xff] }
0x11e7   :  { %5542 = vmatmul.msk.f32.vlgmr.msra.gmra.mxu0 %vm236_vm0, %v6572_v48  ;;  %5544 = vmatmul.msk.f32.vlgmr.msrb.gmra.mxu2 %vm236_vm0, %v6572_v48 }
0x11e8   :  { %v1849_v52 = vmul.f32 0.5, %v1848_v51  ;;  %v2261_v51 = vld [vmem:[%s6539_s6 + $0x8] sm:$0xff] }
0x11ea   :  { %5877 = vtanh.f32 %v1849_v52  ;;  %v2260_v52 = vld [vmem:[%s6539_s6] sm:$0xff] }
0x11f0   :  { %v5878_v53 = vpop.eup %5877 }
0x11f1   :  { %v1851_v55 = vadd.f32 1.0, %v5878_v53  ;;  %v2259_v53 = vld [vmem:[%s5361_s15 + $0x18] sm:$0xff] }
0x11f3   :  { %v1852_v56 = vmul.f32 0.5, %v1851_v55 }
0x11f5   :  { %v1864_v63 = vsub.f32 1.0, %v1852_v56  ;;  %v1870_v1 = vmul.f32 %v1852_v56, %v1822_v44 }
0x1258   :  { %v1855_v57 = vpop.permute.xlu0 %1854 }
0x1259   :  { %v1857_v58 = vmul.f32 %v1855_v57, %v1852_v56  ;;  %v2258_v56 = vld [vmem:[%s5361_s15 + $0x10] sm:$0xff]  ;;  %v2257_v57 = vld [vmem:[%s5361_s15 + $0x8] sm:$0xff] }
0x125b   :  { %1859 = vrot.lane.b32.xlu1 %v1857_v58, %s5944_s13  ;;  %v2256_v58 = vld [vmem:[%s5361_s15] sm:$0xff] }
0x12cd   :  { %v1860_v59 = vpop.permute.xlu1 %1859 }
0x12ce   :  { %v1862_v60 = vadd.f32 %v1860_v59, %v1518_v50  ;;  %v2262_v50 = vld [vmem:[%s6539_s6 + $0x10] sm:$0xff]  ;;  %v2073_v59 = vld [vmem:[%s5357_s2 + $0x18] sm:$0xff]  ;;  %s6617_s6 = sld [smem:[%s7733_s0 + %s5957_s3]]  }
0x12cf   :  { %2114 = vmatpush.msrb.mxu0 %v2073_v59  ;;  %s5365_s3 = sld [smem:[%s7733_s0 + %s5963_s30]]  }
0x12d0   :  { %5879 = vtanh.f32 %v1862_v60  ;;  %v2072_v60 = vld [vmem:[%s5357_s2 + $0x10] sm:$0xff] }
0x12d1   :  { %2115 = vmatpush.msrb.mxu0 %v2072_v60 }
0x12d4   :  { %v2154_v29 = vld [vmem:[%s6617_s6 + $0x18] sm:$0xff]  ;;  %v2152_v39 = vld [vmem:[%s6617_s6 + $0x8] sm:$0xff]  ;;  %v2151_v40 = vld [vmem:[%s6617_s6] sm:$0xff] }
0x12d5   :  { %2195 = vmatpush.msrb.mxu1 %v2154_v29 }
0x12d6   :  { %v5880_v62 = vpop.eup %5879 }
0x12d7   :  { %1866 = vrot.lane.b32.xlu2 %v5880_v62, %s5945_s16  ;;  %v2071_v62 = vld [vmem:[%s5357_s2 + $0x8] sm:$0xff] }
0x12d8   :  { %2116 = vmatpush.msrb.mxu0 %v2071_v62 }
0x1331   :  { %v1867_v0 = vpop.permute.xlu2 %1866 }
0x1332   :  { %v1869_v54 = vmul.f32 %v1867_v0, %v1864_v63  ;;  %v2070_v63 = vld [vmem:[%s5357_s2] sm:$0xff]  ;;  %v1958_v0 = vpop.f32.mrf.mxu0  ;;  %s5970_s2 = smov 39  }
0x1333   :  { %2117 = vmatpush.msrb.mxu0 %v2070_v63  ;;  %s6737_s5 = sld [smem:[%s7733_s0 + %s5970_s2]]  }
0x1334   :  { %v6505_v2 = vadd.f32 %v1870_v1, %v1869_v54 }
0x1336   :  { %1873 = vrot.lane.b32.xlu0 %v6505_v2, %s5945_s16 }
0x13a8   :  { %v1874_v13 = vpop.permute.xlu0 %1873 }
0x13a9   :  { %5541 = vmatmul.msk.f32.vlgmr.msrb.gmra.mxu3 %vm797_vm2, %v1874_v13 }
0x13aa   :  { %2276 = vmatpush.msrb.mxu3 %v2266_v15 }
0x13ac   :  { %2277 = vmatpush.msrb.mxu3 %v2265_v19  ;;  %v2153_v19 = vld [vmem:[%s6617_s6 + $0x10] sm:$0xff]  ;;  %s5971_s6 = smov 53  }
0x13ad   :  { %2196 = vmatpush.msrb.mxu1 %v2153_v19  ;;  %v2380_v19 = vld [vmem:[%s5368_s29] sm:$0xff]  ;;  %s5385_s9 = sld [smem:[%s7733_s0 + %s5971_s6]]   ;;  %s5977_s6 = smov 46  }
0x13ae   :  { %2278 = vmatpush.msrb.mxu3 %v2264_v41  ;;  %v5812_v41 = vld [vmem:[%s6606_s28] ss:$0 sm:$0xff]  ;;  %s5969_s28 = smov 34  }
0x13af   :  { %2197 = vmatpush.msrb.mxu1 %v2152_v39  ;;  %v2344_v39 = vld [vmem:[%s5365_s3 + $0x18] sm:$0xff]  ;;  %s5366_s1 = sld [smem:[%s7733_s0 + %s5969_s28]]  }
0x13b0   :  { %2279 = vmatpush.msrb.mxu3 %v2263_v49 }
0x13b1   :  { %2198 = vmatpush.msrb.mxu1 %v2151_v40  ;;  %v2343_v40 = vld [vmem:[%s5365_s3 + $0x10] sm:$0xff] }
0x13b2   :  { %2280 = vmatpush.msrb.mxu3 %v2262_v50 }
0x13b4   :  { %2281 = vmatpush.msrb.mxu3 %v2261_v51 }
0x13b6   :  { %2282 = vmatpush.msrb.mxu3 %v2260_v52 }
0x142c   :  { %v1894_v3 = vpop.f32.mrf.mxu3 }
0x142d   :  { %v1895_v4 = vadd.f32 %v6425_v61, %v1894_v3 }
0x142f   :  { %1903 = vrot.lane.b32.xlu1 %v1895_v4, %s5944_s13  ;;  %v1897_v7 = vadd.f32 %v1895_v4, %v1521_v6 }
0x1431   :  { %v1898_v8 = vmul.f32 0.5, %v1897_v7 }
0x1433   :  { %5881 = vtanh.f32 %v1898_v8 }
0x1439   :  { %v5882_v9 = vpop.eup %5881 }
0x143a   :  { %v1900_v10 = vadd.f32 1.0, %v5882_v9 }
0x143c   :  { %v6513_v11 = vmul.f32 0.5, %v1900_v10 }
0x143e   :  { %v1913_v42 = vsub.f32 1.0, %v6513_v11  ;;  %v1919_v44 = vmul.f32 %v6513_v11, %v6505_v2  ;;  %v2011_v2 = vpop.f32.mrf.mxu2 }
0x14a1   :  { %v1904_v12 = vpop.permute.xlu1 %1903 }
0x14a2   :  { %v1906_v14 = vmul.f32 %v1904_v12, %v6513_v11 }
0x14a4   :  { %1908 = vrot.lane.b32.xlu2 %v1906_v14, %s5944_s13 }
0x14fe   :  { %v1909_v18 = vpop.permute.xlu2 %1908 }
0x14ff   :  { %v1911_v21 = vadd.f32 %v1909_v18, %v1521_v6 }
0x1501   :  { %5883 = vtanh.f32 %v1911_v21 }
0x1507   :  { %v5884_v61 = vpop.eup %5883 }
0x1508   :  { %1915 = vrot.lane.b32.xlu0 %v5884_v61, %s5945_s16 }
0x157a   :  { %v1916_v43 = vpop.permute.xlu0 %1915 }
0x157b   :  { %v1918_v45 = vmul.f32 %v1916_v43, %v1913_v42 }
0x157d   :  { %v1920_v47 = vadd.f32 %v1919_v44, %v1918_v45 }
0x157f   :  { %1922 = vrot.lane.b32.xlu1 %v1920_v47, %s5945_s16 }
0x15f1   :  { %v6588_v55 = vpop.permute.xlu1 %1922 }
0x15f2   :  { %1925 = vst.msk [vmem:[%s5386_s20] sm:$0xff] %vm797_vm2, %v6588_v55  ;;  %5543 = vmatmul.msk.f32.vlgmr.msra.gmra.mxu1 %vm797_vm2, %v6588_v55  ;;  %5545 = vmatmul.msk.f32.vlgmr.msra.gmra.mxu3 %vm797_vm2, %v6588_v55  ;;  %s5967_s20 = smov 35  }
0x15f3   :  { %2299 = vmatpush.msra.mxu3 %v2259_v53  ;;  %s6686_s23 = sld [smem:[%s7733_s0 + %s5967_s20]]  }
0x15f5   :  { %2300 = vmatpush.msra.mxu3 %v2258_v56 }
0x15f7   :  { %2301 = vmatpush.msra.mxu3 %v2257_v57 }
0x15f9   :  { %2302 = vmatpush.msra.mxu3 %v2256_v58 }
0x15fa   :  { %5563 = vmatmul.msk.f32.vlgmr.msrb.gmra.mxu3 %vm236_vm0, %v6572_v48 }
0x15fb   :  { %2364 = vmatpush.msrb.mxu3 %v2344_v39 }
0x15fd   :  { %2365 = vmatpush.msrb.mxu3 %v2343_v40 }
0x1602   :  { %5564 = vmatmul.msk.f32.vlgmr.msra.gmra.mxu3 %vm797_vm2, %v6588_v55 }
0x166f   :  { %v1980_v1 = vpop.f32.mrf.mxu1 }
0x1670   :  { %v1981_v54 = vadd.f32 %v1980_v1, %v1958_v0 }
0x1672   :  { %v2034_v4 = vperm.slane %v1981_v54, 0  ;;  %v2035_v8 = vperm.slane %v1981_v54, 1  ;;  %v2036_v12 = vperm.slane %v1981_v54, 2  ;;  %v2037_v61 = vperm.slane %v1981_v54, 3 }
0x1673   :  { %v2038_v25 = vperm.slane %v1981_v54, 4  ;;  %v2039_v31 = vperm.slane %v1981_v54, 5  ;;  %v2040_v36 = vperm.slane %v1981_v54, 6  ;;  %v2041_v24 = vperm.slane %v1981_v54, 7 }
0x1675   :  { %v2031_v13 = vpop.f32.mrf.mxu3 }
0x1676   :  { %v2032_v3 = vadd.f32 %v2031_v13, %v2011_v2 }
0x1678   :  { %v2042_v6 = vadd.f32 %v2034_v4, %v2032_v3  ;;  %v2043_v10 = vadd.f32 %v2035_v8, %v2032_v3  ;;  %v2044_v18 = vadd.f32 %v2036_v12, %v2032_v3  ;;  %v2045_v22 = vadd.f32 %v2037_v61, %v2032_v3  ;;  %v5813_v12 = vld [vmem:[%s6628_s11] ss:$0 sm:$0xff]  ;;  %s5972_s11 = smov 40  }
0x1679   :  { %v2046_v27 = vadd.f32 %v2038_v25, %v2032_v3  ;;  %v2047_v34 = vadd.f32 %v2039_v31, %v2032_v3  ;;  %v2048_v28 = vadd.f32 %v2040_v36, %v2032_v3  ;;  %v2049_v38 = vadd.f32 %v2041_v24, %v2032_v3  ;;  %v2308_v24 = vld [vmem:[%s5363_s21 + $0x8] sm:$0xff]  ;;  %s6758_s15 = sld [smem:[%s7733_s0 + %s5972_s11]]   ;;  %s5978_s11 = smov 49  }
0x167a   :  { %v2054_v7 = vadd.f32 %v5811_v5, %v2042_v6  ;;  %v2055_v11 = vadd.f32 %v5811_v5, %v2043_v10  ;;  %v2056_v21 = vadd.f32 %v5811_v5, %v2044_v18  ;;  %v2057_v23 = vadd.f32 %v5811_v5, %v2045_v22 }
0x167b   :  { %v2058_v30 = vadd.f32 %v5811_v5, %v2046_v27  ;;  %v2059_v35 = vadd.f32 %v5811_v5, %v2047_v34  ;;  %v2060_v20 = vadd.f32 %v5811_v5, %v2048_v28  ;;  %v2061_v16 = vadd.f32 %v5811_v5, %v2049_v38  ;;  %v2310_v28 = vld [vmem:[%s5363_s21 + $0x18] sm:$0xff] }
0x167c   :  { %v2062_v9 = vmax.f32 %v2054_v7, 0.0  ;;  %v2063_v14 = vmax.f32 %v2055_v11, 0.0  ;;  %v2064_v46 = vmax.f32 %v2056_v21, 0.0  ;;  %v2065_v26 = vmax.f32 %v2057_v23, 0.0  ;;  %v2383_v38 = vld [vmem:[%s5368_s29 + $0x18] sm:$0xff] }
0x167d   :  { %v2066_v33 = vmax.f32 %v2058_v30, 0.0  ;;  %v2067_v37 = vmax.f32 %v2059_v35, 0.0  ;;  %v2068_v15 = vmax.f32 %v2060_v20, 0.0  ;;  %v2069_v17 = vmax.f32 %v2061_v16, 0.0  ;;  %v2309_v20 = vld [vmem:[%s5363_s21 + $0x10] sm:$0xff] }
0x167e   :  { %5546 = vmatmul.msk.f32.vlgmr.msrb.gmra.mxu0 %vm797_vm2, %v2062_v9  ;;  %v2382_v16 = vld [vmem:[%s5368_s29 + $0x10] sm:$0xff] }
0x1686   :  { %5547 = vmatmul.msk.f32.gmra.mxu0 %vm797_vm2, %v2063_v14 }
0x168e   :  { %5548 = vmatmul.msk.f32.gmra.mxu0 %vm797_vm2, %v2064_v46 }
0x1696   :  { %5549 = vmatmul.msk.f32.gmra.mxu0 %vm797_vm2, %v2065_v26 }
0x169e   :  { %5550 = vmatmul.msk.f32.gmra.mxu0 %vm797_vm2, %v2066_v33 }
0x16a6   :  { %5551 = vmatmul.msk.f32.gmra.mxu0 %vm797_vm2, %v2067_v37  ;;  %v6652_v37 = vld [vmem:[%s6646_s17] sm:$0xff] }
0x16ae   :  { %5552 = vmatmul.msk.f32.gmra.mxu0 %vm797_vm2, %v2068_v15  ;;  %v2307_v15 = vld [vmem:[%s5363_s21] sm:$0xff]  ;;  %s6808_s21 = sld [smem:[%s7733_s0 + %s5973_s18]]  }
0x16af   :  { %s6941_s18 = sld [smem:[%s7733_s0 + %s5978_s11]]  }
0x16b6   :  { %5553 = vmatmul.msk.f32.gmra.mxu0 %vm797_vm2, %v2069_v17  ;;  %v2381_v17 = vld [vmem:[%s5368_s29 + $0x8] sm:$0xff] }
0x16fb   :  { %v2119_v42 = vpop.f32.mrf.mxu0 }
0x16fc   :  { %v2120_v43 = vadd.f32 %v5812_v41, %v2119_v42 }
0x16fe   :  { %v2143_v44 = vmax.f32 %v2120_v43, 0.0  ;;  %v2458_v43 = vld [vmem:[%s5375_s7 + $0x10] sm:$0xff] }
0x1700   :  { %5554 = vmatmul.msk.f32.vlgmr.msrb.gmra.mxu1 %vm797_vm2, %v2143_v44  ;;  %v2457_v44 = vld [vmem:[%s5375_s7 + $0x8] sm:$0xff] }
0x1703   :  { %v2122_v45 = vpop.f32.mrf.mxu0 }
0x1704   :  { %v2123_v47 = vadd.f32 %v5812_v41, %v2122_v45  ;;  %v2456_v45 = vld [vmem:[%s5375_s7] sm:$0xff] }
0x1706   :  { %v2144_v49 = vmax.f32 %v2123_v47, 0.0  ;;  %v2342_v47 = vld [vmem:[%s5365_s3 + $0x8] sm:$0xff] }
0x1707   :  { %2366 = vmatpush.msrb.mxu3 %v2342_v47 }
0x1708   :  { %5555 = vmatmul.msk.f32.gmra.mxu1 %vm797_vm2, %v2144_v49  ;;  %v2341_v49 = vld [vmem:[%s5365_s3] sm:$0xff] }
0x1709   :  { %2367 = vmatpush.msrb.mxu3 %v2341_v49 }
0x170b   :  { %v2125_v50 = vpop.f32.mrf.mxu0 }
0x170c   :  { %v2126_v51 = vadd.f32 %v5812_v41, %v2125_v50  ;;  %v2415_v50 = vld [vmem:[%s5369_s19 + $0x18] sm:$0xff] }
0x170d   :  { %2428 = vmatpush.msra.mxu3 %v2415_v50 }
0x170e   :  { %v2145_v52 = vmax.f32 %v2126_v51, 0.0  ;;  %v2414_v51 = vld [vmem:[%s5369_s19 + $0x10] sm:$0xff] }
0x170f   :  { %2429 = vmatpush.msra.mxu3 %v2414_v51 }
0x1710   :  { %5556 = vmatmul.msk.f32.gmra.mxu1 %vm797_vm2, %v2145_v52  ;;  %v2413_v52 = vld [vmem:[%s5369_s19 + $0x8] sm:$0xff] }
0x1711   :  { %2430 = vmatpush.msra.mxu3 %v2413_v52 }
0x1713   :  { %v2128_v53 = vpop.f32.mrf.mxu0 }
0x1714   :  { %v2129_v56 = vadd.f32 %v5812_v41, %v2128_v53  ;;  %v2412_v53 = vld [vmem:[%s5369_s19] sm:$0xff]  ;;  %s5979_s19 = smov 47  }
0x1715   :  { %2431 = vmatpush.msra.mxu3 %v2412_v53  ;;  %s6946_s24 = sld [smem:[%s7733_s0 + %s5979_s19]]  }
0x1716   :  { %v2146_v57 = vmax.f32 %v2129_v56, 0.0  ;;  %v2284_v56 = vpop.f32.mrf.mxu3 }
0x1718   :  { %5557 = vmatmul.msk.f32.gmra.mxu1 %vm797_vm2, %v2146_v57 }
0x171b   :  { %v2131_v58 = vpop.f32.mrf.mxu0 }
0x171c   :  { %v2132_v59 = vadd.f32 %v5812_v41, %v2131_v58 }
0x171e   :  { %v2147_v60 = vmax.f32 %v2132_v59, 0.0  ;;  %v2304_v57 = vpop.f32.mrf.mxu3  ;;  %v5814_v59 = vld [vmem:[%s6659_s25] ss:$0 sm:$0xff]  ;;  %s5981_s25 = smov 50  }
0x171f   :  { %v2305_v58 = vadd.f32 %v2304_v57, %v2284_v56  ;;  %s6983_s29 = sld [smem:[%s7733_s0 + %s5981_s25]]  }
0x1720   :  { %5558 = vmatmul.msk.f32.gmra.mxu1 %vm797_vm2, %v2147_v60 }
0x1723   :  { %v2134_v62 = vpop.f32.mrf.mxu0 }
0x1724   :  { %v2135_v63 = vadd.f32 %v5812_v41, %v2134_v62 }
0x1726   :  { %v2148_v0 = vmax.f32 %v2135_v63, 0.0 }
0x1728   :  { %5559 = vmatmul.msk.f32.gmra.mxu1 %vm797_vm2, %v2148_v0 }
0x172b   :  { %v2137_v1 = vpop.f32.mrf.mxu0 }
0x172c   :  { %v2138_v54 = vadd.f32 %v5812_v41, %v2137_v1  ;;  %v6690_v1 = vld [vmem:[%s6686_s23 + $0x30] sm:$0xff] }
0x172e   :  { %v2149_v2 = vmax.f32 %v2138_v54, 0.0  ;;  %v6694_v54 = vld [vmem:[%s6686_s23 + $0x28] sm:$0xff] }
0x1730   :  { %5560 = vmatmul.msk.f32.gmra.mxu1 %vm797_vm2, %v2149_v2 }
0x1733   :  { %v2140_v13 = vpop.f32.mrf.mxu0 }
0x1734   :  { %v2141_v3 = vadd.f32 %v5812_v41, %v2140_v13  ;;  %v2459_v41 = vld [vmem:[%s5375_s7 + $0x18] sm:$0xff]  ;;  %v6700_v13 = vld [vmem:[%s6686_s23 + $0x20] sm:$0xff]  ;;  %s5983_s7 = smov 52  }
0x1736   :  { %v2150_v4 = vmax.f32 %v2141_v3, 0.0  ;;  %v6704_v3 = vld [vmem:[%s6686_s23 + $0x18] sm:$0xff] }
0x1738   :  { %5561 = vmatmul.msk.f32.gmra.mxu1 %vm797_vm2, %v2150_v4  ;;  %v5815_v4 = vld [vmem:[%s6676_s12] ss:$0 sm:$0xff]  ;;  %s7026_s12 = sld [smem:[%s7733_s0 + %s5983_s7]]  }
0x177d   :  { %v2200_v5 = vpop.f32.mrf.mxu1 }
0x177e   :  { %v2201_v33 = vadd.f32 %v5813_v12, %v2200_v5  ;;  %v6709_v5 = vld [vmem:[%s6686_s23 + $0x10] sm:$0xff] }
0x1780   :  { %v2224_v36 = vmax.f32 %v2201_v33, 0.0 }
0x1785   :  { %v2203_v6 = vpop.f32.mrf.mxu1 }
0x1786   :  { %v2204_v30 = vadd.f32 %v5813_v12, %v2203_v6  ;;  %v6720_v6 = vld [vmem:[%s6686_s23 + $0x8] sm:$0xff] }
0x1788   :  { %v2225_v35 = vmax.f32 %v2204_v30, 0.0 }
0x178d   :  { %v2206_v7 = vpop.f32.mrf.mxu1 }
0x178e   :  { %v2207_v27 = vadd.f32 %v5813_v12, %v2206_v7 }
0x1790   :  { %v2226_v34 = vmax.f32 %v2207_v27, 0.0 }
0x1795   :  { %v2209_v8 = vpop.f32.mrf.mxu1 }
0x1796   :  { %v2210_v25 = vadd.f32 %v5813_v12, %v2209_v8 }
0x1798   :  { %v2227_v31 = vmax.f32 %v2210_v25, 0.0  ;;  %v6775_v25 = vld [vmem:[%s6715_s27] ss:$0 sm:$0xff]  ;;  %s5975_s27 = smov 44  }
0x1799   :  { %s6877_s30 = sld [smem:[%s7733_s0 + %s5975_s27]]  }
0x179d   :  { %v2212_v9 = vpop.f32.mrf.mxu1 }
0x179e   :  { %v2213_v22 = vadd.f32 %v5813_v12, %v2212_v9  ;;  %v6724_v9 = vld [vmem:[%s6686_s23] sm:$0xff] }
0x17a0   :  { %v2228_v29 = vmax.f32 %v2213_v22, 0.0 }
0x17a5   :  { %v2215_v10 = vpop.f32.mrf.mxu1 }
0x17a6   :  { %v2216_v61 = vadd.f32 %v5813_v12, %v2215_v10  ;;  %v6740_v10 = vld [vmem:[%s6737_s5 + $0x18] sm:$0xff] }
0x17a8   :  { %v2229_v26 = vmax.f32 %v2216_v61, 0.0  ;;  %v6764_v61 = vld [vmem:[%s6737_s5 + $0x8] sm:$0xff] }
0x17ad   :  { %v2218_v11 = vpop.f32.mrf.mxu1 }
0x17ae   :  { %v2219_v18 = vadd.f32 %v5813_v12, %v2218_v11 }
0x17b0   :  { %v2230_v23 = vmax.f32 %v2219_v18, 0.0 }
0x17b5   :  { %v2221_v14 = vpop.f32.mrf.mxu1 }
0x17b6   :  { %v2222_v21 = vadd.f32 %v5813_v12, %v2221_v14 }
0x17b8   :  { %v2231_v46 = vmax.f32 %v2222_v21, 0.0  ;;  %v6761_v21 = vld [vmem:[%s6737_s5 + $0x10] sm:$0xff] }
0x17ba   :  { %2244 = vmatpush.msra.mxu2 %v2231_v46  ;;  %v6768_v46 = vld [vmem:[%s6737_s5] sm:$0xff] }
0x17bc   :  { %2245 = vmatpush.msra.mxu2 %v2230_v23 }
0x17be   :  { %2246 = vmatpush.msra.mxu2 %v2229_v26 }
0x17c0   :  { %2247 = vmatpush.msra.mxu2 %v2228_v29 }
0x17c2   :  { %2248 = vmatpush.msra.mxu2 %v2227_v31 }
0x17c4   :  { %2249 = vmatpush.msra.mxu2 %v2226_v34 }
0x17c6   :  { %2250 = vmatpush.msra.mxu2 %v2225_v35 }
0x17c8   :  { %2251 = vmatpush.msra.mxu2 %v2224_v36 }
0x17c9   :  { %5562 = vmatmul.msk.f32.vlgmr.msra.gmra.mxu2 %vm400_vm1, %v6652_v37 }
0x17ca   :  { %2326 = vmatpush.msrb.mxu2 %v2310_v28 }
0x17cc   :  { %2327 = vmatpush.msrb.mxu2 %v2309_v20 }
0x17ce   :  { %2328 = vmatpush.msrb.mxu2 %v2308_v24 }
0x17d0   :  { %2329 = vmatpush.msrb.mxu2 %v2307_v15 }
0x17d2   :  { %2396 = vmatpush.msra.mxu2 %v2383_v38 }
0x17d4   :  { %2397 = vmatpush.msra.mxu2 %v2382_v16 }
0x17d6   :  { %2398 = vmatpush.msra.mxu2 %v2381_v17 }
0x17d8   :  { %2399 = vmatpush.msra.mxu2 %v2380_v19 }
0x184c   :  { %v2253_v42 = vpop.f32.mrf.mxu2 }
0x184d   :  { %5565 = vmatmul.msk.f32.vlgmr.msrb.gmra.mxu2 %vm797_vm2, %v2253_v42 }
0x184e   :  { %2476 = vmatpush.msrb.mxu2 %v2459_v41 }
0x1850   :  { %2477 = vmatpush.msrb.mxu2 %v2458_v43 }
0x1852   :  { %2478 = vmatpush.msrb.mxu2 %v2457_v44 }
0x1854   :  { %2479 = vmatpush.msrb.mxu2 %v2456_v45 }
0x1855   :  { %5567 = vmatmul.msk.f32.vlgmr.msra.gmra.mxu2 %vm797_vm2, %v6588_v55 }
0x1856   :  { %2592 = vmatpush.msra.mxu2 %v6740_v10 }
0x1858   :  { %2593 = vmatpush.msra.mxu2 %v6761_v21 }
0x185a   :  { %2594 = vmatpush.msra.mxu2 %v6764_v61 }
0x185c   :  { %2595 = vmatpush.msra.mxu2 %v6768_v46 }
0x185d   :  { %5569 = vmatmul.msk.f32.vlgmr.msrb.gmra.mxu2 %vm797_vm2, %v6588_v55 }
0x18d0   :  { %v2331_v60 = vpop.f32.mrf.mxu2 }
0x18d1   :  { %v2334_v62 = vadd.f32 %v2331_v60, %v2305_v58  ;;  %v6819_v58 = vld [vmem:[%s6808_s21 + $0x18] sm:$0xff] }
0x18d3   :  { %v2339_v63 = vadd.f32 %v5814_v59, %v2334_v62 }
0x18d5   :  { %v2340_v0 = vmax.f32 %v2339_v63, 0.0 }
0x18d7   :  { %5566 = vmatmul.msk.f32.vlgmr.msrb.gmra.mxu3 %vm797_vm2, %v2340_v0 }
0x18d8   :  { %v6696_v2 = vpop.f32.mrf.mxu2  ;;  %2501 = vmatpush.msrb.mxu3 %v6690_v1 }
0x18d9   :  { %v2404_v22 = vperm.slane %v6696_v2, 0  ;;  %v2405_v29 = vperm.slane %v6696_v2, 1  ;;  %v2406_v24 = vperm.slane %v6696_v2, 2  ;;  %v2407_v40 = vperm.slane %v6696_v2, 3 }
0x18da   :  { %2502 = vmatpush.msrb.mxu3 %v6694_v54  ;;  %v2408_v49 = vperm.slane %v6696_v2, 4  ;;  %v2409_v59 = vperm.slane %v6696_v2, 5 }
0x18dc   :  { %2503 = vmatpush.msrb.mxu3 %v6700_v13 }
0x18de   :  { %2504 = vmatpush.msrb.mxu3 %v6704_v3 }
0x18df   :  { %5568 = vmatmul.msk.f32.vlgmr.msra.gmra.mxu3 %vm797_vm2, %v6588_v55  ;;  %v115_v55 = vstv %s5366_s1  ;;  %s5976_s1 = smov 48  }
0x18e0   :  { %v2481_v7 = vpop.f32.mrf.mxu2  ;;  %2505 = vmatpush.msrb.mxu3 %v6709_v5  ;;  %116 = vst [vmem:[#allocation2] sm:$0x1] %v115_v55  ;;  %s6902_s4 = sld [smem:[%s7733_s0 + %s5976_s1]]   ;;  %s5982_s1 = smov 51  }
0x18e1   :  { %v2482_v8 = vadd.f32 %v5815_v4, %v2481_v7 }
0x18e2   :  { %2506 = vmatpush.msrb.mxu3 %v6720_v6 }
0x18e3   :  { %2766 = vrot.lane.b32.xlu1 %v2482_v8, %s5944_s13  ;;  %v2410_v8 = vperm.slane %v6696_v2, 6 }
0x18e4   :  { %2507 = vmatpush.msrb.mxu3 %v6724_v9 }
0x18e6   :  { %2673 = vmatpush.msra.mxu3 %v6819_v58 }
0x18e7   :  { %5570 = vmatmul.msk.f32.vlgmr.msrb.gmra.mxu3 %vm236_vm0, %v6572_v48  ;;  %v5816_v48 = vld [vmem:[#allocation2] ss:$0 sm:$0xff] }
0x195a   :  { %v2369_v11 = vpop.f32.mrf.mxu3 }
0x195b   :  { %v6746_v12 = vadd.f32 %v5816_v48, %v2369_v11 }
0x195d   :  { %2373 = vst.msk [vmem:[%s5385_s9] sm:$0xff] %vm2372_vm4, %v6746_v12  ;;  %s6936_s9 = sld [smem:[%s7733_s0 + %s5977_s6]]  }
0x195e   :  { %s7012_s6 = sld [smem:[%s7733_s0 + %s5982_s1]]  }
0x1962   :  { %v6749_v14 = vpop.f32.mrf.mxu3 }
0x1963   :  { %v2436_v23 = vadd.f32 %v6749_v14, %v2404_v22  ;;  %v2437_v33 = vadd.f32 %v6749_v14, %v2405_v29  ;;  %v2438_v38 = vadd.f32 %v6749_v14, %v2406_v24  ;;  %v2439_v42 = vadd.f32 %v6749_v14, %v2407_v40 }
0x1964   :  { %v2440_v51 = vadd.f32 %v6749_v14, %v2408_v49  ;;  %v2441_v62 = vadd.f32 %v6749_v14, %v2409_v59  ;;  %v2442_v48 = vadd.f32 %v6749_v14, %v2410_v8  ;;  %v2411_v29 = vperm.slane %v6696_v2, 7  ;;  %v6854_v2 = vld [vmem:[%s6808_s21 + $0x10] sm:$0xff] }
0x1965   :  { %v6780_v30 = vadd.f32 %v6775_v25, %v2436_v23  ;;  %v6786_v20 = vadd.f32 %v6775_v25, %v2437_v33  ;;  %v6794_v39 = vadd.f32 %v6775_v25, %v2438_v38  ;;  %v6802_v47 = vadd.f32 %v6775_v25, %v2439_v42  ;;  %2674 = vmatpush.msra.mxu3 %v6854_v2 }
0x1966   :  { %v6815_v57 = vadd.f32 %v6775_v25, %v2440_v51  ;;  %v6827_v7 = vadd.f32 %v6775_v25, %v2441_v62  ;;  %v2443_v33 = vadd.f32 %v6749_v14, %v2411_v29  ;;  %v6858_v14 = vld [vmem:[%s6808_s21 + $0x8] sm:$0xff] }
0x1967   :  { %2675 = vmatpush.msra.mxu3 %v6858_v14 }
0x196a   :  { %v6751_v18 = vpop.f32.mrf.mxu3 }
0x196b   :  { %2521 = vrot.lane.b32.xlu2 %v6751_v18, %s5945_s16  ;;  %v2512_v26 = vperm.slane %v6751_v18, 0  ;;  %v2513_v35 = vperm.slane %v6751_v18, 1  ;;  %v2514_v16 = vperm.slane %v6751_v18, 2  ;;  %v2515_v43 = vperm.slane %v6751_v18, 3 }
0x196c   :  { %v2516_v52 = vperm.slane %v6751_v18, 4  ;;  %v2517_v63 = vperm.slane %v6751_v18, 5  ;;  %v2518_v11 = vperm.slane %v6751_v18, 6 }
0x19c5   :  { %v2522_v27 = vpop.permute.xlu2 %2521 }
0x19c6   :  { %v2524_v31 = vadd.f32 %v2522_v27, %v2512_v26  ;;  %v2525_v28 = vadd.f32 %v2522_v27, %v2513_v35  ;;  %v2526_v19 = vadd.f32 %v2522_v27, %v2514_v16  ;;  %v2527_v45 = vadd.f32 %v2522_v27, %v2515_v43 }
0x19c7   :  { %v2528_v56 = vadd.f32 %v2522_v27, %v2516_v52  ;;  %v2529_v4 = vadd.f32 %v2522_v27, %v2517_v63  ;;  %v2530_v23 = vadd.f32 %v2522_v27, %v2518_v11  ;;  %v6835_v26 = vadd.f32 %v6775_v25, %v2442_v48 }
0x19c8   :  { %v2532_v34 = vadd.f32 %v2524_v31, %v6780_v30  ;;  %v2533_v15 = vadd.f32 %v2525_v28, %v6786_v20  ;;  %v2534_v41 = vadd.f32 %v2526_v19, %v6794_v39  ;;  %v2535_v50 = vadd.f32 %v2527_v45, %v6802_v47 }
0x19c9   :  { %v2536_v60 = vadd.f32 %v2528_v56, %v6815_v57  ;;  %v2537_v55 = vadd.f32 %v2529_v4, %v6827_v7  ;;  %v2538_v31 = vadd.f32 %v2530_v23, %v6835_v26  ;;  %v6843_v28 = vadd.f32 %v6775_v25, %v2443_v33  ;;  %v6862_v25 = vld [vmem:[%s6808_s21] sm:$0xff]  ;;  %v6880_v33 = vld [vmem:[%s6877_s30 + $0x18] sm:$0xff] }
0x19ca   :  { %v2540_v36 = vmax.f32 %v2532_v34, 0.0  ;;  %v2541_v17 = vmax.f32 %v2533_v15, 0.0  ;;  %v2542_v44 = vmax.f32 %v2534_v41, 0.0  ;;  %v2543_v53 = vmax.f32 %v2535_v50, 0.0  ;;  %2676 = vmatpush.msra.mxu3 %v6862_v25  ;;  %2752 = vmatpush.msra.mxu1 %v6880_v33 }
0x19cb   :  { %v2544_v0 = vmax.f32 %v2536_v60, 0.0  ;;  %v2545_v22 = vmax.f32 %v2537_v55, 0.0  ;;  %v2519_v34 = vperm.slane %v6751_v18, 7  ;;  %v2546_v35 = vmax.f32 %v2538_v31, 0.0 }
0x19cc   :  { %5571 = vmatmul.msk.f32.vlgmr.msra.gmra.mxu2 %vm797_vm2, %v2540_v36 }
0x19cd   :  { %v2531_v36 = vadd.f32 %v2522_v27, %v2519_v34  ;;  %v5818_v27 = vld [vmem:[%s6758_s15] ss:$0 sm:$0xff]  ;;  %v6883_v34 = vld [vmem:[%s6877_s30 + $0x10] sm:$0xff] }
0x19ce   :  { %2753 = vmatpush.msra.mxu1 %v6883_v34 }
0x19cf   :  { %v2539_v24 = vadd.f32 %v2531_v36, %v6843_v28 }
0x19d1   :  { %v2547_v15 = vmax.f32 %v2539_v24, 0.0  ;;  %v5819_v24 = vld [vmem:[%s6851_s26] ss:$0 sm:$0xff] }
0x19d4   :  { %5572 = vmatmul.msk.f32.gmra.mxu2 %vm797_vm2, %v2541_v17 }
0x19dc   :  { %5573 = vmatmul.msk.f32.gmra.mxu2 %vm797_vm2, %v2542_v44 }
0x19e4   :  { %5574 = vmatmul.msk.f32.gmra.mxu2 %vm797_vm2, %v2543_v53 }
0x19ec   :  { %5575 = vmatmul.msk.f32.gmra.mxu2 %vm797_vm2, %v2544_v0 }
0x19f4   :  { %5576 = vmatmul.msk.f32.gmra.mxu2 %vm797_vm2, %v2545_v22 }
0x19fc   :  { %5577 = vmatmul.msk.f32.gmra.mxu2 %vm797_vm2, %v2546_v35  ;;  %v6887_v35 = vld [vmem:[%s6877_s30 + $0x8] sm:$0xff] }
0x19fd   :  { %2754 = vmatpush.msra.mxu1 %v6887_v35 }
0x1a04   :  { %5578 = vmatmul.msk.f32.gmra.mxu2 %vm797_vm2, %v2547_v15 }
0x1a4f   :  { %v2597_v38 = vpop.f32.mrf.mxu2 }
0x1a50   :  { %v2598_v16 = vadd.f32 %v5818_v27, %v2597_v38 }
0x1a52   :  { %v2621_v17 = vmax.f32 %v2598_v16, 0.0 }
0x1a54   :  { %5579 = vmatmul.msk.f32.vlgmr.msra.gmra.mxu3 %vm797_vm2, %v2621_v17 }
0x1a57   :  { %v2600_v19 = vpop.f32.mrf.mxu2 }
0x1a58   :  { %v2601_v40 = vadd.f32 %v5818_v27, %v2600_v19 }
0x1a5a   :  { %v2622_v41 = vmax.f32 %v2601_v40, 0.0 }
0x1a5c   :  { %5580 = vmatmul.msk.f32.gmra.mxu3 %vm797_vm2, %v2622_v41 }
0x1a5f   :  { %v2603_v42 = vpop.f32.mrf.mxu2 }
0x1a60   :  { %v2604_v43 = vadd.f32 %v5818_v27, %v2603_v42 }
0x1a62   :  { %v2623_v44 = vmax.f32 %v2604_v43, 0.0 }
0x1a64   :  { %5581 = vmatmul.msk.f32.gmra.mxu3 %vm797_vm2, %v2623_v44 }
0x1a67   :  { %v2606_v45 = vpop.f32.mrf.mxu2 }
0x1a68   :  { %v2607_v49 = vadd.f32 %v5818_v27, %v2606_v45 }
0x1a6a   :  { %v2624_v50 = vmax.f32 %v2607_v49, 0.0 }
0x1a6c   :  { %5582 = vmatmul.msk.f32.gmra.mxu3 %vm797_vm2, %v2624_v50 }
0x1a6f   :  { %v2609_v51 = vpop.f32.mrf.mxu2 }
0x1a70   :  { %v2610_v52 = vadd.f32 %v5818_v27, %v2609_v51 }
0x1a72   :  { %v2625_v53 = vmax.f32 %v2610_v52, 0.0 }
0x1a74   :  { %5583 = vmatmul.msk.f32.gmra.mxu3 %vm797_vm2, %v2625_v53 }
0x1a77   :  { %v2612_v56 = vpop.f32.mrf.mxu2 }
0x1a78   :  { %v2613_v59 = vadd.f32 %v5818_v27, %v2612_v56  ;;  %v6895_v56 = vld [vmem:[%s6877_s30] sm:$0xff] }
0x1a79   :  { %2755 = vmatpush.msra.mxu1 %v6895_v56 }
0x1a7a   :  { %v2626_v60 = vmax.f32 %v2613_v59, 0.0 }
0x1a7c   :  { %5584 = vmatmul.msk.f32.gmra.mxu3 %vm797_vm2, %v2626_v60  ;;  %v6905_v60 = vld [vmem:[%s6902_s4 + $0x18] sm:$0xff] }
0x1a7d   :  { %2824 = vmatpush.msrb.mxu1 %v6905_v60 }
0x1a7f   :  { %v2615_v62 = vpop.f32.mrf.mxu2 }
0x1a80   :  { %v2616_v63 = vadd.f32 %v5818_v27, %v2615_v62  ;;  %v6912_v62 = vld [vmem:[%s6902_s4 + $0x8] sm:$0xff] }
0x1a82   :  { %v2627_v0 = vmax.f32 %v2616_v63, 0.0  ;;  %v6916_v63 = vld [vmem:[%s6902_s4] sm:$0xff] }
0x1a84   :  { %5585 = vmatmul.msk.f32.gmra.mxu3 %vm797_vm2, %v2627_v0 }
0x1a87   :  { %v2618_v4 = vpop.f32.mrf.mxu2 }
0x1a88   :  { %v2619_v8 = vadd.f32 %v5818_v27, %v2618_v4 }
0x1a8a   :  { %v2628_v55 = vmax.f32 %v2619_v8, 0.0  ;;  %v5820_v8 = vld [vmem:[%s6941_s18] ss:$0 sm:$0xff] }
0x1a8c   :  { %5586 = vmatmul.msk.f32.gmra.mxu3 %vm797_vm2, %v2628_v55 }
0x1ad7   :  { %v2678_v48 = vpop.f32.mrf.mxu3 }
0x1ad8   :  { %v2679_v50 = vadd.f32 %v5819_v24, %v2678_v48 }
0x1ada   :  { %v2702_v53 = vmax.f32 %v2679_v50, 0.0  ;;  %v6989_v50 = vld [vmem:[%s6983_s29 + $0x10] sm:$0xff] }
0x1adf   :  { %v2681_v11 = vpop.f32.mrf.mxu3 }
0x1ae0   :  { %v2682_v45 = vadd.f32 %v5819_v24, %v2681_v11 }
0x1ae2   :  { %v2703_v52 = vmax.f32 %v2682_v45, 0.0 }
0x1ae7   :  { %v2684_v22 = vpop.f32.mrf.mxu3 }
0x1ae8   :  { %v2685_v43 = vadd.f32 %v5819_v24, %v2684_v22  ;;  %v5980_v22 = vmov 0  }
0x1ae9   :  { %5803 = vset.pattern.permute.xlu1 %v5980_v22  ;;  %5804 = vset.pattern.permute.xlu0 %v5980_v22  ;;  %v5923_v22 = vld [vmem:[%s6569_s10] sm:$0xff] }
0x1aea   :  { %v2704_v51 = vmax.f32 %v2685_v43, 0.0 }
0x1aef   :  { %v2687_v23 = vpop.f32.mrf.mxu3 }
0x1af0   :  { %v2688_v41 = vadd.f32 %v5819_v24, %v2687_v23  ;;  %v5821_v23 = vld [vmem:[%s6946_s24] ss:$0 sm:$0xff] }
0x1af2   :  { %v2705_v49 = vmax.f32 %v2688_v41, 0.0 }
0x1af7   :  { %v2690_v29 = vpop.f32.mrf.mxu3 }
0x1af8   :  { %v2691_v19 = vadd.f32 %v5819_v24, %v2690_v29  ;;  %v2374_v29 = vmul.f32 100.0, %v6746_v12 }
0x1afa   :  { %v2706_v44 = vmax.f32 %v2691_v19, 0.0 }
0x1aff   :  { %v2693_v31 = vpop.f32.mrf.mxu3 }
0x1b00   :  { %v2694_v16 = vadd.f32 %v5819_v24, %v2693_v31 }
0x1b02   :  { %v2707_v42 = vmax.f32 %v2694_v16, 0.0 }
0x1b07   :  { %v2696_v36 = vpop.f32.mrf.mxu3 }
0x1b08   :  { %v2697_v27 = vadd.f32 %v5819_v24, %v2696_v36 }
0x1b0a   :  { %v2708_v40 = vmax.f32 %v2697_v27, 0.0 }
0x1b0f   :  { %v2699_v15 = vpop.f32.mrf.mxu3 }
0x1b10   :  { %v2700_v38 = vadd.f32 %v5819_v24, %v2699_v15  ;;  %v2375_v24 = vmul.f32 0.5, %v2374_v29 }
0x1b12   :  { %v2709_v17 = vmax.f32 %v2700_v38, 0.0 }
0x1b14   :  { %2721 = vmatpush.msra.mxu0 %v2709_v17 }
0x1b16   :  { %2722 = vmatpush.msra.mxu0 %v2708_v40 }
0x1b18   :  { %2723 = vmatpush.msra.mxu0 %v2707_v42 }
0x1b1a   :  { %2724 = vmatpush.msra.mxu0 %v2706_v44 }
0x1b1c   :  { %2725 = vmatpush.msra.mxu0 %v2705_v49  ;;  %v6986_v49 = vld [vmem:[%s6983_s29 + $0x18] sm:$0xff] }
0x1b1e   :  { %2726 = vmatpush.msra.mxu0 %v2704_v51  ;;  %v6994_v51 = vld [vmem:[%s6983_s29 + $0x8] sm:$0xff] }
0x1b20   :  { %2727 = vmatpush.msra.mxu0 %v2703_v52  ;;  %v6999_v52 = vld [vmem:[%s6983_s29] sm:$0xff] }
0x1b22   :  { %2728 = vmatpush.msra.mxu0 %v2702_v53 }
0x1b23   :  { %5587 = vmatmul.msk.f32.vlgmr.msra.gmra.mxu0 %vm400_vm1, %v6652_v37  ;;  %v6908_v37 = vld [vmem:[%s6902_s4 + $0x10] sm:$0xff] }
0x1b24   :  { %2825 = vmatpush.msrb.mxu1 %v6908_v37 }
0x1b26   :  { %2826 = vmatpush.msrb.mxu1 %v6912_v62 }
0x1b28   :  { %2827 = vmatpush.msrb.mxu1 %v6916_v63 }
0x1ba0   :  { %v2730_v59 = vpop.f32.mrf.mxu0 }
0x1ba1   :  { %5588 = vmatmul.msk.f32.vlgmr.msra.gmra.mxu1 %vm797_vm2, %v2730_v59 }
0x1ba2   :  { %2916 = vmatpush.msra.mxu1 %v6690_v1  ;;  %v6949_v1 = vld [vmem:[%s6936_s9 + $0x18] sm:$0xff] }
0x1ba3   :  { %2796 = vmatpush.msrb.mxu0 %v6949_v1  ;;  %3204 = vmatpush.msrb.mxu3 %v6949_v1 }
0x1ba4   :  { %2917 = vmatpush.msra.mxu1 %v6694_v54  ;;  %v6952_v54 = vld [vmem:[%s6936_s9 + $0x10] sm:$0xff] }
0x1ba5   :  { %2797 = vmatpush.msrb.mxu0 %v6952_v54  ;;  %3205 = vmatpush.msrb.mxu3 %v6952_v54 }
0x1ba6   :  { %2918 = vmatpush.msra.mxu1 %v6700_v13  ;;  %v6956_v13 = vld [vmem:[%s6936_s9 + $0x8] sm:$0xff] }
0x1ba7   :  { %2798 = vmatpush.msrb.mxu0 %v6956_v13  ;;  %3206 = vmatpush.msrb.mxu3 %v6956_v13 }
0x1ba8   :  { %2919 = vmatpush.msra.mxu1 %v6704_v3  ;;  %v6960_v3 = vld [vmem:[%s6936_s9] sm:$0xff] }
0x1ba9   :  { %2828 = vmatmul.f32.vlgmr.msrb.gmra.mxu1 %v5940_v32  ;;  %2799 = vmatpush.msrb.mxu0 %v6960_v3 }
0x1baa   :  { %2920 = vmatpush.msra.mxu1 %v6709_v5  ;;  %3207 = vmatpush.msrb.mxu3 %v6960_v3 }
0x1bab   :  { %2881 = vmatpush.msra.mxu0 %v6986_v49 }
0x1bac   :  { %2921 = vmatpush.msra.mxu1 %v6720_v6  ;;  %3289 = vmatpush.msra.mxu3 %v6986_v49 }
0x1bad   :  { %2882 = vmatpush.msra.mxu0 %v6989_v50 }
0x1bae   :  { %2922 = vmatpush.msra.mxu1 %v6724_v9  ;;  %v6969_v9 = vpop.permute.xlu1 %2766  ;;  %3290 = vmatpush.msra.mxu3 %v6989_v50 }
0x1baf   :  { %2883 = vmatpush.msra.mxu0 %v6994_v51 }
0x1bb0   :  { %3088 = vmatpush.msrb.mxu1 %v6819_v58  ;;  %3291 = vmatpush.msra.mxu3 %v6994_v51 }
0x1bb1   :  { %2884 = vmatpush.msra.mxu0 %v6999_v52 }
0x1bb2   :  { %3089 = vmatpush.msrb.mxu1 %v6854_v2  ;;  %3292 = vmatpush.msra.mxu3 %v6999_v52 }
0x1bb4   :  { %3090 = vmatpush.msrb.mxu1 %v6858_v14 }
0x1bb6   :  { %3091 = vmatpush.msrb.mxu1 %v6862_v25 }
0x1c1e   :  { %v2757_v32 = vpop.f32.mrf.mxu1 }
0x1c1f   :  { %2761 = vrot.lane.b32.xlu0 %v2757_v32, %s5944_s13 }
0x1c26   :  { %v2829_v55 = vpop.f32.mrf.mxu1 }
0x1c27   :  { %v2830_v48 = vadd.f32 %v5820_v8, %v2829_v55 }
0x1c29   :  { %2838 = vrot.lane.b32.xlu0 %v2830_v48, %s5944_s13 }
0x1c91   :  { %v2762_v5 = vpop.permute.xlu0 %2761 }
0x1c92   :  { %v2764_v6 = vadd.f32 %v2762_v5, %v6751_v18 }
0x1c94   :  { %v2769_v0 = vadd.f32 %v6969_v9, %v2764_v6 }
0x1c96   :  { %v2770_v4 = vmax.f32 %v2769_v0, 0.0 }
0x1c98   :  { %2780 = vrot.lane.b32.xlu2 %v2770_v4, %s5944_s13  ;;  %v5822_v4 = vld [vmem:[%s7012_s6] ss:$0 sm:$0xff] }
0x1c9b   :  { %v2839_v17 = vpop.permute.xlu0 %2838 }
0x1cf2   :  { %v2781_v11 = vpop.permute.xlu2 %2780 }
0x1cf3   :  { %5589 = vmatmul.msk.f32.vlgmr.msrb.gmra.mxu0 %vm797_vm2, %v2781_v11 }
0x1cf4   :  { %3007 = vmatpush.msrb.mxu0 %v6740_v10 }
0x1cf6   :  { %3008 = vmatpush.msrb.mxu0 %v6761_v21 }
0x1cf8   :  { %3009 = vmatpush.msrb.mxu0 %v6764_v61 }
0x1cfa   :  { %3010 = vmatpush.msrb.mxu0 %v6768_v46 }
0x1d70   :  { %v2801_v18 = vpop.f32.mrf.mxu0 }
0x1d71   :  { %v2802_v31 = vadd.f32 %v5821_v23, %v2801_v18 }
0x1d73   :  { %v2832_v36 = vadd.f32 %v2830_v48, %v2802_v31 }
0x1d75   :  { %v2833_v15 = vmul.f32 0.5, %v2832_v36 }
0x1d77   :  { %5885 = vtanh.f32 %v2833_v15 }
0x1d78   :  { %5887 = vtanh.f32 %v2375_v24 }
0x1d7d   :  { %v5886_v27 = vpop.eup %5885 }
0x1d7e   :  { %v2835_v38 = vadd.f32 1.0, %v5886_v27  ;;  %v5888_v16 = vpop.eup %5887 }
0x1d7f   :  { %v2377_v41 = vadd.f32 1.0, %v5888_v16 }
0x1d80   :  { %v2836_v19 = vmul.f32 0.5, %v2835_v38 }
0x1d81   :  { %v2378_v42 = vmul.f32 0.5, %v2377_v41 }
0x1d82   :  { %v2841_v40 = vmul.f32 %v2839_v17, %v2836_v19  ;;  %v2848_v53 = vsub.f32 1.0, %v2836_v19  ;;  %v2854_v32 = vmul.f32 0.0, %v2836_v19 }
0x1d83   :  { %v2379_v43 = vsub.f32 1.0, %v2378_v42 }
0x1d84   :  { %2843 = vrot.lane.b32.xlu1 %v2841_v40, %s5944_s13 }
0x1d8c   :  { %2891 = vperm.xlu1 %5803, %v2379_v43  }
0x1df6   :  { %v2844_v44 = vpop.permute.xlu1 %2843 }
0x1df7   :  { %v2846_v12 = vadd.f32 %v2844_v44, %v2802_v31 }
0x1df9   :  { %5889 = vtanh.f32 %v2846_v12 }
0x1dfe   :  { %v7028_v48 = vpop.permute.xlu1 %2891 }
0x1dff   :  { %v5890_v45 = vpop.eup %5889 }
0x1e00   :  { %2850 = vrot.lane.b32.xlu2 %v5890_v45, %s5945_s16 }
0x1e5a   :  { %v2851_v59 = vpop.permute.xlu2 %2850 }
0x1e5b   :  { %v2853_v5 = vmul.f32 %v2851_v59, %v2848_v53 }
0x1e5d   :  { %v7014_v6 = vadd.f32 %v2854_v32, %v2853_v5 }
0x1e5f   :  { %2865 = vrot.lane.b32.xlu0 %v7014_v6, %s5945_s16 }
0x1ed1   :  { %v7018_v0 = vpop.permute.xlu0 %2865 }
0x1ed2   :  { %5590 = vmatmul.msk.f32.vlgmr.msra.gmra.mxu0 %vm797_vm2, %v7018_v0 }
0x1f4f   :  { %v2886_v8 = vpop.f32.mrf.mxu0 }
0x1f50   :  { %v2887_v55 = vadd.f32 %v5822_v4, %v2886_v8 }
0x1f52   :  { %v2894_v11 = vmul.f32 %v7028_v48, %v2887_v55 }
0x1f54   :  { %v7032_v23 = vadd.f32 %v5923_v22, %v2894_v11 }
0x1f56   :  { %2896 = vst.msk [vmem:[%s7026_s12] sm:$0xff] %vm236_vm0, %v7032_v23  ;;  %5591 = vmatmul.msk.f32.vlgmr.msra.gmra.mxu1 %vm236_vm0, %v7032_v23 }
0x1f57   :  { %3568 = vmatpush.msra.mxu1 %v6880_v33 }
0x1f59   :  { %3569 = vmatpush.msra.mxu1 %v6883_v34 }
0x1f5b   :  { %3570 = vmatpush.msra.mxu1 %v6887_v35 }
0x1f5d   :  { %3571 = vmatpush.msra.mxu1 %v6895_v56 }
0x1fd3   :  { %v7043_v18 = vpop.f32.mrf.mxu1 }
0x1fd4   :  { %2936 = vrot.lane.b32.xlu2 %v7043_v18, %s5945_s16  ;;  %v2927_v29 = vperm.slane %v7043_v18, 0  ;;  %v2928_v15 = vperm.slane %v7043_v18, 1  ;;  %v2929_v17 = vperm.slane %v7043_v18, 2  ;;  %v2930_v42 = vperm.slane %v7043_v18, 3 }
0x1fd5   :  { %v2931_v45 = vperm.slane %v7043_v18, 4  ;;  %v2932_v5 = vperm.slane %v7043_v18, 5  ;;  %v2933_v11 = vperm.slane %v7043_v18, 6 }
0x202e   :  { %v2937_v31 = vpop.permute.xlu2 %2936 }
0x202f   :  { %v2939_v36 = vadd.f32 %v2937_v31, %v2927_v29  ;;  %v2940_v38 = vadd.f32 %v2937_v31, %v2928_v15  ;;  %v2941_v40 = vadd.f32 %v2937_v31, %v2929_v17  ;;  %v2942_v44 = vadd.f32 %v2937_v31, %v2930_v42  ;;  %v5823_v17 = vld [vmem:[%s6758_s15] ss:$0 sm:$0xff] }
0x2030   :  { %v2943_v59 = vadd.f32 %v2937_v31, %v2931_v45  ;;  %v2944_v8 = vadd.f32 %v2937_v31, %v2932_v5  ;;  %v2945_v29 = vadd.f32 %v2937_v31, %v2933_v11 }
0x2031   :  { %v2947_v24 = vadd.f32 %v2939_v36, %v6780_v30  ;;  %v2948_v16 = vadd.f32 %v2940_v38, %v6786_v20  ;;  %v2949_v41 = vadd.f32 %v2941_v40, %v6794_v39  ;;  %v2950_v12 = vadd.f32 %v2942_v44, %v6802_v47 }
0x2032   :  { %v2951_v32 = vadd.f32 %v2943_v59, %v6815_v57  ;;  %v2952_v55 = vadd.f32 %v2944_v8, %v6827_v7  ;;  %v2953_v36 = vadd.f32 %v2945_v29, %v6835_v26 }
0x2033   :  { %v2955_v27 = vmax.f32 %v2947_v24, 0.0  ;;  %v2956_v19 = vmax.f32 %v2948_v16, 0.0  ;;  %v2957_v43 = vmax.f32 %v2949_v41, 0.0  ;;  %v2958_v53 = vmax.f32 %v2950_v12, 0.0 }
0x2034   :  { %v2959_v4 = vmax.f32 %v2951_v32, 0.0  ;;  %v2960_v22 = vmax.f32 %v2952_v55, 0.0  ;;  %v2934_v24 = vperm.slane %v7043_v18, 7  ;;  %v2961_v15 = vmax.f32 %v2953_v36, 0.0 }
0x2035   :  { %5592 = vmatmul.msk.f32.vlgmr.msrb.gmra.mxu0 %vm797_vm2, %v2955_v27 }
0x2036   :  { %v2946_v27 = vadd.f32 %v2937_v31, %v2934_v24 }
0x2038   :  { %v2954_v38 = vadd.f32 %v2946_v27, %v6843_v28 }
0x203a   :  { %v2962_v16 = vmax.f32 %v2954_v38, 0.0 }
0x203d   :  { %5593 = vmatmul.msk.f32.gmra.mxu0 %vm797_vm2, %v2956_v19 }
0x2045   :  { %5594 = vmatmul.msk.f32.gmra.mxu0 %vm797_vm2, %v2957_v43 }
0x204d   :  { %5595 = vmatmul.msk.f32.gmra.mxu0 %vm797_vm2, %v2958_v53 }
0x2055   :  { %5596 = vmatmul.msk.f32.gmra.mxu0 %vm797_vm2, %v2959_v4 }
0x205d   :  { %5597 = vmatmul.msk.f32.gmra.mxu0 %vm797_vm2, %v2960_v22 }
0x2065   :  { %5598 = vmatmul.msk.f32.gmra.mxu0 %vm797_vm2, %v2961_v15 }
0x206d   :  { %5599 = vmatmul.msk.f32.gmra.mxu0 %vm797_vm2, %v2962_v16 }
0x20b2   :  { %v3012_v19 = vpop.f32.mrf.mxu0 }
0x20b3   :  { %v3013_v40 = vadd.f32 %v5823_v17, %v3012_v19 }
0x20b5   :  { %v3036_v41 = vmax.f32 %v3013_v40, 0.0 }
0x20b7   :  { %5600 = vmatmul.msk.f32.vlgmr.msrb.gmra.mxu1 %vm797_vm2, %v3036_v41 }
0x20b8   :  { %3636 = vmatpush.msrb.mxu1 %v6905_v60 }
0x20ba   :  { %v3015_v42 = vpop.f32.mrf.mxu0  ;;  %3637 = vmatpush.msrb.mxu1 %v6908_v37 }
0x20bb   :  { %v3016_v43 = vadd.f32 %v5823_v17, %v3015_v42 }
0x20bc   :  { %3638 = vmatpush.msrb.mxu1 %v6912_v62 }
0x20bd   :  { %v3037_v31 = vmax.f32 %v3016_v43, 0.0 }
0x20be   :  { %3639 = vmatpush.msrb.mxu1 %v6916_v63 }
0x20bf   :  { %5601 = vmatmul.msk.f32.gmra.mxu1 %vm797_vm2, %v3037_v31 }
0x20c2   :  { %v3018_v44 = vpop.f32.mrf.mxu0 }
0x20c3   :  { %v3019_v12 = vadd.f32 %v5823_v17, %v3018_v44  ;;  %v5824_v44 = vld [vmem:[%s6851_s26] ss:$0 sm:$0xff] }
0x20c5   :  { %v3038_v45 = vmax.f32 %v3019_v12, 0.0 }
0x20c7   :  { %5602 = vmatmul.msk.f32.gmra.mxu1 %vm797_vm2, %v3038_v45 }
0x20ca   :  { %v3021_v53 = vpop.f32.mrf.mxu0 }
0x20cb   :  { %v3022_v59 = vadd.f32 %v5823_v17, %v3021_v53 }
0x20cd   :  { %v3039_v32 = vmax.f32 %v3022_v59, 0.0 }
0x20cf   :  { %5603 = vmatmul.msk.f32.gmra.mxu1 %vm797_vm2, %v3039_v32 }
0x20d2   :  { %v3024_v5 = vpop.f32.mrf.mxu0 }
0x20d3   :  { %v3025_v4 = vadd.f32 %v5823_v17, %v3024_v5 }
0x20d5   :  { %v3040_v8 = vmax.f32 %v3025_v4, 0.0 }
0x20d7   :  { %5604 = vmatmul.msk.f32.gmra.mxu1 %vm797_vm2, %v3040_v8 }
0x20da   :  { %v3027_v55 = vpop.f32.mrf.mxu0 }
0x20db   :  { %v3028_v11 = vadd.f32 %v5823_v17, %v3027_v55 }
0x20dd   :  { %v3041_v22 = vmax.f32 %v3028_v11, 0.0 }
0x20df   :  { %5605 = vmatmul.msk.f32.gmra.mxu1 %vm797_vm2, %v3041_v22 }
0x20e2   :  { %v3030_v29 = vpop.f32.mrf.mxu0 }
0x20e3   :  { %v3031_v36 = vadd.f32 %v5823_v17, %v3030_v29 }
0x20e5   :  { %v3042_v24 = vmax.f32 %v3031_v36, 0.0 }
0x20e7   :  { %5606 = vmatmul.msk.f32.gmra.mxu1 %vm797_vm2, %v3042_v24 }
0x20ea   :  { %v3033_v15 = vpop.f32.mrf.mxu0 }
0x20eb   :  { %v3034_v27 = vadd.f32 %v5823_v17, %v3033_v15 }
0x20ed   :  { %v3043_v38 = vmax.f32 %v3034_v27, 0.0 }
0x20ef   :  { %5607 = vmatmul.msk.f32.gmra.mxu1 %vm797_vm2, %v3043_v38  ;;  %v7086_v38 = vld [vmem:[%s6646_s17] sm:$0xff] }
0x2134   :  { %v3093_v16 = vpop.f32.mrf.mxu1 }
0x2135   :  { %v3094_v36 = vadd.f32 %v5824_v44, %v3093_v16 }
0x2137   :  { %v3117_v27 = vmax.f32 %v3094_v36, 0.0  ;;  %v5827_v36 = vld [vmem:[%s7012_s6] ss:$0 sm:$0xff] }
0x213c   :  { %v3096_v19 = vpop.f32.mrf.mxu1 }
0x213d   :  { %v3097_v22 = vadd.f32 %v5824_v44, %v3096_v19 }
0x213f   :  { %v3118_v15 = vmax.f32 %v3097_v22, 0.0  ;;  %v7145_v22 = vld [vmem:[%s6686_s23 + $0x8] sm:$0xff] }
0x2144   :  { %v3099_v40 = vpop.f32.mrf.mxu1 }
0x2145   :  { %v3100_v55 = vadd.f32 %v5824_v44, %v3099_v40 }
0x2147   :  { %v3119_v24 = vmax.f32 %v3100_v55, 0.0  ;;  %v7137_v55 = vld [vmem:[%s6686_s23 + $0x18] sm:$0xff] }
0x214c   :  { %v3102_v41 = vpop.f32.mrf.mxu1 }
0x214d   :  { %v3103_v17 = vadd.f32 %v5824_v44, %v3102_v41 }
0x214f   :  { %v3120_v29 = vmax.f32 %v3103_v17, 0.0  ;;  %v7124_v17 = vld [vmem:[%s6686_s23 + $0x28] sm:$0xff] }
0x2154   :  { %v3105_v42 = vpop.f32.mrf.mxu1 }
0x2155   :  { %v3106_v5 = vadd.f32 %v5824_v44, %v3105_v42 }
0x2157   :  { %v3121_v11 = vmax.f32 %v3106_v5, 0.0 }
0x215c   :  { %v3108_v43 = vpop.f32.mrf.mxu1 }
0x215d   :  { %v3109_v59 = vadd.f32 %v5824_v44, %v3108_v43 }
0x215f   :  { %v3122_v8 = vmax.f32 %v3109_v59, 0.0 }
0x2164   :  { %v3111_v31 = vpop.f32.mrf.mxu1 }
0x2165   :  { %v3112_v45 = vadd.f32 %v5824_v44, %v3111_v31 }
0x2167   :  { %v3123_v4 = vmax.f32 %v3112_v45, 0.0 }
0x216c   :  { %v3114_v12 = vpop.f32.mrf.mxu1 }
0x216d   :  { %v3115_v53 = vadd.f32 %v5824_v44, %v3114_v12 }
0x216f   :  { %v3124_v32 = vmax.f32 %v3115_v53, 0.0 }
0x2171   :  { %3133 = vmatpush.msrb.mxu2 %v3124_v32 }
0x2173   :  { %3134 = vmatpush.msrb.mxu2 %v3123_v4  ;;  %v7121_v4 = vld [vmem:[%s6686_s23 + $0x30] sm:$0xff] }
0x2175   :  { %3135 = vmatpush.msrb.mxu2 %v3122_v8  ;;  %v7128_v8 = vld [vmem:[%s6686_s23 + $0x20] sm:$0xff] }
0x2177   :  { %3136 = vmatpush.msrb.mxu2 %v3121_v11  ;;  %v7141_v11 = vld [vmem:[%s6686_s23 + $0x10] sm:$0xff] }
0x2179   :  { %3137 = vmatpush.msrb.mxu2 %v3120_v29  ;;  %v7149_v29 = vld [vmem:[%s6686_s23] sm:$0xff] }
0x217b   :  { %3138 = vmatpush.msrb.mxu2 %v3119_v24 }
0x217d   :  { %3139 = vmatpush.msrb.mxu2 %v3118_v15 }
0x217f   :  { %3140 = vmatpush.msrb.mxu2 %v3117_v27 }
0x2180   :  { %5608 = vmatmul.msk.f32.vlgmr.msrb.gmra.mxu2 %vm400_vm1, %v7086_v38 }
0x2181   :  { %3164 = vmatpush.msra.mxu2 %v6880_v33 }
0x2183   :  { %3165 = vmatpush.msra.mxu2 %v6883_v34  ;;  %v5825_v34 = vld [vmem:[%s6941_s18] ss:$0 sm:$0xff] }
0x2185   :  { %3166 = vmatpush.msra.mxu2 %v6887_v35 }
0x2187   :  { %3167 = vmatpush.msra.mxu2 %v6895_v56 }
0x2189   :  { %3232 = vmatpush.msrb.mxu2 %v6905_v60 }
0x218b   :  { %3233 = vmatpush.msrb.mxu2 %v6908_v37 }
0x218d   :  { %3234 = vmatpush.msrb.mxu2 %v6912_v62 }
0x218f   :  { %3235 = vmatpush.msrb.mxu2 %v6916_v63 }
0x2203   :  { %v3142_v16 = vpop.f32.mrf.mxu2 }
0x2204   :  { %5609 = vmatmul.msk.f32.vlgmr.msra.gmra.mxu2 %vm797_vm2, %v3142_v16 }
0x2205   :  { %3320 = vmatpush.msra.mxu2 %v7121_v4 }
0x2207   :  { %3321 = vmatpush.msra.mxu2 %v7124_v17 }
0x2209   :  { %3322 = vmatpush.msra.mxu2 %v7128_v8 }
0x220b   :  { %3323 = vmatpush.msra.mxu2 %v7137_v55 }
0x220c   :  { %5611 = vmatmul.msk.f32.vlgmr.msrb.gmra.mxu2 %vm797_vm2, %v7018_v0  ;;  %v5826_v0 = vld [vmem:[%s6946_s24] ss:$0 sm:$0xff] }
0x220d   :  { %3324 = vmatpush.msra.mxu2 %v7141_v11 }
0x220f   :  { %3325 = vmatpush.msra.mxu2 %v7145_v22 }
0x2211   :  { %3326 = vmatpush.msra.mxu2 %v7149_v29 }
0x2213   :  { %3492 = vmatpush.msrb.mxu2 %v6819_v58 }
0x2215   :  { %3493 = vmatpush.msrb.mxu2 %v6854_v2 }
0x2217   :  { %3494 = vmatpush.msrb.mxu2 %v6858_v14 }
0x2219   :  { %3495 = vmatpush.msrb.mxu2 %v6862_v25 }
0x2287   :  { %v3169_v33 = vpop.f32.mrf.mxu2 }
0x2288   :  { %3173 = vrot.lane.b32.xlu0 %v3169_v33, %s5944_s13 }
0x228f   :  { %v3237_v35 = vpop.f32.mrf.mxu2 }
0x2290   :  { %v3238_v56 = vadd.f32 %v5825_v34, %v3237_v35 }
0x2292   :  { %3246 = vrot.lane.b32.xlu2 %v3238_v56, %s5944_s13 }
0x22ec   :  { %v3247_v12 = vpop.permute.xlu2 %3246 }
0x22fa   :  { %v3174_v60 = vpop.permute.xlu0 %3173 }
0x22fb   :  { %v3176_v37 = vadd.f32 %v3174_v60, %v7043_v18 }
0x22fd   :  { %v3177_v62 = vadd.f32 %v3176_v37, %v6969_v9 }
0x22ff   :  { %v3178_v63 = vmax.f32 %v3177_v62, 0.0 }
0x2301   :  { %3188 = vrot.lane.b32.xlu1 %v3178_v63, %s5944_s13 }
0x2373   :  { %v3189_v19 = vpop.permute.xlu1 %3188 }
0x2374   :  { %5610 = vmatmul.msk.f32.vlgmr.msrb.gmra.mxu3 %vm797_vm2, %v3189_v19 }
0x2375   :  { %3411 = vmatpush.msrb.mxu3 %v6740_v10 }
0x2377   :  { %3412 = vmatpush.msrb.mxu3 %v6761_v21 }
0x2379   :  { %3413 = vmatpush.msrb.mxu3 %v6764_v61 }
0x237b   :  { %3414 = vmatpush.msrb.mxu3 %v6768_v46 }
0x23f7   :  { %v3209_v40 = vpop.f32.mrf.mxu3 }
0x23f8   :  { %v3210_v41 = vadd.f32 %v5826_v0, %v3209_v40 }
0x23fa   :  { %v3240_v18 = vadd.f32 %v3238_v56, %v3210_v41 }
0x23fc   :  { %v3241_v42 = vmul.f32 0.5, %v3240_v18 }
0x23fe   :  { %5891 = vtanh.f32 %v3241_v42 }
0x2404   :  { %v5892_v43 = vpop.eup %5891 }
0x2405   :  { %v3243_v31 = vadd.f32 1.0, %v5892_v43 }
0x2407   :  { %v3244_v44 = vmul.f32 0.5, %v3243_v31 }
0x2409   :  { %v3249_v45 = vmul.f32 %v3247_v12, %v3244_v44  ;;  %v3256_v46 = vsub.f32 1.0, %v3244_v44  ;;  %v3262_v59 = vmul.f32 %v3244_v44, %v7014_v6 }
0x240b   :  { %3251 = vrot.lane.b32.xlu0 %v3249_v45, %s5944_s13 }
0x247d   :  { %v3252_v10 = vpop.permute.xlu0 %3251 }
0x247e   :  { %v3254_v21 = vadd.f32 %v3252_v10, %v3210_v41 }
0x2480   :  { %5893 = vtanh.f32 %v3254_v21 }
0x2486   :  { %v5894_v61 = vpop.eup %5893 }
0x2487   :  { %3258 = vrot.lane.b32.xlu1 %v5894_v61, %s5945_s16 }
0x24f9   :  { %v3259_v53 = vpop.permute.xlu1 %3258 }
0x24fa   :  { %v3261_v32 = vmul.f32 %v3259_v53, %v3256_v46 }
0x24fc   :  { %v7116_v5 = vadd.f32 %v3262_v59, %v3261_v32 }
0x24fe   :  { %3273 = vrot.lane.b32.xlu2 %v7116_v5, %s5945_s16 }
0x2558   :  { %v7132_v6 = vpop.permute.xlu2 %3273 }
0x2559   :  { %5612 = vmatmul.msk.f32.vlgmr.msra.gmra.mxu3 %vm797_vm2, %v7132_v6 }
0x25dc   :  { %v3294_v24 = vpop.f32.mrf.mxu3 }
0x25dd   :  { %v3295_v15 = vadd.f32 %v5827_v36, %v3294_v24 }
0x25df   :  { %v3297_v27 = vmul.f32 %v3295_v15, %v7028_v48 }
0x25e1   :  { %v7159_v16 = vadd.f32 %v3297_v27, %v7032_v23  ;;  %v5828_v27 = vld [vmem:[%s6758_s15] ss:$0 sm:$0xff] }
0x25e3   :  { %5613 = vst.msk [vmem:[%s7026_s12 + $0x8] sm:$0xff] %vm236_vm0, %v7159_v16  ;;  %5614 = vmatmul.msk.f32.vlgmr.msra.gmra.mxu2 %vm236_vm0, %v7159_v16 }
0x2666   :  { %v7166_v58 = vpop.f32.mrf.mxu2 }
0x2667   :  { %3340 = vrot.lane.b32.xlu0 %v7166_v58, %s5945_s16  ;;  %v3331_v2 = vperm.slane %v7166_v58, 0  ;;  %v3332_v23 = vperm.slane %v7166_v58, 1  ;;  %v3333_v60 = vperm.slane %v7166_v58, 2  ;;  %v3334_v19 = vperm.slane %v7166_v58, 3 }
0x2668   :  { %v3335_v18 = vperm.slane %v7166_v58, 4  ;;  %v3336_v44 = vperm.slane %v7166_v58, 5  ;;  %v3337_v21 = vperm.slane %v7166_v58, 6  ;;  %v3338_v59 = vperm.slane %v7166_v58, 7 }
0x26d9   :  { %v3341_v14 = vpop.permute.xlu0 %3340 }
0x26da   :  { %v3343_v25 = vadd.f32 %v3341_v14, %v3331_v2  ;;  %v3344_v35 = vadd.f32 %v3341_v14, %v3332_v23  ;;  %v3345_v62 = vadd.f32 %v3341_v14, %v3333_v60  ;;  %v3346_v40 = vadd.f32 %v3341_v14, %v3334_v19 }
0x26db   :  { %v3347_v43 = vadd.f32 %v3341_v14, %v3335_v18  ;;  %v3348_v45 = vadd.f32 %v3341_v14, %v3336_v44  ;;  %v3349_v46 = vadd.f32 %v3341_v14, %v3337_v21  ;;  %v3350_v36 = vadd.f32 %v3341_v14, %v3338_v59 }
0x26dc   :  { %v3351_v33 = vadd.f32 %v3343_v25, %v6780_v30  ;;  %v3352_v56 = vadd.f32 %v3344_v35, %v6786_v20  ;;  %v3353_v63 = vadd.f32 %v3345_v62, %v6794_v39  ;;  %v3354_v41 = vadd.f32 %v3346_v40, %v6802_v47 }
0x26dd   :  { %v3355_v31 = vadd.f32 %v3347_v43, %v6815_v57  ;;  %v3356_v10 = vadd.f32 %v3348_v45, %v6827_v7  ;;  %v3357_v53 = vadd.f32 %v3349_v46, %v6835_v26  ;;  %v3358_v24 = vadd.f32 %v3350_v36, %v6843_v28 }
0x26de   :  { %v3359_v34 = vmax.f32 %v3351_v33, 0.0  ;;  %v3360_v37 = vmax.f32 %v3352_v56, 0.0  ;;  %v3361_v0 = vmax.f32 %v3353_v63, 0.0  ;;  %v3362_v42 = vmax.f32 %v3354_v41, 0.0 }
0x26df   :  { %v3363_v12 = vmax.f32 %v3355_v31, 0.0  ;;  %v3364_v61 = vmax.f32 %v3356_v10, 0.0  ;;  %v3365_v32 = vmax.f32 %v3357_v53, 0.0  ;;  %v3366_v15 = vmax.f32 %v3358_v24, 0.0  ;;  %v5829_v24 = vld [vmem:[%s6851_s26] ss:$0 sm:$0xff] }
0x26e0   :  { %5615 = vmatmul.msk.f32.vlgmr.msrb.gmra.mxu3 %vm797_vm2, %v3359_v34 }
0x26e8   :  { %5616 = vmatmul.msk.f32.gmra.mxu3 %vm797_vm2, %v3360_v37 }
0x26f0   :  { %5617 = vmatmul.msk.f32.gmra.mxu3 %vm797_vm2, %v3361_v0 }
0x26f8   :  { %5618 = vmatmul.msk.f32.gmra.mxu3 %vm797_vm2, %v3362_v42 }
0x2700   :  { %5619 = vmatmul.msk.f32.gmra.mxu3 %vm797_vm2, %v3363_v12 }
0x2708   :  { %5620 = vmatmul.msk.f32.gmra.mxu3 %vm797_vm2, %v3364_v61 }
0x2710   :  { %5621 = vmatmul.msk.f32.gmra.mxu3 %vm797_vm2, %v3365_v32 }
0x2718   :  { %5622 = vmatmul.msk.f32.gmra.mxu3 %vm797_vm2, %v3366_v15 }
0x2763   :  { %v3416_v2 = vpop.f32.mrf.mxu3 }
0x2764   :  { %v3417_v25 = vadd.f32 %v5828_v27, %v3416_v2 }
0x2766   :  { %v3440_v33 = vmax.f32 %v3417_v25, 0.0 }
0x2768   :  { %5623 = vmatmul.msk.f32.vlgmr.msrb.gmra.mxu2 %vm797_vm2, %v3440_v33 }
0x276b   :  { %v3419_v23 = vpop.f32.mrf.mxu3 }
0x276c   :  { %v3420_v34 = vadd.f32 %v5828_v27, %v3419_v23 }
0x276e   :  { %v3441_v35 = vmax.f32 %v3420_v34, 0.0 }
0x2770   :  { %5624 = vmatmul.msk.f32.gmra.mxu2 %vm797_vm2, %v3441_v35 }
0x2773   :  { %v3422_v56 = vpop.f32.mrf.mxu3 }
0x2774   :  { %v3423_v14 = vadd.f32 %v5828_v27, %v3422_v56 }
0x2776   :  { %v3442_v60 = vmax.f32 %v3423_v14, 0.0 }
0x2778   :  { %5625 = vmatmul.msk.f32.gmra.mxu2 %vm797_vm2, %v3442_v60 }
0x277b   :  { %v3425_v37 = vpop.f32.mrf.mxu3 }
0x277c   :  { %v3426_v62 = vadd.f32 %v5828_v27, %v3425_v37 }
0x277e   :  { %v3443_v63 = vmax.f32 %v3426_v62, 0.0 }
0x2780   :  { %5626 = vmatmul.msk.f32.gmra.mxu2 %vm797_vm2, %v3443_v63 }
0x2783   :  { %v3428_v19 = vpop.f32.mrf.mxu3 }
0x2784   :  { %v3429_v0 = vadd.f32 %v5828_v27, %v3428_v19 }
0x2786   :  { %v3444_v40 = vmax.f32 %v3429_v0, 0.0 }
0x2788   :  { %5627 = vmatmul.msk.f32.gmra.mxu2 %vm797_vm2, %v3444_v40 }
0x278b   :  { %v3431_v41 = vpop.f32.mrf.mxu3 }
0x278c   :  { %v3432_v18 = vadd.f32 %v5828_v27, %v3431_v41 }
0x278e   :  { %v3445_v42 = vmax.f32 %v3432_v18, 0.0  ;;  %v5831_v18 = vld [vmem:[%s6946_s24] ss:$0 sm:$0xff] }
0x2790   :  { %5628 = vmatmul.msk.f32.gmra.mxu2 %vm797_vm2, %v3445_v42 }
0x2793   :  { %v3434_v43 = vpop.f32.mrf.mxu3 }
0x2794   :  { %v3435_v31 = vadd.f32 %v5828_v27, %v3434_v43 }
0x2796   :  { %v3446_v44 = vmax.f32 %v3435_v31, 0.0 }
0x2798   :  { %5629 = vmatmul.msk.f32.gmra.mxu2 %vm797_vm2, %v3446_v44 }
0x279b   :  { %v3437_v12 = vpop.f32.mrf.mxu3 }
0x279c   :  { %v3438_v45 = vadd.f32 %v5828_v27, %v3437_v12 }
0x279e   :  { %v3447_v10 = vmax.f32 %v3438_v45, 0.0 }
0x27a0   :  { %5630 = vmatmul.msk.f32.gmra.mxu2 %vm797_vm2, %v3447_v10 }
0x27eb   :  { %v3497_v21 = vpop.f32.mrf.mxu2 }
0x27ec   :  { %v3498_v63 = vadd.f32 %v5829_v24, %v3497_v21 }
0x27ee   :  { %v3521_v40 = vmax.f32 %v3498_v63, 0.0 }
0x27f3   :  { %v3500_v61 = vpop.f32.mrf.mxu2 }
0x27f4   :  { %v3501_v37 = vadd.f32 %v5829_v24, %v3500_v61 }
0x27f6   :  { %v3522_v0 = vmax.f32 %v3501_v37, 0.0 }
0x27fb   :  { %v3503_v46 = vpop.f32.mrf.mxu2 }
0x27fc   :  { %v3504_v14 = vadd.f32 %v5829_v24, %v3503_v46 }
0x27fe   :  { %v3523_v19 = vmax.f32 %v3504_v14, 0.0  ;;  %v7265_v14 = vld [vmem:[%s6737_s5 + $0x8] sm:$0xff] }
0x2803   :  { %v3506_v53 = vpop.f32.mrf.mxu2 }
0x2804   :  { %v3507_v27 = vadd.f32 %v5829_v24, %v3506_v53 }
0x2806   :  { %v3524_v62 = vmax.f32 %v3507_v27, 0.0 }
0x280b   :  { %v3509_v59 = vpop.f32.mrf.mxu2 }
0x280c   :  { %v3510_v34 = vadd.f32 %v5829_v24, %v3509_v59 }
0x280e   :  { %v3525_v60 = vmax.f32 %v3510_v34, 0.0 }
0x2813   :  { %v3512_v32 = vpop.f32.mrf.mxu2 }
0x2814   :  { %v3513_v33 = vadd.f32 %v5829_v24, %v3512_v32 }
0x2816   :  { %v3526_v56 = vmax.f32 %v3513_v33, 0.0 }
0x281b   :  { %v3515_v36 = vpop.f32.mrf.mxu2 }
0x281c   :  { %v3516_v2 = vadd.f32 %v5829_v24, %v3515_v36 }
0x281e   :  { %v3527_v35 = vmax.f32 %v3516_v2, 0.0 }
0x2823   :  { %v3518_v15 = vpop.f32.mrf.mxu2 }
0x2824   :  { %v3519_v25 = vadd.f32 %v5829_v24, %v3518_v15 }
0x2826   :  { %v3528_v23 = vmax.f32 %v3519_v25, 0.0  ;;  %v5832_v25 = vld [vmem:[%s7012_s6] ss:$0 sm:$0xff] }
0x2828   :  { %3537 = vmatpush.msra.mxu0 %v3528_v23 }
0x282a   :  { %3538 = vmatpush.msra.mxu0 %v3527_v35  ;;  %v7254_v35 = vld [vmem:[%s6737_s5 + $0x18] sm:$0xff] }
0x282c   :  { %3539 = vmatpush.msra.mxu0 %v3526_v56  ;;  %v7262_v56 = vld [vmem:[%s6737_s5 + $0x10] sm:$0xff] }
0x282e   :  { %3540 = vmatpush.msra.mxu0 %v3525_v60 }
0x2830   :  { %3541 = vmatpush.msra.mxu0 %v3524_v62 }
0x2832   :  { %3542 = vmatpush.msra.mxu0 %v3523_v19 }
0x2834   :  { %3543 = vmatpush.msra.mxu0 %v3522_v0 }
0x2836   :  { %3544 = vmatpush.msra.mxu0 %v3521_v40 }
0x2837   :  { %5631 = vmatmul.msk.f32.vlgmr.msra.gmra.mxu0 %vm400_vm1, %v7086_v38 }
0x2838   :  { %3608 = vmatpush.msrb.mxu0 %v6949_v1 }
0x283a   :  { %3609 = vmatpush.msrb.mxu0 %v6952_v54  ;;  %v5830_v54 = vld [vmem:[%s6941_s18] ss:$0 sm:$0xff] }
0x283c   :  { %3610 = vmatpush.msrb.mxu0 %v6956_v13 }
0x283e   :  { %3611 = vmatpush.msrb.mxu0 %v6960_v3 }
0x2840   :  { %3693 = vmatpush.msra.mxu0 %v6986_v49 }
0x2842   :  { %3694 = vmatpush.msra.mxu0 %v6989_v50 }
0x2844   :  { %3695 = vmatpush.msra.mxu0 %v6994_v51 }
0x2846   :  { %3696 = vmatpush.msra.mxu0 %v6999_v52 }
0x28b4   :  { %v3546_v41 = vpop.f32.mrf.mxu0 }
0x28b5   :  { %5632 = vmatmul.msk.f32.vlgmr.msra.gmra.mxu1 %vm797_vm2, %v3546_v41 }
0x28b6   :  { %3724 = vmatpush.msra.mxu1 %v7121_v4 }
0x28b8   :  { %3725 = vmatpush.msra.mxu1 %v7124_v17 }
0x28ba   :  { %3726 = vmatpush.msra.mxu1 %v7128_v8 }
0x28bc   :  { %3727 = vmatpush.msra.mxu1 %v7137_v55 }
0x28bd   :  { %5634 = vmatmul.msk.f32.vlgmr.msrb.gmra.mxu1 %vm797_vm2, %v7132_v6 }
0x28be   :  { %3728 = vmatpush.msra.mxu1 %v7141_v11 }
0x28c0   :  { %3729 = vmatpush.msra.mxu1 %v7145_v22 }
0x28c2   :  { %3730 = vmatpush.msra.mxu1 %v7149_v29 }
0x2932   :  { %v3573_v1 = vpop.f32.mrf.mxu1 }
0x2933   :  { %3577 = vrot.lane.b32.xlu1 %v3573_v1, %s5944_s13 }
0x293a   :  { %v3641_v13 = vpop.f32.mrf.mxu1 }
0x293b   :  { %v3642_v3 = vadd.f32 %v5830_v54, %v3641_v13 }
0x293d   :  { %3650 = vrot.lane.b32.xlu0 %v3642_v3, %s5944_s13 }
0x29a5   :  { %v3578_v49 = vpop.permute.xlu1 %3577 }
0x29a6   :  { %v3580_v50 = vadd.f32 %v3578_v49, %v7166_v58 }
0x29a8   :  { %v3581_v51 = vadd.f32 %v3580_v50, %v6969_v9 }
0x29aa   :  { %v3582_v52 = vmax.f32 %v3581_v51, 0.0 }
0x29ac   :  { %3592 = vrot.lane.b32.xlu2 %v3582_v52, %s5944_s13 }
0x29af   :  { %v3651_v21 = vpop.permute.xlu0 %3650 }
0x2a06   :  { %v3593_v6 = vpop.permute.xlu2 %3592 }
0x2a07   :  { %5633 = vmatmul.msk.f32.vlgmr.msrb.gmra.mxu0 %vm797_vm2, %v3593_v6 }
0x2a08   :  { %3815 = vmatpush.msrb.mxu0 %v7254_v35 }
0x2a0a   :  { %3816 = vmatpush.msrb.mxu0 %v7262_v56 }
0x2a0c   :  { %3817 = vmatpush.msrb.mxu0 %v7265_v14 }
0x2a84   :  { %v3613_v42 = vpop.f32.mrf.mxu0 }
0x2a85   :  { %v3614_v43 = vadd.f32 %v5831_v18, %v3613_v42 }
0x2a87   :  { %v3644_v31 = vadd.f32 %v3642_v3, %v3614_v43 }
0x2a89   :  { %v3645_v44 = vmul.f32 0.5, %v3644_v31 }
0x2a8b   :  { %5895 = vtanh.f32 %v3645_v44 }
0x2a91   :  { %v5896_v12 = vpop.eup %5895 }
0x2a92   :  { %v3647_v45 = vadd.f32 1.0, %v5896_v12 }
0x2a94   :  { %v3648_v10 = vmul.f32 0.5, %v3647_v45 }
0x2a96   :  { %v3653_v58 = vmul.f32 %v3651_v21, %v3648_v10  ;;  %v3660_v59 = vsub.f32 1.0, %v3648_v10  ;;  %v3666_v36 = vmul.f32 %v3648_v10, %v7116_v5 }
0x2a98   :  { %3655 = vrot.lane.b32.xlu1 %v3653_v58, %s5944_s13 }
0x2b0a   :  { %v3656_v61 = vpop.permute.xlu1 %3655 }
0x2b0b   :  { %v3658_v46 = vadd.f32 %v3656_v61, %v3614_v43  ;;  %v7287_v43 = vld [vmem:[%s6808_s21 + $0x18] sm:$0xff] }
0x2b0c   :  { %3896 = vmatpush.msrb.mxu1 %v7287_v43 }
0x2b0d   :  { %5897 = vtanh.f32 %v3658_v46 }
0x2b13   :  { %v5898_v53 = vpop.eup %5897 }
0x2b14   :  { %3662 = vrot.lane.b32.xlu2 %v5898_v53, %s5945_s16 }
0x2b6e   :  { %v3663_v32 = vpop.permute.xlu2 %3662 }
0x2b6f   :  { %v3665_v24 = vmul.f32 %v3663_v32, %v3660_v59 }
0x2b71   :  { %v7235_v15 = vadd.f32 %v3666_v36, %v3665_v24 }
0x2b73   :  { %3677 = vrot.lane.b32.xlu0 %v7235_v15, %s5945_s16 }
0x2be5   :  { %v7239_v2 = vpop.permute.xlu0 %3677 }
0x2be6   :  { %5635 = vmatmul.msk.f32.vlgmr.msra.gmra.mxu0 %vm797_vm2, %v7239_v2 }
0x2c63   :  { %v3698_v33 = vpop.f32.mrf.mxu0 }
0x2c64   :  { %v3699_v23 = vadd.f32 %v5832_v25, %v3698_v33  ;;  %v7302_v25 = vld [vmem:[%s6808_s21 + $0x10] sm:$0xff]  ;;  %v7306_v33 = vld [vmem:[%s6808_s21 + $0x8] sm:$0xff] }
0x2c65   :  { %3897 = vmatpush.msrb.mxu1 %v7302_v25 }
0x2c66   :  { %v3701_v34 = vmul.f32 %v3699_v23, %v7028_v48  ;;  %v7310_v23 = vld [vmem:[%s6808_s21] sm:$0xff] }
0x2c67   :  { %3898 = vmatpush.msrb.mxu1 %v7306_v33 }
0x2c68   :  { %v7246_v5 = vadd.f32 %v3701_v34, %v7159_v16  ;;  %v7269_v16 = vld [vmem:[%s6737_s5] sm:$0xff] }
0x2c69   :  { %3818 = vmatpush.msrb.mxu0 %v7269_v16  ;;  %3899 = vmatpush.msrb.mxu1 %v7310_v23  ;;  %v5833_v34 = vld [vmem:[%s6758_s15] ss:$0 sm:$0xff] }
0x2c6a   :  { %5636 = vst.msk [vmem:[%s7026_s12 + $0x10] sm:$0xff] %vm236_vm0, %v7246_v5  ;;  %5637 = vmatmul.msk.f32.vlgmr.msra.gmra.mxu1 %vm236_vm0, %v7246_v5 }
0x2ce7   :  { %v7257_v27 = vpop.f32.mrf.mxu1 }
0x2ce8   :  { %3744 = vrot.lane.b32.xlu1 %v7257_v27, %s5945_s16  ;;  %v3735_v60 = vperm.slane %v7257_v27, 0  ;;  %v3736_v19 = vperm.slane %v7257_v27, 1  ;;  %v3737_v1 = vperm.slane %v7257_v27, 2  ;;  %v3738_v49 = vperm.slane %v7257_v27, 3 }
0x2ce9   :  { %v3739_v6 = vperm.slane %v7257_v27, 4  ;;  %v3740_v44 = vperm.slane %v7257_v27, 5  ;;  %v3741_v21 = vperm.slane %v7257_v27, 6  ;;  %v3742_v53 = vperm.slane %v7257_v27, 7 }
0x2d5a   :  { %v3745_v37 = vpop.permute.xlu1 %3744 }
0x2d5b   :  { %v3747_v62 = vadd.f32 %v3745_v37, %v3735_v60  ;;  %v3748_v40 = vadd.f32 %v3745_v37, %v3736_v19  ;;  %v3749_v13 = vadd.f32 %v3745_v37, %v3737_v1  ;;  %v3750_v51 = vadd.f32 %v3745_v37, %v3738_v49 }
0x2d5c   :  { %v3751_v42 = vadd.f32 %v3745_v37, %v3739_v6  ;;  %v3752_v45 = vadd.f32 %v3745_v37, %v3740_v44  ;;  %v3753_v61 = vadd.f32 %v3745_v37, %v3741_v21  ;;  %v3754_v32 = vadd.f32 %v3745_v37, %v3742_v53 }
0x2d5d   :  { %v3755_v63 = vadd.f32 %v3747_v62, %v6780_v30  ;;  %v3756_v41 = vadd.f32 %v3748_v40, %v6786_v20  ;;  %v3757_v3 = vadd.f32 %v3749_v13, %v6794_v39  ;;  %v3758_v52 = vadd.f32 %v3750_v51, %v6802_v47 }
0x2d5e   :  { %v3759_v31 = vadd.f32 %v3751_v42, %v6815_v57  ;;  %v3760_v10 = vadd.f32 %v3752_v45, %v6827_v7  ;;  %v3761_v46 = vadd.f32 %v3753_v61, %v6835_v26  ;;  %v3762_v36 = vadd.f32 %v3754_v32, %v6843_v28 }
0x2d5f   :  { %v3763_v0 = vmax.f32 %v3755_v63, 0.0  ;;  %v3764_v54 = vmax.f32 %v3756_v41, 0.0  ;;  %v3765_v50 = vmax.f32 %v3757_v3, 0.0  ;;  %v3766_v18 = vmax.f32 %v3758_v52, 0.0 }
0x2d60   :  { %v3767_v12 = vmax.f32 %v3759_v31, 0.0  ;;  %v3768_v58 = vmax.f32 %v3760_v10, 0.0  ;;  %v3769_v59 = vmax.f32 %v3761_v46, 0.0  ;;  %v3770_v24 = vmax.f32 %v3762_v36, 0.0  ;;  %v5834_v36 = vld [vmem:[%s6851_s26] ss:$0 sm:$0xff] }
0x2d61   :  { %5638 = vmatmul.msk.f32.vlgmr.msrb.gmra.mxu0 %vm797_vm2, %v3763_v0 }
0x2d69   :  { %5639 = vmatmul.msk.f32.gmra.mxu0 %vm797_vm2, %v3764_v54 }
0x2d71   :  { %5640 = vmatmul.msk.f32.gmra.mxu0 %vm797_vm2, %v3765_v50 }
0x2d79   :  { %5641 = vmatmul.msk.f32.gmra.mxu0 %vm797_vm2, %v3766_v18 }
0x2d81   :  { %5642 = vmatmul.msk.f32.gmra.mxu0 %vm797_vm2, %v3767_v12 }
0x2d89   :  { %5643 = vmatmul.msk.f32.gmra.mxu0 %vm797_vm2, %v3768_v58 }
0x2d91   :  { %5644 = vmatmul.msk.f32.gmra.mxu0 %vm797_vm2, %v3769_v59 }
0x2d99   :  { %5645 = vmatmul.msk.f32.gmra.mxu0 %vm797_vm2, %v3770_v24 }
0x2dde   :  { %v3820_v60 = vpop.f32.mrf.mxu0 }
0x2ddf   :  { %v3821_v37 = vadd.f32 %v5833_v34, %v3820_v60 }
0x2de1   :  { %v3844_v62 = vmax.f32 %v3821_v37, 0.0 }
0x2de3   :  { %5646 = vmatmul.msk.f32.vlgmr.msrb.gmra.mxu1 %vm797_vm2, %v3844_v62 }
0x2de6   :  { %v3823_v63 = vpop.f32.mrf.mxu0 }
0x2de7   :  { %v3824_v19 = vadd.f32 %v5833_v34, %v3823_v63 }
0x2de9   :  { %v3845_v0 = vmax.f32 %v3824_v19, 0.0 }
0x2deb   :  { %5647 = vmatmul.msk.f32.gmra.mxu1 %vm797_vm2, %v3845_v0 }
0x2dee   :  { %v3826_v40 = vpop.f32.mrf.mxu0 }
0x2def   :  { %v3827_v41 = vadd.f32 %v5833_v34, %v3826_v40 }
0x2df1   :  { %v3846_v1 = vmax.f32 %v3827_v41, 0.0 }
0x2df3   :  { %5648 = vmatmul.msk.f32.gmra.mxu1 %vm797_vm2, %v3846_v1 }
0x2df6   :  { %v3829_v54 = vpop.f32.mrf.mxu0 }
0x2df7   :  { %v3830_v13 = vadd.f32 %v5833_v34, %v3829_v54 }
0x2df9   :  { %v3847_v3 = vmax.f32 %v3830_v13, 0.0 }
0x2dfb   :  { %5649 = vmatmul.msk.f32.gmra.mxu1 %vm797_vm2, %v3847_v3 }
0x2dfe   :  { %v3832_v49 = vpop.f32.mrf.mxu0 }
0x2dff   :  { %v3833_v50 = vadd.f32 %v5833_v34, %v3832_v49 }
0x2e01   :  { %v3848_v51 = vmax.f32 %v3833_v50, 0.0 }
0x2e03   :  { %5650 = vmatmul.msk.f32.gmra.mxu1 %vm797_vm2, %v3848_v51 }
0x2e06   :  { %v3835_v52 = vpop.f32.mrf.mxu0 }
0x2e07   :  { %v3836_v6 = vadd.f32 %v5833_v34, %v3835_v52  ;;  %v7324_v52 = vld [vmem:[%s6877_s30 + $0x18] sm:$0xff] }
0x2e09   :  { %v3849_v18 = vmax.f32 %v3836_v6, 0.0  ;;  %v7329_v6 = vld [vmem:[%s6877_s30 + $0x10] sm:$0xff] }
0x2e0b   :  { %5651 = vmatmul.msk.f32.gmra.mxu1 %vm797_vm2, %v3849_v18  ;;  %v7333_v18 = vld [vmem:[%s6877_s30 + $0x8] sm:$0xff] }
0x2e0e   :  { %v3838_v42 = vpop.f32.mrf.mxu0 }
0x2e0f   :  { %v3839_v31 = vadd.f32 %v5833_v34, %v3838_v42  ;;  %v7338_v42 = vld [vmem:[%s6877_s30] sm:$0xff] }
0x2e11   :  { %v3850_v44 = vmax.f32 %v3839_v31, 0.0  ;;  %v7342_v31 = vld [vmem:[%s6902_s4 + $0x18] sm:$0xff] }
0x2e13   :  { %5652 = vmatmul.msk.f32.gmra.mxu1 %vm797_vm2, %v3850_v44  ;;  %v7345_v44 = vld [vmem:[%s6902_s4 + $0x10] sm:$0xff] }
0x2e16   :  { %v3841_v12 = vpop.f32.mrf.mxu0 }
0x2e17   :  { %v3842_v45 = vadd.f32 %v5833_v34, %v3841_v12  ;;  %v7353_v12 = vld [vmem:[%s6902_s4] sm:$0xff] }
0x2e19   :  { %v3851_v10 = vmax.f32 %v3842_v45, 0.0 }
0x2e1b   :  { %5653 = vmatmul.msk.f32.gmra.mxu1 %vm797_vm2, %v3851_v10 }
0x2e60   :  { %v3901_v21 = vpop.f32.mrf.mxu1 }
0x2e61   :  { %v3902_v3 = vadd.f32 %v5834_v36, %v3901_v21  ;;  %v3988_v21 = vld [vmem:[%s6936_s9 + $0x8] sm:$0xff] }
0x2e63   :  { %v3925_v51 = vmax.f32 %v3902_v3, 0.0 }
0x2e68   :  { %v3904_v58 = vpop.f32.mrf.mxu1 }
0x2e69   :  { %v3905_v54 = vadd.f32 %v5834_v36, %v3904_v58 }
0x2e6b   :  { %v3926_v50 = vmax.f32 %v3905_v54, 0.0  ;;  %v7407_v54 = vld [vmem:[%s6983_s29] sm:$0xff] }
0x2e70   :  { %v3907_v61 = vpop.f32.mrf.mxu1 }
0x2e71   :  { %v3908_v41 = vadd.f32 %v5834_v36, %v3907_v61  ;;  %v3987_v61 = vld [vmem:[%s6936_s9] sm:$0xff] }
0x2e73   :  { %v3927_v49 = vmax.f32 %v3908_v41, 0.0  ;;  %v7397_v41 = vld [vmem:[%s6983_s29 + $0x10] sm:$0xff] }
0x2e78   :  { %v3910_v46 = vpop.f32.mrf.mxu1 }
0x2e79   :  { %v3911_v34 = vadd.f32 %v5834_v36, %v3910_v46  ;;  %v5836_v46 = vld [vmem:[%s6946_s24] ss:$0 sm:$0xff] }
0x2e7b   :  { %v3928_v13 = vmax.f32 %v3911_v34, 0.0 }
0x2e80   :  { %v3913_v53 = vpop.f32.mrf.mxu1 }
0x2e81   :  { %v3914_v19 = vadd.f32 %v5834_v36, %v3913_v53 }
0x2e83   :  { %v3929_v1 = vmax.f32 %v3914_v19, 0.0 }
0x2e88   :  { %v3916_v59 = vpop.f32.mrf.mxu1 }
0x2e89   :  { %v3917_v62 = vadd.f32 %v5834_v36, %v3916_v59 }
0x2e8b   :  { %v3930_v40 = vmax.f32 %v3917_v62, 0.0 }
0x2e90   :  { %v3919_v32 = vpop.f32.mrf.mxu1 }
0x2e91   :  { %v3920_v60 = vadd.f32 %v5834_v36, %v3919_v32 }
0x2e93   :  { %v3931_v0 = vmax.f32 %v3920_v60, 0.0 }
0x2e98   :  { %v3922_v24 = vpop.f32.mrf.mxu1 }
0x2e99   :  { %v3923_v37 = vadd.f32 %v5834_v36, %v3922_v24 }
0x2e9b   :  { %v3932_v63 = vmax.f32 %v3923_v37, 0.0 }
0x2e9d   :  { %3941 = vmatpush.msra.mxu3 %v3932_v63 }
0x2e9f   :  { %3942 = vmatpush.msra.mxu3 %v3931_v0 }
0x2ea1   :  { %3943 = vmatpush.msra.mxu3 %v3930_v40  ;;  %v7394_v40 = vld [vmem:[%s6983_s29 + $0x18] sm:$0xff] }
0x2ea3   :  { %3944 = vmatpush.msra.mxu3 %v3929_v1  ;;  %v7402_v1 = vld [vmem:[%s6983_s29 + $0x8] sm:$0xff] }
0x2ea5   :  { %3945 = vmatpush.msra.mxu3 %v3928_v13 }
0x2ea7   :  { %3946 = vmatpush.msra.mxu3 %v3927_v49 }
0x2ea9   :  { %3947 = vmatpush.msra.mxu3 %v3926_v50 }
0x2eab   :  { %3948 = vmatpush.msra.mxu3 %v3925_v51 }
0x2eac   :  { %5654 = vmatmul.msk.f32.vlgmr.msra.gmra.mxu3 %vm400_vm1, %v7086_v38  ;;  %v7349_v38 = vld [vmem:[%s6902_s4 + $0x8] sm:$0xff] }
0x2ead   :  { %3972 = vmatpush.msrb.mxu3 %v7324_v52 }
0x2eaf   :  { %3973 = vmatpush.msrb.mxu3 %v7329_v6 }
0x2eb1   :  { %3974 = vmatpush.msrb.mxu3 %v7333_v18 }
0x2eb3   :  { %3975 = vmatpush.msrb.mxu3 %v7338_v42 }
0x2eb5   :  { %4040 = vmatpush.msra.mxu3 %v7342_v31 }
0x2eb7   :  { %4041 = vmatpush.msra.mxu3 %v7345_v44 }
0x2eb9   :  { %4042 = vmatpush.msra.mxu3 %v7349_v38 }
0x2ebb   :  { %4043 = vmatpush.msra.mxu3 %v7353_v12 }
0x2f2f   :  { %v3950_v45 = vpop.f32.mrf.mxu3 }
0x2f30   :  { %5655 = vmatmul.msk.f32.vlgmr.msrb.gmra.mxu3 %vm797_vm2, %v3950_v45 }
0x2f31   :  { %4128 = vmatpush.msrb.mxu3 %v7121_v4 }
0x2f33   :  { %4129 = vmatpush.msrb.mxu3 %v7124_v17  ;;  %v5835_v17 = vld [vmem:[%s6941_s18] ss:$0 sm:$0xff] }
0x2f35   :  { %4130 = vmatpush.msrb.mxu3 %v7128_v8 }
0x2f37   :  { %4131 = vmatpush.msrb.mxu3 %v7137_v55 }
0x2f38   :  { %5657 = vmatmul.msk.f32.vlgmr.msra.gmra.mxu3 %vm797_vm2, %v7239_v2  ;;  %v7379_v2 = vld [vmem:[%s6936_s9 + $0x10] sm:$0xff] }
0x2f39   :  { %4132 = vmatpush.msrb.mxu3 %v7141_v11 }
0x2f3b   :  { %4133 = vmatpush.msrb.mxu3 %v7145_v22 }
0x2f3d   :  { %4134 = vmatpush.msrb.mxu3 %v7149_v29  ;;  %v7376_v29 = vld [vmem:[%s6936_s9 + $0x18] sm:$0xff] }
0x2f3e   :  { %4012 = vmatpush.msra.mxu2 %v7376_v29  ;;  %4416 = vmatpush.msra.mxu1 %v7376_v29 }
0x2f3f   :  { %4300 = vmatpush.msra.mxu3 %v7287_v43 }
0x2f40   :  { %4013 = vmatpush.msra.mxu2 %v7379_v2  ;;  %4417 = vmatpush.msra.mxu1 %v7379_v2 }
0x2f41   :  { %4301 = vmatpush.msra.mxu3 %v7302_v25 }
0x2f42   :  { %4014 = vmatpush.msra.mxu2 %v3988_v21  ;;  %4418 = vmatpush.msra.mxu1 %v3988_v21 }
0x2f43   :  { %4302 = vmatpush.msra.mxu3 %v7306_v33 }
0x2f44   :  { %4015 = vmatpush.msra.mxu2 %v3987_v61  ;;  %4419 = vmatpush.msra.mxu1 %v3987_v61 }
0x2f45   :  { %4303 = vmatpush.msra.mxu3 %v7310_v23 }
0x2f46   :  { %4097 = vmatpush.msrb.mxu2 %v7394_v40  ;;  %4501 = vmatpush.msrb.mxu1 %v7394_v40 }
0x2f48   :  { %4098 = vmatpush.msrb.mxu2 %v7397_v41  ;;  %4502 = vmatpush.msrb.mxu1 %v7397_v41 }
0x2f4a   :  { %4099 = vmatpush.msrb.mxu2 %v7402_v1  ;;  %4503 = vmatpush.msrb.mxu1 %v7402_v1 }
0x2f4c   :  { %4100 = vmatpush.msrb.mxu2 %v7407_v54  ;;  %4504 = vmatpush.msrb.mxu1 %v7407_v54 }
0x2fb3   :  { %v3977_v4 = vpop.f32.mrf.mxu3 }
0x2fb4   :  { %3981 = vrot.lane.b32.xlu2 %v3977_v4, %s5944_s13  ;;  %v5837_v4 = vld [vmem:[%s7012_s6] ss:$0 sm:$0xff] }
0x2fbb   :  { %v4045_v8 = vpop.f32.mrf.mxu3 }
0x2fbc   :  { %v4046_v55 = vadd.f32 %v5835_v17, %v4045_v8 }
0x2fbe   :  { %4054 = vrot.lane.b32.xlu1 %v4046_v55, %s5944_s13 }
0x300e   :  { %v3982_v11 = vpop.permute.xlu2 %3981 }
0x300f   :  { %v3984_v22 = vadd.f32 %v3982_v11, %v7257_v27 }
0x3011   :  { %v3985_v10 = vadd.f32 %v3984_v22, %v6969_v9 }
0x3013   :  { %v3986_v58 = vmax.f32 %v3985_v10, 0.0 }
0x3015   :  { %3996 = vrot.lane.b32.xlu0 %v3986_v58, %s5944_s13 }
0x3030   :  { %v4055_v62 = vpop.permute.xlu1 %4054 }
0x3087   :  { %v3997_v27 = vpop.permute.xlu0 %3996 }
0x3088   :  { %5656 = vmatmul.msk.f32.vlgmr.msra.gmra.mxu2 %vm797_vm2, %v3997_v27 }
0x3089   :  { %4219 = vmatpush.msra.mxu2 %v7254_v35 }
0x308b   :  { %4220 = vmatpush.msra.mxu2 %v7262_v56 }
0x308d   :  { %4221 = vmatpush.msra.mxu2 %v7265_v14 }
0x308f   :  { %4222 = vmatpush.msra.mxu2 %v7269_v16 }
0x310b   :  { %v4017_v53 = vpop.f32.mrf.mxu2 }
0x310c   :  { %v4018_v59 = vadd.f32 %v5836_v46, %v4017_v53 }
0x310e   :  { %v4048_v32 = vadd.f32 %v4046_v55, %v4018_v59 }
0x3110   :  { %v4049_v36 = vmul.f32 0.5, %v4048_v32 }
0x3112   :  { %5899 = vtanh.f32 %v4049_v36 }
0x3118   :  { %v5900_v24 = vpop.eup %5899 }
0x3119   :  { %v4051_v60 = vadd.f32 1.0, %v5900_v24 }
0x311b   :  { %v4052_v37 = vmul.f32 0.5, %v4051_v60 }
0x311d   :  { %v4057_v63 = vmul.f32 %v4055_v62, %v4052_v37  ;;  %v4064_v13 = vsub.f32 1.0, %v4052_v37  ;;  %v4070_v49 = vmul.f32 %v4052_v37, %v7235_v15 }
0x311f   :  { %4059 = vrot.lane.b32.xlu2 %v4057_v63, %s5944_s13 }
0x3179   :  { %v4060_v19 = vpop.permute.xlu2 %4059 }
0x317a   :  { %v4062_v0 = vadd.f32 %v4060_v19, %v4018_v59 }
0x317c   :  { %5901 = vtanh.f32 %v4062_v0 }
0x3182   :  { %v5902_v34 = vpop.eup %5901 }
0x3183   :  { %4066 = vrot.lane.b32.xlu0 %v5902_v34, %s5945_s16 }
0x31f5   :  { %v4067_v3 = vpop.permute.xlu0 %4066 }
0x31f6   :  { %v4069_v50 = vmul.f32 %v4067_v3, %v4064_v13 }
0x31f8   :  { %v7418_v51 = vadd.f32 %v4070_v49, %v4069_v50 }
0x31fa   :  { %4081 = vrot.lane.b32.xlu1 %v7418_v51, %s5945_s16 }
0x326c   :  { %v7422_v45 = vpop.permute.xlu1 %4081 }
0x326d   :  { %5658 = vmatmul.msk.f32.vlgmr.msrb.gmra.mxu2 %vm797_vm2, %v7422_v45 }
0x32f0   :  { %v4102_v17 = vpop.f32.mrf.mxu2 }
0x32f1   :  { %v4103_v8 = vadd.f32 %v5837_v4, %v4102_v17 }
0x32f3   :  { %v4105_v55 = vmul.f32 %v4103_v8, %v7028_v48 }
0x32f5   :  { %v7429_v11 = vadd.f32 %v4105_v55, %v7246_v5 }
0x32f7   :  { %5659 = vst.msk [vmem:[%s7026_s12 + $0x18] sm:$0xff] %vm236_vm0, %v7429_v11  ;;  %5660 = vmatmul.msk.f32.vlgmr.msrb.gmra.mxu3 %vm236_vm0, %v7429_v11 }
0x32f8   :  { %4820 = vmatpush.msrb.mxu3 %v7376_v29 }
0x32fa   :  { %4821 = vmatpush.msrb.mxu3 %v7379_v2 }
0x32fc   :  { %4822 = vmatpush.msrb.mxu3 %v3988_v21 }
0x32fe   :  { %4823 = vmatpush.msrb.mxu3 %v3987_v61 }
0x337a   :  { %v7438_v15 = vpop.f32.mrf.mxu3 }
0x337b   :  { %4148 = vrot.lane.b32.xlu2 %v7438_v15, %s5945_s16  ;;  %v4139_v5 = vperm.slane %v7438_v15, 0  ;;  %v4140_v27 = vperm.slane %v7438_v15, 1  ;;  %v4141_v2 = vperm.slane %v7438_v15, 2  ;;  %v4142_v32 = vperm.slane %v7438_v15, 3 }
0x337c   :  { %v4143_v37 = vperm.slane %v7438_v15, 4  ;;  %v4144_v0 = vperm.slane %v7438_v15, 5  ;;  %v4145_v49 = vperm.slane %v7438_v15, 6  ;;  %v4146_v8 = vperm.slane %v7438_v15, 7 }
0x33d5   :  { %v4149_v22 = vpop.permute.xlu2 %4148 }
0x33d6   :  { %v4151_v10 = vadd.f32 %v4149_v22, %v4139_v5  ;;  %v4152_v53 = vadd.f32 %v4149_v22, %v4140_v27  ;;  %v4153_v61 = vadd.f32 %v4149_v22, %v4141_v2  ;;  %v4154_v24 = vadd.f32 %v4149_v22, %v4142_v32  ;;  %v5838_v27 = vld [vmem:[%s6758_s15] ss:$0 sm:$0xff] }
0x33d7   :  { %v4155_v63 = vadd.f32 %v4149_v22, %v4143_v37  ;;  %v4156_v13 = vadd.f32 %v4149_v22, %v4144_v0  ;;  %v4157_v4 = vadd.f32 %v4149_v22, %v4145_v49  ;;  %v4158_v5 = vadd.f32 %v4149_v22, %v4146_v8 }
0x33d8   :  { %v4159_v58 = vadd.f32 %v4151_v10, %v6780_v30  ;;  %v4160_v29 = vadd.f32 %v4152_v53, %v6786_v20  ;;  %v4161_v59 = vadd.f32 %v4153_v61, %v6794_v39  ;;  %v4162_v60 = vadd.f32 %v4154_v24, %v6802_v47 }
0x33d9   :  { %v4163_v19 = vadd.f32 %v4155_v63, %v6815_v57  ;;  %v4164_v3 = vadd.f32 %v4156_v13, %v6827_v7  ;;  %v4165_v17 = vadd.f32 %v4157_v4, %v6835_v26  ;;  %v4166_v10 = vadd.f32 %v4158_v5, %v6843_v28 }
0x33da   :  { %v4167_v46 = vmax.f32 %v4159_v58, 0.0  ;;  %v4168_v21 = vmax.f32 %v4160_v29, 0.0  ;;  %v4169_v36 = vmax.f32 %v4161_v59, 0.0  ;;  %v4170_v62 = vmax.f32 %v4162_v60, 0.0 }
0x33db   :  { %v4171_v34 = vmax.f32 %v4163_v19, 0.0  ;;  %v4172_v50 = vmax.f32 %v4164_v3, 0.0  ;;  %v4173_v55 = vmax.f32 %v4165_v17, 0.0  ;;  %v4174_v58 = vmax.f32 %v4166_v10, 0.0  ;;  %v5839_v10 = vld [vmem:[%s6851_s26] ss:$0 sm:$0xff] }
0x33dc   :  { %5661 = vmatmul.msk.f32.vlgmr.msra.gmra.mxu2 %vm797_vm2, %v4167_v46 }
0x33e4   :  { %5662 = vmatmul.msk.f32.gmra.mxu2 %vm797_vm2, %v4168_v21 }
0x33ec   :  { %5663 = vmatmul.msk.f32.gmra.mxu2 %vm797_vm2, %v4169_v36 }
0x33f4   :  { %5664 = vmatmul.msk.f32.gmra.mxu2 %vm797_vm2, %v4170_v62 }
0x33fc   :  { %5665 = vmatmul.msk.f32.gmra.mxu2 %vm797_vm2, %v4171_v34 }
0x3404   :  { %5666 = vmatmul.msk.f32.gmra.mxu2 %vm797_vm2, %v4172_v50 }
0x340c   :  { %5667 = vmatmul.msk.f32.gmra.mxu2 %vm797_vm2, %v4173_v55 }
0x3414   :  { %5668 = vmatmul.msk.f32.gmra.mxu2 %vm797_vm2, %v4174_v58 }
0x345f   :  { %v4224_v46 = vpop.f32.mrf.mxu2 }
0x3460   :  { %v4225_v53 = vadd.f32 %v5838_v27, %v4224_v46 }
0x3462   :  { %v4248_v29 = vmax.f32 %v4225_v53, 0.0 }
0x3464   :  { %5669 = vmatmul.msk.f32.vlgmr.msra.gmra.mxu3 %vm797_vm2, %v4248_v29 }
0x3465   :  { %4905 = vmatpush.msra.mxu3 %v7394_v40 }
0x3467   :  { %v4227_v2 = vpop.f32.mrf.mxu2  ;;  %4906 = vmatpush.msra.mxu3 %v7397_v41 }
0x3468   :  { %v4228_v21 = vadd.f32 %v5838_v27, %v4227_v2 }
0x3469   :  { %4907 = vmatpush.msra.mxu3 %v7402_v1 }
0x346a   :  { %v4249_v22 = vmax.f32 %v4228_v21, 0.0 }
0x346b   :  { %4908 = vmatpush.msra.mxu3 %v7407_v54 }
0x346c   :  { %5670 = vmatmul.msk.f32.gmra.mxu3 %vm797_vm2, %v4249_v22 }
0x346f   :  { %v4230_v61 = vpop.f32.mrf.mxu2 }
0x3470   :  { %v4231_v59 = vadd.f32 %v5838_v27, %v4230_v61 }
0x3472   :  { %v4250_v32 = vmax.f32 %v4231_v59, 0.0 }
0x3474   :  { %5671 = vmatmul.msk.f32.gmra.mxu3 %vm797_vm2, %v4250_v32 }
0x3477   :  { %v4233_v36 = vpop.f32.mrf.mxu2 }
0x3478   :  { %v4234_v24 = vadd.f32 %v5838_v27, %v4233_v36 }
0x347a   :  { %v4251_v60 = vmax.f32 %v4234_v24, 0.0 }
0x347c   :  { %5672 = vmatmul.msk.f32.gmra.mxu3 %vm797_vm2, %v4251_v60 }
0x347f   :  { %v4236_v40 = vpop.f32.mrf.mxu2 }
0x3480   :  { %v4237_v41 = vadd.f32 %v5838_v27, %v4236_v40 }
0x3482   :  { %v4252_v37 = vmax.f32 %v4237_v41, 0.0 }
0x3484   :  { %5673 = vmatmul.msk.f32.gmra.mxu3 %vm797_vm2, %v4252_v37 }
0x3487   :  { %v4239_v1 = vpop.f32.mrf.mxu2 }
0x3488   :  { %v4240_v62 = vadd.f32 %v5838_v27, %v4239_v1  ;;  %v7481_v1 = vld [vmem:[%s6646_s17] sm:$0xff] }
0x348a   :  { %v4253_v54 = vmax.f32 %v4240_v62, 0.0 }
0x348c   :  { %5674 = vmatmul.msk.f32.gmra.mxu3 %vm797_vm2, %v4253_v54 }
0x348f   :  { %v4242_v63 = vpop.f32.mrf.mxu2 }
0x3490   :  { %v4243_v19 = vadd.f32 %v5838_v27, %v4242_v63  ;;  %v5840_v63 = vld [vmem:[%s6941_s18] ss:$0 sm:$0xff] }
0x3492   :  { %v4254_v0 = vmax.f32 %v4243_v19, 0.0 }
0x3494   :  { %5675 = vmatmul.msk.f32.gmra.mxu3 %vm797_vm2, %v4254_v0 }
0x3497   :  { %v4245_v34 = vpop.f32.mrf.mxu2 }
0x3498   :  { %v4246_v13 = vadd.f32 %v5838_v27, %v4245_v34 }
0x349a   :  { %v4255_v3 = vmax.f32 %v4246_v13, 0.0 }
0x349c   :  { %5676 = vmatmul.msk.f32.gmra.mxu3 %vm797_vm2, %v4255_v3 }
0x34e7   :  { %v4305_v49 = vpop.f32.mrf.mxu3 }
0x34e8   :  { %v4306_v60 = vadd.f32 %v5839_v10, %v4305_v49 }
0x34ea   :  { %v4329_v37 = vmax.f32 %v4306_v60, 0.0  ;;  %v5842_v60 = vld [vmem:[%s7012_s6] ss:$0 sm:$0xff] }
0x34ef   :  { %v4308_v50 = vpop.f32.mrf.mxu3 }
0x34f0   :  { %v4309_v36 = vadd.f32 %v5839_v10, %v4308_v50 }
0x34f2   :  { %v4330_v41 = vmax.f32 %v4309_v36, 0.0  ;;  %v7540_v36 = vld [vmem:[%s6686_s23 + $0x8] sm:$0xff] }
0x34f7   :  { %v4311_v4 = vpop.f32.mrf.mxu3 }
0x34f8   :  { %v4312_v59 = vadd.f32 %v5839_v10, %v4311_v4 }
0x34fa   :  { %v4331_v40 = vmax.f32 %v4312_v59, 0.0  ;;  %v7532_v59 = vld [vmem:[%s6686_s23 + $0x18] sm:$0xff] }
0x34ff   :  { %v4314_v17 = vpop.f32.mrf.mxu3 }
0x3500   :  { %v4315_v27 = vadd.f32 %v5839_v10, %v4314_v17 }
0x3502   :  { %v4332_v24 = vmax.f32 %v4315_v27, 0.0  ;;  %v7519_v27 = vld [vmem:[%s6686_s23 + $0x28] sm:$0xff] }
0x3507   :  { %v4317_v8 = vpop.f32.mrf.mxu3 }
0x3508   :  { %v4318_v21 = vadd.f32 %v5839_v10, %v4317_v8 }
0x350a   :  { %v4333_v32 = vmax.f32 %v4318_v21, 0.0 }
0x350f   :  { %v4320_v55 = vpop.f32.mrf.mxu3 }
0x3510   :  { %v4321_v29 = vadd.f32 %v5839_v10, %v4320_v55 }
0x3512   :  { %v4334_v61 = vmax.f32 %v4321_v29, 0.0 }
0x3517   :  { %v4323_v5 = vpop.f32.mrf.mxu3 }
0x3518   :  { %v4324_v46 = vadd.f32 %v5839_v10, %v4323_v5 }
0x351a   :  { %v4335_v22 = vmax.f32 %v4324_v46, 0.0 }
0x351f   :  { %v4326_v58 = vpop.f32.mrf.mxu3 }
0x3520   :  { %v4327_v53 = vadd.f32 %v5839_v10, %v4326_v58 }
0x3522   :  { %v4336_v2 = vmax.f32 %v4327_v53, 0.0 }
0x3524   :  { %4345 = vmatpush.msra.mxu0 %v4336_v2 }
0x3526   :  { %4346 = vmatpush.msra.mxu0 %v4335_v22  ;;  %v7516_v22 = vld [vmem:[%s6686_s23 + $0x30] sm:$0xff] }
0x3528   :  { %4347 = vmatpush.msra.mxu0 %v4334_v61  ;;  %v7523_v61 = vld [vmem:[%s6686_s23 + $0x20] sm:$0xff] }
0x352a   :  { %4348 = vmatpush.msra.mxu0 %v4333_v32  ;;  %v7536_v32 = vld [vmem:[%s6686_s23 + $0x10] sm:$0xff] }
0x352c   :  { %4349 = vmatpush.msra.mxu0 %v4332_v24  ;;  %v7544_v24 = vld [vmem:[%s6686_s23] sm:$0xff] }
0x352e   :  { %4350 = vmatpush.msra.mxu0 %v4331_v40 }
0x3530   :  { %4351 = vmatpush.msra.mxu0 %v4330_v41 }
0x3532   :  { %4352 = vmatpush.msra.mxu0 %v4329_v37 }
0x3533   :  { %5677 = vmatmul.msk.f32.vlgmr.msra.gmra.mxu0 %vm400_vm1, %v7481_v1 }
0x3534   :  { %4376 = vmatpush.msrb.mxu0 %v7324_v52 }
0x3536   :  { %4377 = vmatpush.msrb.mxu0 %v7329_v6 }
0x3538   :  { %4378 = vmatpush.msrb.mxu0 %v7333_v18 }
0x353a   :  { %4379 = vmatpush.msrb.mxu0 %v7338_v42 }
0x353c   :  { %4444 = vmatpush.msra.mxu0 %v7342_v31 }
0x353e   :  { %4445 = vmatpush.msra.mxu0 %v7345_v44 }
0x3540   :  { %4446 = vmatpush.msra.mxu0 %v7349_v38 }
0x3542   :  { %4447 = vmatpush.msra.mxu0 %v7353_v12 }
0x35b0   :  { %v4354_v62 = vpop.f32.mrf.mxu0 }
0x35b1   :  { %5678 = vmatmul.msk.f32.vlgmr.msrb.gmra.mxu0 %vm797_vm2, %v4354_v62 }
0x35b2   :  { %4532 = vmatpush.msrb.mxu0 %v7516_v22 }
0x35b4   :  { %4533 = vmatpush.msrb.mxu0 %v7519_v27 }
0x35b6   :  { %4534 = vmatpush.msrb.mxu0 %v7523_v61 }
0x35b8   :  { %4535 = vmatpush.msrb.mxu0 %v7532_v59 }
0x35b9   :  { %5680 = vmatmul.msk.f32.vlgmr.msra.gmra.mxu0 %vm797_vm2, %v7422_v45  ;;  %v5841_v45 = vld [vmem:[%s6946_s24] ss:$0 sm:$0xff] }
0x35ba   :  { %4536 = vmatpush.msrb.mxu0 %v7536_v32 }
0x35bc   :  { %4537 = vmatpush.msrb.mxu0 %v7540_v36 }
0x35be   :  { %4538 = vmatpush.msrb.mxu0 %v7544_v24 }
0x35c0   :  { %4704 = vmatpush.msra.mxu0 %v7287_v43 }
0x35c2   :  { %4705 = vmatpush.msra.mxu0 %v7302_v25 }
0x35c4   :  { %4706 = vmatpush.msra.mxu0 %v7306_v33 }
0x35c6   :  { %4707 = vmatpush.msra.mxu0 %v7310_v23 }
0x362e   :  { %v4381_v54 = vpop.f32.mrf.mxu0 }
0x362f   :  { %4385 = vrot.lane.b32.xlu0 %v4381_v54, %s5944_s13 }
0x3636   :  { %v4449_v19 = vpop.f32.mrf.mxu0 }
0x3637   :  { %v4450_v0 = vadd.f32 %v5840_v63, %v4449_v19 }
0x3639   :  { %4458 = vrot.lane.b32.xlu2 %v4450_v0, %s5944_s13 }
0x3693   :  { %v4459_v58 = vpop.permute.xlu2 %4458 }
0x36a1   :  { %v4386_v34 = vpop.permute.xlu0 %4385 }
0x36a2   :  { %v4388_v13 = vadd.f32 %v4386_v34, %v7438_v15 }
0x36a4   :  { %v4389_v3 = vadd.f32 %v4388_v13, %v6969_v9 }
0x36a6   :  { %v4390_v49 = vmax.f32 %v4389_v3, 0.0 }
0x36a8   :  { %4400 = vrot.lane.b32.xlu1 %v4390_v49, %s5944_s13 }
0x371a   :  { %v4401_v50 = vpop.permute.xlu1 %4400 }
0x371b   :  { %5679 = vmatmul.msk.f32.vlgmr.msra.gmra.mxu1 %vm797_vm2, %v4401_v50 }
0x371c   :  { %4623 = vmatpush.msra.mxu1 %v7254_v35 }
0x371e   :  { %4624 = vmatpush.msra.mxu1 %v7262_v56 }
0x3720   :  { %4625 = vmatpush.msra.mxu1 %v7265_v14 }
0x3722   :  { %4626 = vmatpush.msra.mxu1 %v7269_v16 }
0x3798   :  { %v4421_v4 = vpop.f32.mrf.mxu1 }
0x3799   :  { %v4422_v17 = vadd.f32 %v5841_v45, %v4421_v4 }
0x379b   :  { %v4452_v15 = vadd.f32 %v4450_v0, %v4422_v17 }
0x379d   :  { %v4453_v8 = vmul.f32 0.5, %v4452_v15 }
0x379f   :  { %5903 = vtanh.f32 %v4453_v8 }
0x37a5   :  { %v5904_v55 = vpop.eup %5903 }
0x37a6   :  { %v4455_v5 = vadd.f32 1.0, %v5904_v55 }
0x37a8   :  { %v4456_v10 = vmul.f32 0.5, %v4455_v5 }
0x37aa   :  { %v4461_v46 = vmul.f32 %v4459_v58, %v4456_v10  ;;  %v4468_v16 = vsub.f32 1.0, %v4456_v10  ;;  %v4474_v29 = vmul.f32 %v4456_v10, %v7418_v51 }
0x37ac   :  { %4463 = vrot.lane.b32.xlu0 %v4461_v46, %s5944_s13 }
0x381e   :  { %v4464_v35 = vpop.permute.xlu0 %4463 }
0x381f   :  { %v4466_v56 = vadd.f32 %v4464_v35, %v4422_v17 }
0x3821   :  { %5905 = vtanh.f32 %v4466_v56 }
0x3827   :  { %v5906_v14 = vpop.eup %5905 }
0x3828   :  { %4470 = vrot.lane.b32.xlu1 %v5906_v14, %s5945_s16 }
0x389a   :  { %v4471_v53 = vpop.permute.xlu1 %4470 }
0x389b   :  { %v4473_v2 = vmul.f32 %v4471_v53, %v4468_v16 }
0x389d   :  { %v7511_v21 = vadd.f32 %v4474_v29, %v4473_v2 }
0x389f   :  { %4485 = vrot.lane.b32.xlu2 %v7511_v21, %s5945_s16 }
0x38f9   :  { %v7527_v51 = vpop.permute.xlu2 %4485 }
0x38fa   :  { %5681 = vmatmul.msk.f32.vlgmr.msrb.gmra.mxu1 %vm797_vm2, %v7527_v51 }
0x3977   :  { %v4506_v40 = vpop.f32.mrf.mxu1 }
0x3978   :  { %v4507_v41 = vadd.f32 %v5842_v60, %v4506_v40 }
0x397a   :  { %v4509_v37 = vmul.f32 %v4507_v41, %v7028_v48 }
0x397c   :  { %v7554_v62 = vadd.f32 %v4509_v37, %v7429_v11  ;;  %v5843_v37 = vld [vmem:[%s6758_s15] ss:$0 sm:$0xff] }
0x397e   :  { %5682 = vst.msk [vmem:[%s7026_s12 + $0x20] sm:$0xff] %vm236_vm0, %v7554_v62  ;;  %5683 = vmatmul.msk.f32.vlgmr.msrb.gmra.mxu0 %vm236_vm0, %v7554_v62 }
0x39fb   :  { %v7561_v43 = vpop.f32.mrf.mxu0 }
0x39fc   :  { %4552 = vrot.lane.b32.xlu0 %v7561_v43, %s5945_s16  ;;  %v4543_v25 = vperm.slane %v7561_v43, 0  ;;  %v4544_v11 = vperm.slane %v7561_v43, 1  ;;  %v4545_v34 = vperm.slane %v7561_v43, 2  ;;  %v4546_v50 = vperm.slane %v7561_v43, 3 }
0x39fd   :  { %v4547_v15 = vperm.slane %v7561_v43, 4  ;;  %v4548_v10 = vperm.slane %v7561_v43, 5  ;;  %v4549_v56 = vperm.slane %v7561_v43, 6  ;;  %v4550_v29 = vperm.slane %v7561_v43, 7 }
0x3a6e   :  { %v4553_v33 = vpop.permute.xlu0 %4552 }
0x3a6f   :  { %v4555_v23 = vadd.f32 %v4553_v33, %v4543_v25  ;;  %v4556_v19 = vadd.f32 %v4553_v33, %v4544_v11  ;;  %v4557_v3 = vadd.f32 %v4553_v33, %v4545_v34  ;;  %v4558_v4 = vadd.f32 %v4553_v33, %v4546_v50 }
0x3a70   :  { %v4559_v55 = vadd.f32 %v4553_v33, %v4547_v15  ;;  %v4560_v46 = vadd.f32 %v4553_v33, %v4548_v10  ;;  %v4561_v16 = vadd.f32 %v4553_v33, %v4549_v56  ;;  %v4562_v60 = vadd.f32 %v4553_v33, %v4550_v29 }
0x3a71   :  { %v4563_v54 = vadd.f32 %v4555_v23, %v6780_v30  ;;  %v4564_v0 = vadd.f32 %v4556_v19, %v6786_v20  ;;  %v4565_v49 = vadd.f32 %v4557_v3, %v6794_v39  ;;  %v4566_v17 = vadd.f32 %v4558_v4, %v6802_v47 }
0x3a72   :  { %v4567_v5 = vadd.f32 %v4559_v55, %v6815_v57  ;;  %v4568_v35 = vadd.f32 %v4560_v46, %v6827_v7  ;;  %v4569_v53 = vadd.f32 %v4561_v16, %v6835_v26  ;;  %v4570_v40 = vadd.f32 %v4562_v60, %v6843_v28 }
0x3a73   :  { %v4571_v63 = vmax.f32 %v4563_v54, 0.0  ;;  %v4572_v13 = vmax.f32 %v4564_v0, 0.0  ;;  %v4573_v45 = vmax.f32 %v4565_v49, 0.0  ;;  %v4574_v8 = vmax.f32 %v4566_v17, 0.0 }
0x3a74   :  { %v4575_v58 = vmax.f32 %v4567_v5, 0.0  ;;  %v4576_v14 = vmax.f32 %v4568_v35, 0.0  ;;  %v4577_v2 = vmax.f32 %v4569_v53, 0.0  ;;  %v4578_v41 = vmax.f32 %v4570_v40, 0.0  ;;  %v5844_v40 = vld [vmem:[%s6851_s26] ss:$0 sm:$0xff] }
0x3a75   :  { %5684 = vmatmul.msk.f32.vlgmr.msra.gmra.mxu1 %vm797_vm2, %v4571_v63 }
0x3a7d   :  { %5685 = vmatmul.msk.f32.gmra.mxu1 %vm797_vm2, %v4572_v13 }
0x3a85   :  { %5686 = vmatmul.msk.f32.gmra.mxu1 %vm797_vm2, %v4573_v45 }
0x3a8d   :  { %5687 = vmatmul.msk.f32.gmra.mxu1 %vm797_vm2, %v4574_v8 }
0x3a95   :  { %5688 = vmatmul.msk.f32.gmra.mxu1 %vm797_vm2, %v4575_v58 }
0x3a9d   :  { %5689 = vmatmul.msk.f32.gmra.mxu1 %vm797_vm2, %v4576_v14 }
0x3aa5   :  { %5690 = vmatmul.msk.f32.gmra.mxu1 %vm797_vm2, %v4577_v2 }
0x3aad   :  { %5691 = vmatmul.msk.f32.gmra.mxu1 %vm797_vm2, %v4578_v41 }
0x3af2   :  { %v4628_v25 = vpop.f32.mrf.mxu1 }
0x3af3   :  { %v4629_v23 = vadd.f32 %v5843_v37, %v4628_v25 }
0x3af5   :  { %v4652_v54 = vmax.f32 %v4629_v23, 0.0 }
0x3af7   :  { %5692 = vmatmul.msk.f32.vlgmr.msra.gmra.mxu0 %vm797_vm2, %v4652_v54 }
0x3afa   :  { %v4631_v11 = vpop.f32.mrf.mxu1 }
0x3afb   :  { %v4632_v63 = vadd.f32 %v5843_v37, %v4631_v11 }
0x3afd   :  { %v4653_v19 = vmax.f32 %v4632_v63, 0.0 }
0x3aff   :  { %5693 = vmatmul.msk.f32.gmra.mxu0 %vm797_vm2, %v4653_v19 }
0x3b02   :  { %v4634_v0 = vpop.f32.mrf.mxu1 }
0x3b03   :  { %v4635_v33 = vadd.f32 %v5843_v37, %v4634_v0 }
0x3b05   :  { %v4654_v34 = vmax.f32 %v4635_v33, 0.0 }
0x3b07   :  { %5694 = vmatmul.msk.f32.gmra.mxu0 %vm797_vm2, %v4654_v34 }
0x3b0a   :  { %v4637_v13 = vpop.f32.mrf.mxu1 }
0x3b0b   :  { %v4638_v3 = vadd.f32 %v5843_v37, %v4637_v13 }
0x3b0d   :  { %v4655_v49 = vmax.f32 %v4638_v3, 0.0 }
0x3b0f   :  { %5695 = vmatmul.msk.f32.gmra.mxu0 %vm797_vm2, %v4655_v49 }
0x3b12   :  { %v4640_v50 = vpop.f32.mrf.mxu1 }
0x3b13   :  { %v4641_v45 = vadd.f32 %v5843_v37, %v4640_v50 }
0x3b15   :  { %v4656_v4 = vmax.f32 %v4641_v45, 0.0 }
0x3b17   :  { %5696 = vmatmul.msk.f32.gmra.mxu0 %vm797_vm2, %v4656_v4 }
0x3b1a   :  { %v4643_v17 = vpop.f32.mrf.mxu1 }
0x3b1b   :  { %v4644_v15 = vadd.f32 %v5843_v37, %v4643_v17 }
0x3b1d   :  { %v4657_v8 = vmax.f32 %v4644_v15, 0.0 }
0x3b1f   :  { %5697 = vmatmul.msk.f32.gmra.mxu0 %vm797_vm2, %v4657_v8 }
0x3b22   :  { %v4646_v55 = vpop.f32.mrf.mxu1 }
0x3b23   :  { %v4647_v5 = vadd.f32 %v5843_v37, %v4646_v55 }
0x3b25   :  { %v4658_v10 = vmax.f32 %v4647_v5, 0.0 }
0x3b27   :  { %5698 = vmatmul.msk.f32.gmra.mxu0 %vm797_vm2, %v4658_v10 }
0x3b2a   :  { %v4649_v58 = vpop.f32.mrf.mxu1 }
0x3b2b   :  { %v4650_v46 = vadd.f32 %v5843_v37, %v4649_v58 }
0x3b2d   :  { %v4659_v35 = vmax.f32 %v4650_v46, 0.0 }
0x3b2f   :  { %5699 = vmatmul.msk.f32.gmra.mxu0 %vm797_vm2, %v4659_v35 }
0x3b74   :  { %v4709_v56 = vpop.f32.mrf.mxu0 }
0x3b75   :  { %v4710_v49 = vadd.f32 %v5844_v40, %v4709_v56 }
0x3b77   :  { %v4733_v4 = vmax.f32 %v4710_v49, 0.0 }
0x3b7c   :  { %v4712_v14 = vpop.f32.mrf.mxu0 }
0x3b7d   :  { %v4713_v13 = vadd.f32 %v5844_v40, %v4712_v14 }
0x3b7f   :  { %v4734_v45 = vmax.f32 %v4713_v13, 0.0 }
0x3b84   :  { %v4715_v16 = vpop.f32.mrf.mxu0 }
0x3b85   :  { %v4716_v33 = vadd.f32 %v5844_v40, %v4715_v16 }
0x3b87   :  { %v4735_v50 = vmax.f32 %v4716_v33, 0.0 }
0x3b8c   :  { %v4718_v53 = vpop.f32.mrf.mxu0 }
0x3b8d   :  { %v4719_v37 = vadd.f32 %v5844_v40, %v4718_v53  ;;  %v5847_v53 = vld [vmem:[%s7012_s6] ss:$0 sm:$0xff] }
0x3b8f   :  { %v4736_v3 = vmax.f32 %v4719_v37, 0.0 }
0x3b94   :  { %v4721_v29 = vpop.f32.mrf.mxu0 }
0x3b95   :  { %v4722_v63 = vadd.f32 %v5844_v40, %v4721_v29 }
0x3b97   :  { %v4737_v34 = vmax.f32 %v4722_v63, 0.0 }
0x3b9c   :  { %v4724_v2 = vpop.f32.mrf.mxu0 }
0x3b9d   :  { %v4725_v54 = vadd.f32 %v5844_v40, %v4724_v2 }
0x3b9f   :  { %v4738_v0 = vmax.f32 %v4725_v54, 0.0  ;;  %v4983_v54 = vld [vmem:[%s6737_s5] sm:$0xff] }
0x3ba4   :  { %v4727_v60 = vpop.f32.mrf.mxu0 }
0x3ba5   :  { %v4728_v25 = vadd.f32 %v5844_v40, %v4727_v60 }
0x3ba7   :  { %v4739_v19 = vmax.f32 %v4728_v25, 0.0  ;;  %v4985_v25 = vld [vmem:[%s6737_s5 + $0x10] sm:$0xff] }
0x3bac   :  { %v4730_v41 = vpop.f32.mrf.mxu0 }
0x3bad   :  { %v4731_v23 = vadd.f32 %v5844_v40, %v4730_v41  ;;  %v4986_v40 = vld [vmem:[%s6737_s5 + $0x18] sm:$0xff] }
0x3baf   :  { %v4740_v11 = vmax.f32 %v4731_v23, 0.0  ;;  %v4984_v23 = vld [vmem:[%s6737_s5 + $0x8] sm:$0xff] }
0x3bb1   :  { %4749 = vmatpush.msrb.mxu2 %v4740_v11 }
0x3bb3   :  { %4750 = vmatpush.msrb.mxu2 %v4739_v19 }
0x3bb5   :  { %4751 = vmatpush.msrb.mxu2 %v4738_v0 }
0x3bb7   :  { %4752 = vmatpush.msrb.mxu2 %v4737_v34 }
0x3bb9   :  { %4753 = vmatpush.msrb.mxu2 %v4736_v3 }
0x3bbb   :  { %4754 = vmatpush.msrb.mxu2 %v4735_v50 }
0x3bbd   :  { %4755 = vmatpush.msrb.mxu2 %v4734_v45 }
0x3bbf   :  { %4756 = vmatpush.msrb.mxu2 %v4733_v4 }
0x3bc0   :  { %5700 = vmatmul.msk.f32.vlgmr.msrb.gmra.mxu2 %vm400_vm1, %v7481_v1 }
0x3bc1   :  { %4780 = vmatpush.msra.mxu2 %v7324_v52 }
0x3bc3   :  { %4781 = vmatpush.msra.mxu2 %v7329_v6  ;;  %v5845_v6 = vld [vmem:[%s6941_s18] ss:$0 sm:$0xff] }
0x3bc5   :  { %4782 = vmatpush.msra.mxu2 %v7333_v18 }
0x3bc7   :  { %4783 = vmatpush.msra.mxu2 %v7338_v42 }
0x3bc9   :  { %4848 = vmatpush.msrb.mxu2 %v7342_v31 }
0x3bcb   :  { %4849 = vmatpush.msrb.mxu2 %v7345_v44 }
0x3bcd   :  { %4850 = vmatpush.msrb.mxu2 %v7349_v38 }
0x3bcf   :  { %4851 = vmatpush.msrb.mxu2 %v7353_v12 }
0x3c43   :  { %v4758_v17 = vpop.f32.mrf.mxu2 }
0x3c44   :  { %5701 = vmatmul.msk.f32.vlgmr.msra.gmra.mxu2 %vm797_vm2, %v4758_v17 }
0x3c45   :  { %4936 = vmatpush.msra.mxu2 %v7516_v22 }
0x3c47   :  { %4937 = vmatpush.msra.mxu2 %v7519_v27  ;;  %v5846_v27 = vld [vmem:[%s6946_s24] ss:$0 sm:$0xff] }
0x3c49   :  { %4938 = vmatpush.msra.mxu2 %v7523_v61 }
0x3c4b   :  { %4939 = vmatpush.msra.mxu2 %v7532_v59 }
0x3c4c   :  { %5703 = vmatmul.msk.f32.vlgmr.msrb.gmra.mxu2 %vm797_vm2, %v7527_v51 }
0x3c4d   :  { %4940 = vmatpush.msra.mxu2 %v7536_v32 }
0x3c4f   :  { %4941 = vmatpush.msra.mxu2 %v7540_v36 }
0x3c51   :  { %4942 = vmatpush.msra.mxu2 %v7544_v24 }
0x3cc7   :  { %v4785_v52 = vpop.f32.mrf.mxu2 }
0x3cc8   :  { %4789 = vrot.lane.b32.xlu1 %v4785_v52, %s5944_s13 }
0x3ccf   :  { %v4853_v18 = vpop.f32.mrf.mxu2 }
0x3cd0   :  { %v4854_v42 = vadd.f32 %v5845_v6, %v4853_v18  ;;  %v5067_v18 = vld [vmem:[%s6808_s21 + $0x18] sm:$0xff] }
0x3cd1   :  { %5108 = vmatpush.msrb.mxu2 %v5067_v18 }
0x3cd2   :  { %4862 = vrot.lane.b32.xlu0 %v4854_v42, %s5944_s13 }
0x3d3a   :  { %v4790_v31 = vpop.permute.xlu1 %4789 }
0x3d3b   :  { %v4792_v44 = vadd.f32 %v4790_v31, %v7561_v43 }
0x3d3d   :  { %v4793_v38 = vadd.f32 %v4792_v44, %v6969_v9 }
0x3d3f   :  { %v4794_v12 = vmax.f32 %v4793_v38, 0.0 }
0x3d41   :  { %4804 = vrot.lane.b32.xlu2 %v4794_v12, %s5944_s13 }
0x3d44   :  { %v4863_v8 = vpop.permute.xlu0 %4862 }
0x3d9b   :  { %v4805_v22 = vpop.permute.xlu2 %4804 }
0x3d9c   :  { %5702 = vmatmul.msk.f32.vlgmr.msrb.gmra.mxu3 %vm797_vm2, %v4805_v22 }
0x3d9d   :  { %5027 = vmatpush.msrb.mxu3 %v4986_v40 }
0x3d9f   :  { %5028 = vmatpush.msrb.mxu3 %v4985_v25 }
0x3da1   :  { %5029 = vmatpush.msrb.mxu3 %v4984_v23 }
0x3da3   :  { %5030 = vmatpush.msrb.mxu3 %v4983_v54 }
0x3e1f   :  { %v4825_v61 = vpop.f32.mrf.mxu3 }
0x3e20   :  { %v4826_v51 = vadd.f32 %v5846_v27, %v4825_v61 }
0x3e22   :  { %v4856_v59 = vadd.f32 %v4854_v42, %v4826_v51 }
0x3e24   :  { %v4857_v32 = vmul.f32 0.5, %v4856_v59 }
0x3e26   :  { %5907 = vtanh.f32 %v4857_v32 }
0x3e2c   :  { %v5908_v36 = vpop.eup %5907 }
0x3e2d   :  { %v4859_v24 = vadd.f32 1.0, %v5908_v36  ;;  %v5065_v36 = vld [vmem:[%s6808_s21 + $0x8] sm:$0xff] }
0x3e2f   :  { %v4860_v15 = vmul.f32 0.5, %v4859_v24  ;;  %v5064_v24 = vld [vmem:[%s6808_s21] sm:$0xff] }
0x3e31   :  { %v4865_v43 = vmul.f32 %v4863_v8, %v4860_v15  ;;  %v4872_v58 = vsub.f32 1.0, %v4860_v15  ;;  %v4878_v35 = vmul.f32 %v4860_v15, %v7511_v21  ;;  %v5848_v15 = vld [vmem:[%s6758_s15] ss:$0 sm:$0xff] }
0x3e33   :  { %4867 = vrot.lane.b32.xlu1 %v4865_v43, %s5944_s13 }
0x3ea5   :  { %v4868_v55 = vpop.permute.xlu1 %4867 }
0x3ea6   :  { %v4870_v5 = vadd.f32 %v4868_v55, %v4826_v51 }
0x3ea8   :  { %5909 = vtanh.f32 %v4870_v5 }
0x3eae   :  { %v5910_v10 = vpop.eup %5909 }
0x3eaf   :  { %4874 = vrot.lane.b32.xlu2 %v5910_v10, %s5945_s16 }
0x3f09   :  { %v4875_v46 = vpop.permute.xlu2 %4874 }
0x3f0a   :  { %v4877_v56 = vmul.f32 %v4875_v46, %v4872_v58 }
0x3f0c   :  { %v7630_v14 = vadd.f32 %v4878_v35, %v4877_v56 }
0x3f0e   :  { %4889 = vrot.lane.b32.xlu0 %v7630_v14, %s5945_s16 }
0x3f80   :  { %v7634_v16 = vpop.permute.xlu0 %4889 }
0x3f81   :  { %5704 = vmatmul.msk.f32.vlgmr.msra.gmra.mxu3 %vm797_vm2, %v7634_v16 }
0x4004   :  { %v4910_v29 = vpop.f32.mrf.mxu3 }
0x4005   :  { %v4911_v2 = vadd.f32 %v5847_v53, %v4910_v29 }
0x4007   :  { %v4913_v60 = vmul.f32 %v4911_v2, %v7028_v48 }
0x4009   :  { %v7641_v21 = vadd.f32 %v4913_v60, %v7554_v62 }
0x400b   :  { %5705 = vst.msk [vmem:[%s7026_s12 + $0x28] sm:$0xff] %vm236_vm0, %v7641_v21  ;;  %5706 = vmatmul.msk.f32.vlgmr.msra.gmra.mxu2 %vm236_vm0, %v7641_v21 }
0x408e   :  { %v7649_v41 = vpop.f32.mrf.mxu2 }
0x408f   :  { %4956 = vrot.lane.b32.xlu1 %v7649_v41, %s5945_s16  ;;  %v4947_v62 = vperm.slane %v7649_v41, 0  ;;  %v4948_v37 = vperm.slane %v7649_v41, 1  ;;  %v4949_v13 = vperm.slane %v7649_v41, 2  ;;  %v4950_v45 = vperm.slane %v7649_v41, 3 }
0x4090   :  { %v4951_v52 = vperm.slane %v7649_v41, 4  ;;  %v4953_v38 = vperm.slane %v7649_v41, 6  ;;  %v4954_v27 = vperm.slane %v7649_v41, 7 }
0x4101   :  { %v4957_v11 = vpop.permute.xlu1 %4956 }
0x4102   :  { %v4959_v63 = vadd.f32 %v4957_v11, %v4947_v62  ;;  %v4960_v33 = vadd.f32 %v4957_v11, %v4948_v37  ;;  %v4961_v49 = vadd.f32 %v4957_v11, %v4949_v13  ;;  %v4962_v4 = vadd.f32 %v4957_v11, %v4950_v45  ;;  %v5849_v45 = vld [vmem:[%s6851_s26] ss:$0 sm:$0xff] }
0x4103   :  { %v4965_v22 = vadd.f32 %v4957_v11, %v4953_v38  ;;  %v4966_v51 = vadd.f32 %v4957_v11, %v4954_v27 }
0x4104   :  { %v4967_v19 = vadd.f32 %v4959_v63, %v6780_v30  ;;  %v4968_v34 = vadd.f32 %v4960_v33, %v6786_v20  ;;  %v4969_v50 = vadd.f32 %v4961_v49, %v6794_v39  ;;  %v4970_v17 = vadd.f32 %v4962_v4, %v6802_v47 }
0x4105   :  { %v4963_v20 = vadd.f32 %v4957_v11, %v4951_v52  ;;  %v4952_v39 = vperm.slane %v7649_v41, 5  ;;  %v4974_v59 = vadd.f32 %v4966_v51, %v6843_v28  ;;  %v5167_v51 = vld [vmem:[%s6877_s30 + $0x10] sm:$0xff] }
0x4106   :  { %v4975_v0 = vmax.f32 %v4967_v19, 0.0  ;;  %v4976_v3 = vmax.f32 %v4968_v34, 0.0  ;;  %v4977_v30 = vmax.f32 %v4969_v50, 0.0  ;;  %v4978_v6 = vmax.f32 %v4970_v17, 0.0 }
0x4107   :  { %v4971_v42 = vadd.f32 %v4963_v20, %v6815_v57  ;;  %v4964_v44 = vadd.f32 %v4957_v11, %v4952_v39  ;;  %v4973_v57 = vadd.f32 %v4965_v22, %v6835_v26  ;;  %v4982_v32 = vmax.f32 %v4974_v59, 0.0  ;;  %v5166_v59 = vld [vmem:[%s6877_s30 + $0x8] sm:$0xff] }
0x4108   :  { %5707 = vmatmul.msk.f32.vlgmr.msrb.gmra.mxu3 %vm797_vm2, %v4975_v0 }
0x4109   :  { %v4979_v31 = vmax.f32 %v4971_v42, 0.0  ;;  %v4972_v47 = vadd.f32 %v4964_v44, %v6827_v7  ;;  %v4981_v61 = vmax.f32 %v4973_v57, 0.0  ;;  %v5066_v7 = vld [vmem:[%s6808_s21 + $0x10] sm:$0xff] }
0x410a   :  { %5109 = vmatpush.msrb.mxu2 %v5066_v7  ;;  %v5235_v7 = vld [vmem:[%s6902_s4 + $0x18] sm:$0xff] }
0x410b   :  { %v4980_v12 = vmax.f32 %v4972_v47, 0.0 }
0x410c   :  { %5110 = vmatpush.msrb.mxu2 %v5065_v36  ;;  %v5234_v36 = vld [vmem:[%s6902_s4 + $0x10] sm:$0xff] }
0x410e   :  { %5111 = vmatpush.msrb.mxu2 %v5064_v24  ;;  %v5233_v24 = vld [vmem:[%s6902_s4 + $0x8] sm:$0xff] }
0x4110   :  { %5708 = vmatmul.msk.f32.gmra.mxu3 %vm797_vm2, %v4976_v3 }
0x4118   :  { %5709 = vmatmul.msk.f32.gmra.mxu3 %vm797_vm2, %v4977_v30 }
0x4120   :  { %5710 = vmatmul.msk.f32.gmra.mxu3 %vm797_vm2, %v4978_v6 }
0x4128   :  { %5711 = vmatmul.msk.f32.gmra.mxu3 %vm797_vm2, %v4979_v31 }
0x4130   :  { %5712 = vmatmul.msk.f32.gmra.mxu3 %vm797_vm2, %v4980_v12 }
0x4138   :  { %5713 = vmatmul.msk.f32.gmra.mxu3 %vm797_vm2, %v4981_v61  ;;  %v5168_v61 = vld [vmem:[%s6877_s30 + $0x18] sm:$0xff] }
0x4140   :  { %5714 = vmatmul.msk.f32.gmra.mxu3 %vm797_vm2, %v4982_v32  ;;  %v5165_v32 = vld [vmem:[%s6877_s30] sm:$0xff] }
0x418b   :  { %v5032_v8 = vpop.f32.mrf.mxu3 }
0x418c   :  { %v5033_v26 = vadd.f32 %v5848_v15, %v5032_v8 }
0x418e   :  { %v5056_v43 = vmax.f32 %v5033_v26, 0.0  ;;  %v5850_v26 = vld [vmem:[%s6941_s18] ss:$0 sm:$0xff] }
0x4190   :  { %5715 = vmatmul.msk.f32.vlgmr.msrb.gmra.mxu2 %vm797_vm2, %v5056_v43 }
0x4193   :  { %v5035_v55 = vpop.f32.mrf.mxu3 }
0x4194   :  { %v5036_v5 = vadd.f32 %v5848_v15, %v5035_v55 }
0x4196   :  { %v5057_v10 = vmax.f32 %v5036_v5, 0.0 }
0x4198   :  { %5716 = vmatmul.msk.f32.gmra.mxu2 %vm797_vm2, %v5057_v10 }
0x419b   :  { %v5038_v28 = vpop.f32.mrf.mxu3 }
0x419c   :  { %v5039_v58 = vadd.f32 %v5848_v15, %v5038_v28  ;;  %v5202_v28 = vld [vmem:[%s6936_s9 + $0x18] sm:$0xff] }
0x419d   :  { %5224 = vmatpush.msrb.mxu0 %v5202_v28 }
0x419e   :  { %v5058_v46 = vmax.f32 %v5039_v58, 0.0  ;;  %v5201_v58 = vld [vmem:[%s6936_s9 + $0x10] sm:$0xff] }
0x419f   :  { %5225 = vmatpush.msrb.mxu0 %v5201_v58 }
0x41a0   :  { %5717 = vmatmul.msk.f32.gmra.mxu2 %vm797_vm2, %v5058_v46 }
0x41a3   :  { %v5041_v35 = vpop.f32.mrf.mxu3 }
0x41a4   :  { %v5042_v56 = vadd.f32 %v5848_v15, %v5041_v35  ;;  %v5200_v35 = vld [vmem:[%s6936_s9 + $0x8] sm:$0xff] }
0x41a5   :  { %5226 = vmatpush.msrb.mxu0 %v5200_v35 }
0x41a6   :  { %v5059_v53 = vmax.f32 %v5042_v56, 0.0  ;;  %v5199_v56 = vld [vmem:[%s6936_s9] sm:$0xff] }
0x41a7   :  { %5227 = vmatpush.msrb.mxu0 %v5199_v56 }
0x41a8   :  { %5718 = vmatmul.msk.f32.gmra.mxu2 %vm797_vm2, %v5059_v53 }
0x41ab   :  { %v5044_v29 = vpop.f32.mrf.mxu3 }
0x41ac   :  { %v5045_v2 = vadd.f32 %v5848_v15, %v5044_v29  ;;  %v5851_v29 = vld [vmem:[%s6946_s24] ss:$0 sm:$0xff] }
0x41ae   :  { %v5060_v60 = vmax.f32 %v5045_v2, 0.0 }
0x41b0   :  { %5719 = vmatmul.msk.f32.gmra.mxu2 %vm797_vm2, %v5060_v60 }
0x41b3   :  { %v5047_v40 = vpop.f32.mrf.mxu3 }
0x41b4   :  { %v5048_v25 = vadd.f32 %v5848_v15, %v5047_v40 }
0x41b6   :  { %v5061_v23 = vmax.f32 %v5048_v25, 0.0 }
0x41b8   :  { %5720 = vmatmul.msk.f32.gmra.mxu2 %vm797_vm2, %v5061_v23 }
0x41bb   :  { %v5050_v54 = vpop.f32.mrf.mxu3 }
0x41bc   :  { %v5051_v62 = vadd.f32 %v5848_v15, %v5050_v54 }
0x41be   :  { %v5062_v11 = vmax.f32 %v5051_v62, 0.0 }
0x41c0   :  { %5721 = vmatmul.msk.f32.gmra.mxu2 %vm797_vm2, %v5062_v11 }
0x41c3   :  { %v5053_v63 = vpop.f32.mrf.mxu3 }
0x41c4   :  { %v5054_v19 = vadd.f32 %v5848_v15, %v5053_v63  ;;  %v5232_v15 = vld [vmem:[%s6902_s4] sm:$0xff] }
0x41c6   :  { %v5063_v37 = vmax.f32 %v5054_v19, 0.0 }
0x41c8   :  { %5722 = vmatmul.msk.f32.gmra.mxu2 %vm797_vm2, %v5063_v37  ;;  %v5287_v37 = vld [vmem:[%s6983_s29 + $0x18] sm:$0xff] }
0x41c9   :  { %5309 = vmatpush.msra.mxu0 %v5287_v37 }
0x4213   :  { %v5113_v0 = vpop.f32.mrf.mxu2 }
0x4214   :  { %v5114_v12 = vadd.f32 %v5849_v45, %v5113_v0  ;;  %v5286_v0 = vld [vmem:[%s6983_s29 + $0x10] sm:$0xff] }
0x4215   :  { %5310 = vmatpush.msra.mxu0 %v5286_v0 }
0x4216   :  { %v5137_v27 = vmax.f32 %v5114_v12, 0.0 }
0x421b   :  { %v5116_v33 = vpop.f32.mrf.mxu2 }
0x421c   :  { %v5117_v47 = vadd.f32 %v5849_v45, %v5116_v33  ;;  %v5285_v33 = vld [vmem:[%s6983_s29 + $0x8] sm:$0xff] }
0x421d   :  { %5311 = vmatpush.msra.mxu0 %v5285_v33 }
0x421e   :  { %v5138_v57 = vmax.f32 %v5117_v47, 0.0 }
0x4223   :  { %v5119_v34 = vpop.f32.mrf.mxu2 }
0x4224   :  { %v5120_v31 = vadd.f32 %v5849_v45, %v5119_v34  ;;  %v5284_v34 = vld [vmem:[%s6983_s29] sm:$0xff] }
0x4225   :  { %5312 = vmatpush.msra.mxu0 %v5284_v34 }
0x4226   :  { %v5139_v22 = vmax.f32 %v5120_v31, 0.0 }
0x422b   :  { %v5122_v13 = vpop.f32.mrf.mxu2 }
0x422c   :  { %v5123_v42 = vadd.f32 %v5849_v45, %v5122_v13 }
0x422e   :  { %v5140_v38 = vmax.f32 %v5123_v42, 0.0 }
0x4233   :  { %v5125_v3 = vpop.f32.mrf.mxu2 }
0x4234   :  { %v5126_v20 = vadd.f32 %v5849_v45, %v5125_v3 }
0x4236   :  { %v5141_v44 = vmax.f32 %v5126_v20, 0.0 }
0x423b   :  { %v5128_v49 = vpop.f32.mrf.mxu2 }
0x423c   :  { %v5129_v52 = vadd.f32 %v5849_v45, %v5128_v49 }
0x423e   :  { %v5142_v39 = vmax.f32 %v5129_v52, 0.0 }
0x4243   :  { %v5131_v50 = vpop.f32.mrf.mxu2 }
0x4244   :  { %v5132_v4 = vadd.f32 %v5849_v45, %v5131_v50 }
0x4246   :  { %v5143_v18 = vmax.f32 %v5132_v4, 0.0  ;;  %v5852_v4 = vld [vmem:[%s7012_s6] ss:$0 sm:$0xff] }
0x424b   :  { %v5134_v30 = vpop.f32.mrf.mxu2 }
0x424c   :  { %v5135_v17 = vadd.f32 %v5849_v45, %v5134_v30 }
0x424e   :  { %v5144_v6 = vmax.f32 %v5135_v17, 0.0 }
0x4250   :  { %5153 = vmatpush.msrb.mxu1 %v5144_v6 }
0x4252   :  { %5154 = vmatpush.msrb.mxu1 %v5143_v18 }
0x4254   :  { %5155 = vmatpush.msrb.mxu1 %v5142_v39 }
0x4256   :  { %5156 = vmatpush.msrb.mxu1 %v5141_v44 }
0x4258   :  { %5157 = vmatpush.msrb.mxu1 %v5140_v38 }
0x425a   :  { %5158 = vmatpush.msrb.mxu1 %v5139_v22 }
0x425c   :  { %5159 = vmatpush.msrb.mxu1 %v5138_v57 }
0x425e   :  { %5160 = vmatpush.msrb.mxu1 %v5137_v27 }
0x425f   :  { %5723 = vmatmul.msk.f32.vlgmr.msrb.gmra.mxu1 %vm400_vm1, %v7481_v1 }
0x4260   :  { %5184 = vmatpush.msra.mxu1 %v5168_v61 }
0x4262   :  { %5185 = vmatpush.msra.mxu1 %v5167_v51 }
0x4264   :  { %5186 = vmatpush.msra.mxu1 %v5166_v59 }
0x4266   :  { %5187 = vmatpush.msra.mxu1 %v5165_v32 }
0x4268   :  { %5252 = vmatpush.msrb.mxu1 %v5235_v7 }
0x426a   :  { %5253 = vmatpush.msrb.mxu1 %v5234_v36 }
0x426c   :  { %5254 = vmatpush.msrb.mxu1 %v5233_v24 }
0x426e   :  { %5255 = vmatpush.msrb.mxu1 %v5232_v15 }
0x42dc   :  { %v5162_v1 = vpop.f32.mrf.mxu1 }
0x42dd   :  { %5724 = vmatmul.msk.f32.vlgmr.msra.gmra.mxu1 %vm797_vm2, %v5162_v1 }
0x42e5   :  { %5726 = vmatmul.msk.f32.vlgmr.msrb.gmra.mxu1 %vm797_vm2, %v7634_v16 }
0x435a   :  { %v5189_v8 = vpop.f32.mrf.mxu1 }
0x435b   :  { %5193 = vrot.lane.b32.xlu2 %v5189_v8, %s5944_s13 }
0x4362   :  { %v5257_v43 = vpop.f32.mrf.mxu1 }
0x4363   :  { %v5258_v55 = vadd.f32 %v5850_v26, %v5257_v43 }
0x4365   :  { %5266 = vrot.lane.b32.xlu1 %v5258_v55, %s5944_s13 }
0x43b5   :  { %v5194_v5 = vpop.permute.xlu2 %5193 }
0x43b6   :  { %v5196_v10 = vadd.f32 %v5194_v5, %v7649_v41 }
0x43b8   :  { %v5197_v46 = vadd.f32 %v5196_v10, %v6969_v9 }
0x43ba   :  { %v5198_v16 = vmax.f32 %v5197_v46, 0.0 }
0x43bc   :  { %5208 = vrot.lane.b32.xlu0 %v5198_v16, %s5944_s13 }
0x43d7   :  { %v5267_v54 = vpop.permute.xlu1 %5266 }
0x442e   :  { %v5209_v53 = vpop.permute.xlu0 %5208 }
0x442f   :  { %5725 = vmatmul.msk.f32.vlgmr.msrb.gmra.mxu0 %vm797_vm2, %v5209_v53 }
0x44ac   :  { %v5229_v2 = vpop.f32.mrf.mxu0 }
0x44ad   :  { %v5230_v41 = vadd.f32 %v5851_v29, %v5229_v2 }
0x44af   :  { %v5260_v60 = vadd.f32 %v5258_v55, %v5230_v41 }
0x44b1   :  { %v5261_v40 = vmul.f32 0.5, %v5260_v60 }
0x44b3   :  { %5911 = vtanh.f32 %v5261_v40 }
0x44b9   :  { %v5912_v9 = vpop.eup %5911 }
0x44ba   :  { %v5263_v25 = vadd.f32 1.0, %v5912_v9 }
0x44bc   :  { %v5264_v23 = vmul.f32 0.5, %v5263_v25 }
0x44be   :  { %v5269_v62 = vmul.f32 %v5267_v54, %v5264_v23  ;;  %v5276_v13 = vsub.f32 1.0, %v5264_v23  ;;  %v5282_v49 = vmul.f32 %v5264_v23, %v7630_v14 }
0x44c0   :  { %5271 = vrot.lane.b32.xlu2 %v5269_v62, %s5944_s13 }
0x451a   :  { %v5272_v11 = vpop.permute.xlu2 %5271 }
0x451b   :  { %v5274_v63 = vadd.f32 %v5272_v11, %v5230_v41 }
0x451d   :  { %5913 = vtanh.f32 %v5274_v63 }
0x4523   :  { %v5914_v19 = vpop.eup %5913 }
0x4524   :  { %5278 = vrot.lane.b32.xlu0 %v5914_v19, %s5945_s16 }
0x4596   :  { %v5279_v3 = vpop.permute.xlu0 %5278 }
0x4597   :  { %v5281_v50 = vmul.f32 %v5279_v3, %v5276_v13 }
0x4599   :  { %v5283_v45 = vadd.f32 %v5282_v49, %v5281_v50 }
0x459b   :  { %5293 = vrot.lane.b32.xlu1 %v5283_v45, %s5945_s16 }
0x460d   :  { %v5294_v30 = vpop.permute.xlu1 %5293 }
0x460e   :  { %5727 = vmatmul.msk.f32.vlgmr.msra.gmra.mxu0 %vm797_vm2, %v5294_v30 }
0x468b   :  { %v5314_v17 = vpop.f32.mrf.mxu0 }
0x468c   :  { %v5315_v52 = vadd.f32 %v5852_v4, %v5314_v17 }
0x468e   :  { %v5317_v6 = vmul.f32 %v5315_v52, %v7028_v48 }
0x4690   :  { %v5318_v20 = vadd.f32 %v5317_v6, %v7641_v21 }
0x4692   :  { %5728 = vst.msk [vmem:[%s7026_s12 + $0x30] sm:$0xff] %vm236_vm0, %v5318_v20 }

</bundles_post_ra>
